<compile_context>
chip_gen: v7x
topology: tpu7x:2x2x1
jax: 0.10.0
libtpu: 0.0.40
codegen_flags: <defaults>
</compile_context>

<pallas_src>
import math

import jax
import jax.numpy as jnp
from jax.experimental import pallas as pl
from jax.experimental.pallas import tpu as pltpu


_EXP_CAP = 20.0  # clamp for the exponential re-gating pre-activation


def _sigmoid(v):
    # exact identity: sigmoid(v) = 0.5*(1 + tanh(v/2)); single EUP op, robust.
    return 0.5 * (jnp.tanh(0.5 * v) + 1.0)


def _gelu_tanh(v):
    c = 0.7978845608028654  # sqrt(2/pi)
    return 0.5 * v * (1.0 + jnp.tanh(c * (v + 0.044715 * v * v * v)))


# ----------------------------------------------------------------------------
# Fused Pallas kernel: all blocks, all timesteps, output head (no grid)
# ----------------------------------------------------------------------------

def xlstm_fused_kernel(
    x_ref,        # [S, B, D]        input sequence (seq-major)
    w_g_ref,      # [NB, L, D+H, 4H] fused (x||h) gate weights, cols = i|f|o|g
    b_g_ref,      # [NB, L, 1, 4H]
    w_e_ref,      # [NB, L, H, 2H]   fused exp-gate weights, cols = f_e|i_e
    b_e_ref,      # [NB, L, 1, 2H]
    w_p_ref,      # [NB, H, D]       block projection (pre-transposed)
    b_p_ref,      # [NB, 1, D]
    gamma_ref,    # [NB, 1, D]       LayerNorm scale
    beta_ref,     # [NB, 1, D]       LayerNorm shift
    w_out_ref,    # [D, 1]           output head (pre-transposed)
    b_out_ref,    # [1, 1]
    prob_ref,     # [B, 1]           sigmoid(head)
    hN_ref,       # [NB, L, B, H]    final hidden states
    cN_ref,       # [NB, L, B, H]    final cell states
):
    S, B, D = x_ref.shape
    NB, L, _, fourH = w_g_ref.shape
    H = fourH // 4

    seq = None  # previous block's output sequence (list of [B, D] values)

    for blk in range(NB):                       # static unroll over blocks
        is_last = (blk == NB - 1)

        # hoisted per-block small broadcasts (JAX won't CSE broadcast_in_dim)
        b_g = [jnp.broadcast_to(b_g_ref[blk, l], (B, 4 * H)) for l in range(L)]
        b_e = [jnp.broadcast_to(b_e_ref[blk, l], (B, 2 * H)) for l in range(L)]
        b_p = jnp.broadcast_to(b_p_ref[blk], (B, D))
        gamma = jnp.broadcast_to(gamma_ref[blk], (B, D))
        beta = jnp.broadcast_to(beta_ref[blk], (B, D))

        # recurrent state carried as traced values (pure dataflow, no scratch)
        h = [jnp.zeros((B, H), jnp.float32) for _ in range(L)]
        c = [jnp.zeros((B, H), jnp.float32) for _ in range(L)]

        out = []
        for t in range(S):                      # static unroll over time
            x = x_ref[t] if blk == 0 else seq[t]            # [B, D]
            residual = x
            for l in range(L):                  # static unroll over layers
                xh = jnp.concatenate([x, h[l]], axis=-1)     # [B, D+H]
                gates = jnp.dot(xh, w_g_ref[blk, l],
                                preferred_element_type=jnp.float32) \
                    + b_g[l]                                  # [B, 4H]
                sig = _sigmoid(gates[:, :3 * H])              # i|f|o slab
                i_g = sig[:, :H]
                f_g = sig[:, H:2 * H]
                o_g = sig[:, 2 * H:3 * H]
                g_g = jnp.tanh(gates[:, 3 * H:])
                c_new = f_g * c[l] + i_g * g_g
                h_new = o_g * jnp.tanh(c_new)
                # sLSTM exponential re-gating (fused f_e || i_e, clamped exp)
                e_pre = jnp.dot(h_new, w_e_ref[blk, l],
                                preferred_element_type=jnp.float32) \
                    + b_e[l]                                  # [B, 2H]
                e = jnp.exp(jnp.minimum(e_pre, _EXP_CAP))
                c_new = e[:, :H] * c_new + e[:, H:] * g_g
                h[l] = h_new
                c[l] = c_new
                x = h_new          # feeds next layer (dropout = identity)

            # block head: proj -> GELU -> residual -> LayerNorm.
            # Only computed where its result is consumed: every t for
            # non-final blocks, only t == S-1 for the final block.
            if (not is_last) or (t == S - 1):
                y = _gelu_tanh(
                    jnp.dot(x, w_p_ref[blk],
                            preferred_element_type=jnp.float32) + b_p)
                z = y + residual
                mean = jnp.mean(z, axis=-1, keepdims=True)
                var = jnp.mean((z - mean) ** 2, axis=-1, keepdims=True)
                zn = (z - mean) * jax.lax.rsqrt(var + 1e-5)
                out.append(zn * gamma + beta)

        for l in range(L):
            hN_ref[blk, l] = h[l]
            cN_ref[blk, l] = c[l]

        seq = out                               # next block's input sequence

    # model head on the last timestep of the final block's output sequence
    x_last = seq[-1]                                             # [B, D]
    logits = jnp.dot(x_last, w_out_ref[...],
                     preferred_element_type=jnp.float32) + b_out_ref[...]
    prob_ref[...] = _sigmoid(logits)


# ----------------------------------------------------------------------------
# Wrapper
# ----------------------------------------------------------------------------

def xlstm_forward(x_bsd, params):
    """Full xLSTM forward. x_bsd: [B, S, D] (batch_first, like PyTorch)."""
    B, S, D = x_bsd.shape
    w_g = params["w_gates"]
    NB, L, dph, fourH = w_g.shape
    H = fourH // 4
    assert dph == D + H and D == H, "kernel assumes input_size == hidden_size"

    x_sbd = jnp.transpose(x_bsd, (1, 0, 2))     # one layout transpose, at entry

    vmem = pl.BlockSpec(memory_space=pltpu.MemorySpace.VMEM)
    prob, hN, cN = pl.pallas_call(
        xlstm_fused_kernel,
        out_shape=(
            jax.ShapeDtypeStruct((B, 1), jnp.float32),
            jax.ShapeDtypeStruct((NB, L, B, H), jnp.float32),
            jax.ShapeDtypeStruct((NB, L, B, H), jnp.float32),
        ),
        in_specs=[vmem] * 11,
        out_specs=(vmem, vmem, vmem),
    )(
        x_sbd, params["w_gates"], params["b_gates"], params["w_exp"],
        params["b_exp"], params["w_proj"], params["b_proj"],
        params["gamma"], params["beta"], params["w_out"], params["b_out"],
    )
    hidden_states = [(hN[b], cN[b]) for b in range(NB)]
    return prob, hidden_states


# ----------------------------------------------------------------------------
# Pure-JAX reference (mirrors the kernel math exactly)
# ----------------------------------------------------------------------------

def xlstm_ref(x_bsd, p):
    B, S, D = x_bsd.shape
    NB, L, _, fourH = p["w_gates"].shape
    H = fourH // 4
    seq = x_bsd
    for blk in range(NB):
        h = [jnp.zeros((B, H), jnp.float32) for _ in range(L)]
        c = [jnp.zeros((B, H), jnp.float32) for _ in range(L)]
        outs = []
        for t in range(S):
            x = seq[:, t, :]
            residual = x
            for l in range(L):
                xh = jnp.concatenate([x, h[l]], axis=-1)
                gates = xh @ p["w_gates"][blk, l] + p["b_gates"][blk, l]
                i_g = _sigmoid(gates[:, :H])
                f_g = _sigmoid(gates[:, H:2 * H])
                o_g = _sigmoid(gates[:, 2 * H:3 * H])
                g_g = jnp.tanh(gates[:, 3 * H:])
                c_new = f_g * c[l] + i_g * g_g
                h_new = o_g * jnp.tanh(c_new)
                e = jnp.exp(jnp.minimum(
                    h_new @ p["w_exp"][blk, l] + p["b_exp"][blk, l], _EXP_CAP))
                c_new = e[:, :H] * c_new + e[:, H:] * g_g
                h[l] = h_new
                c[l] = c_new
                x = h_new
            y = _gelu_tanh(x @ p["w_proj"][blk] + p["b_proj"][blk])
            z = y + residual
            mean = z.mean(-1, keepdims=True)
            var = ((z - mean) ** 2).mean(-1, keepdims=True)
            outs.append((z - mean) / jnp.sqrt(var + 1e-5) * p["gamma"][blk]
                        + p["beta"][blk])
        seq = jnp.stack(outs, axis=1)
    logits = seq[:, -1, :] @ p["w_out"] + p["b_out"]
    return _sigmoid(logits)


# ----------------------------------------------------------------------------
# Deterministic parameter init (PyTorch-style uniform(-1/sqrt(fan), +)),
# stored directly in the fused / pre-transposed layout the kernel consumes.
# ----------------------------------------------------------------------------

def init_params(key, D, H, L, num_blocks):
    assert D == H, "model assumes input_size == hidden_size"

    def unif(k, shape, scale):
        return jax.random.uniform(k, shape, jnp.float32, -scale, scale)

    k_h = 1.0 / math.sqrt(H)
    k_d = 1.0 / math.sqrt(D)
    key, *ks = jax.random.split(key, 10)
    return dict(
        # fused (x||h) gate weights [D+H, 4H], gate column order = i|f|o|g
        w_gates=unif(ks[0], (num_blocks, L, D + H, 4 * H), k_h),
        b_gates=unif(ks[1], (num_blocks, L, 1, 4 * H), k_h)
        + unif(ks[2], (num_blocks, L, 1, 4 * H), k_h),   # b_ih + b_hh
        # fused exponential re-gating weights [H, 2H], column order = f_e|i_e
        w_exp=unif(ks[3], (num_blocks, L, H, 2 * H), k_h),
        b_exp=unif(ks[4], (num_blocks, L, 1, 2 * H), k_h),
        w_proj=unif(ks[5], (num_blocks, H, D), k_h),
        b_proj=unif(ks[6], (num_blocks, 1, D), k_h),
        gamma=jnp.ones((num_blocks, 1, D), jnp.float32),
        beta=jnp.zeros((num_blocks, 1, D), jnp.float32),
        w_out=unif(ks[7], (D, 1), k_d),
        b_out=unif(ks[8], (1, 1), k_d),
    )


# ----------------------------------------------------------------------------
# Main
# ----------------------------------------------------------------------------

if __name__ == "__main__":
    B, S = 2, 8                   # batch, sequence length
    D = H = 32                    # input_size == hidden_size
    L = 2                         # num_layers per block
    NUM_BLOCKS = 2

    key = jax.random.PRNGKey(0)
    key, kx, kp = jax.random.split(key, 3)
    x = jax.random.normal(kx, (B, S, D), jnp.float32)
    params = init_params(kp, D, H, L, NUM_BLOCKS)

    prob, hidden = xlstm_forward(x, params)
    prob = jax.block_until_ready(prob)

    ref = jax.block_until_ready(xlstm_ref(x, params))
    assert prob.shape == (B, 1)
    assert jnp.all(jnp.isfinite(prob))
    assert all(jnp.all(jnp.isfinite(h)) and jnp.all(jnp.isfinite(c))
               for h, c in hidden)
    assert jnp.allclose(prob, ref, atol=1e-3, rtol=1e-3), (prob, ref)

    print("KERNEL_OK")
</pallas_src>

<mosaic_0001>
module attributes {stable_mosaic.version = 11 : i64} {
  func.func @xlstm_fused_kernel(%arg0: memref<8x2x32xf32, #tpu.memory_space<vmem>>, %arg1: memref<2x2x64x128xf32, #tpu.memory_space<vmem>>, %arg2: memref<2x2x1x128xf32, #tpu.memory_space<vmem>>, %arg3: memref<2x2x32x64xf32, #tpu.memory_space<vmem>>, %arg4: memref<2x2x1x64xf32, #tpu.memory_space<vmem>>, %arg5: memref<2x32x32xf32, #tpu.memory_space<vmem>>, %arg6: memref<2x1x32xf32, #tpu.memory_space<vmem>>, %arg7: memref<2x1x32xf32, #tpu.memory_space<vmem>>, %arg8: memref<2x1x32xf32, #tpu.memory_space<vmem>>, %arg9: memref<32x1xf32, #tpu.memory_space<vmem>>, %arg10: memref<1x1xf32, #tpu.memory_space<vmem>>, %arg11: memref<2x1xf32, #tpu.memory_space<vmem>>, %arg12: memref<2x2x2x32xf32, #tpu.memory_space<vmem>>, %arg13: memref<2x2x2x32xf32, #tpu.memory_space<vmem>>) attributes {dimension_semantics = [], scalar_prefetch = 0 : i64, scratch_operands = 0 : i64, tpu.core_type = #tpu.core_type<tc>} {
    %c0 = arith.constant 0 : index
    %c0_0 = arith.constant 0 : index
    %c0_1 = arith.constant 0 : index
    %c0_2 = arith.constant 0 : index
    %0 = vector.load %arg2[%c0, %c0_0, %c0_1, %c0_2] : memref<2x2x1x128xf32, #tpu.memory_space<vmem>>, vector<1x1x1x128xf32>
    %1 = vector.shape_cast %0 : vector<1x1x1x128xf32> to vector<1x128xf32>
    %2 = vector.shape_cast %1 : vector<1x128xf32> to vector<1x128xf32>
    %3 = vector.broadcast %2 : vector<1x128xf32> to vector<2x128xf32>
    %c0_3 = arith.constant 0 : index
    %c1 = arith.constant 1 : index
    %c0_4 = arith.constant 0 : index
    %c0_5 = arith.constant 0 : index
    %4 = vector.load %arg2[%c0_3, %c1, %c0_4, %c0_5] : memref<2x2x1x128xf32, #tpu.memory_space<vmem>>, vector<1x1x1x128xf32>
    %5 = vector.shape_cast %4 : vector<1x1x1x128xf32> to vector<1x128xf32>
    %6 = vector.shape_cast %5 : vector<1x128xf32> to vector<1x128xf32>
    %7 = vector.broadcast %6 : vector<1x128xf32> to vector<2x128xf32>
    %c0_6 = arith.constant 0 : index
    %c0_7 = arith.constant 0 : index
    %c0_8 = arith.constant 0 : index
    %c0_9 = arith.constant 0 : index
    %8 = vector.load %arg4[%c0_6, %c0_7, %c0_8, %c0_9] : memref<2x2x1x64xf32, #tpu.memory_space<vmem>>, vector<1x1x1x64xf32>
    %9 = vector.shape_cast %8 : vector<1x1x1x64xf32> to vector<1x64xf32>
    %10 = vector.shape_cast %9 : vector<1x64xf32> to vector<1x64xf32>
    %11 = vector.broadcast %10 : vector<1x64xf32> to vector<2x64xf32>
    %c0_10 = arith.constant 0 : index
    %c1_11 = arith.constant 1 : index
    %c0_12 = arith.constant 0 : index
    %c0_13 = arith.constant 0 : index
    %12 = vector.load %arg4[%c0_10, %c1_11, %c0_12, %c0_13] : memref<2x2x1x64xf32, #tpu.memory_space<vmem>>, vector<1x1x1x64xf32>
    %13 = vector.shape_cast %12 : vector<1x1x1x64xf32> to vector<1x64xf32>
    %14 = vector.shape_cast %13 : vector<1x64xf32> to vector<1x64xf32>
    %15 = vector.broadcast %14 : vector<1x64xf32> to vector<2x64xf32>
    %c0_14 = arith.constant 0 : index
    %c0_15 = arith.constant 0 : index
    %c0_16 = arith.constant 0 : index
    %16 = vector.load %arg6[%c0_14, %c0_15, %c0_16] : memref<2x1x32xf32, #tpu.memory_space<vmem>>, vector<1x1x32xf32>
    %17 = vector.shape_cast %16 : vector<1x1x32xf32> to vector<1x32xf32>
    %18 = vector.shape_cast %17 : vector<1x32xf32> to vector<1x32xf32>
    %19 = vector.broadcast %18 : vector<1x32xf32> to vector<2x32xf32>
    %c0_17 = arith.constant 0 : index
    %c0_18 = arith.constant 0 : index
    %c0_19 = arith.constant 0 : index
    %20 = vector.load %arg7[%c0_17, %c0_18, %c0_19] : memref<2x1x32xf32, #tpu.memory_space<vmem>>, vector<1x1x32xf32>
    %21 = vector.shape_cast %20 : vector<1x1x32xf32> to vector<1x32xf32>
    %22 = vector.shape_cast %21 : vector<1x32xf32> to vector<1x32xf32>
    %23 = vector.broadcast %22 : vector<1x32xf32> to vector<2x32xf32>
    %c0_20 = arith.constant 0 : index
    %c0_21 = arith.constant 0 : index
    %c0_22 = arith.constant 0 : index
    %24 = vector.load %arg8[%c0_20, %c0_21, %c0_22] : memref<2x1x32xf32, #tpu.memory_space<vmem>>, vector<1x1x32xf32>
    %25 = vector.shape_cast %24 : vector<1x1x32xf32> to vector<1x32xf32>
    %26 = vector.shape_cast %25 : vector<1x32xf32> to vector<1x32xf32>
    %27 = vector.broadcast %26 : vector<1x32xf32> to vector<2x32xf32>
    %cst = arith.constant 0.000000e+00 : f32
    %28 = vector.broadcast %cst : f32 to vector<2x32xf32>
    %cst_23 = arith.constant 0.000000e+00 : f32
    %29 = vector.broadcast %cst_23 : f32 to vector<2x32xf32>
    %cst_24 = arith.constant 0.000000e+00 : f32
    %30 = vector.broadcast %cst_24 : f32 to vector<2x32xf32>
    %cst_25 = arith.constant 0.000000e+00 : f32
    %31 = vector.broadcast %cst_25 : f32 to vector<2x32xf32>
    %c0_26 = arith.constant 0 : index
    %c0_27 = arith.constant 0 : index
    %c0_28 = arith.constant 0 : index
    %32 = vector.load %arg0[%c0_26, %c0_27, %c0_28] : memref<8x2x32xf32, #tpu.memory_space<vmem>>, vector<1x2x32xf32>
    %33 = vector.shape_cast %32 : vector<1x2x32xf32> to vector<2x32xf32>
    %34 = tpu.concatenate %33, %28 in 1 : vector<2x32xf32>, vector<2x32xf32> -> vector<2x64xf32>
    %c0_29 = arith.constant 0 : index
    %c0_30 = arith.constant 0 : index
    %c0_31 = arith.constant 0 : index
    %c0_32 = arith.constant 0 : index
    %35 = vector.load %arg1[%c0_29, %c0_30, %c0_31, %c0_32] : memref<2x2x64x128xf32, #tpu.memory_space<vmem>>, vector<1x1x64x128xf32>
    %36 = vector.shape_cast %35 : vector<1x1x64x128xf32> to vector<64x128xf32>
    %cst_33 = arith.constant dense<0.000000e+00> : vector<2x128xf32>
    %37 = tpu.matmul %34, %36, %cst_33 {dimension_numbers = #tpu.dot_dimension_numbers<[1], [0], [0], [1], [0, 0, 1, 1], [], []>} : vector<2x64xf32>, vector<64x128xf32>, vector<2x128xf32> -> vector<2x128xf32>
    %38 = arith.addf %37, %3 : vector<2x128xf32>
    %39 = vector.extract_strided_slice %38 {offsets = [0, 0], sizes = [2, 96], strides = [1, 1]} : vector<2x128xf32> to vector<2x96xf32>
    %cst_34 = arith.constant 5.000000e-01 : f32
    %40 = vector.broadcast %cst_34 : f32 to vector<2x96xf32>
    %41 = arith.mulf %40, %39 : vector<2x96xf32>
    %42 = math.tanh %41 : vector<2x96xf32>
    %cst_35 = arith.constant 1.000000e+00 : f32
    %43 = vector.broadcast %cst_35 : f32 to vector<2x96xf32>
    %44 = arith.addf %42, %43 : vector<2x96xf32>
    %cst_36 = arith.constant 5.000000e-01 : f32
    %45 = vector.broadcast %cst_36 : f32 to vector<2x96xf32>
    %46 = arith.mulf %45, %44 : vector<2x96xf32>
    %47 = vector.extract_strided_slice %46 {offsets = [0, 0], sizes = [2, 32], strides = [1, 1]} : vector<2x96xf32> to vector<2x32xf32>
    %48 = vector.extract_strided_slice %46 {offsets = [0, 32], sizes = [2, 32], strides = [1, 1]} : vector<2x96xf32> to vector<2x32xf32>
    %49 = vector.extract_strided_slice %46 {offsets = [0, 64], sizes = [2, 32], strides = [1, 1]} : vector<2x96xf32> to vector<2x32xf32>
    %50 = vector.extract_strided_slice %38 {offsets = [0, 96], sizes = [2, 32], strides = [1, 1]} : vector<2x128xf32> to vector<2x32xf32>
    %51 = math.tanh %50 : vector<2x32xf32>
    %52 = arith.mulf %48, %30 : vector<2x32xf32>
    %53 = arith.mulf %47, %51 : vector<2x32xf32>
    %54 = arith.addf %52, %53 : vector<2x32xf32>
    %55 = math.tanh %54 : vector<2x32xf32>
    %56 = arith.mulf %49, %55 : vector<2x32xf32>
    %c0_37 = arith.constant 0 : index
    %c0_38 = arith.constant 0 : index
    %c0_39 = arith.constant 0 : index
    %c0_40 = arith.constant 0 : index
    %57 = vector.load %arg3[%c0_37, %c0_38, %c0_39, %c0_40] : memref<2x2x32x64xf32, #tpu.memory_space<vmem>>, vector<1x1x32x64xf32>
    %58 = vector.shape_cast %57 : vector<1x1x32x64xf32> to vector<32x64xf32>
    %cst_41 = arith.constant dense<0.000000e+00> : vector<2x64xf32>
    %59 = tpu.matmul %56, %58, %cst_41 {dimension_numbers = #tpu.dot_dimension_numbers<[1], [0], [0], [1], [0, 0, 1, 1], [], []>} : vector<2x32xf32>, vector<32x64xf32>, vector<2x64xf32> -> vector<2x64xf32>
    %60 = arith.addf %59, %11 : vector<2x64xf32>
    %cst_42 = arith.constant 2.000000e+01 : f32
    %61 = vector.broadcast %cst_42 : f32 to vector<2x64xf32>
    %62 = arith.minimumf %60, %61 : vector<2x64xf32>
    %63 = math.exp %62 : vector<2x64xf32>
    %64 = vector.extract_strided_slice %63 {offsets = [0, 0], sizes = [2, 32], strides = [1, 1]} : vector<2x64xf32> to vector<2x32xf32>
    %65 = arith.mulf %64, %54 : vector<2x32xf32>
    %66 = vector.extract_strided_slice %63 {offsets = [0, 32], sizes = [2, 32], strides = [1, 1]} : vector<2x64xf32> to vector<2x32xf32>
    %67 = arith.mulf %66, %51 : vector<2x32xf32>
    %68 = arith.addf %65, %67 : vector<2x32xf32>
    %69 = tpu.concatenate %56, %29 in 1 : vector<2x32xf32>, vector<2x32xf32> -> vector<2x64xf32>
    %c0_43 = arith.constant 0 : index
    %c1_44 = arith.constant 1 : index
    %c0_45 = arith.constant 0 : index
    %c0_46 = arith.constant 0 : index
    %70 = vector.load %arg1[%c0_43, %c1_44, %c0_45, %c0_46] : memref<2x2x64x128xf32, #tpu.memory_space<vmem>>, vector<1x1x64x128xf32>
    %71 = vector.shape_cast %70 : vector<1x1x64x128xf32> to vector<64x128xf32>
    %cst_47 = arith.constant dense<0.000000e+00> : vector<2x128xf32>
    %72 = tpu.matmul %69, %71, %cst_47 {dimension_numbers = #tpu.dot_dimension_numbers<[1], [0], [0], [1], [0, 0, 1, 1], [], []>} : vector<2x64xf32>, vector<64x128xf32>, vector<2x128xf32> -> vector<2x128xf32>
    %73 = arith.addf %72, %7 : vector<2x128xf32>
    %74 = vector.extract_strided_slice %73 {offsets = [0, 0], sizes = [2, 96], strides = [1, 1]} : vector<2x128xf32> to vector<2x96xf32>
    %cst_48 = arith.constant 5.000000e-01 : f32
    %75 = vector.broadcast %cst_48 : f32 to vector<2x96xf32>
    %76 = arith.mulf %75, %74 : vector<2x96xf32>
    %77 = math.tanh %76 : vector<2x96xf32>
    %cst_49 = arith.constant 1.000000e+00 : f32
    %78 = vector.broadcast %cst_49 : f32 to vector<2x96xf32>
    %79 = arith.addf %77, %78 : vector<2x96xf32>
    %cst_50 = arith.constant 5.000000e-01 : f32
    %80 = vector.broadcast %cst_50 : f32 to vector<2x96xf32>
    %81 = arith.mulf %80, %79 : vector<2x96xf32>
    %82 = vector.extract_strided_slice %81 {offsets = [0, 0], sizes = [2, 32], strides = [1, 1]} : vector<2x96xf32> to vector<2x32xf32>
    %83 = vector.extract_strided_slice %81 {offsets = [0, 32], sizes = [2, 32], strides = [1, 1]} : vector<2x96xf32> to vector<2x32xf32>
    %84 = vector.extract_strided_slice %81 {offsets = [0, 64], sizes = [2, 32], strides = [1, 1]} : vector<2x96xf32> to vector<2x32xf32>
    %85 = vector.extract_strided_slice %73 {offsets = [0, 96], sizes = [2, 32], strides = [1, 1]} : vector<2x128xf32> to vector<2x32xf32>
    %86 = math.tanh %85 : vector<2x32xf32>
    %87 = arith.mulf %83, %31 : vector<2x32xf32>
    %88 = arith.mulf %82, %86 : vector<2x32xf32>
    %89 = arith.addf %87, %88 : vector<2x32xf32>
    %90 = math.tanh %89 : vector<2x32xf32>
    %91 = arith.mulf %84, %90 : vector<2x32xf32>
    %c0_51 = arith.constant 0 : index
    %c1_52 = arith.constant 1 : index
    %c0_53 = arith.constant 0 : index
    %c0_54 = arith.constant 0 : index
    %92 = vector.load %arg3[%c0_51, %c1_52, %c0_53, %c0_54] : memref<2x2x32x64xf32, #tpu.memory_space<vmem>>, vector<1x1x32x64xf32>
    %93 = vector.shape_cast %92 : vector<1x1x32x64xf32> to vector<32x64xf32>
    %cst_55 = arith.constant dense<0.000000e+00> : vector<2x64xf32>
    %94 = tpu.matmul %91, %93, %cst_55 {dimension_numbers = #tpu.dot_dimension_numbers<[1], [0], [0], [1], [0, 0, 1, 1], [], []>} : vector<2x32xf32>, vector<32x64xf32>, vector<2x64xf32> -> vector<2x64xf32>
    %95 = arith.addf %94, %15 : vector<2x64xf32>
    %cst_56 = arith.constant 2.000000e+01 : f32
    %96 = vector.broadcast %cst_56 : f32 to vector<2x64xf32>
    %97 = arith.minimumf %95, %96 : vector<2x64xf32>
    %98 = math.exp %97 : vector<2x64xf32>
    %99 = vector.extract_strided_slice %98 {offsets = [0, 0], sizes = [2, 32], strides = [1, 1]} : vector<2x64xf32> to vector<2x32xf32>
    %100 = arith.mulf %99, %89 : vector<2x32xf32>
    %101 = vector.extract_strided_slice %98 {offsets = [0, 32], sizes = [2, 32], strides = [1, 1]} : vector<2x64xf32> to vector<2x32xf32>
    %102 = arith.mulf %101, %86 : vector<2x32xf32>
    %103 = arith.addf %100, %102 : vector<2x32xf32>
    %c0_57 = arith.constant 0 : index
    %c0_58 = arith.constant 0 : index
    %c0_59 = arith.constant 0 : index
    %104 = vector.load %arg5[%c0_57, %c0_58, %c0_59] : memref<2x32x32xf32, #tpu.memory_space<vmem>>, vector<1x32x32xf32>
    %105 = vector.shape_cast %104 : vector<1x32x32xf32> to vector<32x32xf32>
    %cst_60 = arith.constant dense<0.000000e+00> : vector<2x32xf32>
    %106 = tpu.matmul %91, %105, %cst_60 {dimension_numbers = #tpu.dot_dimension_numbers<[1], [0], [0], [1], [0, 0, 1, 1], [], []>} : vector<2x32xf32>, vector<32x32xf32>, vector<2x32xf32> -> vector<2x32xf32>
    %107 = arith.addf %106, %19 : vector<2x32xf32>
    %cst_61 = arith.constant 5.000000e-01 : f32
    %108 = vector.broadcast %cst_61 : f32 to vector<2x32xf32>
    %109 = arith.mulf %108, %107 : vector<2x32xf32>
    %cst_62 = arith.constant 4.471500e-02 : f32
    %110 = vector.broadcast %cst_62 : f32 to vector<2x32xf32>
    %111 = arith.mulf %110, %107 : vector<2x32xf32>
    %112 = arith.mulf %111, %107 : vector<2x32xf32>
    %113 = arith.mulf %112, %107 : vector<2x32xf32>
    %114 = arith.addf %107, %113 : vector<2x32xf32>
    %cst_63 = arith.constant 0.797884583 : f32
    %115 = vector.broadcast %cst_63 : f32 to vector<2x32xf32>
    %116 = arith.mulf %115, %114 : vector<2x32xf32>
    %117 = math.tanh %116 : vector<2x32xf32>
    %cst_64 = arith.constant 1.000000e+00 : f32
    %118 = vector.broadcast %cst_64 : f32 to vector<2x32xf32>
    %119 = arith.addf %118, %117 : vector<2x32xf32>
    %120 = arith.mulf %109, %119 : vector<2x32xf32>
    %121 = arith.addf %120, %33 : vector<2x32xf32>
    %cst_65 = arith.constant dense<0.000000e+00> : vector<2xf32>
    %122 = vector.multi_reduction <add>, %121, %cst_65 [1] : vector<2x32xf32> to vector<2xf32>
    %123 = vector.shape_cast %122 : vector<2xf32> to vector<2x1xf32>
    %cst_66 = arith.constant 3.200000e+01 : f32
    %124 = vector.broadcast %cst_66 : f32 to vector<2x1xf32>
    %125 = arith.divf %123, %124 : vector<2x1xf32>
    %126 = vector.broadcast %125 : vector<2x1xf32> to vector<2x32xf32>
    %127 = arith.subf %121, %126 : vector<2x32xf32>
    %128 = arith.mulf %127, %127 : vector<2x32xf32>
    %cst_67 = arith.constant dense<0.000000e+00> : vector<2xf32>
    %129 = vector.multi_reduction <add>, %128, %cst_67 [1] : vector<2x32xf32> to vector<2xf32>
    %130 = vector.shape_cast %129 : vector<2xf32> to vector<2x1xf32>
    %cst_68 = arith.constant 3.200000e+01 : f32
    %131 = vector.broadcast %cst_68 : f32 to vector<2x1xf32>
    %132 = arith.divf %130, %131 : vector<2x1xf32>
    %133 = vector.broadcast %125 : vector<2x1xf32> to vector<2x32xf32>
    %134 = arith.subf %121, %133 : vector<2x32xf32>
    %cst_69 = arith.constant 9.99999974E-6 : f32
    %135 = vector.broadcast %cst_69 : f32 to vector<2x1xf32>
    %136 = arith.addf %132, %135 : vector<2x1xf32>
    %137 = math.rsqrt %136 : vector<2x1xf32>
    %138 = vector.broadcast %137 : vector<2x1xf32> to vector<2x32xf32>
    %139 = arith.mulf %134, %138 : vector<2x32xf32>
    %140 = arith.mulf %139, %23 : vector<2x32xf32>
    %141 = arith.addf %140, %27 : vector<2x32xf32>
    %c1_70 = arith.constant 1 : index
    %c0_71 = arith.constant 0 : index
    %c0_72 = arith.constant 0 : index
    %142 = vector.load %arg0[%c1_70, %c0_71, %c0_72] : memref<8x2x32xf32, #tpu.memory_space<vmem>>, vector<1x2x32xf32>
    %143 = vector.shape_cast %142 : vector<1x2x32xf32> to vector<2x32xf32>
    %144 = tpu.concatenate %143, %56 in 1 : vector<2x32xf32>, vector<2x32xf32> -> vector<2x64xf32>
    %c0_73 = arith.constant 0 : index
    %c0_74 = arith.constant 0 : index
    %c0_75 = arith.constant 0 : index
    %c0_76 = arith.constant 0 : index
    %145 = vector.load %arg1[%c0_73, %c0_74, %c0_75, %c0_76] : memref<2x2x64x128xf32, #tpu.memory_space<vmem>>, vector<1x1x64x128xf32>
    %146 = vector.shape_cast %145 : vector<1x1x64x128xf32> to vector<64x128xf32>
    %cst_77 = arith.constant dense<0.000000e+00> : vector<2x128xf32>
    %147 = tpu.matmul %144, %146, %cst_77 {dimension_numbers = #tpu.dot_dimension_numbers<[1], [0], [0], [1], [0, 0, 1, 1], [], []>} : vector<2x64xf32>, vector<64x128xf32>, vector<2x128xf32> -> vector<2x128xf32>
    %148 = arith.addf %147, %3 : vector<2x128xf32>
    %149 = vector.extract_strided_slice %148 {offsets = [0, 0], sizes = [2, 96], strides = [1, 1]} : vector<2x128xf32> to vector<2x96xf32>
    %cst_78 = arith.constant 5.000000e-01 : f32
    %150 = vector.broadcast %cst_78 : f32 to vector<2x96xf32>
    %151 = arith.mulf %150, %149 : vector<2x96xf32>
    %152 = math.tanh %151 : vector<2x96xf32>
    %cst_79 = arith.constant 1.000000e+00 : f32
    %153 = vector.broadcast %cst_79 : f32 to vector<2x96xf32>
    %154 = arith.addf %152, %153 : vector<2x96xf32>
    %cst_80 = arith.constant 5.000000e-01 : f32
    %155 = vector.broadcast %cst_80 : f32 to vector<2x96xf32>
    %156 = arith.mulf %155, %154 : vector<2x96xf32>
    %157 = vector.extract_strided_slice %156 {offsets = [0, 0], sizes = [2, 32], strides = [1, 1]} : vector<2x96xf32> to vector<2x32xf32>
    %158 = vector.extract_strided_slice %156 {offsets = [0, 32], sizes = [2, 32], strides = [1, 1]} : vector<2x96xf32> to vector<2x32xf32>
    %159 = vector.extract_strided_slice %156 {offsets = [0, 64], sizes = [2, 32], strides = [1, 1]} : vector<2x96xf32> to vector<2x32xf32>
    %160 = vector.extract_strided_slice %148 {offsets = [0, 96], sizes = [2, 32], strides = [1, 1]} : vector<2x128xf32> to vector<2x32xf32>
    %161 = math.tanh %160 : vector<2x32xf32>
    %162 = arith.mulf %158, %68 : vector<2x32xf32>
    %163 = arith.mulf %157, %161 : vector<2x32xf32>
    %164 = arith.addf %162, %163 : vector<2x32xf32>
    %165 = math.tanh %164 : vector<2x32xf32>
    %166 = arith.mulf %159, %165 : vector<2x32xf32>
    %c0_81 = arith.constant 0 : index
    %c0_82 = arith.constant 0 : index
    %c0_83 = arith.constant 0 : index
    %c0_84 = arith.constant 0 : index
    %167 = vector.load %arg3[%c0_81, %c0_82, %c0_83, %c0_84] : memref<2x2x32x64xf32, #tpu.memory_space<vmem>>, vector<1x1x32x64xf32>
    %168 = vector.shape_cast %167 : vector<1x1x32x64xf32> to vector<32x64xf32>
    %cst_85 = arith.constant dense<0.000000e+00> : vector<2x64xf32>
    %169 = tpu.matmul %166, %168, %cst_85 {dimension_numbers = #tpu.dot_dimension_numbers<[1], [0], [0], [1], [0, 0, 1, 1], [], []>} : vector<2x32xf32>, vector<32x64xf32>, vector<2x64xf32> -> vector<2x64xf32>
    %170 = arith.addf %169, %11 : vector<2x64xf32>
    %cst_86 = arith.constant 2.000000e+01 : f32
    %171 = vector.broadcast %cst_86 : f32 to vector<2x64xf32>
    %172 = arith.minimumf %170, %171 : vector<2x64xf32>
    %173 = math.exp %172 : vector<2x64xf32>
    %174 = vector.extract_strided_slice %173 {offsets = [0, 0], sizes = [2, 32], strides = [1, 1]} : vector<2x64xf32> to vector<2x32xf32>
    %175 = arith.mulf %174, %164 : vector<2x32xf32>
    %176 = vector.extract_strided_slice %173 {offsets = [0, 32], sizes = [2, 32], strides = [1, 1]} : vector<2x64xf32> to vector<2x32xf32>
    %177 = arith.mulf %176, %161 : vector<2x32xf32>
    %178 = arith.addf %175, %177 : vector<2x32xf32>
    %179 = tpu.concatenate %166, %91 in 1 : vector<2x32xf32>, vector<2x32xf32> -> vector<2x64xf32>
    %c0_87 = arith.constant 0 : index
    %c1_88 = arith.constant 1 : index
    %c0_89 = arith.constant 0 : index
    %c0_90 = arith.constant 0 : index
    %180 = vector.load %arg1[%c0_87, %c1_88, %c0_89, %c0_90] : memref<2x2x64x128xf32, #tpu.memory_space<vmem>>, vector<1x1x64x128xf32>
    %181 = vector.shape_cast %180 : vector<1x1x64x128xf32> to vector<64x128xf32>
    %cst_91 = arith.constant dense<0.000000e+00> : vector<2x128xf32>
    %182 = tpu.matmul %179, %181, %cst_91 {dimension_numbers = #tpu.dot_dimension_numbers<[1], [0], [0], [1], [0, 0, 1, 1], [], []>} : vector<2x64xf32>, vector<64x128xf32>, vector<2x128xf32> -> vector<2x128xf32>
    %183 = arith.addf %182, %7 : vector<2x128xf32>
    %184 = vector.extract_strided_slice %183 {offsets = [0, 0], sizes = [2, 96], strides = [1, 1]} : vector<2x128xf32> to vector<2x96xf32>
    %cst_92 = arith.constant 5.000000e-01 : f32
    %185 = vector.broadcast %cst_92 : f32 to vector<2x96xf32>
    %186 = arith.mulf %185, %184 : vector<2x96xf32>
    %187 = math.tanh %186 : vector<2x96xf32>
    %cst_93 = arith.constant 1.000000e+00 : f32
    %188 = vector.broadcast %cst_93 : f32 to vector<2x96xf32>
    %189 = arith.addf %187, %188 : vector<2x96xf32>
    %cst_94 = arith.constant 5.000000e-01 : f32
    %190 = vector.broadcast %cst_94 : f32 to vector<2x96xf32>
    %191 = arith.mulf %190, %189 : vector<2x96xf32>
    %192 = vector.extract_strided_slice %191 {offsets = [0, 0], sizes = [2, 32], strides = [1, 1]} : vector<2x96xf32> to vector<2x32xf32>
    %193 = vector.extract_strided_slice %191 {offsets = [0, 32], sizes = [2, 32], strides = [1, 1]} : vector<2x96xf32> to vector<2x32xf32>
    %194 = vector.extract_strided_slice %191 {offsets = [0, 64], sizes = [2, 32], strides = [1, 1]} : vector<2x96xf32> to vector<2x32xf32>
    %195 = vector.extract_strided_slice %183 {offsets = [0, 96], sizes = [2, 32], strides = [1, 1]} : vector<2x128xf32> to vector<2x32xf32>
    %196 = math.tanh %195 : vector<2x32xf32>
    %197 = arith.mulf %193, %103 : vector<2x32xf32>
    %198 = arith.mulf %192, %196 : vector<2x32xf32>
    %199 = arith.addf %197, %198 : vector<2x32xf32>
    %200 = math.tanh %199 : vector<2x32xf32>
    %201 = arith.mulf %194, %200 : vector<2x32xf32>
    %c0_95 = arith.constant 0 : index
    %c1_96 = arith.constant 1 : index
    %c0_97 = arith.constant 0 : index
    %c0_98 = arith.constant 0 : index
    %202 = vector.load %arg3[%c0_95, %c1_96, %c0_97, %c0_98] : memref<2x2x32x64xf32, #tpu.memory_space<vmem>>, vector<1x1x32x64xf32>
    %203 = vector.shape_cast %202 : vector<1x1x32x64xf32> to vector<32x64xf32>
    %cst_99 = arith.constant dense<0.000000e+00> : vector<2x64xf32>
    %204 = tpu.matmul %201, %203, %cst_99 {dimension_numbers = #tpu.dot_dimension_numbers<[1], [0], [0], [1], [0, 0, 1, 1], [], []>} : vector<2x32xf32>, vector<32x64xf32>, vector<2x64xf32> -> vector<2x64xf32>
    %205 = arith.addf %204, %15 : vector<2x64xf32>
    %cst_100 = arith.constant 2.000000e+01 : f32
    %206 = vector.broadcast %cst_100 : f32 to vector<2x64xf32>
    %207 = arith.minimumf %205, %206 : vector<2x64xf32>
    %208 = math.exp %207 : vector<2x64xf32>
    %209 = vector.extract_strided_slice %208 {offsets = [0, 0], sizes = [2, 32], strides = [1, 1]} : vector<2x64xf32> to vector<2x32xf32>
    %210 = arith.mulf %209, %199 : vector<2x32xf32>
    %211 = vector.extract_strided_slice %208 {offsets = [0, 32], sizes = [2, 32], strides = [1, 1]} : vector<2x64xf32> to vector<2x32xf32>
    %212 = arith.mulf %211, %196 : vector<2x32xf32>
    %213 = arith.addf %210, %212 : vector<2x32xf32>
    %c0_101 = arith.constant 0 : index
    %c0_102 = arith.constant 0 : index
    %c0_103 = arith.constant 0 : index
    %214 = vector.load %arg5[%c0_101, %c0_102, %c0_103] : memref<2x32x32xf32, #tpu.memory_space<vmem>>, vector<1x32x32xf32>
    %215 = vector.shape_cast %214 : vector<1x32x32xf32> to vector<32x32xf32>
    %cst_104 = arith.constant dense<0.000000e+00> : vector<2x32xf32>
    %216 = tpu.matmul %201, %215, %cst_104 {dimension_numbers = #tpu.dot_dimension_numbers<[1], [0], [0], [1], [0, 0, 1, 1], [], []>} : vector<2x32xf32>, vector<32x32xf32>, vector<2x32xf32> -> vector<2x32xf32>
    %217 = arith.addf %216, %19 : vector<2x32xf32>
    %cst_105 = arith.constant 5.000000e-01 : f32
    %218 = vector.broadcast %cst_105 : f32 to vector<2x32xf32>
    %219 = arith.mulf %218, %217 : vector<2x32xf32>
    %cst_106 = arith.constant 4.471500e-02 : f32
    %220 = vector.broadcast %cst_106 : f32 to vector<2x32xf32>
    %221 = arith.mulf %220, %217 : vector<2x32xf32>
    %222 = arith.mulf %221, %217 : vector<2x32xf32>
    %223 = arith.mulf %222, %217 : vector<2x32xf32>
    %224 = arith.addf %217, %223 : vector<2x32xf32>
    %cst_107 = arith.constant 0.797884583 : f32
    %225 = vector.broadcast %cst_107 : f32 to vector<2x32xf32>
    %226 = arith.mulf %225, %224 : vector<2x32xf32>
    %227 = math.tanh %226 : vector<2x32xf32>
    %cst_108 = arith.constant 1.000000e+00 : f32
    %228 = vector.broadcast %cst_108 : f32 to vector<2x32xf32>
    %229 = arith.addf %228, %227 : vector<2x32xf32>
    %230 = arith.mulf %219, %229 : vector<2x32xf32>
    %231 = arith.addf %230, %143 : vector<2x32xf32>
    %cst_109 = arith.constant dense<0.000000e+00> : vector<2xf32>
    %232 = vector.multi_reduction <add>, %231, %cst_109 [1] : vector<2x32xf32> to vector<2xf32>
    %233 = vector.shape_cast %232 : vector<2xf32> to vector<2x1xf32>
    %cst_110 = arith.constant 3.200000e+01 : f32
    %234 = vector.broadcast %cst_110 : f32 to vector<2x1xf32>
    %235 = arith.divf %233, %234 : vector<2x1xf32>
    %236 = vector.broadcast %235 : vector<2x1xf32> to vector<2x32xf32>
    %237 = arith.subf %231, %236 : vector<2x32xf32>
    %238 = arith.mulf %237, %237 : vector<2x32xf32>
    %cst_111 = arith.constant dense<0.000000e+00> : vector<2xf32>
    %239 = vector.multi_reduction <add>, %238, %cst_111 [1] : vector<2x32xf32> to vector<2xf32>
    %240 = vector.shape_cast %239 : vector<2xf32> to vector<2x1xf32>
    %cst_112 = arith.constant 3.200000e+01 : f32
    %241 = vector.broadcast %cst_112 : f32 to vector<2x1xf32>
    %242 = arith.divf %240, %241 : vector<2x1xf32>
    %243 = vector.broadcast %235 : vector<2x1xf32> to vector<2x32xf32>
    %244 = arith.subf %231, %243 : vector<2x32xf32>
    %cst_113 = arith.constant 9.99999974E-6 : f32
    %245 = vector.broadcast %cst_113 : f32 to vector<2x1xf32>
    %246 = arith.addf %242, %245 : vector<2x1xf32>
    %247 = math.rsqrt %246 : vector<2x1xf32>
    %248 = vector.broadcast %247 : vector<2x1xf32> to vector<2x32xf32>
    %249 = arith.mulf %244, %248 : vector<2x32xf32>
    %250 = arith.mulf %249, %23 : vector<2x32xf32>
    %251 = arith.addf %250, %27 : vector<2x32xf32>
    %c2 = arith.constant 2 : index
    %c0_114 = arith.constant 0 : index
    %c0_115 = arith.constant 0 : index
    %252 = vector.load %arg0[%c2, %c0_114, %c0_115] : memref<8x2x32xf32, #tpu.memory_space<vmem>>, vector<1x2x32xf32>
    %253 = vector.shape_cast %252 : vector<1x2x32xf32> to vector<2x32xf32>
    %254 = tpu.concatenate %253, %166 in 1 : vector<2x32xf32>, vector<2x32xf32> -> vector<2x64xf32>
    %c0_116 = arith.constant 0 : index
    %c0_117 = arith.constant 0 : index
    %c0_118 = arith.constant 0 : index
    %c0_119 = arith.constant 0 : index
    %255 = vector.load %arg1[%c0_116, %c0_117, %c0_118, %c0_119] : memref<2x2x64x128xf32, #tpu.memory_space<vmem>>, vector<1x1x64x128xf32>
    %256 = vector.shape_cast %255 : vector<1x1x64x128xf32> to vector<64x128xf32>
    %cst_120 = arith.constant dense<0.000000e+00> : vector<2x128xf32>
    %257 = tpu.matmul %254, %256, %cst_120 {dimension_numbers = #tpu.dot_dimension_numbers<[1], [0], [0], [1], [0, 0, 1, 1], [], []>} : vector<2x64xf32>, vector<64x128xf32>, vector<2x128xf32> -> vector<2x128xf32>
    %258 = arith.addf %257, %3 : vector<2x128xf32>
    %259 = vector.extract_strided_slice %258 {offsets = [0, 0], sizes = [2, 96], strides = [1, 1]} : vector<2x128xf32> to vector<2x96xf32>
    %cst_121 = arith.constant 5.000000e-01 : f32
    %260 = vector.broadcast %cst_121 : f32 to vector<2x96xf32>
    %261 = arith.mulf %260, %259 : vector<2x96xf32>
    %262 = math.tanh %261 : vector<2x96xf32>
    %cst_122 = arith.constant 1.000000e+00 : f32
    %263 = vector.broadcast %cst_122 : f32 to vector<2x96xf32>
    %264 = arith.addf %262, %263 : vector<2x96xf32>
    %cst_123 = arith.constant 5.000000e-01 : f32
    %265 = vector.broadcast %cst_123 : f32 to vector<2x96xf32>
    %266 = arith.mulf %265, %264 : vector<2x96xf32>
    %267 = vector.extract_strided_slice %266 {offsets = [0, 0], sizes = [2, 32], strides = [1, 1]} : vector<2x96xf32> to vector<2x32xf32>
    %268 = vector.extract_strided_slice %266 {offsets = [0, 32], sizes = [2, 32], strides = [1, 1]} : vector<2x96xf32> to vector<2x32xf32>
    %269 = vector.extract_strided_slice %266 {offsets = [0, 64], sizes = [2, 32], strides = [1, 1]} : vector<2x96xf32> to vector<2x32xf32>
    %270 = vector.extract_strided_slice %258 {offsets = [0, 96], sizes = [2, 32], strides = [1, 1]} : vector<2x128xf32> to vector<2x32xf32>
    %271 = math.tanh %270 : vector<2x32xf32>
    %272 = arith.mulf %268, %178 : vector<2x32xf32>
    %273 = arith.mulf %267, %271 : vector<2x32xf32>
    %274 = arith.addf %272, %273 : vector<2x32xf32>
    %275 = math.tanh %274 : vector<2x32xf32>
    %276 = arith.mulf %269, %275 : vector<2x32xf32>
    %c0_124 = arith.constant 0 : index
    %c0_125 = arith.constant 0 : index
    %c0_126 = arith.constant 0 : index
    %c0_127 = arith.constant 0 : index
    %277 = vector.load %arg3[%c0_124, %c0_125, %c0_126, %c0_127] : memref<2x2x32x64xf32, #tpu.memory_space<vmem>>, vector<1x1x32x64xf32>
    %278 = vector.shape_cast %277 : vector<1x1x32x64xf32> to vector<32x64xf32>
    %cst_128 = arith.constant dense<0.000000e+00> : vector<2x64xf32>
    %279 = tpu.matmul %276, %278, %cst_128 {dimension_numbers = #tpu.dot_dimension_numbers<[1], [0], [0], [1], [0, 0, 1, 1], [], []>} : vector<2x32xf32>, vector<32x64xf32>, vector<2x64xf32> -> vector<2x64xf32>
    %280 = arith.addf %279, %11 : vector<2x64xf32>
    %cst_129 = arith.constant 2.000000e+01 : f32
    %281 = vector.broadcast %cst_129 : f32 to vector<2x64xf32>
    %282 = arith.minimumf %280, %281 : vector<2x64xf32>
    %283 = math.exp %282 : vector<2x64xf32>
    %284 = vector.extract_strided_slice %283 {offsets = [0, 0], sizes = [2, 32], strides = [1, 1]} : vector<2x64xf32> to vector<2x32xf32>
    %285 = arith.mulf %284, %274 : vector<2x32xf32>
    %286 = vector.extract_strided_slice %283 {offsets = [0, 32], sizes = [2, 32], strides = [1, 1]} : vector<2x64xf32> to vector<2x32xf32>
    %287 = arith.mulf %286, %271 : vector<2x32xf32>
    %288 = arith.addf %285, %287 : vector<2x32xf32>
    %289 = tpu.concatenate %276, %201 in 1 : vector<2x32xf32>, vector<2x32xf32> -> vector<2x64xf32>
    %c0_130 = arith.constant 0 : index
    %c1_131 = arith.constant 1 : index
    %c0_132 = arith.constant 0 : index
    %c0_133 = arith.constant 0 : index
    %290 = vector.load %arg1[%c0_130, %c1_131, %c0_132, %c0_133] : memref<2x2x64x128xf32, #tpu.memory_space<vmem>>, vector<1x1x64x128xf32>
    %291 = vector.shape_cast %290 : vector<1x1x64x128xf32> to vector<64x128xf32>
    %cst_134 = arith.constant dense<0.000000e+00> : vector<2x128xf32>
    %292 = tpu.matmul %289, %291, %cst_134 {dimension_numbers = #tpu.dot_dimension_numbers<[1], [0], [0], [1], [0, 0, 1, 1], [], []>} : vector<2x64xf32>, vector<64x128xf32>, vector<2x128xf32> -> vector<2x128xf32>
    %293 = arith.addf %292, %7 : vector<2x128xf32>
    %294 = vector.extract_strided_slice %293 {offsets = [0, 0], sizes = [2, 96], strides = [1, 1]} : vector<2x128xf32> to vector<2x96xf32>
    %cst_135 = arith.constant 5.000000e-01 : f32
    %295 = vector.broadcast %cst_135 : f32 to vector<2x96xf32>
    %296 = arith.mulf %295, %294 : vector<2x96xf32>
    %297 = math.tanh %296 : vector<2x96xf32>
    %cst_136 = arith.constant 1.000000e+00 : f32
    %298 = vector.broadcast %cst_136 : f32 to vector<2x96xf32>
    %299 = arith.addf %297, %298 : vector<2x96xf32>
    %cst_137 = arith.constant 5.000000e-01 : f32
    %300 = vector.broadcast %cst_137 : f32 to vector<2x96xf32>
    %301 = arith.mulf %300, %299 : vector<2x96xf32>
    %302 = vector.extract_strided_slice %301 {offsets = [0, 0], sizes = [2, 32], strides = [1, 1]} : vector<2x96xf32> to vector<2x32xf32>
    %303 = vector.extract_strided_slice %301 {offsets = [0, 32], sizes = [2, 32], strides = [1, 1]} : vector<2x96xf32> to vector<2x32xf32>
    %304 = vector.extract_strided_slice %301 {offsets = [0, 64], sizes = [2, 32], strides = [1, 1]} : vector<2x96xf32> to vector<2x32xf32>
    %305 = vector.extract_strided_slice %293 {offsets = [0, 96], sizes = [2, 32], strides = [1, 1]} : vector<2x128xf32> to vector<2x32xf32>
    %306 = math.tanh %305 : vector<2x32xf32>
    %307 = arith.mulf %303, %213 : vector<2x32xf32>
    %308 = arith.mulf %302, %306 : vector<2x32xf32>
    %309 = arith.addf %307, %308 : vector<2x32xf32>
    %310 = math.tanh %309 : vector<2x32xf32>
    %311 = arith.mulf %304, %310 : vector<2x32xf32>
    %c0_138 = arith.constant 0 : index
    %c1_139 = arith.constant 1 : index
    %c0_140 = arith.constant 0 : index
    %c0_141 = arith.constant 0 : index
    %312 = vector.load %arg3[%c0_138, %c1_139, %c0_140, %c0_141] : memref<2x2x32x64xf32, #tpu.memory_space<vmem>>, vector<1x1x32x64xf32>
    %313 = vector.shape_cast %312 : vector<1x1x32x64xf32> to vector<32x64xf32>
    %cst_142 = arith.constant dense<0.000000e+00> : vector<2x64xf32>
    %314 = tpu.matmul %311, %313, %cst_142 {dimension_numbers = #tpu.dot_dimension_numbers<[1], [0], [0], [1], [0, 0, 1, 1], [], []>} : vector<2x32xf32>, vector<32x64xf32>, vector<2x64xf32> -> vector<2x64xf32>
    %315 = arith.addf %314, %15 : vector<2x64xf32>
    %cst_143 = arith.constant 2.000000e+01 : f32
    %316 = vector.broadcast %cst_143 : f32 to vector<2x64xf32>
    %317 = arith.minimumf %315, %316 : vector<2x64xf32>
    %318 = math.exp %317 : vector<2x64xf32>
    %319 = vector.extract_strided_slice %318 {offsets = [0, 0], sizes = [2, 32], strides = [1, 1]} : vector<2x64xf32> to vector<2x32xf32>
    %320 = arith.mulf %319, %309 : vector<2x32xf32>
    %321 = vector.extract_strided_slice %318 {offsets = [0, 32], sizes = [2, 32], strides = [1, 1]} : vector<2x64xf32> to vector<2x32xf32>
    %322 = arith.mulf %321, %306 : vector<2x32xf32>
    %323 = arith.addf %320, %322 : vector<2x32xf32>
    %c0_144 = arith.constant 0 : index
    %c0_145 = arith.constant 0 : index
    %c0_146 = arith.constant 0 : index
    %324 = vector.load %arg5[%c0_144, %c0_145, %c0_146] : memref<2x32x32xf32, #tpu.memory_space<vmem>>, vector<1x32x32xf32>
    %325 = vector.shape_cast %324 : vector<1x32x32xf32> to vector<32x32xf32>
    %cst_147 = arith.constant dense<0.000000e+00> : vector<2x32xf32>
    %326 = tpu.matmul %311, %325, %cst_147 {dimension_numbers = #tpu.dot_dimension_numbers<[1], [0], [0], [1], [0, 0, 1, 1], [], []>} : vector<2x32xf32>, vector<32x32xf32>, vector<2x32xf32> -> vector<2x32xf32>
    %327 = arith.addf %326, %19 : vector<2x32xf32>
    %cst_148 = arith.constant 5.000000e-01 : f32
    %328 = vector.broadcast %cst_148 : f32 to vector<2x32xf32>
    %329 = arith.mulf %328, %327 : vector<2x32xf32>
    %cst_149 = arith.constant 4.471500e-02 : f32
    %330 = vector.broadcast %cst_149 : f32 to vector<2x32xf32>
    %331 = arith.mulf %330, %327 : vector<2x32xf32>
    %332 = arith.mulf %331, %327 : vector<2x32xf32>
    %333 = arith.mulf %332, %327 : vector<2x32xf32>
    %334 = arith.addf %327, %333 : vector<2x32xf32>
    %cst_150 = arith.constant 0.797884583 : f32
    %335 = vector.broadcast %cst_150 : f32 to vector<2x32xf32>
    %336 = arith.mulf %335, %334 : vector<2x32xf32>
    %337 = math.tanh %336 : vector<2x32xf32>
    %cst_151 = arith.constant 1.000000e+00 : f32
    %338 = vector.broadcast %cst_151 : f32 to vector<2x32xf32>
    %339 = arith.addf %338, %337 : vector<2x32xf32>
    %340 = arith.mulf %329, %339 : vector<2x32xf32>
    %341 = arith.addf %340, %253 : vector<2x32xf32>
    %cst_152 = arith.constant dense<0.000000e+00> : vector<2xf32>
    %342 = vector.multi_reduction <add>, %341, %cst_152 [1] : vector<2x32xf32> to vector<2xf32>
    %343 = vector.shape_cast %342 : vector<2xf32> to vector<2x1xf32>
    %cst_153 = arith.constant 3.200000e+01 : f32
    %344 = vector.broadcast %cst_153 : f32 to vector<2x1xf32>
    %345 = arith.divf %343, %344 : vector<2x1xf32>
    %346 = vector.broadcast %345 : vector<2x1xf32> to vector<2x32xf32>
    %347 = arith.subf %341, %346 : vector<2x32xf32>
    %348 = arith.mulf %347, %347 : vector<2x32xf32>
    %cst_154 = arith.constant dense<0.000000e+00> : vector<2xf32>
    %349 = vector.multi_reduction <add>, %348, %cst_154 [1] : vector<2x32xf32> to vector<2xf32>
    %350 = vector.shape_cast %349 : vector<2xf32> to vector<2x1xf32>
    %cst_155 = arith.constant 3.200000e+01 : f32
    %351 = vector.broadcast %cst_155 : f32 to vector<2x1xf32>
    %352 = arith.divf %350, %351 : vector<2x1xf32>
    %353 = vector.broadcast %345 : vector<2x1xf32> to vector<2x32xf32>
    %354 = arith.subf %341, %353 : vector<2x32xf32>
    %cst_156 = arith.constant 9.99999974E-6 : f32
    %355 = vector.broadcast %cst_156 : f32 to vector<2x1xf32>
    %356 = arith.addf %352, %355 : vector<2x1xf32>
    %357 = math.rsqrt %356 : vector<2x1xf32>
    %358 = vector.broadcast %357 : vector<2x1xf32> to vector<2x32xf32>
    %359 = arith.mulf %354, %358 : vector<2x32xf32>
    %360 = arith.mulf %359, %23 : vector<2x32xf32>
    %361 = arith.addf %360, %27 : vector<2x32xf32>
    %c3 = arith.constant 3 : index
    %c0_157 = arith.constant 0 : index
    %c0_158 = arith.constant 0 : index
    %362 = vector.load %arg0[%c3, %c0_157, %c0_158] : memref<8x2x32xf32, #tpu.memory_space<vmem>>, vector<1x2x32xf32>
    %363 = vector.shape_cast %362 : vector<1x2x32xf32> to vector<2x32xf32>
    %364 = tpu.concatenate %363, %276 in 1 : vector<2x32xf32>, vector<2x32xf32> -> vector<2x64xf32>
    %c0_159 = arith.constant 0 : index
    %c0_160 = arith.constant 0 : index
    %c0_161 = arith.constant 0 : index
    %c0_162 = arith.constant 0 : index
    %365 = vector.load %arg1[%c0_159, %c0_160, %c0_161, %c0_162] : memref<2x2x64x128xf32, #tpu.memory_space<vmem>>, vector<1x1x64x128xf32>
    %366 = vector.shape_cast %365 : vector<1x1x64x128xf32> to vector<64x128xf32>
    %cst_163 = arith.constant dense<0.000000e+00> : vector<2x128xf32>
    %367 = tpu.matmul %364, %366, %cst_163 {dimension_numbers = #tpu.dot_dimension_numbers<[1], [0], [0], [1], [0, 0, 1, 1], [], []>} : vector<2x64xf32>, vector<64x128xf32>, vector<2x128xf32> -> vector<2x128xf32>
    %368 = arith.addf %367, %3 : vector<2x128xf32>
    %369 = vector.extract_strided_slice %368 {offsets = [0, 0], sizes = [2, 96], strides = [1, 1]} : vector<2x128xf32> to vector<2x96xf32>
    %cst_164 = arith.constant 5.000000e-01 : f32
    %370 = vector.broadcast %cst_164 : f32 to vector<2x96xf32>
    %371 = arith.mulf %370, %369 : vector<2x96xf32>
    %372 = math.tanh %371 : vector<2x96xf32>
    %cst_165 = arith.constant 1.000000e+00 : f32
    %373 = vector.broadcast %cst_165 : f32 to vector<2x96xf32>
    %374 = arith.addf %372, %373 : vector<2x96xf32>
    %cst_166 = arith.constant 5.000000e-01 : f32
    %375 = vector.broadcast %cst_166 : f32 to vector<2x96xf32>
    %376 = arith.mulf %375, %374 : vector<2x96xf32>
    %377 = vector.extract_strided_slice %376 {offsets = [0, 0], sizes = [2, 32], strides = [1, 1]} : vector<2x96xf32> to vector<2x32xf32>
    %378 = vector.extract_strided_slice %376 {offsets = [0, 32], sizes = [2, 32], strides = [1, 1]} : vector<2x96xf32> to vector<2x32xf32>
    %379 = vector.extract_strided_slice %376 {offsets = [0, 64], sizes = [2, 32], strides = [1, 1]} : vector<2x96xf32> to vector<2x32xf32>
    %380 = vector.extract_strided_slice %368 {offsets = [0, 96], sizes = [2, 32], strides = [1, 1]} : vector<2x128xf32> to vector<2x32xf32>
    %381 = math.tanh %380 : vector<2x32xf32>
    %382 = arith.mulf %378, %288 : vector<2x32xf32>
    %383 = arith.mulf %377, %381 : vector<2x32xf32>
    %384 = arith.addf %382, %383 : vector<2x32xf32>
    %385 = math.tanh %384 : vector<2x32xf32>
    %386 = arith.mulf %379, %385 : vector<2x32xf32>
    %c0_167 = arith.constant 0 : index
    %c0_168 = arith.constant 0 : index
    %c0_169 = arith.constant 0 : index
    %c0_170 = arith.constant 0 : index
    %387 = vector.load %arg3[%c0_167, %c0_168, %c0_169, %c0_170] : memref<2x2x32x64xf32, #tpu.memory_space<vmem>>, vector<1x1x32x64xf32>
    %388 = vector.shape_cast %387 : vector<1x1x32x64xf32> to vector<32x64xf32>
    %cst_171 = arith.constant dense<0.000000e+00> : vector<2x64xf32>
    %389 = tpu.matmul %386, %388, %cst_171 {dimension_numbers = #tpu.dot_dimension_numbers<[1], [0], [0], [1], [0, 0, 1, 1], [], []>} : vector<2x32xf32>, vector<32x64xf32>, vector<2x64xf32> -> vector<2x64xf32>
    %390 = arith.addf %389, %11 : vector<2x64xf32>
    %cst_172 = arith.constant 2.000000e+01 : f32
    %391 = vector.broadcast %cst_172 : f32 to vector<2x64xf32>
    %392 = arith.minimumf %390, %391 : vector<2x64xf32>
    %393 = math.exp %392 : vector<2x64xf32>
    %394 = vector.extract_strided_slice %393 {offsets = [0, 0], sizes = [2, 32], strides = [1, 1]} : vector<2x64xf32> to vector<2x32xf32>
    %395 = arith.mulf %394, %384 : vector<2x32xf32>
    %396 = vector.extract_strided_slice %393 {offsets = [0, 32], sizes = [2, 32], strides = [1, 1]} : vector<2x64xf32> to vector<2x32xf32>
    %397 = arith.mulf %396, %381 : vector<2x32xf32>
    %398 = arith.addf %395, %397 : vector<2x32xf32>
    %399 = tpu.concatenate %386, %311 in 1 : vector<2x32xf32>, vector<2x32xf32> -> vector<2x64xf32>
    %c0_173 = arith.constant 0 : index
    %c1_174 = arith.constant 1 : index
    %c0_175 = arith.constant 0 : index
    %c0_176 = arith.constant 0 : index
    %400 = vector.load %arg1[%c0_173, %c1_174, %c0_175, %c0_176] : memref<2x2x64x128xf32, #tpu.memory_space<vmem>>, vector<1x1x64x128xf32>
    %401 = vector.shape_cast %400 : vector<1x1x64x128xf32> to vector<64x128xf32>
    %cst_177 = arith.constant dense<0.000000e+00> : vector<2x128xf32>
    %402 = tpu.matmul %399, %401, %cst_177 {dimension_numbers = #tpu.dot_dimension_numbers<[1], [0], [0], [1], [0, 0, 1, 1], [], []>} : vector<2x64xf32>, vector<64x128xf32>, vector<2x128xf32> -> vector<2x128xf32>
    %403 = arith.addf %402, %7 : vector<2x128xf32>
    %404 = vector.extract_strided_slice %403 {offsets = [0, 0], sizes = [2, 96], strides = [1, 1]} : vector<2x128xf32> to vector<2x96xf32>
    %cst_178 = arith.constant 5.000000e-01 : f32
    %405 = vector.broadcast %cst_178 : f32 to vector<2x96xf32>
    %406 = arith.mulf %405, %404 : vector<2x96xf32>
    %407 = math.tanh %406 : vector<2x96xf32>
    %cst_179 = arith.constant 1.000000e+00 : f32
    %408 = vector.broadcast %cst_179 : f32 to vector<2x96xf32>
    %409 = arith.addf %407, %408 : vector<2x96xf32>
    %cst_180 = arith.constant 5.000000e-01 : f32
    %410 = vector.broadcast %cst_180 : f32 to vector<2x96xf32>
    %411 = arith.mulf %410, %409 : vector<2x96xf32>
    %412 = vector.extract_strided_slice %411 {offsets = [0, 0], sizes = [2, 32], strides = [1, 1]} : vector<2x96xf32> to vector<2x32xf32>
    %413 = vector.extract_strided_slice %411 {offsets = [0, 32], sizes = [2, 32], strides = [1, 1]} : vector<2x96xf32> to vector<2x32xf32>
    %414 = vector.extract_strided_slice %411 {offsets = [0, 64], sizes = [2, 32], strides = [1, 1]} : vector<2x96xf32> to vector<2x32xf32>
    %415 = vector.extract_strided_slice %403 {offsets = [0, 96], sizes = [2, 32], strides = [1, 1]} : vector<2x128xf32> to vector<2x32xf32>
    %416 = math.tanh %415 : vector<2x32xf32>
    %417 = arith.mulf %413, %323 : vector<2x32xf32>
    %418 = arith.mulf %412, %416 : vector<2x32xf32>
    %419 = arith.addf %417, %418 : vector<2x32xf32>
    %420 = math.tanh %419 : vector<2x32xf32>
    %421 = arith.mulf %414, %420 : vector<2x32xf32>
    %c0_181 = arith.constant 0 : index
    %c1_182 = arith.constant 1 : index
    %c0_183 = arith.constant 0 : index
    %c0_184 = arith.constant 0 : index
    %422 = vector.load %arg3[%c0_181, %c1_182, %c0_183, %c0_184] : memref<2x2x32x64xf32, #tpu.memory_space<vmem>>, vector<1x1x32x64xf32>
    %423 = vector.shape_cast %422 : vector<1x1x32x64xf32> to vector<32x64xf32>
    %cst_185 = arith.constant dense<0.000000e+00> : vector<2x64xf32>
    %424 = tpu.matmul %421, %423, %cst_185 {dimension_numbers = #tpu.dot_dimension_numbers<[1], [0], [0], [1], [0, 0, 1, 1], [], []>} : vector<2x32xf32>, vector<32x64xf32>, vector<2x64xf32> -> vector<2x64xf32>
    %425 = arith.addf %424, %15 : vector<2x64xf32>
    %cst_186 = arith.constant 2.000000e+01 : f32
    %426 = vector.broadcast %cst_186 : f32 to vector<2x64xf32>
    %427 = arith.minimumf %425, %426 : vector<2x64xf32>
    %428 = math.exp %427 : vector<2x64xf32>
    %429 = vector.extract_strided_slice %428 {offsets = [0, 0], sizes = [2, 32], strides = [1, 1]} : vector<2x64xf32> to vector<2x32xf32>
    %430 = arith.mulf %429, %419 : vector<2x32xf32>
    %431 = vector.extract_strided_slice %428 {offsets = [0, 32], sizes = [2, 32], strides = [1, 1]} : vector<2x64xf32> to vector<2x32xf32>
    %432 = arith.mulf %431, %416 : vector<2x32xf32>
    %433 = arith.addf %430, %432 : vector<2x32xf32>
    %c0_187 = arith.constant 0 : index
    %c0_188 = arith.constant 0 : index
    %c0_189 = arith.constant 0 : index
    %434 = vector.load %arg5[%c0_187, %c0_188, %c0_189] : memref<2x32x32xf32, #tpu.memory_space<vmem>>, vector<1x32x32xf32>
    %435 = vector.shape_cast %434 : vector<1x32x32xf32> to vector<32x32xf32>
    %cst_190 = arith.constant dense<0.000000e+00> : vector<2x32xf32>
    %436 = tpu.matmul %421, %435, %cst_190 {dimension_numbers = #tpu.dot_dimension_numbers<[1], [0], [0], [1], [0, 0, 1, 1], [], []>} : vector<2x32xf32>, vector<32x32xf32>, vector<2x32xf32> -> vector<2x32xf32>
    %437 = arith.addf %436, %19 : vector<2x32xf32>
    %cst_191 = arith.constant 5.000000e-01 : f32
    %438 = vector.broadcast %cst_191 : f32 to vector<2x32xf32>
    %439 = arith.mulf %438, %437 : vector<2x32xf32>
    %cst_192 = arith.constant 4.471500e-02 : f32
    %440 = vector.broadcast %cst_192 : f32 to vector<2x32xf32>
    %441 = arith.mulf %440, %437 : vector<2x32xf32>
    %442 = arith.mulf %441, %437 : vector<2x32xf32>
    %443 = arith.mulf %442, %437 : vector<2x32xf32>
    %444 = arith.addf %437, %443 : vector<2x32xf32>
    %cst_193 = arith.constant 0.797884583 : f32
    %445 = vector.broadcast %cst_193 : f32 to vector<2x32xf32>
    %446 = arith.mulf %445, %444 : vector<2x32xf32>
    %447 = math.tanh %446 : vector<2x32xf32>
    %cst_194 = arith.constant 1.000000e+00 : f32
    %448 = vector.broadcast %cst_194 : f32 to vector<2x32xf32>
    %449 = arith.addf %448, %447 : vector<2x32xf32>
    %450 = arith.mulf %439, %449 : vector<2x32xf32>
    %451 = arith.addf %450, %363 : vector<2x32xf32>
    %cst_195 = arith.constant dense<0.000000e+00> : vector<2xf32>
    %452 = vector.multi_reduction <add>, %451, %cst_195 [1] : vector<2x32xf32> to vector<2xf32>
    %453 = vector.shape_cast %452 : vector<2xf32> to vector<2x1xf32>
    %cst_196 = arith.constant 3.200000e+01 : f32
    %454 = vector.broadcast %cst_196 : f32 to vector<2x1xf32>
    %455 = arith.divf %453, %454 : vector<2x1xf32>
    %456 = vector.broadcast %455 : vector<2x1xf32> to vector<2x32xf32>
    %457 = arith.subf %451, %456 : vector<2x32xf32>
    %458 = arith.mulf %457, %457 : vector<2x32xf32>
    %cst_197 = arith.constant dense<0.000000e+00> : vector<2xf32>
    %459 = vector.multi_reduction <add>, %458, %cst_197 [1] : vector<2x32xf32> to vector<2xf32>
    %460 = vector.shape_cast %459 : vector<2xf32> to vector<2x1xf32>
    %cst_198 = arith.constant 3.200000e+01 : f32
    %461 = vector.broadcast %cst_198 : f32 to vector<2x1xf32>
    %462 = arith.divf %460, %461 : vector<2x1xf32>
    %463 = vector.broadcast %455 : vector<2x1xf32> to vector<2x32xf32>
    %464 = arith.subf %451, %463 : vector<2x32xf32>
    %cst_199 = arith.constant 9.99999974E-6 : f32
    %465 = vector.broadcast %cst_199 : f32 to vector<2x1xf32>
    %466 = arith.addf %462, %465 : vector<2x1xf32>
    %467 = math.rsqrt %466 : vector<2x1xf32>
    %468 = vector.broadcast %467 : vector<2x1xf32> to vector<2x32xf32>
    %469 = arith.mulf %464, %468 : vector<2x32xf32>
    %470 = arith.mulf %469, %23 : vector<2x32xf32>
    %471 = arith.addf %470, %27 : vector<2x32xf32>
    %c4 = arith.constant 4 : index
    %c0_200 = arith.constant 0 : index
    %c0_201 = arith.constant 0 : index
    %472 = vector.load %arg0[%c4, %c0_200, %c0_201] : memref<8x2x32xf32, #tpu.memory_space<vmem>>, vector<1x2x32xf32>
    %473 = vector.shape_cast %472 : vector<1x2x32xf32> to vector<2x32xf32>
    %474 = tpu.concatenate %473, %386 in 1 : vector<2x32xf32>, vector<2x32xf32> -> vector<2x64xf32>
    %c0_202 = arith.constant 0 : index
    %c0_203 = arith.constant 0 : index
    %c0_204 = arith.constant 0 : index
    %c0_205 = arith.constant 0 : index
    %475 = vector.load %arg1[%c0_202, %c0_203, %c0_204, %c0_205] : memref<2x2x64x128xf32, #tpu.memory_space<vmem>>, vector<1x1x64x128xf32>
    %476 = vector.shape_cast %475 : vector<1x1x64x128xf32> to vector<64x128xf32>
    %cst_206 = arith.constant dense<0.000000e+00> : vector<2x128xf32>
    %477 = tpu.matmul %474, %476, %cst_206 {dimension_numbers = #tpu.dot_dimension_numbers<[1], [0], [0], [1], [0, 0, 1, 1], [], []>} : vector<2x64xf32>, vector<64x128xf32>, vector<2x128xf32> -> vector<2x128xf32>
    %478 = arith.addf %477, %3 : vector<2x128xf32>
    %479 = vector.extract_strided_slice %478 {offsets = [0, 0], sizes = [2, 96], strides = [1, 1]} : vector<2x128xf32> to vector<2x96xf32>
    %cst_207 = arith.constant 5.000000e-01 : f32
    %480 = vector.broadcast %cst_207 : f32 to vector<2x96xf32>
    %481 = arith.mulf %480, %479 : vector<2x96xf32>
    %482 = math.tanh %481 : vector<2x96xf32>
    %cst_208 = arith.constant 1.000000e+00 : f32
    %483 = vector.broadcast %cst_208 : f32 to vector<2x96xf32>
    %484 = arith.addf %482, %483 : vector<2x96xf32>
    %cst_209 = arith.constant 5.000000e-01 : f32
    %485 = vector.broadcast %cst_209 : f32 to vector<2x96xf32>
    %486 = arith.mulf %485, %484 : vector<2x96xf32>
    %487 = vector.extract_strided_slice %486 {offsets = [0, 0], sizes = [2, 32], strides = [1, 1]} : vector<2x96xf32> to vector<2x32xf32>
    %488 = vector.extract_strided_slice %486 {offsets = [0, 32], sizes = [2, 32], strides = [1, 1]} : vector<2x96xf32> to vector<2x32xf32>
    %489 = vector.extract_strided_slice %486 {offsets = [0, 64], sizes = [2, 32], strides = [1, 1]} : vector<2x96xf32> to vector<2x32xf32>
    %490 = vector.extract_strided_slice %478 {offsets = [0, 96], sizes = [2, 32], strides = [1, 1]} : vector<2x128xf32> to vector<2x32xf32>
    %491 = math.tanh %490 : vector<2x32xf32>
    %492 = arith.mulf %488, %398 : vector<2x32xf32>
    %493 = arith.mulf %487, %491 : vector<2x32xf32>
    %494 = arith.addf %492, %493 : vector<2x32xf32>
    %495 = math.tanh %494 : vector<2x32xf32>
    %496 = arith.mulf %489, %495 : vector<2x32xf32>
    %c0_210 = arith.constant 0 : index
    %c0_211 = arith.constant 0 : index
    %c0_212 = arith.constant 0 : index
    %c0_213 = arith.constant 0 : index
    %497 = vector.load %arg3[%c0_210, %c0_211, %c0_212, %c0_213] : memref<2x2x32x64xf32, #tpu.memory_space<vmem>>, vector<1x1x32x64xf32>
    %498 = vector.shape_cast %497 : vector<1x1x32x64xf32> to vector<32x64xf32>
    %cst_214 = arith.constant dense<0.000000e+00> : vector<2x64xf32>
    %499 = tpu.matmul %496, %498, %cst_214 {dimension_numbers = #tpu.dot_dimension_numbers<[1], [0], [0], [1], [0, 0, 1, 1], [], []>} : vector<2x32xf32>, vector<32x64xf32>, vector<2x64xf32> -> vector<2x64xf32>
    %500 = arith.addf %499, %11 : vector<2x64xf32>
    %cst_215 = arith.constant 2.000000e+01 : f32
    %501 = vector.broadcast %cst_215 : f32 to vector<2x64xf32>
    %502 = arith.minimumf %500, %501 : vector<2x64xf32>
    %503 = math.exp %502 : vector<2x64xf32>
    %504 = vector.extract_strided_slice %503 {offsets = [0, 0], sizes = [2, 32], strides = [1, 1]} : vector<2x64xf32> to vector<2x32xf32>
    %505 = arith.mulf %504, %494 : vector<2x32xf32>
    %506 = vector.extract_strided_slice %503 {offsets = [0, 32], sizes = [2, 32], strides = [1, 1]} : vector<2x64xf32> to vector<2x32xf32>
    %507 = arith.mulf %506, %491 : vector<2x32xf32>
    %508 = arith.addf %505, %507 : vector<2x32xf32>
    %509 = tpu.concatenate %496, %421 in 1 : vector<2x32xf32>, vector<2x32xf32> -> vector<2x64xf32>
    %c0_216 = arith.constant 0 : index
    %c1_217 = arith.constant 1 : index
    %c0_218 = arith.constant 0 : index
    %c0_219 = arith.constant 0 : index
    %510 = vector.load %arg1[%c0_216, %c1_217, %c0_218, %c0_219] : memref<2x2x64x128xf32, #tpu.memory_space<vmem>>, vector<1x1x64x128xf32>
    %511 = vector.shape_cast %510 : vector<1x1x64x128xf32> to vector<64x128xf32>
    %cst_220 = arith.constant dense<0.000000e+00> : vector<2x128xf32>
    %512 = tpu.matmul %509, %511, %cst_220 {dimension_numbers = #tpu.dot_dimension_numbers<[1], [0], [0], [1], [0, 0, 1, 1], [], []>} : vector<2x64xf32>, vector<64x128xf32>, vector<2x128xf32> -> vector<2x128xf32>
    %513 = arith.addf %512, %7 : vector<2x128xf32>
    %514 = vector.extract_strided_slice %513 {offsets = [0, 0], sizes = [2, 96], strides = [1, 1]} : vector<2x128xf32> to vector<2x96xf32>
    %cst_221 = arith.constant 5.000000e-01 : f32
    %515 = vector.broadcast %cst_221 : f32 to vector<2x96xf32>
    %516 = arith.mulf %515, %514 : vector<2x96xf32>
    %517 = math.tanh %516 : vector<2x96xf32>
    %cst_222 = arith.constant 1.000000e+00 : f32
    %518 = vector.broadcast %cst_222 : f32 to vector<2x96xf32>
    %519 = arith.addf %517, %518 : vector<2x96xf32>
    %cst_223 = arith.constant 5.000000e-01 : f32
    %520 = vector.broadcast %cst_223 : f32 to vector<2x96xf32>
    %521 = arith.mulf %520, %519 : vector<2x96xf32>
    %522 = vector.extract_strided_slice %521 {offsets = [0, 0], sizes = [2, 32], strides = [1, 1]} : vector<2x96xf32> to vector<2x32xf32>
    %523 = vector.extract_strided_slice %521 {offsets = [0, 32], sizes = [2, 32], strides = [1, 1]} : vector<2x96xf32> to vector<2x32xf32>
    %524 = vector.extract_strided_slice %521 {offsets = [0, 64], sizes = [2, 32], strides = [1, 1]} : vector<2x96xf32> to vector<2x32xf32>
    %525 = vector.extract_strided_slice %513 {offsets = [0, 96], sizes = [2, 32], strides = [1, 1]} : vector<2x128xf32> to vector<2x32xf32>
    %526 = math.tanh %525 : vector<2x32xf32>
    %527 = arith.mulf %523, %433 : vector<2x32xf32>
    %528 = arith.mulf %522, %526 : vector<2x32xf32>
    %529 = arith.addf %527, %528 : vector<2x32xf32>
    %530 = math.tanh %529 : vector<2x32xf32>
    %531 = arith.mulf %524, %530 : vector<2x32xf32>
    %c0_224 = arith.constant 0 : index
    %c1_225 = arith.constant 1 : index
    %c0_226 = arith.constant 0 : index
    %c0_227 = arith.constant 0 : index
    %532 = vector.load %arg3[%c0_224, %c1_225, %c0_226, %c0_227] : memref<2x2x32x64xf32, #tpu.memory_space<vmem>>, vector<1x1x32x64xf32>
    %533 = vector.shape_cast %532 : vector<1x1x32x64xf32> to vector<32x64xf32>
    %cst_228 = arith.constant dense<0.000000e+00> : vector<2x64xf32>
    %534 = tpu.matmul %531, %533, %cst_228 {dimension_numbers = #tpu.dot_dimension_numbers<[1], [0], [0], [1], [0, 0, 1, 1], [], []>} : vector<2x32xf32>, vector<32x64xf32>, vector<2x64xf32> -> vector<2x64xf32>
    %535 = arith.addf %534, %15 : vector<2x64xf32>
    %cst_229 = arith.constant 2.000000e+01 : f32
    %536 = vector.broadcast %cst_229 : f32 to vector<2x64xf32>
    %537 = arith.minimumf %535, %536 : vector<2x64xf32>
    %538 = math.exp %537 : vector<2x64xf32>
    %539 = vector.extract_strided_slice %538 {offsets = [0, 0], sizes = [2, 32], strides = [1, 1]} : vector<2x64xf32> to vector<2x32xf32>
    %540 = arith.mulf %539, %529 : vector<2x32xf32>
    %541 = vector.extract_strided_slice %538 {offsets = [0, 32], sizes = [2, 32], strides = [1, 1]} : vector<2x64xf32> to vector<2x32xf32>
    %542 = arith.mulf %541, %526 : vector<2x32xf32>
    %543 = arith.addf %540, %542 : vector<2x32xf32>
    %c0_230 = arith.constant 0 : index
    %c0_231 = arith.constant 0 : index
    %c0_232 = arith.constant 0 : index
    %544 = vector.load %arg5[%c0_230, %c0_231, %c0_232] : memref<2x32x32xf32, #tpu.memory_space<vmem>>, vector<1x32x32xf32>
    %545 = vector.shape_cast %544 : vector<1x32x32xf32> to vector<32x32xf32>
    %cst_233 = arith.constant dense<0.000000e+00> : vector<2x32xf32>
    %546 = tpu.matmul %531, %545, %cst_233 {dimension_numbers = #tpu.dot_dimension_numbers<[1], [0], [0], [1], [0, 0, 1, 1], [], []>} : vector<2x32xf32>, vector<32x32xf32>, vector<2x32xf32> -> vector<2x32xf32>
    %547 = arith.addf %546, %19 : vector<2x32xf32>
    %cst_234 = arith.constant 5.000000e-01 : f32
    %548 = vector.broadcast %cst_234 : f32 to vector<2x32xf32>
    %549 = arith.mulf %548, %547 : vector<2x32xf32>
    %cst_235 = arith.constant 4.471500e-02 : f32
    %550 = vector.broadcast %cst_235 : f32 to vector<2x32xf32>
    %551 = arith.mulf %550, %547 : vector<2x32xf32>
    %552 = arith.mulf %551, %547 : vector<2x32xf32>
    %553 = arith.mulf %552, %547 : vector<2x32xf32>
    %554 = arith.addf %547, %553 : vector<2x32xf32>
    %cst_236 = arith.constant 0.797884583 : f32
    %555 = vector.broadcast %cst_236 : f32 to vector<2x32xf32>
    %556 = arith.mulf %555, %554 : vector<2x32xf32>
    %557 = math.tanh %556 : vector<2x32xf32>
    %cst_237 = arith.constant 1.000000e+00 : f32
    %558 = vector.broadcast %cst_237 : f32 to vector<2x32xf32>
    %559 = arith.addf %558, %557 : vector<2x32xf32>
    %560 = arith.mulf %549, %559 : vector<2x32xf32>
    %561 = arith.addf %560, %473 : vector<2x32xf32>
    %cst_238 = arith.constant dense<0.000000e+00> : vector<2xf32>
    %562 = vector.multi_reduction <add>, %561, %cst_238 [1] : vector<2x32xf32> to vector<2xf32>
    %563 = vector.shape_cast %562 : vector<2xf32> to vector<2x1xf32>
    %cst_239 = arith.constant 3.200000e+01 : f32
    %564 = vector.broadcast %cst_239 : f32 to vector<2x1xf32>
    %565 = arith.divf %563, %564 : vector<2x1xf32>
    %566 = vector.broadcast %565 : vector<2x1xf32> to vector<2x32xf32>
    %567 = arith.subf %561, %566 : vector<2x32xf32>
    %568 = arith.mulf %567, %567 : vector<2x32xf32>
    %cst_240 = arith.constant dense<0.000000e+00> : vector<2xf32>
    %569 = vector.multi_reduction <add>, %568, %cst_240 [1] : vector<2x32xf32> to vector<2xf32>
    %570 = vector.shape_cast %569 : vector<2xf32> to vector<2x1xf32>
    %cst_241 = arith.constant 3.200000e+01 : f32
    %571 = vector.broadcast %cst_241 : f32 to vector<2x1xf32>
    %572 = arith.divf %570, %571 : vector<2x1xf32>
    %573 = vector.broadcast %565 : vector<2x1xf32> to vector<2x32xf32>
    %574 = arith.subf %561, %573 : vector<2x32xf32>
    %cst_242 = arith.constant 9.99999974E-6 : f32
    %575 = vector.broadcast %cst_242 : f32 to vector<2x1xf32>
    %576 = arith.addf %572, %575 : vector<2x1xf32>
    %577 = math.rsqrt %576 : vector<2x1xf32>
    %578 = vector.broadcast %577 : vector<2x1xf32> to vector<2x32xf32>
    %579 = arith.mulf %574, %578 : vector<2x32xf32>
    %580 = arith.mulf %579, %23 : vector<2x32xf32>
    %581 = arith.addf %580, %27 : vector<2x32xf32>
    %c5 = arith.constant 5 : index
    %c0_243 = arith.constant 0 : index
    %c0_244 = arith.constant 0 : index
    %582 = vector.load %arg0[%c5, %c0_243, %c0_244] : memref<8x2x32xf32, #tpu.memory_space<vmem>>, vector<1x2x32xf32>
    %583 = vector.shape_cast %582 : vector<1x2x32xf32> to vector<2x32xf32>
    %584 = tpu.concatenate %583, %496 in 1 : vector<2x32xf32>, vector<2x32xf32> -> vector<2x64xf32>
    %c0_245 = arith.constant 0 : index
    %c0_246 = arith.constant 0 : index
    %c0_247 = arith.constant 0 : index
    %c0_248 = arith.constant 0 : index
    %585 = vector.load %arg1[%c0_245, %c0_246, %c0_247, %c0_248] : memref<2x2x64x128xf32, #tpu.memory_space<vmem>>, vector<1x1x64x128xf32>
    %586 = vector.shape_cast %585 : vector<1x1x64x128xf32> to vector<64x128xf32>
    %cst_249 = arith.constant dense<0.000000e+00> : vector<2x128xf32>
    %587 = tpu.matmul %584, %586, %cst_249 {dimension_numbers = #tpu.dot_dimension_numbers<[1], [0], [0], [1], [0, 0, 1, 1], [], []>} : vector<2x64xf32>, vector<64x128xf32>, vector<2x128xf32> -> vector<2x128xf32>
    %588 = arith.addf %587, %3 : vector<2x128xf32>
    %589 = vector.extract_strided_slice %588 {offsets = [0, 0], sizes = [2, 96], strides = [1, 1]} : vector<2x128xf32> to vector<2x96xf32>
    %cst_250 = arith.constant 5.000000e-01 : f32
    %590 = vector.broadcast %cst_250 : f32 to vector<2x96xf32>
    %591 = arith.mulf %590, %589 : vector<2x96xf32>
    %592 = math.tanh %591 : vector<2x96xf32>
    %cst_251 = arith.constant 1.000000e+00 : f32
    %593 = vector.broadcast %cst_251 : f32 to vector<2x96xf32>
    %594 = arith.addf %592, %593 : vector<2x96xf32>
    %cst_252 = arith.constant 5.000000e-01 : f32
    %595 = vector.broadcast %cst_252 : f32 to vector<2x96xf32>
    %596 = arith.mulf %595, %594 : vector<2x96xf32>
    %597 = vector.extract_strided_slice %596 {offsets = [0, 0], sizes = [2, 32], strides = [1, 1]} : vector<2x96xf32> to vector<2x32xf32>
    %598 = vector.extract_strided_slice %596 {offsets = [0, 32], sizes = [2, 32], strides = [1, 1]} : vector<2x96xf32> to vector<2x32xf32>
    %599 = vector.extract_strided_slice %596 {offsets = [0, 64], sizes = [2, 32], strides = [1, 1]} : vector<2x96xf32> to vector<2x32xf32>
    %600 = vector.extract_strided_slice %588 {offsets = [0, 96], sizes = [2, 32], strides = [1, 1]} : vector<2x128xf32> to vector<2x32xf32>
    %601 = math.tanh %600 : vector<2x32xf32>
    %602 = arith.mulf %598, %508 : vector<2x32xf32>
    %603 = arith.mulf %597, %601 : vector<2x32xf32>
    %604 = arith.addf %602, %603 : vector<2x32xf32>
    %605 = math.tanh %604 : vector<2x32xf32>
    %606 = arith.mulf %599, %605 : vector<2x32xf32>
    %c0_253 = arith.constant 0 : index
    %c0_254 = arith.constant 0 : index
    %c0_255 = arith.constant 0 : index
    %c0_256 = arith.constant 0 : index
    %607 = vector.load %arg3[%c0_253, %c0_254, %c0_255, %c0_256] : memref<2x2x32x64xf32, #tpu.memory_space<vmem>>, vector<1x1x32x64xf32>
    %608 = vector.shape_cast %607 : vector<1x1x32x64xf32> to vector<32x64xf32>
    %cst_257 = arith.constant dense<0.000000e+00> : vector<2x64xf32>
    %609 = tpu.matmul %606, %608, %cst_257 {dimension_numbers = #tpu.dot_dimension_numbers<[1], [0], [0], [1], [0, 0, 1, 1], [], []>} : vector<2x32xf32>, vector<32x64xf32>, vector<2x64xf32> -> vector<2x64xf32>
    %610 = arith.addf %609, %11 : vector<2x64xf32>
    %cst_258 = arith.constant 2.000000e+01 : f32
    %611 = vector.broadcast %cst_258 : f32 to vector<2x64xf32>
    %612 = arith.minimumf %610, %611 : vector<2x64xf32>
    %613 = math.exp %612 : vector<2x64xf32>
    %614 = vector.extract_strided_slice %613 {offsets = [0, 0], sizes = [2, 32], strides = [1, 1]} : vector<2x64xf32> to vector<2x32xf32>
    %615 = arith.mulf %614, %604 : vector<2x32xf32>
    %616 = vector.extract_strided_slice %613 {offsets = [0, 32], sizes = [2, 32], strides = [1, 1]} : vector<2x64xf32> to vector<2x32xf32>
    %617 = arith.mulf %616, %601 : vector<2x32xf32>
    %618 = arith.addf %615, %617 : vector<2x32xf32>
    %619 = tpu.concatenate %606, %531 in 1 : vector<2x32xf32>, vector<2x32xf32> -> vector<2x64xf32>
    %c0_259 = arith.constant 0 : index
    %c1_260 = arith.constant 1 : index
    %c0_261 = arith.constant 0 : index
    %c0_262 = arith.constant 0 : index
    %620 = vector.load %arg1[%c0_259, %c1_260, %c0_261, %c0_262] : memref<2x2x64x128xf32, #tpu.memory_space<vmem>>, vector<1x1x64x128xf32>
    %621 = vector.shape_cast %620 : vector<1x1x64x128xf32> to vector<64x128xf32>
    %cst_263 = arith.constant dense<0.000000e+00> : vector<2x128xf32>
    %622 = tpu.matmul %619, %621, %cst_263 {dimension_numbers = #tpu.dot_dimension_numbers<[1], [0], [0], [1], [0, 0, 1, 1], [], []>} : vector<2x64xf32>, vector<64x128xf32>, vector<2x128xf32> -> vector<2x128xf32>
    %623 = arith.addf %622, %7 : vector<2x128xf32>
    %624 = vector.extract_strided_slice %623 {offsets = [0, 0], sizes = [2, 96], strides = [1, 1]} : vector<2x128xf32> to vector<2x96xf32>
    %cst_264 = arith.constant 5.000000e-01 : f32
    %625 = vector.broadcast %cst_264 : f32 to vector<2x96xf32>
    %626 = arith.mulf %625, %624 : vector<2x96xf32>
    %627 = math.tanh %626 : vector<2x96xf32>
    %cst_265 = arith.constant 1.000000e+00 : f32
    %628 = vector.broadcast %cst_265 : f32 to vector<2x96xf32>
    %629 = arith.addf %627, %628 : vector<2x96xf32>
    %cst_266 = arith.constant 5.000000e-01 : f32
    %630 = vector.broadcast %cst_266 : f32 to vector<2x96xf32>
    %631 = arith.mulf %630, %629 : vector<2x96xf32>
    %632 = vector.extract_strided_slice %631 {offsets = [0, 0], sizes = [2, 32], strides = [1, 1]} : vector<2x96xf32> to vector<2x32xf32>
    %633 = vector.extract_strided_slice %631 {offsets = [0, 32], sizes = [2, 32], strides = [1, 1]} : vector<2x96xf32> to vector<2x32xf32>
    %634 = vector.extract_strided_slice %631 {offsets = [0, 64], sizes = [2, 32], strides = [1, 1]} : vector<2x96xf32> to vector<2x32xf32>
    %635 = vector.extract_strided_slice %623 {offsets = [0, 96], sizes = [2, 32], strides = [1, 1]} : vector<2x128xf32> to vector<2x32xf32>
    %636 = math.tanh %635 : vector<2x32xf32>
    %637 = arith.mulf %633, %543 : vector<2x32xf32>
    %638 = arith.mulf %632, %636 : vector<2x32xf32>
    %639 = arith.addf %637, %638 : vector<2x32xf32>
    %640 = math.tanh %639 : vector<2x32xf32>
    %641 = arith.mulf %634, %640 : vector<2x32xf32>
    %c0_267 = arith.constant 0 : index
    %c1_268 = arith.constant 1 : index
    %c0_269 = arith.constant 0 : index
    %c0_270 = arith.constant 0 : index
    %642 = vector.load %arg3[%c0_267, %c1_268, %c0_269, %c0_270] : memref<2x2x32x64xf32, #tpu.memory_space<vmem>>, vector<1x1x32x64xf32>
    %643 = vector.shape_cast %642 : vector<1x1x32x64xf32> to vector<32x64xf32>
    %cst_271 = arith.constant dense<0.000000e+00> : vector<2x64xf32>
    %644 = tpu.matmul %641, %643, %cst_271 {dimension_numbers = #tpu.dot_dimension_numbers<[1], [0], [0], [1], [0, 0, 1, 1], [], []>} : vector<2x32xf32>, vector<32x64xf32>, vector<2x64xf32> -> vector<2x64xf32>
    %645 = arith.addf %644, %15 : vector<2x64xf32>
    %cst_272 = arith.constant 2.000000e+01 : f32
    %646 = vector.broadcast %cst_272 : f32 to vector<2x64xf32>
    %647 = arith.minimumf %645, %646 : vector<2x64xf32>
    %648 = math.exp %647 : vector<2x64xf32>
    %649 = vector.extract_strided_slice %648 {offsets = [0, 0], sizes = [2, 32], strides = [1, 1]} : vector<2x64xf32> to vector<2x32xf32>
    %650 = arith.mulf %649, %639 : vector<2x32xf32>
    %651 = vector.extract_strided_slice %648 {offsets = [0, 32], sizes = [2, 32], strides = [1, 1]} : vector<2x64xf32> to vector<2x32xf32>
    %652 = arith.mulf %651, %636 : vector<2x32xf32>
    %653 = arith.addf %650, %652 : vector<2x32xf32>
    %c0_273 = arith.constant 0 : index
    %c0_274 = arith.constant 0 : index
    %c0_275 = arith.constant 0 : index
    %654 = vector.load %arg5[%c0_273, %c0_274, %c0_275] : memref<2x32x32xf32, #tpu.memory_space<vmem>>, vector<1x32x32xf32>
    %655 = vector.shape_cast %654 : vector<1x32x32xf32> to vector<32x32xf32>
    %cst_276 = arith.constant dense<0.000000e+00> : vector<2x32xf32>
    %656 = tpu.matmul %641, %655, %cst_276 {dimension_numbers = #tpu.dot_dimension_numbers<[1], [0], [0], [1], [0, 0, 1, 1], [], []>} : vector<2x32xf32>, vector<32x32xf32>, vector<2x32xf32> -> vector<2x32xf32>
    %657 = arith.addf %656, %19 : vector<2x32xf32>
    %cst_277 = arith.constant 5.000000e-01 : f32
    %658 = vector.broadcast %cst_277 : f32 to vector<2x32xf32>
    %659 = arith.mulf %658, %657 : vector<2x32xf32>
    %cst_278 = arith.constant 4.471500e-02 : f32
    %660 = vector.broadcast %cst_278 : f32 to vector<2x32xf32>
    %661 = arith.mulf %660, %657 : vector<2x32xf32>
    %662 = arith.mulf %661, %657 : vector<2x32xf32>
    %663 = arith.mulf %662, %657 : vector<2x32xf32>
    %664 = arith.addf %657, %663 : vector<2x32xf32>
    %cst_279 = arith.constant 0.797884583 : f32
    %665 = vector.broadcast %cst_279 : f32 to vector<2x32xf32>
    %666 = arith.mulf %665, %664 : vector<2x32xf32>
    %667 = math.tanh %666 : vector<2x32xf32>
    %cst_280 = arith.constant 1.000000e+00 : f32
    %668 = vector.broadcast %cst_280 : f32 to vector<2x32xf32>
    %669 = arith.addf %668, %667 : vector<2x32xf32>
    %670 = arith.mulf %659, %669 : vector<2x32xf32>
    %671 = arith.addf %670, %583 : vector<2x32xf32>
    %cst_281 = arith.constant dense<0.000000e+00> : vector<2xf32>
    %672 = vector.multi_reduction <add>, %671, %cst_281 [1] : vector<2x32xf32> to vector<2xf32>
    %673 = vector.shape_cast %672 : vector<2xf32> to vector<2x1xf32>
    %cst_282 = arith.constant 3.200000e+01 : f32
    %674 = vector.broadcast %cst_282 : f32 to vector<2x1xf32>
    %675 = arith.divf %673, %674 : vector<2x1xf32>
    %676 = vector.broadcast %675 : vector<2x1xf32> to vector<2x32xf32>
    %677 = arith.subf %671, %676 : vector<2x32xf32>
    %678 = arith.mulf %677, %677 : vector<2x32xf32>
    %cst_283 = arith.constant dense<0.000000e+00> : vector<2xf32>
    %679 = vector.multi_reduction <add>, %678, %cst_283 [1] : vector<2x32xf32> to vector<2xf32>
    %680 = vector.shape_cast %679 : vector<2xf32> to vector<2x1xf32>
    %cst_284 = arith.constant 3.200000e+01 : f32
    %681 = vector.broadcast %cst_284 : f32 to vector<2x1xf32>
    %682 = arith.divf %680, %681 : vector<2x1xf32>
    %683 = vector.broadcast %675 : vector<2x1xf32> to vector<2x32xf32>
    %684 = arith.subf %671, %683 : vector<2x32xf32>
    %cst_285 = arith.constant 9.99999974E-6 : f32
    %685 = vector.broadcast %cst_285 : f32 to vector<2x1xf32>
    %686 = arith.addf %682, %685 : vector<2x1xf32>
    %687 = math.rsqrt %686 : vector<2x1xf32>
    %688 = vector.broadcast %687 : vector<2x1xf32> to vector<2x32xf32>
    %689 = arith.mulf %684, %688 : vector<2x32xf32>
    %690 = arith.mulf %689, %23 : vector<2x32xf32>
    %691 = arith.addf %690, %27 : vector<2x32xf32>
    %c6 = arith.constant 6 : index
    %c0_286 = arith.constant 0 : index
    %c0_287 = arith.constant 0 : index
    %692 = vector.load %arg0[%c6, %c0_286, %c0_287] : memref<8x2x32xf32, #tpu.memory_space<vmem>>, vector<1x2x32xf32>
    %693 = vector.shape_cast %692 : vector<1x2x32xf32> to vector<2x32xf32>
    %694 = tpu.concatenate %693, %606 in 1 : vector<2x32xf32>, vector<2x32xf32> -> vector<2x64xf32>
    %c0_288 = arith.constant 0 : index
    %c0_289 = arith.constant 0 : index
    %c0_290 = arith.constant 0 : index
    %c0_291 = arith.constant 0 : index
    %695 = vector.load %arg1[%c0_288, %c0_289, %c0_290, %c0_291] : memref<2x2x64x128xf32, #tpu.memory_space<vmem>>, vector<1x1x64x128xf32>
    %696 = vector.shape_cast %695 : vector<1x1x64x128xf32> to vector<64x128xf32>
    %cst_292 = arith.constant dense<0.000000e+00> : vector<2x128xf32>
    %697 = tpu.matmul %694, %696, %cst_292 {dimension_numbers = #tpu.dot_dimension_numbers<[1], [0], [0], [1], [0, 0, 1, 1], [], []>} : vector<2x64xf32>, vector<64x128xf32>, vector<2x128xf32> -> vector<2x128xf32>
    %698 = arith.addf %697, %3 : vector<2x128xf32>
    %699 = vector.extract_strided_slice %698 {offsets = [0, 0], sizes = [2, 96], strides = [1, 1]} : vector<2x128xf32> to vector<2x96xf32>
    %cst_293 = arith.constant 5.000000e-01 : f32
    %700 = vector.broadcast %cst_293 : f32 to vector<2x96xf32>
    %701 = arith.mulf %700, %699 : vector<2x96xf32>
    %702 = math.tanh %701 : vector<2x96xf32>
    %cst_294 = arith.constant 1.000000e+00 : f32
    %703 = vector.broadcast %cst_294 : f32 to vector<2x96xf32>
    %704 = arith.addf %702, %703 : vector<2x96xf32>
    %cst_295 = arith.constant 5.000000e-01 : f32
    %705 = vector.broadcast %cst_295 : f32 to vector<2x96xf32>
    %706 = arith.mulf %705, %704 : vector<2x96xf32>
    %707 = vector.extract_strided_slice %706 {offsets = [0, 0], sizes = [2, 32], strides = [1, 1]} : vector<2x96xf32> to vector<2x32xf32>
    %708 = vector.extract_strided_slice %706 {offsets = [0, 32], sizes = [2, 32], strides = [1, 1]} : vector<2x96xf32> to vector<2x32xf32>
    %709 = vector.extract_strided_slice %706 {offsets = [0, 64], sizes = [2, 32], strides = [1, 1]} : vector<2x96xf32> to vector<2x32xf32>
    %710 = vector.extract_strided_slice %698 {offsets = [0, 96], sizes = [2, 32], strides = [1, 1]} : vector<2x128xf32> to vector<2x32xf32>
    %711 = math.tanh %710 : vector<2x32xf32>
    %712 = arith.mulf %708, %618 : vector<2x32xf32>
    %713 = arith.mulf %707, %711 : vector<2x32xf32>
    %714 = arith.addf %712, %713 : vector<2x32xf32>
    %715 = math.tanh %714 : vector<2x32xf32>
    %716 = arith.mulf %709, %715 : vector<2x32xf32>
    %c0_296 = arith.constant 0 : index
    %c0_297 = arith.constant 0 : index
    %c0_298 = arith.constant 0 : index
    %c0_299 = arith.constant 0 : index
    %717 = vector.load %arg3[%c0_296, %c0_297, %c0_298, %c0_299] : memref<2x2x32x64xf32, #tpu.memory_space<vmem>>, vector<1x1x32x64xf32>
    %718 = vector.shape_cast %717 : vector<1x1x32x64xf32> to vector<32x64xf32>
    %cst_300 = arith.constant dense<0.000000e+00> : vector<2x64xf32>
    %719 = tpu.matmul %716, %718, %cst_300 {dimension_numbers = #tpu.dot_dimension_numbers<[1], [0], [0], [1], [0, 0, 1, 1], [], []>} : vector<2x32xf32>, vector<32x64xf32>, vector<2x64xf32> -> vector<2x64xf32>
    %720 = arith.addf %719, %11 : vector<2x64xf32>
    %cst_301 = arith.constant 2.000000e+01 : f32
    %721 = vector.broadcast %cst_301 : f32 to vector<2x64xf32>
    %722 = arith.minimumf %720, %721 : vector<2x64xf32>
    %723 = math.exp %722 : vector<2x64xf32>
    %724 = vector.extract_strided_slice %723 {offsets = [0, 0], sizes = [2, 32], strides = [1, 1]} : vector<2x64xf32> to vector<2x32xf32>
    %725 = arith.mulf %724, %714 : vector<2x32xf32>
    %726 = vector.extract_strided_slice %723 {offsets = [0, 32], sizes = [2, 32], strides = [1, 1]} : vector<2x64xf32> to vector<2x32xf32>
    %727 = arith.mulf %726, %711 : vector<2x32xf32>
    %728 = arith.addf %725, %727 : vector<2x32xf32>
    %729 = tpu.concatenate %716, %641 in 1 : vector<2x32xf32>, vector<2x32xf32> -> vector<2x64xf32>
    %c0_302 = arith.constant 0 : index
    %c1_303 = arith.constant 1 : index
    %c0_304 = arith.constant 0 : index
    %c0_305 = arith.constant 0 : index
    %730 = vector.load %arg1[%c0_302, %c1_303, %c0_304, %c0_305] : memref<2x2x64x128xf32, #tpu.memory_space<vmem>>, vector<1x1x64x128xf32>
    %731 = vector.shape_cast %730 : vector<1x1x64x128xf32> to vector<64x128xf32>
    %cst_306 = arith.constant dense<0.000000e+00> : vector<2x128xf32>
    %732 = tpu.matmul %729, %731, %cst_306 {dimension_numbers = #tpu.dot_dimension_numbers<[1], [0], [0], [1], [0, 0, 1, 1], [], []>} : vector<2x64xf32>, vector<64x128xf32>, vector<2x128xf32> -> vector<2x128xf32>
    %733 = arith.addf %732, %7 : vector<2x128xf32>
    %734 = vector.extract_strided_slice %733 {offsets = [0, 0], sizes = [2, 96], strides = [1, 1]} : vector<2x128xf32> to vector<2x96xf32>
    %cst_307 = arith.constant 5.000000e-01 : f32
    %735 = vector.broadcast %cst_307 : f32 to vector<2x96xf32>
    %736 = arith.mulf %735, %734 : vector<2x96xf32>
    %737 = math.tanh %736 : vector<2x96xf32>
    %cst_308 = arith.constant 1.000000e+00 : f32
    %738 = vector.broadcast %cst_308 : f32 to vector<2x96xf32>
    %739 = arith.addf %737, %738 : vector<2x96xf32>
    %cst_309 = arith.constant 5.000000e-01 : f32
    %740 = vector.broadcast %cst_309 : f32 to vector<2x96xf32>
    %741 = arith.mulf %740, %739 : vector<2x96xf32>
    %742 = vector.extract_strided_slice %741 {offsets = [0, 0], sizes = [2, 32], strides = [1, 1]} : vector<2x96xf32> to vector<2x32xf32>
    %743 = vector.extract_strided_slice %741 {offsets = [0, 32], sizes = [2, 32], strides = [1, 1]} : vector<2x96xf32> to vector<2x32xf32>
    %744 = vector.extract_strided_slice %741 {offsets = [0, 64], sizes = [2, 32], strides = [1, 1]} : vector<2x96xf32> to vector<2x32xf32>
    %745 = vector.extract_strided_slice %733 {offsets = [0, 96], sizes = [2, 32], strides = [1, 1]} : vector<2x128xf32> to vector<2x32xf32>
    %746 = math.tanh %745 : vector<2x32xf32>
    %747 = arith.mulf %743, %653 : vector<2x32xf32>
    %748 = arith.mulf %742, %746 : vector<2x32xf32>
    %749 = arith.addf %747, %748 : vector<2x32xf32>
    %750 = math.tanh %749 : vector<2x32xf32>
    %751 = arith.mulf %744, %750 : vector<2x32xf32>
    %c0_310 = arith.constant 0 : index
    %c1_311 = arith.constant 1 : index
    %c0_312 = arith.constant 0 : index
    %c0_313 = arith.constant 0 : index
    %752 = vector.load %arg3[%c0_310, %c1_311, %c0_312, %c0_313] : memref<2x2x32x64xf32, #tpu.memory_space<vmem>>, vector<1x1x32x64xf32>
    %753 = vector.shape_cast %752 : vector<1x1x32x64xf32> to vector<32x64xf32>
    %cst_314 = arith.constant dense<0.000000e+00> : vector<2x64xf32>
    %754 = tpu.matmul %751, %753, %cst_314 {dimension_numbers = #tpu.dot_dimension_numbers<[1], [0], [0], [1], [0, 0, 1, 1], [], []>} : vector<2x32xf32>, vector<32x64xf32>, vector<2x64xf32> -> vector<2x64xf32>
    %755 = arith.addf %754, %15 : vector<2x64xf32>
    %cst_315 = arith.constant 2.000000e+01 : f32
    %756 = vector.broadcast %cst_315 : f32 to vector<2x64xf32>
    %757 = arith.minimumf %755, %756 : vector<2x64xf32>
    %758 = math.exp %757 : vector<2x64xf32>
    %759 = vector.extract_strided_slice %758 {offsets = [0, 0], sizes = [2, 32], strides = [1, 1]} : vector<2x64xf32> to vector<2x32xf32>
    %760 = arith.mulf %759, %749 : vector<2x32xf32>
    %761 = vector.extract_strided_slice %758 {offsets = [0, 32], sizes = [2, 32], strides = [1, 1]} : vector<2x64xf32> to vector<2x32xf32>
    %762 = arith.mulf %761, %746 : vector<2x32xf32>
    %763 = arith.addf %760, %762 : vector<2x32xf32>
    %c0_316 = arith.constant 0 : index
    %c0_317 = arith.constant 0 : index
    %c0_318 = arith.constant 0 : index
    %764 = vector.load %arg5[%c0_316, %c0_317, %c0_318] : memref<2x32x32xf32, #tpu.memory_space<vmem>>, vector<1x32x32xf32>
    %765 = vector.shape_cast %764 : vector<1x32x32xf32> to vector<32x32xf32>
    %cst_319 = arith.constant dense<0.000000e+00> : vector<2x32xf32>
    %766 = tpu.matmul %751, %765, %cst_319 {dimension_numbers = #tpu.dot_dimension_numbers<[1], [0], [0], [1], [0, 0, 1, 1], [], []>} : vector<2x32xf32>, vector<32x32xf32>, vector<2x32xf32> -> vector<2x32xf32>
    %767 = arith.addf %766, %19 : vector<2x32xf32>
    %cst_320 = arith.constant 5.000000e-01 : f32
    %768 = vector.broadcast %cst_320 : f32 to vector<2x32xf32>
    %769 = arith.mulf %768, %767 : vector<2x32xf32>
    %cst_321 = arith.constant 4.471500e-02 : f32
    %770 = vector.broadcast %cst_321 : f32 to vector<2x32xf32>
    %771 = arith.mulf %770, %767 : vector<2x32xf32>
    %772 = arith.mulf %771, %767 : vector<2x32xf32>
    %773 = arith.mulf %772, %767 : vector<2x32xf32>
    %774 = arith.addf %767, %773 : vector<2x32xf32>
    %cst_322 = arith.constant 0.797884583 : f32
    %775 = vector.broadcast %cst_322 : f32 to vector<2x32xf32>
    %776 = arith.mulf %775, %774 : vector<2x32xf32>
    %777 = math.tanh %776 : vector<2x32xf32>
    %cst_323 = arith.constant 1.000000e+00 : f32
    %778 = vector.broadcast %cst_323 : f32 to vector<2x32xf32>
    %779 = arith.addf %778, %777 : vector<2x32xf32>
    %780 = arith.mulf %769, %779 : vector<2x32xf32>
    %781 = arith.addf %780, %693 : vector<2x32xf32>
    %cst_324 = arith.constant dense<0.000000e+00> : vector<2xf32>
    %782 = vector.multi_reduction <add>, %781, %cst_324 [1] : vector<2x32xf32> to vector<2xf32>
    %783 = vector.shape_cast %782 : vector<2xf32> to vector<2x1xf32>
    %cst_325 = arith.constant 3.200000e+01 : f32
    %784 = vector.broadcast %cst_325 : f32 to vector<2x1xf32>
    %785 = arith.divf %783, %784 : vector<2x1xf32>
    %786 = vector.broadcast %785 : vector<2x1xf32> to vector<2x32xf32>
    %787 = arith.subf %781, %786 : vector<2x32xf32>
    %788 = arith.mulf %787, %787 : vector<2x32xf32>
    %cst_326 = arith.constant dense<0.000000e+00> : vector<2xf32>
    %789 = vector.multi_reduction <add>, %788, %cst_326 [1] : vector<2x32xf32> to vector<2xf32>
    %790 = vector.shape_cast %789 : vector<2xf32> to vector<2x1xf32>
    %cst_327 = arith.constant 3.200000e+01 : f32
    %791 = vector.broadcast %cst_327 : f32 to vector<2x1xf32>
    %792 = arith.divf %790, %791 : vector<2x1xf32>
    %793 = vector.broadcast %785 : vector<2x1xf32> to vector<2x32xf32>
    %794 = arith.subf %781, %793 : vector<2x32xf32>
    %cst_328 = arith.constant 9.99999974E-6 : f32
    %795 = vector.broadcast %cst_328 : f32 to vector<2x1xf32>
    %796 = arith.addf %792, %795 : vector<2x1xf32>
    %797 = math.rsqrt %796 : vector<2x1xf32>
    %798 = vector.broadcast %797 : vector<2x1xf32> to vector<2x32xf32>
    %799 = arith.mulf %794, %798 : vector<2x32xf32>
    %800 = arith.mulf %799, %23 : vector<2x32xf32>
    %801 = arith.addf %800, %27 : vector<2x32xf32>
    %c7 = arith.constant 7 : index
    %c0_329 = arith.constant 0 : index
    %c0_330 = arith.constant 0 : index
    %802 = vector.load %arg0[%c7, %c0_329, %c0_330] : memref<8x2x32xf32, #tpu.memory_space<vmem>>, vector<1x2x32xf32>
    %803 = vector.shape_cast %802 : vector<1x2x32xf32> to vector<2x32xf32>
    %804 = tpu.concatenate %803, %716 in 1 : vector<2x32xf32>, vector<2x32xf32> -> vector<2x64xf32>
    %c0_331 = arith.constant 0 : index
    %c0_332 = arith.constant 0 : index
    %c0_333 = arith.constant 0 : index
    %c0_334 = arith.constant 0 : index
    %805 = vector.load %arg1[%c0_331, %c0_332, %c0_333, %c0_334] : memref<2x2x64x128xf32, #tpu.memory_space<vmem>>, vector<1x1x64x128xf32>
    %806 = vector.shape_cast %805 : vector<1x1x64x128xf32> to vector<64x128xf32>
    %cst_335 = arith.constant dense<0.000000e+00> : vector<2x128xf32>
    %807 = tpu.matmul %804, %806, %cst_335 {dimension_numbers = #tpu.dot_dimension_numbers<[1], [0], [0], [1], [0, 0, 1, 1], [], []>} : vector<2x64xf32>, vector<64x128xf32>, vector<2x128xf32> -> vector<2x128xf32>
    %808 = arith.addf %807, %3 : vector<2x128xf32>
    %809 = vector.extract_strided_slice %808 {offsets = [0, 0], sizes = [2, 96], strides = [1, 1]} : vector<2x128xf32> to vector<2x96xf32>
    %cst_336 = arith.constant 5.000000e-01 : f32
    %810 = vector.broadcast %cst_336 : f32 to vector<2x96xf32>
    %811 = arith.mulf %810, %809 : vector<2x96xf32>
    %812 = math.tanh %811 : vector<2x96xf32>
    %cst_337 = arith.constant 1.000000e+00 : f32
    %813 = vector.broadcast %cst_337 : f32 to vector<2x96xf32>
    %814 = arith.addf %812, %813 : vector<2x96xf32>
    %cst_338 = arith.constant 5.000000e-01 : f32
    %815 = vector.broadcast %cst_338 : f32 to vector<2x96xf32>
    %816 = arith.mulf %815, %814 : vector<2x96xf32>
    %817 = vector.extract_strided_slice %816 {offsets = [0, 0], sizes = [2, 32], strides = [1, 1]} : vector<2x96xf32> to vector<2x32xf32>
    %818 = vector.extract_strided_slice %816 {offsets = [0, 32], sizes = [2, 32], strides = [1, 1]} : vector<2x96xf32> to vector<2x32xf32>
    %819 = vector.extract_strided_slice %816 {offsets = [0, 64], sizes = [2, 32], strides = [1, 1]} : vector<2x96xf32> to vector<2x32xf32>
    %820 = vector.extract_strided_slice %808 {offsets = [0, 96], sizes = [2, 32], strides = [1, 1]} : vector<2x128xf32> to vector<2x32xf32>
    %821 = math.tanh %820 : vector<2x32xf32>
    %822 = arith.mulf %818, %728 : vector<2x32xf32>
    %823 = arith.mulf %817, %821 : vector<2x32xf32>
    %824 = arith.addf %822, %823 : vector<2x32xf32>
    %825 = math.tanh %824 : vector<2x32xf32>
    %826 = arith.mulf %819, %825 : vector<2x32xf32>
    %c0_339 = arith.constant 0 : index
    %c0_340 = arith.constant 0 : index
    %c0_341 = arith.constant 0 : index
    %c0_342 = arith.constant 0 : index
    %827 = vector.load %arg3[%c0_339, %c0_340, %c0_341, %c0_342] : memref<2x2x32x64xf32, #tpu.memory_space<vmem>>, vector<1x1x32x64xf32>
    %828 = vector.shape_cast %827 : vector<1x1x32x64xf32> to vector<32x64xf32>
    %cst_343 = arith.constant dense<0.000000e+00> : vector<2x64xf32>
    %829 = tpu.matmul %826, %828, %cst_343 {dimension_numbers = #tpu.dot_dimension_numbers<[1], [0], [0], [1], [0, 0, 1, 1], [], []>} : vector<2x32xf32>, vector<32x64xf32>, vector<2x64xf32> -> vector<2x64xf32>
    %830 = arith.addf %829, %11 : vector<2x64xf32>
    %cst_344 = arith.constant 2.000000e+01 : f32
    %831 = vector.broadcast %cst_344 : f32 to vector<2x64xf32>
    %832 = arith.minimumf %830, %831 : vector<2x64xf32>
    %833 = math.exp %832 : vector<2x64xf32>
    %834 = vector.extract_strided_slice %833 {offsets = [0, 0], sizes = [2, 32], strides = [1, 1]} : vector<2x64xf32> to vector<2x32xf32>
    %835 = arith.mulf %834, %824 : vector<2x32xf32>
    %836 = vector.extract_strided_slice %833 {offsets = [0, 32], sizes = [2, 32], strides = [1, 1]} : vector<2x64xf32> to vector<2x32xf32>
    %837 = arith.mulf %836, %821 : vector<2x32xf32>
    %838 = arith.addf %835, %837 : vector<2x32xf32>
    %839 = tpu.concatenate %826, %751 in 1 : vector<2x32xf32>, vector<2x32xf32> -> vector<2x64xf32>
    %c0_345 = arith.constant 0 : index
    %c1_346 = arith.constant 1 : index
    %c0_347 = arith.constant 0 : index
    %c0_348 = arith.constant 0 : index
    %840 = vector.load %arg1[%c0_345, %c1_346, %c0_347, %c0_348] : memref<2x2x64x128xf32, #tpu.memory_space<vmem>>, vector<1x1x64x128xf32>
    %841 = vector.shape_cast %840 : vector<1x1x64x128xf32> to vector<64x128xf32>
    %cst_349 = arith.constant dense<0.000000e+00> : vector<2x128xf32>
    %842 = tpu.matmul %839, %841, %cst_349 {dimension_numbers = #tpu.dot_dimension_numbers<[1], [0], [0], [1], [0, 0, 1, 1], [], []>} : vector<2x64xf32>, vector<64x128xf32>, vector<2x128xf32> -> vector<2x128xf32>
    %843 = arith.addf %842, %7 : vector<2x128xf32>
    %844 = vector.extract_strided_slice %843 {offsets = [0, 0], sizes = [2, 96], strides = [1, 1]} : vector<2x128xf32> to vector<2x96xf32>
    %cst_350 = arith.constant 5.000000e-01 : f32
    %845 = vector.broadcast %cst_350 : f32 to vector<2x96xf32>
    %846 = arith.mulf %845, %844 : vector<2x96xf32>
    %847 = math.tanh %846 : vector<2x96xf32>
    %cst_351 = arith.constant 1.000000e+00 : f32
    %848 = vector.broadcast %cst_351 : f32 to vector<2x96xf32>
    %849 = arith.addf %847, %848 : vector<2x96xf32>
    %cst_352 = arith.constant 5.000000e-01 : f32
    %850 = vector.broadcast %cst_352 : f32 to vector<2x96xf32>
    %851 = arith.mulf %850, %849 : vector<2x96xf32>
    %852 = vector.extract_strided_slice %851 {offsets = [0, 0], sizes = [2, 32], strides = [1, 1]} : vector<2x96xf32> to vector<2x32xf32>
    %853 = vector.extract_strided_slice %851 {offsets = [0, 32], sizes = [2, 32], strides = [1, 1]} : vector<2x96xf32> to vector<2x32xf32>
    %854 = vector.extract_strided_slice %851 {offsets = [0, 64], sizes = [2, 32], strides = [1, 1]} : vector<2x96xf32> to vector<2x32xf32>
    %855 = vector.extract_strided_slice %843 {offsets = [0, 96], sizes = [2, 32], strides = [1, 1]} : vector<2x128xf32> to vector<2x32xf32>
    %856 = math.tanh %855 : vector<2x32xf32>
    %857 = arith.mulf %853, %763 : vector<2x32xf32>
    %858 = arith.mulf %852, %856 : vector<2x32xf32>
    %859 = arith.addf %857, %858 : vector<2x32xf32>
    %860 = math.tanh %859 : vector<2x32xf32>
    %861 = arith.mulf %854, %860 : vector<2x32xf32>
    %c0_353 = arith.constant 0 : index
    %c1_354 = arith.constant 1 : index
    %c0_355 = arith.constant 0 : index
    %c0_356 = arith.constant 0 : index
    %862 = vector.load %arg3[%c0_353, %c1_354, %c0_355, %c0_356] : memref<2x2x32x64xf32, #tpu.memory_space<vmem>>, vector<1x1x32x64xf32>
    %863 = vector.shape_cast %862 : vector<1x1x32x64xf32> to vector<32x64xf32>
    %cst_357 = arith.constant dense<0.000000e+00> : vector<2x64xf32>
    %864 = tpu.matmul %861, %863, %cst_357 {dimension_numbers = #tpu.dot_dimension_numbers<[1], [0], [0], [1], [0, 0, 1, 1], [], []>} : vector<2x32xf32>, vector<32x64xf32>, vector<2x64xf32> -> vector<2x64xf32>
    %865 = arith.addf %864, %15 : vector<2x64xf32>
    %cst_358 = arith.constant 2.000000e+01 : f32
    %866 = vector.broadcast %cst_358 : f32 to vector<2x64xf32>
    %867 = arith.minimumf %865, %866 : vector<2x64xf32>
    %868 = math.exp %867 : vector<2x64xf32>
    %869 = vector.extract_strided_slice %868 {offsets = [0, 0], sizes = [2, 32], strides = [1, 1]} : vector<2x64xf32> to vector<2x32xf32>
    %870 = arith.mulf %869, %859 : vector<2x32xf32>
    %871 = vector.extract_strided_slice %868 {offsets = [0, 32], sizes = [2, 32], strides = [1, 1]} : vector<2x64xf32> to vector<2x32xf32>
    %872 = arith.mulf %871, %856 : vector<2x32xf32>
    %873 = arith.addf %870, %872 : vector<2x32xf32>
    %c0_359 = arith.constant 0 : index
    %c0_360 = arith.constant 0 : index
    %c0_361 = arith.constant 0 : index
    %874 = vector.load %arg5[%c0_359, %c0_360, %c0_361] : memref<2x32x32xf32, #tpu.memory_space<vmem>>, vector<1x32x32xf32>
    %875 = vector.shape_cast %874 : vector<1x32x32xf32> to vector<32x32xf32>
    %cst_362 = arith.constant dense<0.000000e+00> : vector<2x32xf32>
    %876 = tpu.matmul %861, %875, %cst_362 {dimension_numbers = #tpu.dot_dimension_numbers<[1], [0], [0], [1], [0, 0, 1, 1], [], []>} : vector<2x32xf32>, vector<32x32xf32>, vector<2x32xf32> -> vector<2x32xf32>
    %877 = arith.addf %876, %19 : vector<2x32xf32>
    %cst_363 = arith.constant 5.000000e-01 : f32
    %878 = vector.broadcast %cst_363 : f32 to vector<2x32xf32>
    %879 = arith.mulf %878, %877 : vector<2x32xf32>
    %cst_364 = arith.constant 4.471500e-02 : f32
    %880 = vector.broadcast %cst_364 : f32 to vector<2x32xf32>
    %881 = arith.mulf %880, %877 : vector<2x32xf32>
    %882 = arith.mulf %881, %877 : vector<2x32xf32>
    %883 = arith.mulf %882, %877 : vector<2x32xf32>
    %884 = arith.addf %877, %883 : vector<2x32xf32>
    %cst_365 = arith.constant 0.797884583 : f32
    %885 = vector.broadcast %cst_365 : f32 to vector<2x32xf32>
    %886 = arith.mulf %885, %884 : vector<2x32xf32>
    %887 = math.tanh %886 : vector<2x32xf32>
    %cst_366 = arith.constant 1.000000e+00 : f32
    %888 = vector.broadcast %cst_366 : f32 to vector<2x32xf32>
    %889 = arith.addf %888, %887 : vector<2x32xf32>
    %890 = arith.mulf %879, %889 : vector<2x32xf32>
    %891 = arith.addf %890, %803 : vector<2x32xf32>
    %cst_367 = arith.constant dense<0.000000e+00> : vector<2xf32>
    %892 = vector.multi_reduction <add>, %891, %cst_367 [1] : vector<2x32xf32> to vector<2xf32>
    %893 = vector.shape_cast %892 : vector<2xf32> to vector<2x1xf32>
    %cst_368 = arith.constant 3.200000e+01 : f32
    %894 = vector.broadcast %cst_368 : f32 to vector<2x1xf32>
    %895 = arith.divf %893, %894 : vector<2x1xf32>
    %896 = vector.broadcast %895 : vector<2x1xf32> to vector<2x32xf32>
    %897 = arith.subf %891, %896 : vector<2x32xf32>
    %898 = arith.mulf %897, %897 : vector<2x32xf32>
    %cst_369 = arith.constant dense<0.000000e+00> : vector<2xf32>
    %899 = vector.multi_reduction <add>, %898, %cst_369 [1] : vector<2x32xf32> to vector<2xf32>
    %900 = vector.shape_cast %899 : vector<2xf32> to vector<2x1xf32>
    %cst_370 = arith.constant 3.200000e+01 : f32
    %901 = vector.broadcast %cst_370 : f32 to vector<2x1xf32>
    %902 = arith.divf %900, %901 : vector<2x1xf32>
    %903 = vector.broadcast %895 : vector<2x1xf32> to vector<2x32xf32>
    %904 = arith.subf %891, %903 : vector<2x32xf32>
    %cst_371 = arith.constant 9.99999974E-6 : f32
    %905 = vector.broadcast %cst_371 : f32 to vector<2x1xf32>
    %906 = arith.addf %902, %905 : vector<2x1xf32>
    %907 = math.rsqrt %906 : vector<2x1xf32>
    %908 = vector.broadcast %907 : vector<2x1xf32> to vector<2x32xf32>
    %909 = arith.mulf %904, %908 : vector<2x32xf32>
    %910 = arith.mulf %909, %23 : vector<2x32xf32>
    %911 = arith.addf %910, %27 : vector<2x32xf32>
    %c0_372 = arith.constant 0 : index
    %c0_373 = arith.constant 0 : index
    %c0_374 = arith.constant 0 : index
    %c0_375 = arith.constant 0 : index
    %912 = vector.load %arg12[%c0_372, %c0_373, %c0_374, %c0_375] : memref<2x2x2x32xf32, #tpu.memory_space<vmem>>, vector<1x1x2x32xf32>
    %913 = vector.shape_cast %912 : vector<1x1x2x32xf32> to vector<2x32xf32>
    %914 = vector.shape_cast %826 : vector<2x32xf32> to vector<1x1x2x32xf32>
    tpu.vector_store %arg12[%c0_372, %c0_373, %c0_374, %c0_375], %914 {strides = array<i32>} : memref<2x2x2x32xf32, #tpu.memory_space<vmem>>, vector<1x1x2x32xf32>,
    %c0_376 = arith.constant 0 : index
    %c0_377 = arith.constant 0 : index
    %c0_378 = arith.constant 0 : index
    %c0_379 = arith.constant 0 : index
    %915 = vector.load %arg13[%c0_376, %c0_377, %c0_378, %c0_379] : memref<2x2x2x32xf32, #tpu.memory_space<vmem>>, vector<1x1x2x32xf32>
    %916 = vector.shape_cast %915 : vector<1x1x2x32xf32> to vector<2x32xf32>
    %917 = vector.shape_cast %838 : vector<2x32xf32> to vector<1x1x2x32xf32>
    tpu.vector_store %arg13[%c0_376, %c0_377, %c0_378, %c0_379], %917 {strides = array<i32>} : memref<2x2x2x32xf32, #tpu.memory_space<vmem>>, vector<1x1x2x32xf32>,
    %c0_380 = arith.constant 0 : index
    %c1_381 = arith.constant 1 : index
    %c0_382 = arith.constant 0 : index
    %c0_383 = arith.constant 0 : index
    %918 = vector.load %arg12[%c0_380, %c1_381, %c0_382, %c0_383] : memref<2x2x2x32xf32, #tpu.memory_space<vmem>>, vector<1x1x2x32xf32>
    %919 = vector.shape_cast %918 : vector<1x1x2x32xf32> to vector<2x32xf32>
    %920 = vector.shape_cast %861 : vector<2x32xf32> to vector<1x1x2x32xf32>
    tpu.vector_store %arg12[%c0_380, %c1_381, %c0_382, %c0_383], %920 {strides = array<i32>} : memref<2x2x2x32xf32, #tpu.memory_space<vmem>>, vector<1x1x2x32xf32>,
    %c0_384 = arith.constant 0 : index
    %c1_385 = arith.constant 1 : index
    %c0_386 = arith.constant 0 : index
    %c0_387 = arith.constant 0 : index
    %921 = vector.load %arg13[%c0_384, %c1_385, %c0_386, %c0_387] : memref<2x2x2x32xf32, #tpu.memory_space<vmem>>, vector<1x1x2x32xf32>
    %922 = vector.shape_cast %921 : vector<1x1x2x32xf32> to vector<2x32xf32>
    %923 = vector.shape_cast %873 : vector<2x32xf32> to vector<1x1x2x32xf32>
    tpu.vector_store %arg13[%c0_384, %c1_385, %c0_386, %c0_387], %923 {strides = array<i32>} : memref<2x2x2x32xf32, #tpu.memory_space<vmem>>, vector<1x1x2x32xf32>,
    %c1_388 = arith.constant 1 : index
    %c0_389 = arith.constant 0 : index
    %c0_390 = arith.constant 0 : index
    %c0_391 = arith.constant 0 : index
    %924 = vector.load %arg2[%c1_388, %c0_389, %c0_390, %c0_391] : memref<2x2x1x128xf32, #tpu.memory_space<vmem>>, vector<1x1x1x128xf32>
    %925 = vector.shape_cast %924 : vector<1x1x1x128xf32> to vector<1x128xf32>
    %926 = vector.shape_cast %925 : vector<1x128xf32> to vector<1x128xf32>
    %927 = vector.broadcast %926 : vector<1x128xf32> to vector<2x128xf32>
    %c1_392 = arith.constant 1 : index
    %c1_393 = arith.constant 1 : index
    %c0_394 = arith.constant 0 : index
    %c0_395 = arith.constant 0 : index
    %928 = vector.load %arg2[%c1_392, %c1_393, %c0_394, %c0_395] : memref<2x2x1x128xf32, #tpu.memory_space<vmem>>, vector<1x1x1x128xf32>
    %929 = vector.shape_cast %928 : vector<1x1x1x128xf32> to vector<1x128xf32>
    %930 = vector.shape_cast %929 : vector<1x128xf32> to vector<1x128xf32>
    %931 = vector.broadcast %930 : vector<1x128xf32> to vector<2x128xf32>
    %c1_396 = arith.constant 1 : index
    %c0_397 = arith.constant 0 : index
    %c0_398 = arith.constant 0 : index
    %c0_399 = arith.constant 0 : index
    %932 = vector.load %arg4[%c1_396, %c0_397, %c0_398, %c0_399] : memref<2x2x1x64xf32, #tpu.memory_space<vmem>>, vector<1x1x1x64xf32>
    %933 = vector.shape_cast %932 : vector<1x1x1x64xf32> to vector<1x64xf32>
    %934 = vector.shape_cast %933 : vector<1x64xf32> to vector<1x64xf32>
    %935 = vector.broadcast %934 : vector<1x64xf32> to vector<2x64xf32>
    %c1_400 = arith.constant 1 : index
    %c1_401 = arith.constant 1 : index
    %c0_402 = arith.constant 0 : index
    %c0_403 = arith.constant 0 : index
    %936 = vector.load %arg4[%c1_400, %c1_401, %c0_402, %c0_403] : memref<2x2x1x64xf32, #tpu.memory_space<vmem>>, vector<1x1x1x64xf32>
    %937 = vector.shape_cast %936 : vector<1x1x1x64xf32> to vector<1x64xf32>
    %938 = vector.shape_cast %937 : vector<1x64xf32> to vector<1x64xf32>
    %939 = vector.broadcast %938 : vector<1x64xf32> to vector<2x64xf32>
    %c1_404 = arith.constant 1 : index
    %c0_405 = arith.constant 0 : index
    %c0_406 = arith.constant 0 : index
    %940 = vector.load %arg6[%c1_404, %c0_405, %c0_406] : memref<2x1x32xf32, #tpu.memory_space<vmem>>, vector<1x1x32xf32>
    %941 = vector.shape_cast %940 : vector<1x1x32xf32> to vector<1x32xf32>
    %942 = vector.shape_cast %941 : vector<1x32xf32> to vector<1x32xf32>
    %943 = vector.broadcast %942 : vector<1x32xf32> to vector<2x32xf32>
    %c1_407 = arith.constant 1 : index
    %c0_408 = arith.constant 0 : index
    %c0_409 = arith.constant 0 : index
    %944 = vector.load %arg7[%c1_407, %c0_408, %c0_409] : memref<2x1x32xf32, #tpu.memory_space<vmem>>, vector<1x1x32xf32>
    %945 = vector.shape_cast %944 : vector<1x1x32xf32> to vector<1x32xf32>
    %946 = vector.shape_cast %945 : vector<1x32xf32> to vector<1x32xf32>
    %947 = vector.broadcast %946 : vector<1x32xf32> to vector<2x32xf32>
    %c1_410 = arith.constant 1 : index
    %c0_411 = arith.constant 0 : index
    %c0_412 = arith.constant 0 : index
    %948 = vector.load %arg8[%c1_410, %c0_411, %c0_412] : memref<2x1x32xf32, #tpu.memory_space<vmem>>, vector<1x1x32xf32>
    %949 = vector.shape_cast %948 : vector<1x1x32xf32> to vector<1x32xf32>
    %950 = vector.shape_cast %949 : vector<1x32xf32> to vector<1x32xf32>
    %951 = vector.broadcast %950 : vector<1x32xf32> to vector<2x32xf32>
    %cst_413 = arith.constant 0.000000e+00 : f32
    %952 = vector.broadcast %cst_413 : f32 to vector<2x32xf32>
    %cst_414 = arith.constant 0.000000e+00 : f32
    %953 = vector.broadcast %cst_414 : f32 to vector<2x32xf32>
    %cst_415 = arith.constant 0.000000e+00 : f32
    %954 = vector.broadcast %cst_415 : f32 to vector<2x32xf32>
    %cst_416 = arith.constant 0.000000e+00 : f32
    %955 = vector.broadcast %cst_416 : f32 to vector<2x32xf32>
    %956 = tpu.concatenate %141, %952 in 1 : vector<2x32xf32>, vector<2x32xf32> -> vector<2x64xf32>
    %c1_417 = arith.constant 1 : index
    %c0_418 = arith.constant 0 : index
    %c0_419 = arith.constant 0 : index
    %c0_420 = arith.constant 0 : index
    %957 = vector.load %arg1[%c1_417, %c0_418, %c0_419, %c0_420] : memref<2x2x64x128xf32, #tpu.memory_space<vmem>>, vector<1x1x64x128xf32>
    %958 = vector.shape_cast %957 : vector<1x1x64x128xf32> to vector<64x128xf32>
    %cst_421 = arith.constant dense<0.000000e+00> : vector<2x128xf32>
    %959 = tpu.matmul %956, %958, %cst_421 {dimension_numbers = #tpu.dot_dimension_numbers<[1], [0], [0], [1], [0, 0, 1, 1], [], []>} : vector<2x64xf32>, vector<64x128xf32>, vector<2x128xf32> -> vector<2x128xf32>
    %960 = arith.addf %959, %927 : vector<2x128xf32>
    %961 = vector.extract_strided_slice %960 {offsets = [0, 0], sizes = [2, 96], strides = [1, 1]} : vector<2x128xf32> to vector<2x96xf32>
    %cst_422 = arith.constant 5.000000e-01 : f32
    %962 = vector.broadcast %cst_422 : f32 to vector<2x96xf32>
    %963 = arith.mulf %962, %961 : vector<2x96xf32>
    %964 = math.tanh %963 : vector<2x96xf32>
    %cst_423 = arith.constant 1.000000e+00 : f32
    %965 = vector.broadcast %cst_423 : f32 to vector<2x96xf32>
    %966 = arith.addf %964, %965 : vector<2x96xf32>
    %cst_424 = arith.constant 5.000000e-01 : f32
    %967 = vector.broadcast %cst_424 : f32 to vector<2x96xf32>
    %968 = arith.mulf %967, %966 : vector<2x96xf32>
    %969 = vector.extract_strided_slice %968 {offsets = [0, 0], sizes = [2, 32], strides = [1, 1]} : vector<2x96xf32> to vector<2x32xf32>
    %970 = vector.extract_strided_slice %968 {offsets = [0, 32], sizes = [2, 32], strides = [1, 1]} : vector<2x96xf32> to vector<2x32xf32>
    %971 = vector.extract_strided_slice %968 {offsets = [0, 64], sizes = [2, 32], strides = [1, 1]} : vector<2x96xf32> to vector<2x32xf32>
    %972 = vector.extract_strided_slice %960 {offsets = [0, 96], sizes = [2, 32], strides = [1, 1]} : vector<2x128xf32> to vector<2x32xf32>
    %973 = math.tanh %972 : vector<2x32xf32>
    %974 = arith.mulf %970, %954 : vector<2x32xf32>
    %975 = arith.mulf %969, %973 : vector<2x32xf32>
    %976 = arith.addf %974, %975 : vector<2x32xf32>
    %977 = math.tanh %976 : vector<2x32xf32>
    %978 = arith.mulf %971, %977 : vector<2x32xf32>
    %c1_425 = arith.constant 1 : index
    %c0_426 = arith.constant 0 : index
    %c0_427 = arith.constant 0 : index
    %c0_428 = arith.constant 0 : index
    %979 = vector.load %arg3[%c1_425, %c0_426, %c0_427, %c0_428] : memref<2x2x32x64xf32, #tpu.memory_space<vmem>>, vector<1x1x32x64xf32>
    %980 = vector.shape_cast %979 : vector<1x1x32x64xf32> to vector<32x64xf32>
    %cst_429 = arith.constant dense<0.000000e+00> : vector<2x64xf32>
    %981 = tpu.matmul %978, %980, %cst_429 {dimension_numbers = #tpu.dot_dimension_numbers<[1], [0], [0], [1], [0, 0, 1, 1], [], []>} : vector<2x32xf32>, vector<32x64xf32>, vector<2x64xf32> -> vector<2x64xf32>
    %982 = arith.addf %981, %935 : vector<2x64xf32>
    %cst_430 = arith.constant 2.000000e+01 : f32
    %983 = vector.broadcast %cst_430 : f32 to vector<2x64xf32>
    %984 = arith.minimumf %982, %983 : vector<2x64xf32>
    %985 = math.exp %984 : vector<2x64xf32>
    %986 = vector.extract_strided_slice %985 {offsets = [0, 0], sizes = [2, 32], strides = [1, 1]} : vector<2x64xf32> to vector<2x32xf32>
    %987 = arith.mulf %986, %976 : vector<2x32xf32>
    %988 = vector.extract_strided_slice %985 {offsets = [0, 32], sizes = [2, 32], strides = [1, 1]} : vector<2x64xf32> to vector<2x32xf32>
    %989 = arith.mulf %988, %973 : vector<2x32xf32>
    %990 = arith.addf %987, %989 : vector<2x32xf32>
    %991 = tpu.concatenate %978, %953 in 1 : vector<2x32xf32>, vector<2x32xf32> -> vector<2x64xf32>
    %c1_431 = arith.constant 1 : index
    %c1_432 = arith.constant 1 : index
    %c0_433 = arith.constant 0 : index
    %c0_434 = arith.constant 0 : index
    %992 = vector.load %arg1[%c1_431, %c1_432, %c0_433, %c0_434] : memref<2x2x64x128xf32, #tpu.memory_space<vmem>>, vector<1x1x64x128xf32>
    %993 = vector.shape_cast %992 : vector<1x1x64x128xf32> to vector<64x128xf32>
    %cst_435 = arith.constant dense<0.000000e+00> : vector<2x128xf32>
    %994 = tpu.matmul %991, %993, %cst_435 {dimension_numbers = #tpu.dot_dimension_numbers<[1], [0], [0], [1], [0, 0, 1, 1], [], []>} : vector<2x64xf32>, vector<64x128xf32>, vector<2x128xf32> -> vector<2x128xf32>
    %995 = arith.addf %994, %931 : vector<2x128xf32>
    %996 = vector.extract_strided_slice %995 {offsets = [0, 0], sizes = [2, 96], strides = [1, 1]} : vector<2x128xf32> to vector<2x96xf32>
    %cst_436 = arith.constant 5.000000e-01 : f32
    %997 = vector.broadcast %cst_436 : f32 to vector<2x96xf32>
    %998 = arith.mulf %997, %996 : vector<2x96xf32>
    %999 = math.tanh %998 : vector<2x96xf32>
    %cst_437 = arith.constant 1.000000e+00 : f32
    %1000 = vector.broadcast %cst_437 : f32 to vector<2x96xf32>
    %1001 = arith.addf %999, %1000 : vector<2x96xf32>
    %cst_438 = arith.constant 5.000000e-01 : f32
    %1002 = vector.broadcast %cst_438 : f32 to vector<2x96xf32>
    %1003 = arith.mulf %1002, %1001 : vector<2x96xf32>
    %1004 = vector.extract_strided_slice %1003 {offsets = [0, 0], sizes = [2, 32], strides = [1, 1]} : vector<2x96xf32> to vector<2x32xf32>
    %1005 = vector.extract_strided_slice %1003 {offsets = [0, 32], sizes = [2, 32], strides = [1, 1]} : vector<2x96xf32> to vector<2x32xf32>
    %1006 = vector.extract_strided_slice %1003 {offsets = [0, 64], sizes = [2, 32], strides = [1, 1]} : vector<2x96xf32> to vector<2x32xf32>
    %1007 = vector.extract_strided_slice %995 {offsets = [0, 96], sizes = [2, 32], strides = [1, 1]} : vector<2x128xf32> to vector<2x32xf32>
    %1008 = math.tanh %1007 : vector<2x32xf32>
    %1009 = arith.mulf %1005, %955 : vector<2x32xf32>
    %1010 = arith.mulf %1004, %1008 : vector<2x32xf32>
    %1011 = arith.addf %1009, %1010 : vector<2x32xf32>
    %1012 = math.tanh %1011 : vector<2x32xf32>
    %1013 = arith.mulf %1006, %1012 : vector<2x32xf32>
    %c1_439 = arith.constant 1 : index
    %c1_440 = arith.constant 1 : index
    %c0_441 = arith.constant 0 : index
    %c0_442 = arith.constant 0 : index
    %1014 = vector.load %arg3[%c1_439, %c1_440, %c0_441, %c0_442] : memref<2x2x32x64xf32, #tpu.memory_space<vmem>>, vector<1x1x32x64xf32>
    %1015 = vector.shape_cast %1014 : vector<1x1x32x64xf32> to vector<32x64xf32>
    %cst_443 = arith.constant dense<0.000000e+00> : vector<2x64xf32>
    %1016 = tpu.matmul %1013, %1015, %cst_443 {dimension_numbers = #tpu.dot_dimension_numbers<[1], [0], [0], [1], [0, 0, 1, 1], [], []>} : vector<2x32xf32>, vector<32x64xf32>, vector<2x64xf32> -> vector<2x64xf32>
    %1017 = arith.addf %1016, %939 : vector<2x64xf32>
    %cst_444 = arith.constant 2.000000e+01 : f32
    %1018 = vector.broadcast %cst_444 : f32 to vector<2x64xf32>
    %1019 = arith.minimumf %1017, %1018 : vector<2x64xf32>
    %1020 = math.exp %1019 : vector<2x64xf32>
    %1021 = vector.extract_strided_slice %1020 {offsets = [0, 0], sizes = [2, 32], strides = [1, 1]} : vector<2x64xf32> to vector<2x32xf32>
    %1022 = arith.mulf %1021, %1011 : vector<2x32xf32>
    %1023 = vector.extract_strided_slice %1020 {offsets = [0, 32], sizes = [2, 32], strides = [1, 1]} : vector<2x64xf32> to vector<2x32xf32>
    %1024 = arith.mulf %1023, %1008 : vector<2x32xf32>
    %1025 = arith.addf %1022, %1024 : vector<2x32xf32>
    %1026 = tpu.concatenate %251, %978 in 1 : vector<2x32xf32>, vector<2x32xf32> -> vector<2x64xf32>
    %c1_445 = arith.constant 1 : index
    %c0_446 = arith.constant 0 : index
    %c0_447 = arith.constant 0 : index
    %c0_448 = arith.constant 0 : index
    %1027 = vector.load %arg1[%c1_445, %c0_446, %c0_447, %c0_448] : memref<2x2x64x128xf32, #tpu.memory_space<vmem>>, vector<1x1x64x128xf32>
    %1028 = vector.shape_cast %1027 : vector<1x1x64x128xf32> to vector<64x128xf32>
    %cst_449 = arith.constant dense<0.000000e+00> : vector<2x128xf32>
    %1029 = tpu.matmul %1026, %1028, %cst_449 {dimension_numbers = #tpu.dot_dimension_numbers<[1], [0], [0], [1], [0, 0, 1, 1], [], []>} : vector<2x64xf32>, vector<64x128xf32>, vector<2x128xf32> -> vector<2x128xf32>
    %1030 = arith.addf %1029, %927 : vector<2x128xf32>
    %1031 = vector.extract_strided_slice %1030 {offsets = [0, 0], sizes = [2, 96], strides = [1, 1]} : vector<2x128xf32> to vector<2x96xf32>
    %cst_450 = arith.constant 5.000000e-01 : f32
    %1032 = vector.broadcast %cst_450 : f32 to vector<2x96xf32>
    %1033 = arith.mulf %1032, %1031 : vector<2x96xf32>
    %1034 = math.tanh %1033 : vector<2x96xf32>
    %cst_451 = arith.constant 1.000000e+00 : f32
    %1035 = vector.broadcast %cst_451 : f32 to vector<2x96xf32>
    %1036 = arith.addf %1034, %1035 : vector<2x96xf32>
    %cst_452 = arith.constant 5.000000e-01 : f32
    %1037 = vector.broadcast %cst_452 : f32 to vector<2x96xf32>
    %1038 = arith.mulf %1037, %1036 : vector<2x96xf32>
    %1039 = vector.extract_strided_slice %1038 {offsets = [0, 0], sizes = [2, 32], strides = [1, 1]} : vector<2x96xf32> to vector<2x32xf32>
    %1040 = vector.extract_strided_slice %1038 {offsets = [0, 32], sizes = [2, 32], strides = [1, 1]} : vector<2x96xf32> to vector<2x32xf32>
    %1041 = vector.extract_strided_slice %1038 {offsets = [0, 64], sizes = [2, 32], strides = [1, 1]} : vector<2x96xf32> to vector<2x32xf32>
    %1042 = vector.extract_strided_slice %1030 {offsets = [0, 96], sizes = [2, 32], strides = [1, 1]} : vector<2x128xf32> to vector<2x32xf32>
    %1043 = math.tanh %1042 : vector<2x32xf32>
    %1044 = arith.mulf %1040, %990 : vector<2x32xf32>
    %1045 = arith.mulf %1039, %1043 : vector<2x32xf32>
    %1046 = arith.addf %1044, %1045 : vector<2x32xf32>
    %1047 = math.tanh %1046 : vector<2x32xf32>
    %1048 = arith.mulf %1041, %1047 : vector<2x32xf32>
    %c1_453 = arith.constant 1 : index
    %c0_454 = arith.constant 0 : index
    %c0_455 = arith.constant 0 : index
    %c0_456 = arith.constant 0 : index
    %1049 = vector.load %arg3[%c1_453, %c0_454, %c0_455, %c0_456] : memref<2x2x32x64xf32, #tpu.memory_space<vmem>>, vector<1x1x32x64xf32>
    %1050 = vector.shape_cast %1049 : vector<1x1x32x64xf32> to vector<32x64xf32>
    %cst_457 = arith.constant dense<0.000000e+00> : vector<2x64xf32>
    %1051 = tpu.matmul %1048, %1050, %cst_457 {dimension_numbers = #tpu.dot_dimension_numbers<[1], [0], [0], [1], [0, 0, 1, 1], [], []>} : vector<2x32xf32>, vector<32x64xf32>, vector<2x64xf32> -> vector<2x64xf32>
    %1052 = arith.addf %1051, %935 : vector<2x64xf32>
    %cst_458 = arith.constant 2.000000e+01 : f32
    %1053 = vector.broadcast %cst_458 : f32 to vector<2x64xf32>
    %1054 = arith.minimumf %1052, %1053 : vector<2x64xf32>
    %1055 = math.exp %1054 : vector<2x64xf32>
    %1056 = vector.extract_strided_slice %1055 {offsets = [0, 0], sizes = [2, 32], strides = [1, 1]} : vector<2x64xf32> to vector<2x32xf32>
    %1057 = arith.mulf %1056, %1046 : vector<2x32xf32>
    %1058 = vector.extract_strided_slice %1055 {offsets = [0, 32], sizes = [2, 32], strides = [1, 1]} : vector<2x64xf32> to vector<2x32xf32>
    %1059 = arith.mulf %1058, %1043 : vector<2x32xf32>
    %1060 = arith.addf %1057, %1059 : vector<2x32xf32>
    %1061 = tpu.concatenate %1048, %1013 in 1 : vector<2x32xf32>, vector<2x32xf32> -> vector<2x64xf32>
    %c1_459 = arith.constant 1 : index
    %c1_460 = arith.constant 1 : index
    %c0_461 = arith.constant 0 : index
    %c0_462 = arith.constant 0 : index
    %1062 = vector.load %arg1[%c1_459, %c1_460, %c0_461, %c0_462] : memref<2x2x64x128xf32, #tpu.memory_space<vmem>>, vector<1x1x64x128xf32>
    %1063 = vector.shape_cast %1062 : vector<1x1x64x128xf32> to vector<64x128xf32>
    %cst_463 = arith.constant dense<0.000000e+00> : vector<2x128xf32>
    %1064 = tpu.matmul %1061, %1063, %cst_463 {dimension_numbers = #tpu.dot_dimension_numbers<[1], [0], [0], [1], [0, 0, 1, 1], [], []>} : vector<2x64xf32>, vector<64x128xf32>, vector<2x128xf32> -> vector<2x128xf32>
    %1065 = arith.addf %1064, %931 : vector<2x128xf32>
    %1066 = vector.extract_strided_slice %1065 {offsets = [0, 0], sizes = [2, 96], strides = [1, 1]} : vector<2x128xf32> to vector<2x96xf32>
    %cst_464 = arith.constant 5.000000e-01 : f32
    %1067 = vector.broadcast %cst_464 : f32 to vector<2x96xf32>
    %1068 = arith.mulf %1067, %1066 : vector<2x96xf32>
    %1069 = math.tanh %1068 : vector<2x96xf32>
    %cst_465 = arith.constant 1.000000e+00 : f32
    %1070 = vector.broadcast %cst_465 : f32 to vector<2x96xf32>
    %1071 = arith.addf %1069, %1070 : vector<2x96xf32>
    %cst_466 = arith.constant 5.000000e-01 : f32
    %1072 = vector.broadcast %cst_466 : f32 to vector<2x96xf32>
    %1073 = arith.mulf %1072, %1071 : vector<2x96xf32>
    %1074 = vector.extract_strided_slice %1073 {offsets = [0, 0], sizes = [2, 32], strides = [1, 1]} : vector<2x96xf32> to vector<2x32xf32>
    %1075 = vector.extract_strided_slice %1073 {offsets = [0, 32], sizes = [2, 32], strides = [1, 1]} : vector<2x96xf32> to vector<2x32xf32>
    %1076 = vector.extract_strided_slice %1073 {offsets = [0, 64], sizes = [2, 32], strides = [1, 1]} : vector<2x96xf32> to vector<2x32xf32>
    %1077 = vector.extract_strided_slice %1065 {offsets = [0, 96], sizes = [2, 32], strides = [1, 1]} : vector<2x128xf32> to vector<2x32xf32>
    %1078 = math.tanh %1077 : vector<2x32xf32>
    %1079 = arith.mulf %1075, %1025 : vector<2x32xf32>
    %1080 = arith.mulf %1074, %1078 : vector<2x32xf32>
    %1081 = arith.addf %1079, %1080 : vector<2x32xf32>
    %1082 = math.tanh %1081 : vector<2x32xf32>
    %1083 = arith.mulf %1076, %1082 : vector<2x32xf32>
    %c1_467 = arith.constant 1 : index
    %c1_468 = arith.constant 1 : index
    %c0_469 = arith.constant 0 : index
    %c0_470 = arith.constant 0 : index
    %1084 = vector.load %arg3[%c1_467, %c1_468, %c0_469, %c0_470] : memref<2x2x32x64xf32, #tpu.memory_space<vmem>>, vector<1x1x32x64xf32>
    %1085 = vector.shape_cast %1084 : vector<1x1x32x64xf32> to vector<32x64xf32>
    %cst_471 = arith.constant dense<0.000000e+00> : vector<2x64xf32>
    %1086 = tpu.matmul %1083, %1085, %cst_471 {dimension_numbers = #tpu.dot_dimension_numbers<[1], [0], [0], [1], [0, 0, 1, 1], [], []>} : vector<2x32xf32>, vector<32x64xf32>, vector<2x64xf32> -> vector<2x64xf32>
    %1087 = arith.addf %1086, %939 : vector<2x64xf32>
    %cst_472 = arith.constant 2.000000e+01 : f32
    %1088 = vector.broadcast %cst_472 : f32 to vector<2x64xf32>
    %1089 = arith.minimumf %1087, %1088 : vector<2x64xf32>
    %1090 = math.exp %1089 : vector<2x64xf32>
    %1091 = vector.extract_strided_slice %1090 {offsets = [0, 0], sizes = [2, 32], strides = [1, 1]} : vector<2x64xf32> to vector<2x32xf32>
    %1092 = arith.mulf %1091, %1081 : vector<2x32xf32>
    %1093 = vector.extract_strided_slice %1090 {offsets = [0, 32], sizes = [2, 32], strides = [1, 1]} : vector<2x64xf32> to vector<2x32xf32>
    %1094 = arith.mulf %1093, %1078 : vector<2x32xf32>
    %1095 = arith.addf %1092, %1094 : vector<2x32xf32>
    %1096 = tpu.concatenate %361, %1048 in 1 : vector<2x32xf32>, vector<2x32xf32> -> vector<2x64xf32>
    %c1_473 = arith.constant 1 : index
    %c0_474 = arith.constant 0 : index
    %c0_475 = arith.constant 0 : index
    %c0_476 = arith.constant 0 : index
    %1097 = vector.load %arg1[%c1_473, %c0_474, %c0_475, %c0_476] : memref<2x2x64x128xf32, #tpu.memory_space<vmem>>, vector<1x1x64x128xf32>
    %1098 = vector.shape_cast %1097 : vector<1x1x64x128xf32> to vector<64x128xf32>
    %cst_477 = arith.constant dense<0.000000e+00> : vector<2x128xf32>
    %1099 = tpu.matmul %1096, %1098, %cst_477 {dimension_numbers = #tpu.dot_dimension_numbers<[1], [0], [0], [1], [0, 0, 1, 1], [], []>} : vector<2x64xf32>, vector<64x128xf32>, vector<2x128xf32> -> vector<2x128xf32>
    %1100 = arith.addf %1099, %927 : vector<2x128xf32>
    %1101 = vector.extract_strided_slice %1100 {offsets = [0, 0], sizes = [2, 96], strides = [1, 1]} : vector<2x128xf32> to vector<2x96xf32>
    %cst_478 = arith.constant 5.000000e-01 : f32
    %1102 = vector.broadcast %cst_478 : f32 to vector<2x96xf32>
    %1103 = arith.mulf %1102, %1101 : vector<2x96xf32>
    %1104 = math.tanh %1103 : vector<2x96xf32>
    %cst_479 = arith.constant 1.000000e+00 : f32
    %1105 = vector.broadcast %cst_479 : f32 to vector<2x96xf32>
    %1106 = arith.addf %1104, %1105 : vector<2x96xf32>
    %cst_480 = arith.constant 5.000000e-01 : f32
    %1107 = vector.broadcast %cst_480 : f32 to vector<2x96xf32>
    %1108 = arith.mulf %1107, %1106 : vector<2x96xf32>
    %1109 = vector.extract_strided_slice %1108 {offsets = [0, 0], sizes = [2, 32], strides = [1, 1]} : vector<2x96xf32> to vector<2x32xf32>
    %1110 = vector.extract_strided_slice %1108 {offsets = [0, 32], sizes = [2, 32], strides = [1, 1]} : vector<2x96xf32> to vector<2x32xf32>
    %1111 = vector.extract_strided_slice %1108 {offsets = [0, 64], sizes = [2, 32], strides = [1, 1]} : vector<2x96xf32> to vector<2x32xf32>
    %1112 = vector.extract_strided_slice %1100 {offsets = [0, 96], sizes = [2, 32], strides = [1, 1]} : vector<2x128xf32> to vector<2x32xf32>
    %1113 = math.tanh %1112 : vector<2x32xf32>
    %1114 = arith.mulf %1110, %1060 : vector<2x32xf32>
    %1115 = arith.mulf %1109, %1113 : vector<2x32xf32>
    %1116 = arith.addf %1114, %1115 : vector<2x32xf32>
    %1117 = math.tanh %1116 : vector<2x32xf32>
    %1118 = arith.mulf %1111, %1117 : vector<2x32xf32>
    %c1_481 = arith.constant 1 : index
    %c0_482 = arith.constant 0 : index
    %c0_483 = arith.constant 0 : index
    %c0_484 = arith.constant 0 : index
    %1119 = vector.load %arg3[%c1_481, %c0_482, %c0_483, %c0_484] : memref<2x2x32x64xf32, #tpu.memory_space<vmem>>, vector<1x1x32x64xf32>
    %1120 = vector.shape_cast %1119 : vector<1x1x32x64xf32> to vector<32x64xf32>
    %cst_485 = arith.constant dense<0.000000e+00> : vector<2x64xf32>
    %1121 = tpu.matmul %1118, %1120, %cst_485 {dimension_numbers = #tpu.dot_dimension_numbers<[1], [0], [0], [1], [0, 0, 1, 1], [], []>} : vector<2x32xf32>, vector<32x64xf32>, vector<2x64xf32> -> vector<2x64xf32>
    %1122 = arith.addf %1121, %935 : vector<2x64xf32>
    %cst_486 = arith.constant 2.000000e+01 : f32
    %1123 = vector.broadcast %cst_486 : f32 to vector<2x64xf32>
    %1124 = arith.minimumf %1122, %1123 : vector<2x64xf32>
    %1125 = math.exp %1124 : vector<2x64xf32>
    %1126 = vector.extract_strided_slice %1125 {offsets = [0, 0], sizes = [2, 32], strides = [1, 1]} : vector<2x64xf32> to vector<2x32xf32>
    %1127 = arith.mulf %1126, %1116 : vector<2x32xf32>
    %1128 = vector.extract_strided_slice %1125 {offsets = [0, 32], sizes = [2, 32], strides = [1, 1]} : vector<2x64xf32> to vector<2x32xf32>
    %1129 = arith.mulf %1128, %1113 : vector<2x32xf32>
    %1130 = arith.addf %1127, %1129 : vector<2x32xf32>
    %1131 = tpu.concatenate %1118, %1083 in 1 : vector<2x32xf32>, vector<2x32xf32> -> vector<2x64xf32>
    %c1_487 = arith.constant 1 : index
    %c1_488 = arith.constant 1 : index
    %c0_489 = arith.constant 0 : index
    %c0_490 = arith.constant 0 : index
    %1132 = vector.load %arg1[%c1_487, %c1_488, %c0_489, %c0_490] : memref<2x2x64x128xf32, #tpu.memory_space<vmem>>, vector<1x1x64x128xf32>
    %1133 = vector.shape_cast %1132 : vector<1x1x64x128xf32> to vector<64x128xf32>
    %cst_491 = arith.constant dense<0.000000e+00> : vector<2x128xf32>
    %1134 = tpu.matmul %1131, %1133, %cst_491 {dimension_numbers = #tpu.dot_dimension_numbers<[1], [0], [0], [1], [0, 0, 1, 1], [], []>} : vector<2x64xf32>, vector<64x128xf32>, vector<2x128xf32> -> vector<2x128xf32>
    %1135 = arith.addf %1134, %931 : vector<2x128xf32>
    %1136 = vector.extract_strided_slice %1135 {offsets = [0, 0], sizes = [2, 96], strides = [1, 1]} : vector<2x128xf32> to vector<2x96xf32>
    %cst_492 = arith.constant 5.000000e-01 : f32
    %1137 = vector.broadcast %cst_492 : f32 to vector<2x96xf32>
    %1138 = arith.mulf %1137, %1136 : vector<2x96xf32>
    %1139 = math.tanh %1138 : vector<2x96xf32>
    %cst_493 = arith.constant 1.000000e+00 : f32
    %1140 = vector.broadcast %cst_493 : f32 to vector<2x96xf32>
    %1141 = arith.addf %1139, %1140 : vector<2x96xf32>
    %cst_494 = arith.constant 5.000000e-01 : f32
    %1142 = vector.broadcast %cst_494 : f32 to vector<2x96xf32>
    %1143 = arith.mulf %1142, %1141 : vector<2x96xf32>
    %1144 = vector.extract_strided_slice %1143 {offsets = [0, 0], sizes = [2, 32], strides = [1, 1]} : vector<2x96xf32> to vector<2x32xf32>
    %1145 = vector.extract_strided_slice %1143 {offsets = [0, 32], sizes = [2, 32], strides = [1, 1]} : vector<2x96xf32> to vector<2x32xf32>
    %1146 = vector.extract_strided_slice %1143 {offsets = [0, 64], sizes = [2, 32], strides = [1, 1]} : vector<2x96xf32> to vector<2x32xf32>
    %1147 = vector.extract_strided_slice %1135 {offsets = [0, 96], sizes = [2, 32], strides = [1, 1]} : vector<2x128xf32> to vector<2x32xf32>
    %1148 = math.tanh %1147 : vector<2x32xf32>
    %1149 = arith.mulf %1145, %1095 : vector<2x32xf32>
    %1150 = arith.mulf %1144, %1148 : vector<2x32xf32>
    %1151 = arith.addf %1149, %1150 : vector<2x32xf32>
    %1152 = math.tanh %1151 : vector<2x32xf32>
    %1153 = arith.mulf %1146, %1152 : vector<2x32xf32>
    %c1_495 = arith.constant 1 : index
    %c1_496 = arith.constant 1 : index
    %c0_497 = arith.constant 0 : index
    %c0_498 = arith.constant 0 : index
    %1154 = vector.load %arg3[%c1_495, %c1_496, %c0_497, %c0_498] : memref<2x2x32x64xf32, #tpu.memory_space<vmem>>, vector<1x1x32x64xf32>
    %1155 = vector.shape_cast %1154 : vector<1x1x32x64xf32> to vector<32x64xf32>
    %cst_499 = arith.constant dense<0.000000e+00> : vector<2x64xf32>
    %1156 = tpu.matmul %1153, %1155, %cst_499 {dimension_numbers = #tpu.dot_dimension_numbers<[1], [0], [0], [1], [0, 0, 1, 1], [], []>} : vector<2x32xf32>, vector<32x64xf32>, vector<2x64xf32> -> vector<2x64xf32>
    %1157 = arith.addf %1156, %939 : vector<2x64xf32>
    %cst_500 = arith.constant 2.000000e+01 : f32
    %1158 = vector.broadcast %cst_500 : f32 to vector<2x64xf32>
    %1159 = arith.minimumf %1157, %1158 : vector<2x64xf32>
    %1160 = math.exp %1159 : vector<2x64xf32>
    %1161 = vector.extract_strided_slice %1160 {offsets = [0, 0], sizes = [2, 32], strides = [1, 1]} : vector<2x64xf32> to vector<2x32xf32>
    %1162 = arith.mulf %1161, %1151 : vector<2x32xf32>
    %1163 = vector.extract_strided_slice %1160 {offsets = [0, 32], sizes = [2, 32], strides = [1, 1]} : vector<2x64xf32> to vector<2x32xf32>
    %1164 = arith.mulf %1163, %1148 : vector<2x32xf32>
    %1165 = arith.addf %1162, %1164 : vector<2x32xf32>
    %1166 = tpu.concatenate %471, %1118 in 1 : vector<2x32xf32>, vector<2x32xf32> -> vector<2x64xf32>
    %c1_501 = arith.constant 1 : index
    %c0_502 = arith.constant 0 : index
    %c0_503 = arith.constant 0 : index
    %c0_504 = arith.constant 0 : index
    %1167 = vector.load %arg1[%c1_501, %c0_502, %c0_503, %c0_504] : memref<2x2x64x128xf32, #tpu.memory_space<vmem>>, vector<1x1x64x128xf32>
    %1168 = vector.shape_cast %1167 : vector<1x1x64x128xf32> to vector<64x128xf32>
    %cst_505 = arith.constant dense<0.000000e+00> : vector<2x128xf32>
    %1169 = tpu.matmul %1166, %1168, %cst_505 {dimension_numbers = #tpu.dot_dimension_numbers<[1], [0], [0], [1], [0, 0, 1, 1], [], []>} : vector<2x64xf32>, vector<64x128xf32>, vector<2x128xf32> -> vector<2x128xf32>
    %1170 = arith.addf %1169, %927 : vector<2x128xf32>
    %1171 = vector.extract_strided_slice %1170 {offsets = [0, 0], sizes = [2, 96], strides = [1, 1]} : vector<2x128xf32> to vector<2x96xf32>
    %cst_506 = arith.constant 5.000000e-01 : f32
    %1172 = vector.broadcast %cst_506 : f32 to vector<2x96xf32>
    %1173 = arith.mulf %1172, %1171 : vector<2x96xf32>
    %1174 = math.tanh %1173 : vector<2x96xf32>
    %cst_507 = arith.constant 1.000000e+00 : f32
    %1175 = vector.broadcast %cst_507 : f32 to vector<2x96xf32>
    %1176 = arith.addf %1174, %1175 : vector<2x96xf32>
    %cst_508 = arith.constant 5.000000e-01 : f32
    %1177 = vector.broadcast %cst_508 : f32 to vector<2x96xf32>
    %1178 = arith.mulf %1177, %1176 : vector<2x96xf32>
    %1179 = vector.extract_strided_slice %1178 {offsets = [0, 0], sizes = [2, 32], strides = [1, 1]} : vector<2x96xf32> to vector<2x32xf32>
    %1180 = vector.extract_strided_slice %1178 {offsets = [0, 32], sizes = [2, 32], strides = [1, 1]} : vector<2x96xf32> to vector<2x32xf32>
    %1181 = vector.extract_strided_slice %1178 {offsets = [0, 64], sizes = [2, 32], strides = [1, 1]} : vector<2x96xf32> to vector<2x32xf32>
    %1182 = vector.extract_strided_slice %1170 {offsets = [0, 96], sizes = [2, 32], strides = [1, 1]} : vector<2x128xf32> to vector<2x32xf32>
    %1183 = math.tanh %1182 : vector<2x32xf32>
    %1184 = arith.mulf %1180, %1130 : vector<2x32xf32>
    %1185 = arith.mulf %1179, %1183 : vector<2x32xf32>
    %1186 = arith.addf %1184, %1185 : vector<2x32xf32>
    %1187 = math.tanh %1186 : vector<2x32xf32>
    %1188 = arith.mulf %1181, %1187 : vector<2x32xf32>
    %c1_509 = arith.constant 1 : index
    %c0_510 = arith.constant 0 : index
    %c0_511 = arith.constant 0 : index
    %c0_512 = arith.constant 0 : index
    %1189 = vector.load %arg3[%c1_509, %c0_510, %c0_511, %c0_512] : memref<2x2x32x64xf32, #tpu.memory_space<vmem>>, vector<1x1x32x64xf32>
    %1190 = vector.shape_cast %1189 : vector<1x1x32x64xf32> to vector<32x64xf32>
    %cst_513 = arith.constant dense<0.000000e+00> : vector<2x64xf32>
    %1191 = tpu.matmul %1188, %1190, %cst_513 {dimension_numbers = #tpu.dot_dimension_numbers<[1], [0], [0], [1], [0, 0, 1, 1], [], []>} : vector<2x32xf32>, vector<32x64xf32>, vector<2x64xf32> -> vector<2x64xf32>
    %1192 = arith.addf %1191, %935 : vector<2x64xf32>
    %cst_514 = arith.constant 2.000000e+01 : f32
    %1193 = vector.broadcast %cst_514 : f32 to vector<2x64xf32>
    %1194 = arith.minimumf %1192, %1193 : vector<2x64xf32>
    %1195 = math.exp %1194 : vector<2x64xf32>
    %1196 = vector.extract_strided_slice %1195 {offsets = [0, 0], sizes = [2, 32], strides = [1, 1]} : vector<2x64xf32> to vector<2x32xf32>
    %1197 = arith.mulf %1196, %1186 : vector<2x32xf32>
    %1198 = vector.extract_strided_slice %1195 {offsets = [0, 32], sizes = [2, 32], strides = [1, 1]} : vector<2x64xf32> to vector<2x32xf32>
    %1199 = arith.mulf %1198, %1183 : vector<2x32xf32>
    %1200 = arith.addf %1197, %1199 : vector<2x32xf32>
    %1201 = tpu.concatenate %1188, %1153 in 1 : vector<2x32xf32>, vector<2x32xf32> -> vector<2x64xf32>
    %c1_515 = arith.constant 1 : index
    %c1_516 = arith.constant 1 : index
    %c0_517 = arith.constant 0 : index
    %c0_518 = arith.constant 0 : index
    %1202 = vector.load %arg1[%c1_515, %c1_516, %c0_517, %c0_518] : memref<2x2x64x128xf32, #tpu.memory_space<vmem>>, vector<1x1x64x128xf32>
    %1203 = vector.shape_cast %1202 : vector<1x1x64x128xf32> to vector<64x128xf32>
    %cst_519 = arith.constant dense<0.000000e+00> : vector<2x128xf32>
    %1204 = tpu.matmul %1201, %1203, %cst_519 {dimension_numbers = #tpu.dot_dimension_numbers<[1], [0], [0], [1], [0, 0, 1, 1], [], []>} : vector<2x64xf32>, vector<64x128xf32>, vector<2x128xf32> -> vector<2x128xf32>
    %1205 = arith.addf %1204, %931 : vector<2x128xf32>
    %1206 = vector.extract_strided_slice %1205 {offsets = [0, 0], sizes = [2, 96], strides = [1, 1]} : vector<2x128xf32> to vector<2x96xf32>
    %cst_520 = arith.constant 5.000000e-01 : f32
    %1207 = vector.broadcast %cst_520 : f32 to vector<2x96xf32>
    %1208 = arith.mulf %1207, %1206 : vector<2x96xf32>
    %1209 = math.tanh %1208 : vector<2x96xf32>
    %cst_521 = arith.constant 1.000000e+00 : f32
    %1210 = vector.broadcast %cst_521 : f32 to vector<2x96xf32>
    %1211 = arith.addf %1209, %1210 : vector<2x96xf32>
    %cst_522 = arith.constant 5.000000e-01 : f32
    %1212 = vector.broadcast %cst_522 : f32 to vector<2x96xf32>
    %1213 = arith.mulf %1212, %1211 : vector<2x96xf32>
    %1214 = vector.extract_strided_slice %1213 {offsets = [0, 0], sizes = [2, 32], strides = [1, 1]} : vector<2x96xf32> to vector<2x32xf32>
    %1215 = vector.extract_strided_slice %1213 {offsets = [0, 32], sizes = [2, 32], strides = [1, 1]} : vector<2x96xf32> to vector<2x32xf32>
    %1216 = vector.extract_strided_slice %1213 {offsets = [0, 64], sizes = [2, 32], strides = [1, 1]} : vector<2x96xf32> to vector<2x32xf32>
    %1217 = vector.extract_strided_slice %1205 {offsets = [0, 96], sizes = [2, 32], strides = [1, 1]} : vector<2x128xf32> to vector<2x32xf32>
    %1218 = math.tanh %1217 : vector<2x32xf32>
    %1219 = arith.mulf %1215, %1165 : vector<2x32xf32>
    %1220 = arith.mulf %1214, %1218 : vector<2x32xf32>
    %1221 = arith.addf %1219, %1220 : vector<2x32xf32>
    %1222 = math.tanh %1221 : vector<2x32xf32>
    %1223 = arith.mulf %1216, %1222 : vector<2x32xf32>
    %c1_523 = arith.constant 1 : index
    %c1_524 = arith.constant 1 : index
    %c0_525 = arith.constant 0 : index
    %c0_526 = arith.constant 0 : index
    %1224 = vector.load %arg3[%c1_523, %c1_524, %c0_525, %c0_526] : memref<2x2x32x64xf32, #tpu.memory_space<vmem>>, vector<1x1x32x64xf32>
    %1225 = vector.shape_cast %1224 : vector<1x1x32x64xf32> to vector<32x64xf32>
    %cst_527 = arith.constant dense<0.000000e+00> : vector<2x64xf32>
    %1226 = tpu.matmul %1223, %1225, %cst_527 {dimension_numbers = #tpu.dot_dimension_numbers<[1], [0], [0], [1], [0, 0, 1, 1], [], []>} : vector<2x32xf32>, vector<32x64xf32>, vector<2x64xf32> -> vector<2x64xf32>
    %1227 = arith.addf %1226, %939 : vector<2x64xf32>
    %cst_528 = arith.constant 2.000000e+01 : f32
    %1228 = vector.broadcast %cst_528 : f32 to vector<2x64xf32>
    %1229 = arith.minimumf %1227, %1228 : vector<2x64xf32>
    %1230 = math.exp %1229 : vector<2x64xf32>
    %1231 = vector.extract_strided_slice %1230 {offsets = [0, 0], sizes = [2, 32], strides = [1, 1]} : vector<2x64xf32> to vector<2x32xf32>
    %1232 = arith.mulf %1231, %1221 : vector<2x32xf32>
    %1233 = vector.extract_strided_slice %1230 {offsets = [0, 32], sizes = [2, 32], strides = [1, 1]} : vector<2x64xf32> to vector<2x32xf32>
    %1234 = arith.mulf %1233, %1218 : vector<2x32xf32>
    %1235 = arith.addf %1232, %1234 : vector<2x32xf32>
    %1236 = tpu.concatenate %581, %1188 in 1 : vector<2x32xf32>, vector<2x32xf32> -> vector<2x64xf32>
    %c1_529 = arith.constant 1 : index
    %c0_530 = arith.constant 0 : index
    %c0_531 = arith.constant 0 : index
    %c0_532 = arith.constant 0 : index
    %1237 = vector.load %arg1[%c1_529, %c0_530, %c0_531, %c0_532] : memref<2x2x64x128xf32, #tpu.memory_space<vmem>>, vector<1x1x64x128xf32>
    %1238 = vector.shape_cast %1237 : vector<1x1x64x128xf32> to vector<64x128xf32>
    %cst_533 = arith.constant dense<0.000000e+00> : vector<2x128xf32>
    %1239 = tpu.matmul %1236, %1238, %cst_533 {dimension_numbers = #tpu.dot_dimension_numbers<[1], [0], [0], [1], [0, 0, 1, 1], [], []>} : vector<2x64xf32>, vector<64x128xf32>, vector<2x128xf32> -> vector<2x128xf32>
    %1240 = arith.addf %1239, %927 : vector<2x128xf32>
    %1241 = vector.extract_strided_slice %1240 {offsets = [0, 0], sizes = [2, 96], strides = [1, 1]} : vector<2x128xf32> to vector<2x96xf32>
    %cst_534 = arith.constant 5.000000e-01 : f32
    %1242 = vector.broadcast %cst_534 : f32 to vector<2x96xf32>
    %1243 = arith.mulf %1242, %1241 : vector<2x96xf32>
    %1244 = math.tanh %1243 : vector<2x96xf32>
    %cst_535 = arith.constant 1.000000e+00 : f32
    %1245 = vector.broadcast %cst_535 : f32 to vector<2x96xf32>
    %1246 = arith.addf %1244, %1245 : vector<2x96xf32>
    %cst_536 = arith.constant 5.000000e-01 : f32
    %1247 = vector.broadcast %cst_536 : f32 to vector<2x96xf32>
    %1248 = arith.mulf %1247, %1246 : vector<2x96xf32>
    %1249 = vector.extract_strided_slice %1248 {offsets = [0, 0], sizes = [2, 32], strides = [1, 1]} : vector<2x96xf32> to vector<2x32xf32>
    %1250 = vector.extract_strided_slice %1248 {offsets = [0, 32], sizes = [2, 32], strides = [1, 1]} : vector<2x96xf32> to vector<2x32xf32>
    %1251 = vector.extract_strided_slice %1248 {offsets = [0, 64], sizes = [2, 32], strides = [1, 1]} : vector<2x96xf32> to vector<2x32xf32>
    %1252 = vector.extract_strided_slice %1240 {offsets = [0, 96], sizes = [2, 32], strides = [1, 1]} : vector<2x128xf32> to vector<2x32xf32>
    %1253 = math.tanh %1252 : vector<2x32xf32>
    %1254 = arith.mulf %1250, %1200 : vector<2x32xf32>
    %1255 = arith.mulf %1249, %1253 : vector<2x32xf32>
    %1256 = arith.addf %1254, %1255 : vector<2x32xf32>
    %1257 = math.tanh %1256 : vector<2x32xf32>
    %1258 = arith.mulf %1251, %1257 : vector<2x32xf32>
    %c1_537 = arith.constant 1 : index
    %c0_538 = arith.constant 0 : index
    %c0_539 = arith.constant 0 : index
    %c0_540 = arith.constant 0 : index
    %1259 = vector.load %arg3[%c1_537, %c0_538, %c0_539, %c0_540] : memref<2x2x32x64xf32, #tpu.memory_space<vmem>>, vector<1x1x32x64xf32>
    %1260 = vector.shape_cast %1259 : vector<1x1x32x64xf32> to vector<32x64xf32>
    %cst_541 = arith.constant dense<0.000000e+00> : vector<2x64xf32>
    %1261 = tpu.matmul %1258, %1260, %cst_541 {dimension_numbers = #tpu.dot_dimension_numbers<[1], [0], [0], [1], [0, 0, 1, 1], [], []>} : vector<2x32xf32>, vector<32x64xf32>, vector<2x64xf32> -> vector<2x64xf32>
    %1262 = arith.addf %1261, %935 : vector<2x64xf32>
    %cst_542 = arith.constant 2.000000e+01 : f32
    %1263 = vector.broadcast %cst_542 : f32 to vector<2x64xf32>
    %1264 = arith.minimumf %1262, %1263 : vector<2x64xf32>
    %1265 = math.exp %1264 : vector<2x64xf32>
    %1266 = vector.extract_strided_slice %1265 {offsets = [0, 0], sizes = [2, 32], strides = [1, 1]} : vector<2x64xf32> to vector<2x32xf32>
    %1267 = arith.mulf %1266, %1256 : vector<2x32xf32>
    %1268 = vector.extract_strided_slice %1265 {offsets = [0, 32], sizes = [2, 32], strides = [1, 1]} : vector<2x64xf32> to vector<2x32xf32>
    %1269 = arith.mulf %1268, %1253 : vector<2x32xf32>
    %1270 = arith.addf %1267, %1269 : vector<2x32xf32>
    %1271 = tpu.concatenate %1258, %1223 in 1 : vector<2x32xf32>, vector<2x32xf32> -> vector<2x64xf32>
    %c1_543 = arith.constant 1 : index
    %c1_544 = arith.constant 1 : index
    %c0_545 = arith.constant 0 : index
    %c0_546 = arith.constant 0 : index
    %1272 = vector.load %arg1[%c1_543, %c1_544, %c0_545, %c0_546] : memref<2x2x64x128xf32, #tpu.memory_space<vmem>>, vector<1x1x64x128xf32>
    %1273 = vector.shape_cast %1272 : vector<1x1x64x128xf32> to vector<64x128xf32>
    %cst_547 = arith.constant dense<0.000000e+00> : vector<2x128xf32>
    %1274 = tpu.matmul %1271, %1273, %cst_547 {dimension_numbers = #tpu.dot_dimension_numbers<[1], [0], [0], [1], [0, 0, 1, 1], [], []>} : vector<2x64xf32>, vector<64x128xf32>, vector<2x128xf32> -> vector<2x128xf32>
    %1275 = arith.addf %1274, %931 : vector<2x128xf32>
    %1276 = vector.extract_strided_slice %1275 {offsets = [0, 0], sizes = [2, 96], strides = [1, 1]} : vector<2x128xf32> to vector<2x96xf32>
    %cst_548 = arith.constant 5.000000e-01 : f32
    %1277 = vector.broadcast %cst_548 : f32 to vector<2x96xf32>
    %1278 = arith.mulf %1277, %1276 : vector<2x96xf32>
    %1279 = math.tanh %1278 : vector<2x96xf32>
    %cst_549 = arith.constant 1.000000e+00 : f32
    %1280 = vector.broadcast %cst_549 : f32 to vector<2x96xf32>
    %1281 = arith.addf %1279, %1280 : vector<2x96xf32>
    %cst_550 = arith.constant 5.000000e-01 : f32
    %1282 = vector.broadcast %cst_550 : f32 to vector<2x96xf32>
    %1283 = arith.mulf %1282, %1281 : vector<2x96xf32>
    %1284 = vector.extract_strided_slice %1283 {offsets = [0, 0], sizes = [2, 32], strides = [1, 1]} : vector<2x96xf32> to vector<2x32xf32>
    %1285 = vector.extract_strided_slice %1283 {offsets = [0, 32], sizes = [2, 32], strides = [1, 1]} : vector<2x96xf32> to vector<2x32xf32>
    %1286 = vector.extract_strided_slice %1283 {offsets = [0, 64], sizes = [2, 32], strides = [1, 1]} : vector<2x96xf32> to vector<2x32xf32>
    %1287 = vector.extract_strided_slice %1275 {offsets = [0, 96], sizes = [2, 32], strides = [1, 1]} : vector<2x128xf32> to vector<2x32xf32>
    %1288 = math.tanh %1287 : vector<2x32xf32>
    %1289 = arith.mulf %1285, %1235 : vector<2x32xf32>
    %1290 = arith.mulf %1284, %1288 : vector<2x32xf32>
    %1291 = arith.addf %1289, %1290 : vector<2x32xf32>
    %1292 = math.tanh %1291 : vector<2x32xf32>
    %1293 = arith.mulf %1286, %1292 : vector<2x32xf32>
    %c1_551 = arith.constant 1 : index
    %c1_552 = arith.constant 1 : index
    %c0_553 = arith.constant 0 : index
    %c0_554 = arith.constant 0 : index
    %1294 = vector.load %arg3[%c1_551, %c1_552, %c0_553, %c0_554] : memref<2x2x32x64xf32, #tpu.memory_space<vmem>>, vector<1x1x32x64xf32>
    %1295 = vector.shape_cast %1294 : vector<1x1x32x64xf32> to vector<32x64xf32>
    %cst_555 = arith.constant dense<0.000000e+00> : vector<2x64xf32>
    %1296 = tpu.matmul %1293, %1295, %cst_555 {dimension_numbers = #tpu.dot_dimension_numbers<[1], [0], [0], [1], [0, 0, 1, 1], [], []>} : vector<2x32xf32>, vector<32x64xf32>, vector<2x64xf32> -> vector<2x64xf32>
    %1297 = arith.addf %1296, %939 : vector<2x64xf32>
    %cst_556 = arith.constant 2.000000e+01 : f32
    %1298 = vector.broadcast %cst_556 : f32 to vector<2x64xf32>
    %1299 = arith.minimumf %1297, %1298 : vector<2x64xf32>
    %1300 = math.exp %1299 : vector<2x64xf32>
    %1301 = vector.extract_strided_slice %1300 {offsets = [0, 0], sizes = [2, 32], strides = [1, 1]} : vector<2x64xf32> to vector<2x32xf32>
    %1302 = arith.mulf %1301, %1291 : vector<2x32xf32>
    %1303 = vector.extract_strided_slice %1300 {offsets = [0, 32], sizes = [2, 32], strides = [1, 1]} : vector<2x64xf32> to vector<2x32xf32>
    %1304 = arith.mulf %1303, %1288 : vector<2x32xf32>
    %1305 = arith.addf %1302, %1304 : vector<2x32xf32>
    %1306 = tpu.concatenate %691, %1258 in 1 : vector<2x32xf32>, vector<2x32xf32> -> vector<2x64xf32>
    %c1_557 = arith.constant 1 : index
    %c0_558 = arith.constant 0 : index
    %c0_559 = arith.constant 0 : index
    %c0_560 = arith.constant 0 : index
    %1307 = vector.load %arg1[%c1_557, %c0_558, %c0_559, %c0_560] : memref<2x2x64x128xf32, #tpu.memory_space<vmem>>, vector<1x1x64x128xf32>
    %1308 = vector.shape_cast %1307 : vector<1x1x64x128xf32> to vector<64x128xf32>
    %cst_561 = arith.constant dense<0.000000e+00> : vector<2x128xf32>
    %1309 = tpu.matmul %1306, %1308, %cst_561 {dimension_numbers = #tpu.dot_dimension_numbers<[1], [0], [0], [1], [0, 0, 1, 1], [], []>} : vector<2x64xf32>, vector<64x128xf32>, vector<2x128xf32> -> vector<2x128xf32>
    %1310 = arith.addf %1309, %927 : vector<2x128xf32>
    %1311 = vector.extract_strided_slice %1310 {offsets = [0, 0], sizes = [2, 96], strides = [1, 1]} : vector<2x128xf32> to vector<2x96xf32>
    %cst_562 = arith.constant 5.000000e-01 : f32
    %1312 = vector.broadcast %cst_562 : f32 to vector<2x96xf32>
    %1313 = arith.mulf %1312, %1311 : vector<2x96xf32>
    %1314 = math.tanh %1313 : vector<2x96xf32>
    %cst_563 = arith.constant 1.000000e+00 : f32
    %1315 = vector.broadcast %cst_563 : f32 to vector<2x96xf32>
    %1316 = arith.addf %1314, %1315 : vector<2x96xf32>
    %cst_564 = arith.constant 5.000000e-01 : f32
    %1317 = vector.broadcast %cst_564 : f32 to vector<2x96xf32>
    %1318 = arith.mulf %1317, %1316 : vector<2x96xf32>
    %1319 = vector.extract_strided_slice %1318 {offsets = [0, 0], sizes = [2, 32], strides = [1, 1]} : vector<2x96xf32> to vector<2x32xf32>
    %1320 = vector.extract_strided_slice %1318 {offsets = [0, 32], sizes = [2, 32], strides = [1, 1]} : vector<2x96xf32> to vector<2x32xf32>
    %1321 = vector.extract_strided_slice %1318 {offsets = [0, 64], sizes = [2, 32], strides = [1, 1]} : vector<2x96xf32> to vector<2x32xf32>
    %1322 = vector.extract_strided_slice %1310 {offsets = [0, 96], sizes = [2, 32], strides = [1, 1]} : vector<2x128xf32> to vector<2x32xf32>
    %1323 = math.tanh %1322 : vector<2x32xf32>
    %1324 = arith.mulf %1320, %1270 : vector<2x32xf32>
    %1325 = arith.mulf %1319, %1323 : vector<2x32xf32>
    %1326 = arith.addf %1324, %1325 : vector<2x32xf32>
    %1327 = math.tanh %1326 : vector<2x32xf32>
    %1328 = arith.mulf %1321, %1327 : vector<2x32xf32>
    %c1_565 = arith.constant 1 : index
    %c0_566 = arith.constant 0 : index
    %c0_567 = arith.constant 0 : index
    %c0_568 = arith.constant 0 : index
    %1329 = vector.load %arg3[%c1_565, %c0_566, %c0_567, %c0_568] : memref<2x2x32x64xf32, #tpu.memory_space<vmem>>, vector<1x1x32x64xf32>
    %1330 = vector.shape_cast %1329 : vector<1x1x32x64xf32> to vector<32x64xf32>
    %cst_569 = arith.constant dense<0.000000e+00> : vector<2x64xf32>
    %1331 = tpu.matmul %1328, %1330, %cst_569 {dimension_numbers = #tpu.dot_dimension_numbers<[1], [0], [0], [1], [0, 0, 1, 1], [], []>} : vector<2x32xf32>, vector<32x64xf32>, vector<2x64xf32> -> vector<2x64xf32>
    %1332 = arith.addf %1331, %935 : vector<2x64xf32>
    %cst_570 = arith.constant 2.000000e+01 : f32
    %1333 = vector.broadcast %cst_570 : f32 to vector<2x64xf32>
    %1334 = arith.minimumf %1332, %1333 : vector<2x64xf32>
    %1335 = math.exp %1334 : vector<2x64xf32>
    %1336 = vector.extract_strided_slice %1335 {offsets = [0, 0], sizes = [2, 32], strides = [1, 1]} : vector<2x64xf32> to vector<2x32xf32>
    %1337 = arith.mulf %1336, %1326 : vector<2x32xf32>
    %1338 = vector.extract_strided_slice %1335 {offsets = [0, 32], sizes = [2, 32], strides = [1, 1]} : vector<2x64xf32> to vector<2x32xf32>
    %1339 = arith.mulf %1338, %1323 : vector<2x32xf32>
    %1340 = arith.addf %1337, %1339 : vector<2x32xf32>
    %1341 = tpu.concatenate %1328, %1293 in 1 : vector<2x32xf32>, vector<2x32xf32> -> vector<2x64xf32>
    %c1_571 = arith.constant 1 : index
    %c1_572 = arith.constant 1 : index
    %c0_573 = arith.constant 0 : index
    %c0_574 = arith.constant 0 : index
    %1342 = vector.load %arg1[%c1_571, %c1_572, %c0_573, %c0_574] : memref<2x2x64x128xf32, #tpu.memory_space<vmem>>, vector<1x1x64x128xf32>
    %1343 = vector.shape_cast %1342 : vector<1x1x64x128xf32> to vector<64x128xf32>
    %cst_575 = arith.constant dense<0.000000e+00> : vector<2x128xf32>
    %1344 = tpu.matmul %1341, %1343, %cst_575 {dimension_numbers = #tpu.dot_dimension_numbers<[1], [0], [0], [1], [0, 0, 1, 1], [], []>} : vector<2x64xf32>, vector<64x128xf32>, vector<2x128xf32> -> vector<2x128xf32>
    %1345 = arith.addf %1344, %931 : vector<2x128xf32>
    %1346 = vector.extract_strided_slice %1345 {offsets = [0, 0], sizes = [2, 96], strides = [1, 1]} : vector<2x128xf32> to vector<2x96xf32>
    %cst_576 = arith.constant 5.000000e-01 : f32
    %1347 = vector.broadcast %cst_576 : f32 to vector<2x96xf32>
    %1348 = arith.mulf %1347, %1346 : vector<2x96xf32>
    %1349 = math.tanh %1348 : vector<2x96xf32>
    %cst_577 = arith.constant 1.000000e+00 : f32
    %1350 = vector.broadcast %cst_577 : f32 to vector<2x96xf32>
    %1351 = arith.addf %1349, %1350 : vector<2x96xf32>
    %cst_578 = arith.constant 5.000000e-01 : f32
    %1352 = vector.broadcast %cst_578 : f32 to vector<2x96xf32>
    %1353 = arith.mulf %1352, %1351 : vector<2x96xf32>
    %1354 = vector.extract_strided_slice %1353 {offsets = [0, 0], sizes = [2, 32], strides = [1, 1]} : vector<2x96xf32> to vector<2x32xf32>
    %1355 = vector.extract_strided_slice %1353 {offsets = [0, 32], sizes = [2, 32], strides = [1, 1]} : vector<2x96xf32> to vector<2x32xf32>
    %1356 = vector.extract_strided_slice %1353 {offsets = [0, 64], sizes = [2, 32], strides = [1, 1]} : vector<2x96xf32> to vector<2x32xf32>
    %1357 = vector.extract_strided_slice %1345 {offsets = [0, 96], sizes = [2, 32], strides = [1, 1]} : vector<2x128xf32> to vector<2x32xf32>
    %1358 = math.tanh %1357 : vector<2x32xf32>
    %1359 = arith.mulf %1355, %1305 : vector<2x32xf32>
    %1360 = arith.mulf %1354, %1358 : vector<2x32xf32>
    %1361 = arith.addf %1359, %1360 : vector<2x32xf32>
    %1362 = math.tanh %1361 : vector<2x32xf32>
    %1363 = arith.mulf %1356, %1362 : vector<2x32xf32>
    %c1_579 = arith.constant 1 : index
    %c1_580 = arith.constant 1 : index
    %c0_581 = arith.constant 0 : index
    %c0_582 = arith.constant 0 : index
    %1364 = vector.load %arg3[%c1_579, %c1_580, %c0_581, %c0_582] : memref<2x2x32x64xf32, #tpu.memory_space<vmem>>, vector<1x1x32x64xf32>
    %1365 = vector.shape_cast %1364 : vector<1x1x32x64xf32> to vector<32x64xf32>
    %cst_583 = arith.constant dense<0.000000e+00> : vector<2x64xf32>
    %1366 = tpu.matmul %1363, %1365, %cst_583 {dimension_numbers = #tpu.dot_dimension_numbers<[1], [0], [0], [1], [0, 0, 1, 1], [], []>} : vector<2x32xf32>, vector<32x64xf32>, vector<2x64xf32> -> vector<2x64xf32>
    %1367 = arith.addf %1366, %939 : vector<2x64xf32>
    %cst_584 = arith.constant 2.000000e+01 : f32
    %1368 = vector.broadcast %cst_584 : f32 to vector<2x64xf32>
    %1369 = arith.minimumf %1367, %1368 : vector<2x64xf32>
    %1370 = math.exp %1369 : vector<2x64xf32>
    %1371 = vector.extract_strided_slice %1370 {offsets = [0, 0], sizes = [2, 32], strides = [1, 1]} : vector<2x64xf32> to vector<2x32xf32>
    %1372 = arith.mulf %1371, %1361 : vector<2x32xf32>
    %1373 = vector.extract_strided_slice %1370 {offsets = [0, 32], sizes = [2, 32], strides = [1, 1]} : vector<2x64xf32> to vector<2x32xf32>
    %1374 = arith.mulf %1373, %1358 : vector<2x32xf32>
    %1375 = arith.addf %1372, %1374 : vector<2x32xf32>
    %1376 = tpu.concatenate %801, %1328 in 1 : vector<2x32xf32>, vector<2x32xf32> -> vector<2x64xf32>
    %c1_585 = arith.constant 1 : index
    %c0_586 = arith.constant 0 : index
    %c0_587 = arith.constant 0 : index
    %c0_588 = arith.constant 0 : index
    %1377 = vector.load %arg1[%c1_585, %c0_586, %c0_587, %c0_588] : memref<2x2x64x128xf32, #tpu.memory_space<vmem>>, vector<1x1x64x128xf32>
    %1378 = vector.shape_cast %1377 : vector<1x1x64x128xf32> to vector<64x128xf32>
    %cst_589 = arith.constant dense<0.000000e+00> : vector<2x128xf32>
    %1379 = tpu.matmul %1376, %1378, %cst_589 {dimension_numbers = #tpu.dot_dimension_numbers<[1], [0], [0], [1], [0, 0, 1, 1], [], []>} : vector<2x64xf32>, vector<64x128xf32>, vector<2x128xf32> -> vector<2x128xf32>
    %1380 = arith.addf %1379, %927 : vector<2x128xf32>
    %1381 = vector.extract_strided_slice %1380 {offsets = [0, 0], sizes = [2, 96], strides = [1, 1]} : vector<2x128xf32> to vector<2x96xf32>
    %cst_590 = arith.constant 5.000000e-01 : f32
    %1382 = vector.broadcast %cst_590 : f32 to vector<2x96xf32>
    %1383 = arith.mulf %1382, %1381 : vector<2x96xf32>
    %1384 = math.tanh %1383 : vector<2x96xf32>
    %cst_591 = arith.constant 1.000000e+00 : f32
    %1385 = vector.broadcast %cst_591 : f32 to vector<2x96xf32>
    %1386 = arith.addf %1384, %1385 : vector<2x96xf32>
    %cst_592 = arith.constant 5.000000e-01 : f32
    %1387 = vector.broadcast %cst_592 : f32 to vector<2x96xf32>
    %1388 = arith.mulf %1387, %1386 : vector<2x96xf32>
    %1389 = vector.extract_strided_slice %1388 {offsets = [0, 0], sizes = [2, 32], strides = [1, 1]} : vector<2x96xf32> to vector<2x32xf32>
    %1390 = vector.extract_strided_slice %1388 {offsets = [0, 32], sizes = [2, 32], strides = [1, 1]} : vector<2x96xf32> to vector<2x32xf32>
    %1391 = vector.extract_strided_slice %1388 {offsets = [0, 64], sizes = [2, 32], strides = [1, 1]} : vector<2x96xf32> to vector<2x32xf32>
    %1392 = vector.extract_strided_slice %1380 {offsets = [0, 96], sizes = [2, 32], strides = [1, 1]} : vector<2x128xf32> to vector<2x32xf32>
    %1393 = math.tanh %1392 : vector<2x32xf32>
    %1394 = arith.mulf %1390, %1340 : vector<2x32xf32>
    %1395 = arith.mulf %1389, %1393 : vector<2x32xf32>
    %1396 = arith.addf %1394, %1395 : vector<2x32xf32>
    %1397 = math.tanh %1396 : vector<2x32xf32>
    %1398 = arith.mulf %1391, %1397 : vector<2x32xf32>
    %c1_593 = arith.constant 1 : index
    %c0_594 = arith.constant 0 : index
    %c0_595 = arith.constant 0 : index
    %c0_596 = arith.constant 0 : index
    %1399 = vector.load %arg3[%c1_593, %c0_594, %c0_595, %c0_596] : memref<2x2x32x64xf32, #tpu.memory_space<vmem>>, vector<1x1x32x64xf32>
    %1400 = vector.shape_cast %1399 : vector<1x1x32x64xf32> to vector<32x64xf32>
    %cst_597 = arith.constant dense<0.000000e+00> : vector<2x64xf32>
    %1401 = tpu.matmul %1398, %1400, %cst_597 {dimension_numbers = #tpu.dot_dimension_numbers<[1], [0], [0], [1], [0, 0, 1, 1], [], []>} : vector<2x32xf32>, vector<32x64xf32>, vector<2x64xf32> -> vector<2x64xf32>
    %1402 = arith.addf %1401, %935 : vector<2x64xf32>
    %cst_598 = arith.constant 2.000000e+01 : f32
    %1403 = vector.broadcast %cst_598 : f32 to vector<2x64xf32>
    %1404 = arith.minimumf %1402, %1403 : vector<2x64xf32>
    %1405 = math.exp %1404 : vector<2x64xf32>
    %1406 = vector.extract_strided_slice %1405 {offsets = [0, 0], sizes = [2, 32], strides = [1, 1]} : vector<2x64xf32> to vector<2x32xf32>
    %1407 = arith.mulf %1406, %1396 : vector<2x32xf32>
    %1408 = vector.extract_strided_slice %1405 {offsets = [0, 32], sizes = [2, 32], strides = [1, 1]} : vector<2x64xf32> to vector<2x32xf32>
    %1409 = arith.mulf %1408, %1393 : vector<2x32xf32>
    %1410 = arith.addf %1407, %1409 : vector<2x32xf32>
    %1411 = tpu.concatenate %1398, %1363 in 1 : vector<2x32xf32>, vector<2x32xf32> -> vector<2x64xf32>
    %c1_599 = arith.constant 1 : index
    %c1_600 = arith.constant 1 : index
    %c0_601 = arith.constant 0 : index
    %c0_602 = arith.constant 0 : index
    %1412 = vector.load %arg1[%c1_599, %c1_600, %c0_601, %c0_602] : memref<2x2x64x128xf32, #tpu.memory_space<vmem>>, vector<1x1x64x128xf32>
    %1413 = vector.shape_cast %1412 : vector<1x1x64x128xf32> to vector<64x128xf32>
    %cst_603 = arith.constant dense<0.000000e+00> : vector<2x128xf32>
    %1414 = tpu.matmul %1411, %1413, %cst_603 {dimension_numbers = #tpu.dot_dimension_numbers<[1], [0], [0], [1], [0, 0, 1, 1], [], []>} : vector<2x64xf32>, vector<64x128xf32>, vector<2x128xf32> -> vector<2x128xf32>
    %1415 = arith.addf %1414, %931 : vector<2x128xf32>
    %1416 = vector.extract_strided_slice %1415 {offsets = [0, 0], sizes = [2, 96], strides = [1, 1]} : vector<2x128xf32> to vector<2x96xf32>
    %cst_604 = arith.constant 5.000000e-01 : f32
    %1417 = vector.broadcast %cst_604 : f32 to vector<2x96xf32>
    %1418 = arith.mulf %1417, %1416 : vector<2x96xf32>
    %1419 = math.tanh %1418 : vector<2x96xf32>
    %cst_605 = arith.constant 1.000000e+00 : f32
    %1420 = vector.broadcast %cst_605 : f32 to vector<2x96xf32>
    %1421 = arith.addf %1419, %1420 : vector<2x96xf32>
    %cst_606 = arith.constant 5.000000e-01 : f32
    %1422 = vector.broadcast %cst_606 : f32 to vector<2x96xf32>
    %1423 = arith.mulf %1422, %1421 : vector<2x96xf32>
    %1424 = vector.extract_strided_slice %1423 {offsets = [0, 0], sizes = [2, 32], strides = [1, 1]} : vector<2x96xf32> to vector<2x32xf32>
    %1425 = vector.extract_strided_slice %1423 {offsets = [0, 32], sizes = [2, 32], strides = [1, 1]} : vector<2x96xf32> to vector<2x32xf32>
    %1426 = vector.extract_strided_slice %1423 {offsets = [0, 64], sizes = [2, 32], strides = [1, 1]} : vector<2x96xf32> to vector<2x32xf32>
    %1427 = vector.extract_strided_slice %1415 {offsets = [0, 96], sizes = [2, 32], strides = [1, 1]} : vector<2x128xf32> to vector<2x32xf32>
    %1428 = math.tanh %1427 : vector<2x32xf32>
    %1429 = arith.mulf %1425, %1375 : vector<2x32xf32>
    %1430 = arith.mulf %1424, %1428 : vector<2x32xf32>
    %1431 = arith.addf %1429, %1430 : vector<2x32xf32>
    %1432 = math.tanh %1431 : vector<2x32xf32>
    %1433 = arith.mulf %1426, %1432 : vector<2x32xf32>
    %c1_607 = arith.constant 1 : index
    %c1_608 = arith.constant 1 : index
    %c0_609 = arith.constant 0 : index
    %c0_610 = arith.constant 0 : index
    %1434 = vector.load %arg3[%c1_607, %c1_608, %c0_609, %c0_610] : memref<2x2x32x64xf32, #tpu.memory_space<vmem>>, vector<1x1x32x64xf32>
    %1435 = vector.shape_cast %1434 : vector<1x1x32x64xf32> to vector<32x64xf32>
    %cst_611 = arith.constant dense<0.000000e+00> : vector<2x64xf32>
    %1436 = tpu.matmul %1433, %1435, %cst_611 {dimension_numbers = #tpu.dot_dimension_numbers<[1], [0], [0], [1], [0, 0, 1, 1], [], []>} : vector<2x32xf32>, vector<32x64xf32>, vector<2x64xf32> -> vector<2x64xf32>
    %1437 = arith.addf %1436, %939 : vector<2x64xf32>
    %cst_612 = arith.constant 2.000000e+01 : f32
    %1438 = vector.broadcast %cst_612 : f32 to vector<2x64xf32>
    %1439 = arith.minimumf %1437, %1438 : vector<2x64xf32>
    %1440 = math.exp %1439 : vector<2x64xf32>
    %1441 = vector.extract_strided_slice %1440 {offsets = [0, 0], sizes = [2, 32], strides = [1, 1]} : vector<2x64xf32> to vector<2x32xf32>
    %1442 = arith.mulf %1441, %1431 : vector<2x32xf32>
    %1443 = vector.extract_strided_slice %1440 {offsets = [0, 32], sizes = [2, 32], strides = [1, 1]} : vector<2x64xf32> to vector<2x32xf32>
    %1444 = arith.mulf %1443, %1428 : vector<2x32xf32>
    %1445 = arith.addf %1442, %1444 : vector<2x32xf32>
    %1446 = tpu.concatenate %911, %1398 in 1 : vector<2x32xf32>, vector<2x32xf32> -> vector<2x64xf32>
    %c1_613 = arith.constant 1 : index
    %c0_614 = arith.constant 0 : index
    %c0_615 = arith.constant 0 : index
    %c0_616 = arith.constant 0 : index
    %1447 = vector.load %arg1[%c1_613, %c0_614, %c0_615, %c0_616] : memref<2x2x64x128xf32, #tpu.memory_space<vmem>>, vector<1x1x64x128xf32>
    %1448 = vector.shape_cast %1447 : vector<1x1x64x128xf32> to vector<64x128xf32>
    %cst_617 = arith.constant dense<0.000000e+00> : vector<2x128xf32>
    %1449 = tpu.matmul %1446, %1448, %cst_617 {dimension_numbers = #tpu.dot_dimension_numbers<[1], [0], [0], [1], [0, 0, 1, 1], [], []>} : vector<2x64xf32>, vector<64x128xf32>, vector<2x128xf32> -> vector<2x128xf32>
    %1450 = arith.addf %1449, %927 : vector<2x128xf32>
    %1451 = vector.extract_strided_slice %1450 {offsets = [0, 0], sizes = [2, 96], strides = [1, 1]} : vector<2x128xf32> to vector<2x96xf32>
    %cst_618 = arith.constant 5.000000e-01 : f32
    %1452 = vector.broadcast %cst_618 : f32 to vector<2x96xf32>
    %1453 = arith.mulf %1452, %1451 : vector<2x96xf32>
    %1454 = math.tanh %1453 : vector<2x96xf32>
    %cst_619 = arith.constant 1.000000e+00 : f32
    %1455 = vector.broadcast %cst_619 : f32 to vector<2x96xf32>
    %1456 = arith.addf %1454, %1455 : vector<2x96xf32>
    %cst_620 = arith.constant 5.000000e-01 : f32
    %1457 = vector.broadcast %cst_620 : f32 to vector<2x96xf32>
    %1458 = arith.mulf %1457, %1456 : vector<2x96xf32>
    %1459 = vector.extract_strided_slice %1458 {offsets = [0, 0], sizes = [2, 32], strides = [1, 1]} : vector<2x96xf32> to vector<2x32xf32>
    %1460 = vector.extract_strided_slice %1458 {offsets = [0, 32], sizes = [2, 32], strides = [1, 1]} : vector<2x96xf32> to vector<2x32xf32>
    %1461 = vector.extract_strided_slice %1458 {offsets = [0, 64], sizes = [2, 32], strides = [1, 1]} : vector<2x96xf32> to vector<2x32xf32>
    %1462 = vector.extract_strided_slice %1450 {offsets = [0, 96], sizes = [2, 32], strides = [1, 1]} : vector<2x128xf32> to vector<2x32xf32>
    %1463 = math.tanh %1462 : vector<2x32xf32>
    %1464 = arith.mulf %1460, %1410 : vector<2x32xf32>
    %1465 = arith.mulf %1459, %1463 : vector<2x32xf32>
    %1466 = arith.addf %1464, %1465 : vector<2x32xf32>
    %1467 = math.tanh %1466 : vector<2x32xf32>
    %1468 = arith.mulf %1461, %1467 : vector<2x32xf32>
    %c1_621 = arith.constant 1 : index
    %c0_622 = arith.constant 0 : index
    %c0_623 = arith.constant 0 : index
    %c0_624 = arith.constant 0 : index
    %1469 = vector.load %arg3[%c1_621, %c0_622, %c0_623, %c0_624] : memref<2x2x32x64xf32, #tpu.memory_space<vmem>>, vector<1x1x32x64xf32>
    %1470 = vector.shape_cast %1469 : vector<1x1x32x64xf32> to vector<32x64xf32>
    %cst_625 = arith.constant dense<0.000000e+00> : vector<2x64xf32>
    %1471 = tpu.matmul %1468, %1470, %cst_625 {dimension_numbers = #tpu.dot_dimension_numbers<[1], [0], [0], [1], [0, 0, 1, 1], [], []>} : vector<2x32xf32>, vector<32x64xf32>, vector<2x64xf32> -> vector<2x64xf32>
    %1472 = arith.addf %1471, %935 : vector<2x64xf32>
    %cst_626 = arith.constant 2.000000e+01 : f32
    %1473 = vector.broadcast %cst_626 : f32 to vector<2x64xf32>
    %1474 = arith.minimumf %1472, %1473 : vector<2x64xf32>
    %1475 = math.exp %1474 : vector<2x64xf32>
    %1476 = vector.extract_strided_slice %1475 {offsets = [0, 0], sizes = [2, 32], strides = [1, 1]} : vector<2x64xf32> to vector<2x32xf32>
    %1477 = arith.mulf %1476, %1466 : vector<2x32xf32>
    %1478 = vector.extract_strided_slice %1475 {offsets = [0, 32], sizes = [2, 32], strides = [1, 1]} : vector<2x64xf32> to vector<2x32xf32>
    %1479 = arith.mulf %1478, %1463 : vector<2x32xf32>
    %1480 = arith.addf %1477, %1479 : vector<2x32xf32>
    %1481 = tpu.concatenate %1468, %1433 in 1 : vector<2x32xf32>, vector<2x32xf32> -> vector<2x64xf32>
    %c1_627 = arith.constant 1 : index
    %c1_628 = arith.constant 1 : index
    %c0_629 = arith.constant 0 : index
    %c0_630 = arith.constant 0 : index
    %1482 = vector.load %arg1[%c1_627, %c1_628, %c0_629, %c0_630] : memref<2x2x64x128xf32, #tpu.memory_space<vmem>>, vector<1x1x64x128xf32>
    %1483 = vector.shape_cast %1482 : vector<1x1x64x128xf32> to vector<64x128xf32>
    %cst_631 = arith.constant dense<0.000000e+00> : vector<2x128xf32>
    %1484 = tpu.matmul %1481, %1483, %cst_631 {dimension_numbers = #tpu.dot_dimension_numbers<[1], [0], [0], [1], [0, 0, 1, 1], [], []>} : vector<2x64xf32>, vector<64x128xf32>, vector<2x128xf32> -> vector<2x128xf32>
    %1485 = arith.addf %1484, %931 : vector<2x128xf32>
    %1486 = vector.extract_strided_slice %1485 {offsets = [0, 0], sizes = [2, 96], strides = [1, 1]} : vector<2x128xf32> to vector<2x96xf32>
    %cst_632 = arith.constant 5.000000e-01 : f32
    %1487 = vector.broadcast %cst_632 : f32 to vector<2x96xf32>
    %1488 = arith.mulf %1487, %1486 : vector<2x96xf32>
    %1489 = math.tanh %1488 : vector<2x96xf32>
    %cst_633 = arith.constant 1.000000e+00 : f32
    %1490 = vector.broadcast %cst_633 : f32 to vector<2x96xf32>
    %1491 = arith.addf %1489, %1490 : vector<2x96xf32>
    %cst_634 = arith.constant 5.000000e-01 : f32
    %1492 = vector.broadcast %cst_634 : f32 to vector<2x96xf32>
    %1493 = arith.mulf %1492, %1491 : vector<2x96xf32>
    %1494 = vector.extract_strided_slice %1493 {offsets = [0, 0], sizes = [2, 32], strides = [1, 1]} : vector<2x96xf32> to vector<2x32xf32>
    %1495 = vector.extract_strided_slice %1493 {offsets = [0, 32], sizes = [2, 32], strides = [1, 1]} : vector<2x96xf32> to vector<2x32xf32>
    %1496 = vector.extract_strided_slice %1493 {offsets = [0, 64], sizes = [2, 32], strides = [1, 1]} : vector<2x96xf32> to vector<2x32xf32>
    %1497 = vector.extract_strided_slice %1485 {offsets = [0, 96], sizes = [2, 32], strides = [1, 1]} : vector<2x128xf32> to vector<2x32xf32>
    %1498 = math.tanh %1497 : vector<2x32xf32>
    %1499 = arith.mulf %1495, %1445 : vector<2x32xf32>
    %1500 = arith.mulf %1494, %1498 : vector<2x32xf32>
    %1501 = arith.addf %1499, %1500 : vector<2x32xf32>
    %1502 = math.tanh %1501 : vector<2x32xf32>
    %1503 = arith.mulf %1496, %1502 : vector<2x32xf32>
    %c1_635 = arith.constant 1 : index
    %c1_636 = arith.constant 1 : index
    %c0_637 = arith.constant 0 : index
    %c0_638 = arith.constant 0 : index
    %1504 = vector.load %arg3[%c1_635, %c1_636, %c0_637, %c0_638] : memref<2x2x32x64xf32, #tpu.memory_space<vmem>>, vector<1x1x32x64xf32>
    %1505 = vector.shape_cast %1504 : vector<1x1x32x64xf32> to vector<32x64xf32>
    %cst_639 = arith.constant dense<0.000000e+00> : vector<2x64xf32>
    %1506 = tpu.matmul %1503, %1505, %cst_639 {dimension_numbers = #tpu.dot_dimension_numbers<[1], [0], [0], [1], [0, 0, 1, 1], [], []>} : vector<2x32xf32>, vector<32x64xf32>, vector<2x64xf32> -> vector<2x64xf32>
    %1507 = arith.addf %1506, %939 : vector<2x64xf32>
    %cst_640 = arith.constant 2.000000e+01 : f32
    %1508 = vector.broadcast %cst_640 : f32 to vector<2x64xf32>
    %1509 = arith.minimumf %1507, %1508 : vector<2x64xf32>
    %1510 = math.exp %1509 : vector<2x64xf32>
    %1511 = vector.extract_strided_slice %1510 {offsets = [0, 0], sizes = [2, 32], strides = [1, 1]} : vector<2x64xf32> to vector<2x32xf32>
    %1512 = arith.mulf %1511, %1501 : vector<2x32xf32>
    %1513 = vector.extract_strided_slice %1510 {offsets = [0, 32], sizes = [2, 32], strides = [1, 1]} : vector<2x64xf32> to vector<2x32xf32>
    %1514 = arith.mulf %1513, %1498 : vector<2x32xf32>
    %1515 = arith.addf %1512, %1514 : vector<2x32xf32>
    %c1_641 = arith.constant 1 : index
    %c0_642 = arith.constant 0 : index
    %c0_643 = arith.constant 0 : index
    %1516 = vector.load %arg5[%c1_641, %c0_642, %c0_643] : memref<2x32x32xf32, #tpu.memory_space<vmem>>, vector<1x32x32xf32>
    %1517 = vector.shape_cast %1516 : vector<1x32x32xf32> to vector<32x32xf32>
    %cst_644 = arith.constant dense<0.000000e+00> : vector<2x32xf32>
    %1518 = tpu.matmul %1503, %1517, %cst_644 {dimension_numbers = #tpu.dot_dimension_numbers<[1], [0], [0], [1], [0, 0, 1, 1], [], []>} : vector<2x32xf32>, vector<32x32xf32>, vector<2x32xf32> -> vector<2x32xf32>
    %1519 = arith.addf %1518, %943 : vector<2x32xf32>
    %cst_645 = arith.constant 5.000000e-01 : f32
    %1520 = vector.broadcast %cst_645 : f32 to vector<2x32xf32>
    %1521 = arith.mulf %1520, %1519 : vector<2x32xf32>
    %cst_646 = arith.constant 4.471500e-02 : f32
    %1522 = vector.broadcast %cst_646 : f32 to vector<2x32xf32>
    %1523 = arith.mulf %1522, %1519 : vector<2x32xf32>
    %1524 = arith.mulf %1523, %1519 : vector<2x32xf32>
    %1525 = arith.mulf %1524, %1519 : vector<2x32xf32>
    %1526 = arith.addf %1519, %1525 : vector<2x32xf32>
    %cst_647 = arith.constant 0.797884583 : f32
    %1527 = vector.broadcast %cst_647 : f32 to vector<2x32xf32>
    %1528 = arith.mulf %1527, %1526 : vector<2x32xf32>
    %1529 = math.tanh %1528 : vector<2x32xf32>
    %cst_648 = arith.constant 1.000000e+00 : f32
    %1530 = vector.broadcast %cst_648 : f32 to vector<2x32xf32>
    %1531 = arith.addf %1530, %1529 : vector<2x32xf32>
    %1532 = arith.mulf %1521, %1531 : vector<2x32xf32>
    %1533 = arith.addf %1532, %911 : vector<2x32xf32>
    %cst_649 = arith.constant dense<0.000000e+00> : vector<2xf32>
    %1534 = vector.multi_reduction <add>, %1533, %cst_649 [1] : vector<2x32xf32> to vector<2xf32>
    %1535 = vector.shape_cast %1534 : vector<2xf32> to vector<2x1xf32>
    %cst_650 = arith.constant 3.200000e+01 : f32
    %1536 = vector.broadcast %cst_650 : f32 to vector<2x1xf32>
    %1537 = arith.divf %1535, %1536 : vector<2x1xf32>
    %1538 = vector.broadcast %1537 : vector<2x1xf32> to vector<2x32xf32>
    %1539 = arith.subf %1533, %1538 : vector<2x32xf32>
    %1540 = arith.mulf %1539, %1539 : vector<2x32xf32>
    %cst_651 = arith.constant dense<0.000000e+00> : vector<2xf32>
    %1541 = vector.multi_reduction <add>, %1540, %cst_651 [1] : vector<2x32xf32> to vector<2xf32>
    %1542 = vector.shape_cast %1541 : vector<2xf32> to vector<2x1xf32>
    %cst_652 = arith.constant 3.200000e+01 : f32
    %1543 = vector.broadcast %cst_652 : f32 to vector<2x1xf32>
    %1544 = arith.divf %1542, %1543 : vector<2x1xf32>
    %1545 = vector.broadcast %1537 : vector<2x1xf32> to vector<2x32xf32>
    %1546 = arith.subf %1533, %1545 : vector<2x32xf32>
    %cst_653 = arith.constant 9.99999974E-6 : f32
    %1547 = vector.broadcast %cst_653 : f32 to vector<2x1xf32>
    %1548 = arith.addf %1544, %1547 : vector<2x1xf32>
    %1549 = math.rsqrt %1548 : vector<2x1xf32>
    %1550 = vector.broadcast %1549 : vector<2x1xf32> to vector<2x32xf32>
    %1551 = arith.mulf %1546, %1550 : vector<2x32xf32>
    %1552 = arith.mulf %1551, %947 : vector<2x32xf32>
    %1553 = arith.addf %1552, %951 : vector<2x32xf32>
    %c1_654 = arith.constant 1 : index
    %c0_655 = arith.constant 0 : index
    %c0_656 = arith.constant 0 : index
    %c0_657 = arith.constant 0 : index
    %1554 = vector.load %arg12[%c1_654, %c0_655, %c0_656, %c0_657] : memref<2x2x2x32xf32, #tpu.memory_space<vmem>>, vector<1x1x2x32xf32>
    %1555 = vector.shape_cast %1554 : vector<1x1x2x32xf32> to vector<2x32xf32>
    %1556 = vector.shape_cast %1468 : vector<2x32xf32> to vector<1x1x2x32xf32>
    tpu.vector_store %arg12[%c1_654, %c0_655, %c0_656, %c0_657], %1556 {strides = array<i32>} : memref<2x2x2x32xf32, #tpu.memory_space<vmem>>, vector<1x1x2x32xf32>,
    %c1_658 = arith.constant 1 : index
    %c0_659 = arith.constant 0 : index
    %c0_660 = arith.constant 0 : index
    %c0_661 = arith.constant 0 : index
    %1557 = vector.load %arg13[%c1_658, %c0_659, %c0_660, %c0_661] : memref<2x2x2x32xf32, #tpu.memory_space<vmem>>, vector<1x1x2x32xf32>
    %1558 = vector.shape_cast %1557 : vector<1x1x2x32xf32> to vector<2x32xf32>
    %1559 = vector.shape_cast %1480 : vector<2x32xf32> to vector<1x1x2x32xf32>
    tpu.vector_store %arg13[%c1_658, %c0_659, %c0_660, %c0_661], %1559 {strides = array<i32>} : memref<2x2x2x32xf32, #tpu.memory_space<vmem>>, vector<1x1x2x32xf32>,
    %c1_662 = arith.constant 1 : index
    %c1_663 = arith.constant 1 : index
    %c0_664 = arith.constant 0 : index
    %c0_665 = arith.constant 0 : index
    %1560 = vector.load %arg12[%c1_662, %c1_663, %c0_664, %c0_665] : memref<2x2x2x32xf32, #tpu.memory_space<vmem>>, vector<1x1x2x32xf32>
    %1561 = vector.shape_cast %1560 : vector<1x1x2x32xf32> to vector<2x32xf32>
    %1562 = vector.shape_cast %1503 : vector<2x32xf32> to vector<1x1x2x32xf32>
    tpu.vector_store %arg12[%c1_662, %c1_663, %c0_664, %c0_665], %1562 {strides = array<i32>} : memref<2x2x2x32xf32, #tpu.memory_space<vmem>>, vector<1x1x2x32xf32>,
    %c1_666 = arith.constant 1 : index
    %c1_667 = arith.constant 1 : index
    %c0_668 = arith.constant 0 : index
    %c0_669 = arith.constant 0 : index
    %1563 = vector.load %arg13[%c1_666, %c1_667, %c0_668, %c0_669] : memref<2x2x2x32xf32, #tpu.memory_space<vmem>>, vector<1x1x2x32xf32>
    %1564 = vector.shape_cast %1563 : vector<1x1x2x32xf32> to vector<2x32xf32>
    %1565 = vector.shape_cast %1515 : vector<2x32xf32> to vector<1x1x2x32xf32>
    tpu.vector_store %arg13[%c1_666, %c1_667, %c0_668, %c0_669], %1565 {strides = array<i32>} : memref<2x2x2x32xf32, #tpu.memory_space<vmem>>, vector<1x1x2x32xf32>,
    %c0_670 = arith.constant 0 : index
    %c0_671 = arith.constant 0 : index
    %1566 = vector.load %arg9[%c0_670, %c0_671] : memref<32x1xf32, #tpu.memory_space<vmem>>, vector<32x1xf32>
    %cst_672 = arith.constant dense<0.000000e+00> : vector<2x1xf32>
    %1567 = tpu.matmul %1553, %1566, %cst_672 {dimension_numbers = #tpu.dot_dimension_numbers<[1], [0], [0], [1], [0, 0, 1, 1], [], []>} : vector<2x32xf32>, vector<32x1xf32>, vector<2x1xf32> -> vector<2x1xf32>
    %c0_673 = arith.constant 0 : index
    %c0_674 = arith.constant 0 : index
    %1568 = vector.load %arg10[%c0_673, %c0_674] : memref<1x1xf32, #tpu.memory_space<vmem>>, vector<1x1xf32>
    %1569 = vector.broadcast %1568 : vector<1x1xf32> to vector<2x1xf32>
    %1570 = arith.addf %1567, %1569 : vector<2x1xf32>
    %cst_675 = arith.constant 5.000000e-01 : f32
    %1571 = vector.broadcast %cst_675 : f32 to vector<2x1xf32>
    %1572 = arith.mulf %1571, %1570 : vector<2x1xf32>
    %1573 = math.tanh %1572 : vector<2x1xf32>
    %cst_676 = arith.constant 1.000000e+00 : f32
    %1574 = vector.broadcast %cst_676 : f32 to vector<2x1xf32>
    %1575 = arith.addf %1573, %1574 : vector<2x1xf32>
    %cst_677 = arith.constant 5.000000e-01 : f32
    %1576 = vector.broadcast %cst_677 : f32 to vector<2x1xf32>
    %1577 = arith.mulf %1576, %1575 : vector<2x1xf32>
    %c0_678 = arith.constant 0 : index
    %c0_679 = arith.constant 0 : index
    %1578 = vector.load %arg11[%c0_678, %c0_679] : memref<2x1xf32, #tpu.memory_space<vmem>>, vector<2x1xf32>
    tpu.vector_store %arg11[%c0_678, %c0_679], %1577 {strides = array<i32>} : memref<2x1xf32, #tpu.memory_space<vmem>>, vector<2x1xf32>,
    return
  }
}

</mosaic_0001>

<bundles_post_ra>
// kernel: tpu_custom_call.1
= control target key start
LH: loop header
LB: loop body
LE: loop exit
PB: predicated region body
PF: predicated region fallthrough
CT: control target
= control target key end

     0   :  { %s12008_s0 = inlined_call_operand.vmem [shape: f32[8,2,32], index: 0, kind: input, shape index: {}]   ;;  %s12009_s1 = inlined_call_operand.hbm [shape: f32[2,2,64,128], index: 1, kind: input, shape index: {}]   ;;  %s12010_s2 = inlined_call_operand.vmem [shape: f32[2,2,1,128], index: 2, kind: input, shape index: {}]   ;;  %s12011_s3 = inlined_call_operand.hbm [shape: f32[2,2,32,64], index: 3, kind: input, shape index: {}]   ;;  %s12012_s4 = inlined_call_operand.vmem [shape: f32[2,2,1,64], index: 4, kind: input, shape index: {}]   ;;  %s12013_s5 = inlined_call_operand.hbm [shape: f32[2,32,32], index: 5, kind: input, shape index: {}]   ;;  %s12014_s6 = inlined_call_operand.vmem [shape: f32[2,1,32], index: 6, kind: input, shape index: {}]   ;;  %s12015_s7 = inlined_call_operand.vmem [shape: f32[2,1,32], index: 7, kind: input, shape index: {}]   ;;  %s12016_s8 = inlined_call_operand.vmem [shape: f32[2,1,32], index: 8, kind: input, shape index: {}]   ;;  %s12017_s9 = inlined_call_operand.vmem [shape: f32[32,1], index: 9, kind: input, shape index: {}]   ;;  %s12018_s10 = inlined_call_operand.<no memory space> [shape: f32[1,1], index: 10, kind: input, shape index: {}]   ;;  %s12019_s11 = inlined_call_operand.vmem [shape: f32[2,1], index: 11, kind: output, shape index: {0}]   ;;  %s12020_s12 = inlined_call_operand.hbm [shape: f32[2,2,2,32], index: 12, kind: output, shape index: {1}]   ;;  %s12021_s13 = inlined_call_operand.hbm [shape: f32[2,2,2,32], index: 13, kind: output, shape index: {2}]  }
   0x1   :  { %v19_v0 = vstv %s12018_s10 }
   0x2   :  { %20 = vst [vmem:[#allocation2] sm:$0x1] %v19_v0 }
   0x3   :  { %21 = vsyncpa [#allocation4], 0 }
   0x4   :  { %22 = vsyncpa [#allocation7], 0 }
   0x5   :  { %23 = vsyncpa [#allocation5], 0 }
   0x6   :  { %24 = vsyncpa [#allocation11], 0  ;;  %s10261_s27 = smov [#allocation6]   ;;  %s10262_s29 = smov [#allocation3]  }
   0x7   :  { %s46_s28 = sshll.u32 %s10261_s27, 4  ;;  %s32_s30 = sshll.u32 %s10262_s29, 4  ;;  %s47_s28 = int_to_ptr.vmem [resolvable:$true] %s46_s28  ;;  %s10348_s30 = int_to_ptr.vmem [resolvable:$true] %s32_s30 }
   0x8   :  { %s10143_s16 = scalar_lea.hbm %s12011_s3, 2048 }
   0x9   :  { %p10144_p0 = scmp.ne.s32.totalorder %s12011_s3, %s10143_s16  ;;  %p10147_p1 = scmp.lt.u32.totalorder %s10143_s16, %s12011_s3 }
   0xb   :  { %p10149_p2 = pnand %p10147_p1, %p10144_p0 }
   0xd   :  { %10152 = shalt.err (!%p10149_p2)
}
   0xe   :  { %s10153_s20 = scalar_lea.vmem %s47_s28, 2048  ;;  %p10158_p4 = scmp.lt.s32.totalorder %s47_s28, %s47_s28 }
   0xf   :  { %p10154_p3 = scmp.ne.s32.totalorder %s47_s28, %s10153_s20  ;;  %p10159_p5 = scmp.lt.s32.totalorder %s10153_s20, %s10153_s20 }
  0x11   :  { %p10160_p6 = por %p10159_p5, %p10158_p4 }
  0x13   :  { %p10161_p7 = pnand %p10160_p6, %p10154_p3 }
  0x15   :  { %10164 = shalt.err (!%p10161_p7)
}
  0x16   :  { %s10263_s21 = smov 128   ;;  %s10264_s22 = smov 8  }
  0x17   :  { %52 = dma.hbm_to_vmem [thread:$0]  %s12011_s3, 2048, %s47_s28, [#allocation7], %s10263_s21, %s10263_s21, %s10264_s22  }
  0x18   :  { %s10165_s27 = scalar_lea.hbm %s12009_s1, 4096 }
  0x19   :  { %p10166_p8 = scmp.ne.s32.totalorder %s12009_s1, %s10165_s27  ;;  %p10169_p9 = scmp.lt.u32.totalorder %s10165_s27, %s12009_s1 }
  0x1b   :  { %p10171_p10 = pnand %p10169_p9, %p10166_p8 }
  0x1d   :  { %10174 = shalt.err (!%p10171_p10)
}
  0x1e   :  { %s10175_s17 = scalar_lea.vmem %s10348_s30, 4096  ;;  %p10180_p12 = scmp.lt.s32.totalorder %s10348_s30, %s10348_s30 }
  0x1f   :  { %p10176_p11 = scmp.ne.s32.totalorder %s10348_s30, %s10175_s17  ;;  %p10181_p13 = scmp.lt.s32.totalorder %s10175_s17, %s10175_s17 }
  0x21   :  { %p10182_p0 = por %p10181_p13, %p10180_p12 }
  0x23   :  { %p10183_p1 = pnand %p10182_p0, %p10176_p11 }
  0x25   :  { %10186 = shalt.err (!%p10183_p1)
}
  0x26   :  { %38 = dma.hbm_to_vmem [thread:$0]  %s12009_s1, 4096, %s10348_s30, [#allocation4], %s10263_s21, %s10263_s21, %s10264_s22  }
  0x27   :  { %s10265_s18 = smov [#allocation8]   ;;  %s10187_s23 = scalar_lea.hbm %s12013_s5, 1024 }
  0x28   :  { %s60_s10 = sshll.u32 %s10265_s18, 4  ;;  %p10188_p2 = scmp.ne.s32.totalorder %s12013_s5, %s10187_s23  ;;  %s61_s10 = int_to_ptr.vmem [resolvable:$true] %s60_s10 }
  0x29   :  { %p10191_p3 = scmp.lt.u32.totalorder %s10187_s23, %s12013_s5 }
  0x2b   :  { %p10193_p4 = pnand %p10191_p3, %p10188_p2 }
  0x2d   :  { %10196 = shalt.err (!%p10193_p4)
}
  0x2e   :  { %s10197_s29 = scalar_lea.vmem %s61_s10, 1024  ;;  %p10202_p6 = scmp.lt.s32.totalorder %s61_s10, %s61_s10 }
  0x2f   :  { %p10198_p5 = scmp.ne.s32.totalorder %s61_s10, %s10197_s29  ;;  %p10203_p7 = scmp.lt.s32.totalorder %s10197_s29, %s10197_s29 }
  0x31   :  { %p10204_p8 = por %p10203_p7, %p10202_p6 }
  0x33   :  { %p10205_p9 = pnand %p10204_p8, %p10198_p5 }
  0x35   :  { %10208 = shalt.err (!%p10205_p9)
}
  0x36   :  { %66 = dma.hbm_to_vmem [thread:$0]  %s12013_s5, 1024, %s61_s10, [#allocation7], %s10263_s21, %s10263_s21, %s10264_s22  }
  0x37   :  { %10253 = dma.done.wait [#allocation4], 4096  }
  0x38   :  { %10254 = vsyncadd [#allocation4], 4294963200 }
  0x39   :  { %10255 = dma.done.wait [#allocation7], 3072  }
  0x3a   :  { %10256 = vsyncadd [#allocation7], 4294964224  ;;  %v10266_v1 = vmov 0.0|0.0   ;;  %vm10267_vm0 = vmmov 0   ;;  %v10268_v2 = vmov 0.0   ;;  %v140_v3 = vld [vmem:[#allocation3] sm:$0xff] }
  0x3b   :  { %9175 = vmatprep.subr.bf16.mxu0 %v10266_v1  ;;  %8121 = vmatprep.mubr.msk.f32.mxu0 %vm10267_vm0, %v10268_v2  ;;  %v141_v4 = vld [vmem:[#allocation3 + $0x8] sm:$0xff]  ;;  %v142_v5 = vld [vmem:[#allocation3 + $0x10] sm:$0xff]  ;;  %v143_v7 = vld [vmem:[#allocation3 + $0x18] sm:$0xff]  ;;  %vm138_vm1 = vcmask 261120   ;;  %vm148_vm2 = vcmask 523264   ;;  %s10269_s15 = smov 32  }
  0x3c   :  { %9187 = vmatprep.subr.bf16.mxu1 %v10266_v1  ;;  %8132 = vmatprep.mubr.msk.f32.mxu1 %vm10267_vm0, %v10268_v2  ;;  %v10406_v6 = vpack.c.bf16 %v141_v4, %v140_v3  ;;  %v10409_v8 = vpack.c.bf16 %v143_v7, %v142_v5  ;;  %v144_v9 = vld [vmem:[#allocation3 + $0x20] sm:$0xff]  ;;  %v145_v10 = vld [vmem:[#allocation3 + $0x28] sm:$0xff]  ;;  %v146_v12 = vld [vmem:[#allocation3 + $0x30] sm:$0xff]  ;;  %s10270_s16 = smov 96   ;;  %s10271_s17 = smov 64   ;;  %vm627_vm3 = vcmask 254976  }
  0x3d   :  { %v10413_v11 = vpack.c.bf16 %v145_v10, %v144_v9  ;;  %v147_v13 = vld [vmem:[#allocation3 + $0x38] sm:$0xff]  ;;  %v244_v31 = vld [vmem:[#allocation6] sm:$0xff]  ;;  %v245_v32 = vld [vmem:[#allocation6 + $0x8] sm:$0xff]  ;;  %s10273_s3 = smov [#allocation10]  }
  0x3e   :  { %9177 = vmatpush3.bf16.msra.mxu0 %v10406_v6  ;;  %v10417_v14 = vpack.c.bf16 %v147_v13, %v146_v12  ;;  %v137_v15 = vld [vmem:[%s12008_s0] sm:$0x3]  ;;  %v246_v33 = vld [vmem:[#allocation6 + $0x10] sm:$0xff]  ;;  %v10437_v34 = vpack.c.bf16 %v245_v32, %v244_v31  ;;  %v344_v41 = vld [vmem:[#allocation3 + $0x48] sm:$0xff] }
  0x3f   :  { %9178 = vmatprep.subr.bf16.mxu0 %v10266_v1  ;;  %v139_v16 = vsel %vm138_vm1, %v137_v15, 0.0  ;;  %v10432_v17 = vld [vmem:[%s12010_s2] ss:$0 sm:$0xff]  ;;  %v343_v40 = vld [vmem:[#allocation3 + $0x40] sm:$0xff]  ;;  %v345_v43 = vld [vmem:[#allocation3 + $0x50] sm:$0xff] }
  0x40   :  { %v247_v35 = vld [vmem:[#allocation6 + $0x18] sm:$0xff]  ;;  %9189 = vmatpush3.bf16.msra.mxu1 %v10437_v34  ;;  %v10450_v42 = vpack.c.bf16 %v344_v41, %v343_v40  ;;  %v347_v47 = vld [vmem:[#allocation3 + $0x60] sm:$0xff]  ;;  %v348_v48 = vld [vmem:[#allocation3 + $0x68] sm:$0xff] }
  0x41   :  { %v10441_v37 = vpack.c.bf16 %v247_v35, %v246_v33  ;;  %9190 = vmatprep.subr.bf16.mxu1 %v10266_v1  ;;  %v346_v44 = vld [vmem:[#allocation3 + $0x58] sm:$0xff]  ;;  %v10460_v49 = vpack.c.bf16 %v348_v48, %v347_v47  ;;  %v349_v50 = vld [vmem:[#allocation3 + $0x70] sm:$0xff]  ;;  %v7516_v54 = vld [vmem:[%s12008_s0 + $0x2] sm:$0x3] }
  0x42   :  { %9180 = vmatpush3.bf16.msra.mxu0 %v10409_v8  ;;  %v10454_v46 = vpack.c.bf16 %v346_v44, %v345_v43  ;;  %v350_v51 = vld [vmem:[#allocation3 + $0x78] sm:$0xff]  ;;  %v10497_v63 = vld [vmem:[%s12010_s2 + $0x1] ss:$0 sm:$0xff]  ;;  %v448_v47 = vld [vmem:[#allocation6 + $0x28] sm:$0xff] }
  0x43   :  { %9181 = vmatprep.subr.bf16.mxu0 %v10266_v1  ;;  %v10464_v52 = vpack.c.bf16 %v350_v51, %v349_v50  ;;  %v10491_v59 = vld [vmem:[%s12012_s4] ss:$0 sm:$0xff]  ;;  %v449_v48 = vld [vmem:[#allocation6 + $0x30] sm:$0xff] }
  0x44   :  { %9192 = vmatpush3.bf16.msra.mxu1 %v10441_v37  ;;  %v450_v51 = vld [vmem:[#allocation6 + $0x38] sm:$0xff] }
  0x45   :  { %9193 = vmatprep.subr.bf16.mxu1 %v10266_v1 }
  0x46   :  { %9183 = vmatpush3.bf16.msra.mxu0 %v10413_v11 }
  0x47   :  { %9184 = vmatprep.subr.bf16.mxu0 %v10266_v1 }
  0x4a   :  { %9186 = vmatpush3.bf16.msra.mxu0 %v10417_v14 }
  0x4b   :  { %9205 = vmatprep.subr.bf16.mxu0 %v10266_v1 }
  0x4d   :  { %8122 = vmatmul.mubr.msk.f32.vlgmr.msra.gmra.mrb[0].mxu0 %vm148_vm2, %v139_v16 }
  0x4e   :  { %8162 = vmatprep.mubr.msk.f32.mxu0 %vm10267_vm0, %v10268_v2 }
 0x120   :  { %v218_v18 = vpop.f32.mrb[0].mxu0 }
 0x121   :  { %v219_v19 = vadd.f32 %v10432_v17, %v218_v18  ;;  %v8123_v20 = vpop.f32.mrb[1].mxu0 }
 0x123   :  { %9825 = vtanh.f32 %v219_v19  ;;  %v222_v22 = vmul.f32 0.5, %v219_v19 }
 0x125   :  { %9827 = vtanh.f32 %v222_v22 }
 0x12d   :  { %v9826_v21 = vpop.eup %9825 }
 0x12e   :  { %229 = vrot.lane.b32.xlu0 %v9826_v21, %s10269_s15 }
 0x12f   :  { %v9828_v23 = vpop.eup %9827 }
 0x130   :  { %v224_v24 = vadd.f32 1.0, %v9828_v23 }
 0x132   :  { %v225_v25 = vmul.f32 0.5, %v224_v24 }
 0x134   :  { %v227_v28 = vmul.f32 0.0, %v225_v25 }
 0x1a0   :  { %v230_v26 = vpop.permute.xlu0 %229 }
 0x1a1   :  { %v232_v27 = vmul.f32 %v230_v26, %v225_v25 }
 0x1a3   :  { %234 = vrot.lane.b32.xlu0 %v232_v27, %s10269_s15 }
 0x215   :  { %v235_v29 = vpop.permute.xlu0 %234 }
 0x216   :  { %v237_v30 = vadd.f32 %v235_v29, %v227_v28 }
 0x218   :  { %9829 = vtanh.f32 %v237_v30 }
 0x222   :  { %v9830_v36 = vpop.eup %9829 }
 0x223   :  { %240 = vrot.lane.b32.xlu1 %v9830_v36, %s10269_s15 }
 0x295   :  { %v241_v38 = vpop.permute.xlu1 %240 }
 0x296   :  { %v243_v39 = vmul.f32 %v241_v38, %v225_v25 }
 0x298   :  { %646 = vrot.lane.b32.xlu0 %v243_v39, %s10270_s16  ;;  %249 = vrot.lane.b32.xlu1 %v243_v39, %s10271_s17 }
 0x29c   :  { %331 = vrot.lane.b32.xlu1 %v9826_v21, %s10271_s17 }
 0x2a0   :  { %327 = vrot.lane.b32.xlu1 %v237_v30, %s10270_s16 }
 0x30a   :  { %v250_v45 = vpop.permute.xlu1 %249  ;;  %v647_v55 = vpop.permute.xlu0 %646 }
 0x30b   :  { %8133 = vmatmul.mubr.msk.f32.vlgmr.msra.gmra.mrb[0].mxu1 %vm138_vm1, %v250_v45  ;;  %v341_v53 = vsel %vm138_vm1, %v250_v45, 0.0  ;;  %v649_v56 = vsel %vm138_vm1, %v7516_v54, %v647_v55  ;;  %v447_v45 = vld [vmem:[#allocation6 + $0x20] sm:$0xff]  ;;  %v10515_v54 = vpack.c.bf16 %v450_v51, %v449_v48 }
 0x30c   :  { %9195 = vmatpush3.bf16.msra.mxu1 %v10450_v42  ;;  %8151 = vmatprep.mubr.msk.f32.mxu1 %vm10267_vm0, %v10268_v2  ;;  %v10511_v50 = vpack.c.bf16 %v448_v47, %v447_v45 }
 0x30d   :  { %9196 = vmatprep.subr.bf16.mxu1 %v10266_v1 }
 0x30e   :  { %v332_v9 = vpop.permute.xlu1 %331  ;;  %9207 = vmatpush3.bf16.msra.mxu0 %v10511_v50 }
 0x30f   :  { %9208 = vmatprep.subr.bf16.mxu0 %v10266_v1 }
 0x310   :  { %9198 = vmatpush3.bf16.msra.mxu1 %v10454_v46 }
 0x311   :  { %9199 = vmatprep.subr.bf16.mxu1 %v10266_v1 }
 0x312   :  { %v328_v25 = vpop.permute.xlu1 %327  ;;  %9210 = vmatpush3.bf16.msra.mxu0 %v10515_v54 }
 0x313   :  { %9211 = vmatprep.subr.bf16.mxu0 %v10266_v1 }
 0x314   :  { %9201 = vmatpush3.bf16.msra.mxu1 %v10460_v49 }
 0x315   :  { %9202 = vmatprep.subr.bf16.mxu1 %v10266_v1 }
 0x318   :  { %9204 = vmatpush3.bf16.msra.mxu1 %v10464_v52 }
 0x319   :  { %9217 = vmatprep.subr.bf16.mxu1 %v10266_v1 }
 0x31b   :  { %8152 = vmatmul.mubr.msk.f32.vlgmr.msra.gmra.mrb[2].mxu1 %vm148_vm2, %v341_v53 }
 0x31c   :  { %9219 = vmatpush3.bf16.msra.mxu1 %v10406_v6  ;;  %8192 = vmatprep.mubr.msk.f32.mxu1 %vm10267_vm0, %v10268_v2 }
 0x31d   :  { %9220 = vmatprep.subr.bf16.mxu1 %v10266_v1 }
 0x320   :  { %9222 = vmatpush3.bf16.msra.mxu1 %v10409_v8 }
 0x321   :  { %9223 = vmatprep.subr.bf16.mxu1 %v10266_v1 }
 0x324   :  { %9225 = vmatpush3.bf16.msra.mxu1 %v10413_v11 }
 0x325   :  { %9226 = vmatprep.subr.bf16.mxu1 %v10266_v1 }
 0x328   :  { %9228 = vmatpush3.bf16.msra.mxu1 %v10417_v14 }
 0x329   :  { %9247 = vmatprep.subr.bf16.mxu1 %v10266_v1 }
 0x32b   :  { %8193 = vmatmul.mubr.msk.f32.vlgmr.msra.gmra.mrb[4].mxu1 %vm148_vm2, %v649_v56 }
 0x32c   :  { %8233 = vmatprep.mubr.msk.f32.mxu1 %vm10267_vm0, %v10268_v2  ;;  %9249 = vmatpush3.bf16.msra.mxu1 %v10511_v50 }
 0x32d   :  { %9250 = vmatprep.subr.bf16.mxu1 %v10266_v1 }
 0x330   :  { %9252 = vmatpush3.bf16.msra.mxu1 %v10515_v54 }
 0x331   :  { %9253 = vmatprep.subr.bf16.mxu1 %v10266_v1 }
 0x3de   :  { %v319_v57 = vpop.f32.mrb[0].mxu1 }
 0x3df   :  { %v8134_v58 = vpop.f32.mrb[1].mxu1  ;;  %v320_v60 = vadd.f32 %v10491_v59, %v319_v57 }
 0x3e1   :  { %v323_v61 = vmin.f32 %v320_v60, 20.0  ;;  %v543_v60 = vld [vmem:[#allocation8] sm:$0xff] }
 0x3e3   :  { %v324_v62 = vmul.f32 1.442695, %v323_v61  ;;  %v544_v61 = vld [vmem:[#allocation8 + $0x8] sm:$0xff] }
 0x3e5   :  { %9831 = vpow2.f32 %v324_v62  ;;  %v10531_v62 = vpack.c.bf16 %v544_v61, %v543_v60 }
 0x3ee   :  { %v420_v0 = vpop.f32.mrb[2].mxu1 }
 0x3ef   :  { %v421_v3 = vadd.f32 %v10497_v63, %v420_v0  ;;  %v8153_v4 = vpop.f32.mrb[3].mxu1  ;;  %v9832_v5 = vpop.eup %9831  ;;  %v545_v0 = vld [vmem:[#allocation8 + $0x10] sm:$0xff] }
 0x3f0   :  { %v334_v12 = vmul.f32 %v9832_v5, %v332_v9  ;;  %v330_v26 = vmul.f32 %v9832_v5, %v328_v25 }
 0x3f1   :  { %9833 = vtanh.f32 %v421_v3  ;;  %v424_v18 = vmul.f32 0.5, %v421_v3  ;;  %v546_v3 = vld [vmem:[#allocation8 + $0x18] sm:$0xff] }
 0x3f2   :  { %v10535_v5 = vpack.c.bf16 %v546_v3, %v545_v0 }
 0x3fb   :  { %v9834_v7 = vpop.eup %9833 }
 0x3fc   :  { %431 = vrot.lane.b32.xlu0 %v9834_v7, %s10269_s15 }
 0x3fe   :  { %v719_v10 = vpop.f32.mrb[4].mxu1 }
 0x3ff   :  { %v720_v13 = vadd.f32 %v10432_v17, %v719_v10  ;;  %v8194_v15 = vpop.f32.mrb[5].mxu1 }
 0x400   :  { %336 = vrot.lane.b32.xlu0 %v334_v12, %s10270_s16  ;;  %v7522_v12 = vld [vmem:[%s12008_s0 + $0x4] sm:$0x3] }
 0x401   :  { %9835 = vtanh.f32 %v720_v13  ;;  %v723_v20 = vmul.f32 0.5, %v720_v13 }
 0x402   :  { %9837 = vtanh.f32 %v424_v18 }
 0x403   :  { %9839 = vtanh.f32 %v723_v20 }
 0x40b   :  { %v9836_v16 = vpop.eup %9835 }
 0x40c   :  { %734 = vrot.lane.b32.xlu1 %v9836_v16, %s10269_s15  ;;  %v9838_v19 = vpop.eup %9837 }
 0x40d   :  { %v426_v21 = vadd.f32 1.0, %v9838_v19  ;;  %v9840_v29 = vpop.eup %9839 }
 0x40e   :  { %v725_v30 = vadd.f32 1.0, %v9840_v29 }
 0x40f   :  { %v427_v22 = vmul.f32 0.5, %v426_v21 }
 0x410   :  { %v726_v31 = vmul.f32 0.5, %v725_v30 }
 0x411   :  { %v429_v35 = vmul.f32 0.0, %v427_v22 }
 0x46e   :  { %v432_v23 = vpop.permute.xlu0 %431 }
 0x46f   :  { %v434_v24 = vmul.f32 %v432_v23, %v427_v22 }
 0x471   :  { %436 = vrot.lane.b32.xlu0 %v434_v24, %s10269_s15 }
 0x472   :  { %v337_v27 = vpop.permute.xlu0 %336 }
 0x473   :  { %v339_v28 = vadd.f32 %v337_v27, %v330_v26 }
 0x475   :  { %729 = vrot.lane.b32.xlu1 %v339_v28, %s10269_s15 }
 0x47e   :  { %v735_v32 = vpop.permute.xlu1 %734 }
 0x47f   :  { %v737_v33 = vmul.f32 %v735_v32, %v726_v31 }
 0x481   :  { %739 = vrot.lane.b32.xlu0 %v737_v33, %s10269_s15 }
 0x4e3   :  { %v437_v36 = vpop.permute.xlu0 %436 }
 0x4e4   :  { %v439_v38 = vadd.f32 %v437_v36, %v429_v35 }
 0x4e6   :  { %9841 = vtanh.f32 %v439_v38 }
 0x4e7   :  { %v730_v39 = vpop.permute.xlu1 %729 }
 0x4e8   :  { %v732_v41 = vmul.f32 %v730_v39, %v726_v31 }
 0x4f0   :  { %v9842_v40 = vpop.eup %9841 }
 0x4f1   :  { %442 = vrot.lane.b32.xlu1 %v9842_v40, %s10269_s15 }
 0x4f3   :  { %v740_v43 = vpop.permute.xlu0 %739 }
 0x4f4   :  { %v10508_v44 = vadd.f32 %v740_v43, %v732_v41 }
 0x4f6   :  { %9843 = vtanh.f32 %v10508_v44 }
 0x500   :  { %v9844_v53 = vpop.eup %9843 }
 0x501   :  { %745 = vrot.lane.b32.xlu0 %v9844_v53, %s10269_s15 }
 0x563   :  { %v443_v55 = vpop.permute.xlu1 %442 }
 0x564   :  { %v445_v56 = vmul.f32 %v443_v55, %v427_v22 }
 0x566   :  { %452 = vrot.lane.b32.xlu1 %v445_v56, %s10271_s17 }
 0x56a   :  { %842 = vrot.lane.b32.xlu1 %v445_v56, %s10270_s16 }
 0x56e   :  { %534 = vrot.lane.b32.xlu1 %v9834_v7, %s10271_s17 }
 0x572   :  { %530 = vrot.lane.b32.xlu1 %v439_v38, %s10270_s16 }
 0x573   :  { %v746_v57 = vpop.permute.xlu0 %745 }
 0x574   :  { %v748_v58 = vmul.f32 %v746_v57, %v726_v31 }
 0x576   :  { %750 = vrot.lane.b32.xlu0 %v748_v58, %s10271_s17 }
 0x57a   :  { %1134 = vrot.lane.b32.xlu0 %v748_v58, %s10270_s16 }
 0x57e   :  { %832 = vrot.lane.b32.xlu0 %v9836_v16, %s10271_s17  ;;  %v10586_v16 = vld [vmem:[%s12012_s4 + $0x1] ss:$0 sm:$0xff] }
 0x5d8   :  { %v453_v4 = vpop.permute.xlu1 %452 }
 0x5d9   :  { %8163 = vmatmul.mubr.msk.f32.vlgmr.msra.gmra.mrb[2].mxu0 %vm138_vm1, %v453_v4 }
 0x5da   :  { %9213 = vmatpush3.bf16.msra.mxu0 %v10531_v62  ;;  %8173 = vmatprep.mubr.msk.f32.mxu0 %vm10267_vm0, %v10268_v2 }
 0x5db   :  { %9214 = vmatprep.subr.bf16.mxu0 %v10266_v1 }
 0x5dc   :  { %v843_v9 = vpop.permute.xlu1 %842 }
 0x5de   :  { %9216 = vmatpush3.bf16.msra.mxu0 %v10535_v5 }
 0x5df   :  { %9229 = vmatprep.subr.bf16.mxu0 %v10266_v1 }
 0x5e0   :  { %v535_v27 = vpop.permute.xlu1 %534 }
 0x5e1   :  { %8174 = vmatmul.mubr.msk.f32.vlgmr.msra.gmra.mrb[4].mxu0 %vm138_vm1, %v453_v4 }
 0x5e2   :  { %9231 = vmatpush3.bf16.msra.mxu0 %v10437_v34  ;;  %8203 = vmatprep.mubr.msk.f32.mxu0 %vm10267_vm0, %v10268_v2 }
 0x5e3   :  { %9232 = vmatprep.subr.bf16.mxu0 %v10266_v1 }
 0x5e4   :  { %v531_v48 = vpop.permute.xlu1 %530 }
 0x5e6   :  { %9234 = vmatpush3.bf16.msra.mxu0 %v10441_v37 }
 0x5e7   :  { %9235 = vmatprep.subr.bf16.mxu0 %v10266_v1 }
 0x5e8   :  { %v751_v7 = vpop.permute.xlu0 %750 }
 0x5e9   :  { %8204 = vmatmul.mubr.msk.f32.vlgmr.msra.gmra.mrb[6].mxu0 %vm138_vm1, %v751_v7  ;;  %v845_v10 = vsel %vm138_vm1, %v751_v7, %v843_v9 }
 0x5ea   :  { %9237 = vmatpush3.bf16.msra.mxu0 %v10450_v42  ;;  %8222 = vmatprep.mubr.msk.f32.mxu0 %vm10267_vm0, %v10268_v2 }
 0x5eb   :  { %9238 = vmatprep.subr.bf16.mxu0 %v10266_v1 }
 0x5ec   :  { %v1135_v13 = vpop.permute.xlu0 %1134 }
 0x5ed   :  { %v1137_v15 = vsel %vm138_vm1, %v7522_v12, %v1135_v13 }
 0x5ee   :  { %9240 = vmatpush3.bf16.msra.mxu0 %v10454_v46 }
 0x5ef   :  { %9241 = vmatprep.subr.bf16.mxu0 %v10266_v1 }
 0x5f0   :  { %v833_v40 = vpop.permute.xlu0 %832 }
 0x5f2   :  { %9243 = vmatpush3.bf16.msra.mxu0 %v10460_v49 }
 0x5f3   :  { %9244 = vmatprep.subr.bf16.mxu0 %v10266_v1 }
 0x5f6   :  { %9246 = vmatpush3.bf16.msra.mxu0 %v10464_v52 }
 0x5f7   :  { %9259 = vmatprep.subr.bf16.mxu0 %v10266_v1 }
 0x5f9   :  { %8223 = vmatmul.mubr.msk.f32.vlgmr.msra.gmra.mrb[8].mxu0 %vm148_vm2, %v845_v10 }
 0x5fa   :  { %9261 = vmatpush3.bf16.msra.mxu0 %v10406_v6  ;;  %8263 = vmatprep.mubr.msk.f32.mxu0 %vm10267_vm0, %v10268_v2 }
 0x5fb   :  { %9262 = vmatprep.subr.bf16.mxu0 %v10266_v1 }
 0x5fe   :  { %9264 = vmatpush3.bf16.msra.mxu0 %v10409_v8 }
 0x5ff   :  { %9265 = vmatprep.subr.bf16.mxu0 %v10266_v1 }
 0x602   :  { %9267 = vmatpush3.bf16.msra.mxu0 %v10413_v11 }
 0x603   :  { %9268 = vmatprep.subr.bf16.mxu0 %v10266_v1 }
 0x606   :  { %9270 = vmatpush3.bf16.msra.mxu0 %v10417_v14 }
 0x607   :  { %9289 = vmatprep.subr.bf16.mxu0 %v10266_v1 }
 0x609   :  { %8264 = vmatmul.mubr.msk.f32.vlgmr.msra.gmra.mrb[10].mxu0 %vm148_vm2, %v1137_v15 }
 0x60a   :  { %9291 = vmatpush3.bf16.msra.mxu0 %v10511_v50  ;;  %8304 = vmatprep.mubr.msk.f32.mxu0 %vm10267_vm0, %v10268_v2 }
 0x60b   :  { %9292 = vmatprep.subr.bf16.mxu0 %v10266_v1 }
 0x60e   :  { %9294 = vmatpush3.bf16.msra.mxu0 %v10515_v54 }
 0x60f   :  { %9295 = vmatprep.subr.bf16.mxu0 %v10266_v1 }
 0x6ac   :  { %v522_v18 = vpop.f32.mrb[2].mxu0 }
 0x6ad   :  { %v523_v19 = vadd.f32 %v10586_v16, %v522_v18  ;;  %v8164_v20 = vpop.f32.mrb[3].mxu0 }
 0x6af   :  { %v526_v21 = vmin.f32 %v523_v19, 20.0 }
 0x6b1   :  { %v527_v22 = vmul.f32 1.442695, %v526_v21 }
 0x6b3   :  { %9845 = vpow2.f32 %v527_v22 }
 0x6b4   :  { %v10589_v23 = vpop.f32.mrb[4].mxu0 }
 0x6b5   :  { %v8175_v24 = vpop.f32.mrb[5].mxu0 }
 0x6bc   :  { %v820_v25 = vpop.f32.mrb[6].mxu0 }
 0x6bd   :  { %v9846_v26 = vpop.eup %9845  ;;  %v8205_v28 = vpop.f32.mrb[7].mxu0  ;;  %v821_v30 = vadd.f32 %v10491_v59, %v820_v25 }
 0x6be   :  { %v537_v29 = vmul.f32 %v9846_v26, %v535_v27  ;;  %v533_v51 = vmul.f32 %v9846_v26, %v531_v48 }
 0x6bf   :  { %v824_v31 = vmin.f32 %v821_v30, 20.0 }
 0x6c0   :  { %539 = vrot.lane.b32.xlu0 %v537_v29, %s10270_s16 }
 0x6c1   :  { %v825_v32 = vmul.f32 1.442695, %v824_v31 }
 0x6c3   :  { %9847 = vpow2.f32 %v825_v32 }
 0x6c4   :  { %828 = vrot.lane.b32.xlu0 %v10508_v44, %s10270_s16 }
 0x6cc   :  { %v915_v33 = vpop.f32.mrb[8].mxu0 }
 0x6cd   :  { %v916_v35 = vadd.f32 %v10497_v63, %v915_v33  ;;  %v8224_v36 = vpop.f32.mrb[9].mxu0  ;;  %v9848_v38 = vpop.eup %9847 }
 0x6ce   :  { %v835_v43 = vmul.f32 %v9848_v38, %v833_v40 }
 0x6cf   :  { %9849 = vtanh.f32 %v916_v35  ;;  %v919_v56 = vmul.f32 0.5, %v916_v35 }
 0x6d9   :  { %v9850_v39 = vpop.eup %9849 }
 0x6da   :  { %930 = vrot.lane.b32.xlu1 %v9850_v39, %s10269_s15 }
 0x6dc   :  { %v1207_v41 = vpop.f32.mrb[10].mxu0 }
 0x6dd   :  { %v1208_v45 = vadd.f32 %v10432_v17, %v1207_v41  ;;  %v8265_v47 = vpop.f32.mrb[11].mxu0  ;;  %v7528_v41 = vld [vmem:[%s12008_s0 + $0x6] sm:$0x3] }
 0x6de   :  { %837 = vrot.lane.b32.xlu1 %v835_v43, %s10270_s16 }
 0x6df   :  { %9851 = vtanh.f32 %v1208_v45  ;;  %v1211_v58 = vmul.f32 0.5, %v1208_v45 }
 0x6e0   :  { %9853 = vtanh.f32 %v919_v56 }
 0x6e1   :  { %9855 = vtanh.f32 %v1211_v58 }
 0x6e9   :  { %v9852_v44 = vpop.eup %9851 }
 0x6ea   :  { %1222 = vrot.lane.b32.xlu0 %v9852_v44, %s10269_s15  ;;  %v9854_v57 = vpop.eup %9853 }
 0x6eb   :  { %v921_v60 = vadd.f32 1.0, %v9854_v57  ;;  %v9856_v12 = vpop.eup %9855 }
 0x6ec   :  { %v1213_v13 = vadd.f32 1.0, %v9856_v12 }
 0x6ed   :  { %v922_v61 = vmul.f32 0.5, %v921_v60 }
 0x6ee   :  { %v1214_v15 = vmul.f32 0.5, %v1213_v13 }
 0x732   :  { %v540_v53 = vpop.permute.xlu0 %539 }
 0x733   :  { %v542_v55 = vadd.f32 %v540_v53, %v533_v51 }
 0x735   :  { %925 = vrot.lane.b32.xlu1 %v542_v55, %s10269_s15 }
 0x736   :  { %v829_v0 = vpop.permute.xlu0 %828 }
 0x737   :  { %v831_v7 = vmul.f32 %v9848_v38, %v829_v0 }
 0x74c   :  { %v931_v3 = vpop.permute.xlu1 %930 }
 0x74d   :  { %v933_v4 = vmul.f32 %v931_v3, %v922_v61 }
 0x74f   :  { %935 = vrot.lane.b32.xlu0 %v933_v4, %s10269_s15 }
 0x750   :  { %v838_v9 = vpop.permute.xlu1 %837 }
 0x751   :  { %v840_v10 = vadd.f32 %v838_v9, %v831_v7 }
 0x753   :  { %1217 = vrot.lane.b32.xlu1 %v840_v10, %s10269_s15 }
 0x75c   :  { %v1223_v18 = vpop.permute.xlu0 %1222 }
 0x75d   :  { %v1225_v19 = vmul.f32 %v1223_v18, %v1214_v15 }
 0x75f   :  { %1227 = vrot.lane.b32.xlu0 %v1225_v19, %s10269_s15 }
 0x7a7   :  { %v926_v20 = vpop.permute.xlu1 %925 }
 0x7a8   :  { %v928_v21 = vmul.f32 %v926_v20, %v922_v61 }
 0x7c1   :  { %v936_v22 = vpop.permute.xlu0 %935 }
 0x7c2   :  { %v938_v24 = vadd.f32 %v936_v22, %v928_v21 }
 0x7c4   :  { %9857 = vtanh.f32 %v938_v24 }
 0x7c5   :  { %v1218_v25 = vpop.permute.xlu1 %1217 }
 0x7c6   :  { %v1220_v27 = vmul.f32 %v1218_v25, %v1214_v15 }
 0x7ce   :  { %v9858_v26 = vpop.eup %9857 }
 0x7cf   :  { %941 = vrot.lane.b32.xlu1 %v9858_v26, %s10269_s15 }
 0x7d1   :  { %v1228_v28 = vpop.permute.xlu0 %1227 }
 0x7d2   :  { %v10605_v29 = vadd.f32 %v1228_v28, %v1220_v27 }
 0x7d4   :  { %9859 = vtanh.f32 %v10605_v29 }
 0x7de   :  { %v9860_v30 = vpop.eup %9859 }
 0x7df   :  { %1233 = vrot.lane.b32.xlu0 %v9860_v30, %s10269_s15 }
 0x841   :  { %v942_v31 = vpop.permute.xlu1 %941 }
 0x842   :  { %v944_v32 = vmul.f32 %v942_v31, %v922_v61 }
 0x844   :  { %946 = vrot.lane.b32.xlu1 %v944_v32, %s10271_s17 }
 0x848   :  { %1330 = vrot.lane.b32.xlu1 %v944_v32, %s10270_s16 }
 0x84c   :  { %1028 = vrot.lane.b32.xlu1 %v9850_v39, %s10271_s17 }
 0x850   :  { %1024 = vrot.lane.b32.xlu1 %v938_v24, %s10270_s16 }
 0x851   :  { %v1234_v33 = vpop.permute.xlu0 %1233 }
 0x852   :  { %v1236_v35 = vmul.f32 %v1234_v33, %v1214_v15 }
 0x854   :  { %1238 = vrot.lane.b32.xlu0 %v1236_v35, %s10271_s17 }
 0x858   :  { %1622 = vrot.lane.b32.xlu0 %v1236_v35, %s10270_s16 }
 0x85c   :  { %1320 = vrot.lane.b32.xlu0 %v9852_v44, %s10271_s17 }
 0x8b6   :  { %v947_v36 = vpop.permute.xlu1 %946 }
 0x8b7   :  { %8234 = vmatmul.mubr.msk.f32.vlgmr.msra.gmra.mrb[6].mxu1 %vm138_vm1, %v947_v36 }
 0x8b8   :  { %9255 = vmatpush3.bf16.msra.mxu1 %v10531_v62  ;;  %8244 = vmatprep.mubr.msk.f32.mxu1 %vm10267_vm0, %v10268_v2 }
 0x8b9   :  { %9256 = vmatprep.subr.bf16.mxu1 %v10266_v1 }
 0x8ba   :  { %v1331_v39 = vpop.permute.xlu1 %1330 }
 0x8bc   :  { %9258 = vmatpush3.bf16.msra.mxu1 %v10535_v5 }
 0x8bd   :  { %9271 = vmatprep.subr.bf16.mxu1 %v10266_v1 }
 0x8be   :  { %v1029_v60 = vpop.permute.xlu1 %1028 }
 0x8bf   :  { %8245 = vmatmul.mubr.msk.f32.vlgmr.msra.gmra.mrb[8].mxu1 %vm138_vm1, %v947_v36 }
 0x8c0   :  { %9273 = vmatpush3.bf16.msra.mxu1 %v10437_v34  ;;  %8274 = vmatprep.mubr.msk.f32.mxu1 %vm10267_vm0, %v10268_v2 }
 0x8c1   :  { %9274 = vmatprep.subr.bf16.mxu1 %v10266_v1 }
 0x8c2   :  { %v1025_v25 = vpop.permute.xlu1 %1024 }
 0x8c4   :  { %9276 = vmatpush3.bf16.msra.mxu1 %v10441_v37 }
 0x8c5   :  { %9277 = vmatprep.subr.bf16.mxu1 %v10266_v1 }
 0x8c6   :  { %v1239_v38 = vpop.permute.xlu0 %1238 }
 0x8c7   :  { %8275 = vmatmul.mubr.msk.f32.vlgmr.msra.gmra.mrb[10].mxu1 %vm138_vm1, %v1239_v38  ;;  %v1333_v40 = vsel %vm138_vm1, %v1239_v38, %v1331_v39 }
 0x8c8   :  { %9279 = vmatpush3.bf16.msra.mxu1 %v10450_v42  ;;  %8293 = vmatprep.mubr.msk.f32.mxu1 %vm10267_vm0, %v10268_v2 }
 0x8c9   :  { %9280 = vmatprep.subr.bf16.mxu1 %v10266_v1 }
 0x8ca   :  { %v1623_v43 = vpop.permute.xlu0 %1622 }
 0x8cb   :  { %v1625_v45 = vsel %vm138_vm1, %v7528_v41, %v1623_v43 }
 0x8cc   :  { %9282 = vmatpush3.bf16.msra.mxu1 %v10454_v46 }
 0x8cd   :  { %9283 = vmatprep.subr.bf16.mxu1 %v10266_v1 }
 0x8ce   :  { %v1321_v18 = vpop.permute.xlu0 %1320 }
 0x8d0   :  { %9285 = vmatpush3.bf16.msra.mxu1 %v10460_v49 }
 0x8d1   :  { %9286 = vmatprep.subr.bf16.mxu1 %v10266_v1 }
 0x8d4   :  { %9288 = vmatpush3.bf16.msra.mxu1 %v10464_v52 }
 0x8d5   :  { %9301 = vmatprep.subr.bf16.mxu1 %v10266_v1 }
 0x8d7   :  { %8294 = vmatmul.mubr.msk.f32.vlgmr.msra.gmra.mrb[12].mxu1 %vm148_vm2, %v1333_v40 }
 0x8d8   :  { %9303 = vmatpush3.bf16.msra.mxu1 %v10406_v6  ;;  %8334 = vmatprep.mubr.msk.f32.mxu1 %vm10267_vm0, %v10268_v2 }
 0x8d9   :  { %9304 = vmatprep.subr.bf16.mxu1 %v10266_v1 }
 0x8dc   :  { %9306 = vmatpush3.bf16.msra.mxu1 %v10409_v8 }
 0x8dd   :  { %9307 = vmatprep.subr.bf16.mxu1 %v10266_v1 }
 0x8e0   :  { %9309 = vmatpush3.bf16.msra.mxu1 %v10413_v11 }
 0x8e1   :  { %9310 = vmatprep.subr.bf16.mxu1 %v10266_v1 }
 0x8e4   :  { %9312 = vmatpush3.bf16.msra.mxu1 %v10417_v14 }
 0x8e5   :  { %9331 = vmatprep.subr.bf16.mxu1 %v10266_v1 }
 0x8e7   :  { %8335 = vmatmul.mubr.msk.f32.vlgmr.msra.gmra.mrb[14].mxu1 %vm148_vm2, %v1625_v45 }
 0x8e8   :  { %9333 = vmatpush3.bf16.msra.mxu1 %v10511_v50  ;;  %8375 = vmatprep.mubr.msk.f32.mxu1 %vm10267_vm0, %v10268_v2 }
 0x8e9   :  { %9334 = vmatprep.subr.bf16.mxu1 %v10266_v1 }
 0x8ec   :  { %9336 = vmatpush3.bf16.msra.mxu1 %v10515_v54 }
 0x8ed   :  { %9337 = vmatprep.subr.bf16.mxu1 %v10266_v1 }
 0x98a   :  { %v1016_v47 = vpop.f32.mrb[6].mxu1 }
 0x98b   :  { %v1017_v44 = vadd.f32 %v10586_v16, %v1016_v47  ;;  %v8235_v48 = vpop.f32.mrb[7].mxu1 }
 0x98d   :  { %v1020_v51 = vmin.f32 %v1017_v44, 20.0 }
 0x98f   :  { %v1021_v53 = vmul.f32 1.442695, %v1020_v51 }
 0x991   :  { %9861 = vpow2.f32 %v1021_v53 }
 0x992   :  { %v10665_v55 = vpop.f32.mrb[8].mxu1 }
 0x993   :  { %v8246_v56 = vpop.f32.mrb[9].mxu1 }
 0x99a   :  { %v1308_v57 = vpop.f32.mrb[10].mxu1 }
 0x99b   :  { %v9862_v58 = vpop.eup %9861  ;;  %v8276_v61 = vpop.f32.mrb[11].mxu1  ;;  %v1309_v3 = vadd.f32 %v10491_v59, %v1308_v57 }
 0x99c   :  { %v1031_v0 = vmul.f32 %v9862_v58, %v1029_v60  ;;  %v1027_v26 = vmul.f32 %v9862_v58, %v1025_v25 }
 0x99d   :  { %v1312_v4 = vmin.f32 %v1309_v3, 20.0 }
 0x99e   :  { %1033 = vrot.lane.b32.xlu0 %v1031_v0, %s10270_s16 }
 0x99f   :  { %v1313_v7 = vmul.f32 1.442695, %v1312_v4 }
 0x9a1   :  { %9863 = vpow2.f32 %v1313_v7 }
 0x9a2   :  { %1316 = vrot.lane.b32.xlu0 %v10605_v29, %s10270_s16 }
 0x9aa   :  { %v1403_v9 = vpop.f32.mrb[12].mxu1 }
 0x9ab   :  { %v1404_v10 = vadd.f32 %v10497_v63, %v1403_v9  ;;  %v8295_v12 = vpop.f32.mrb[13].mxu1  ;;  %v9864_v13 = vpop.eup %9863 }
 0x9ac   :  { %v1323_v20 = vmul.f32 %v9864_v13, %v1321_v18 }
 0x9ad   :  { %9865 = vtanh.f32 %v1404_v10  ;;  %v1407_v29 = vmul.f32 0.5, %v1404_v10 }
 0x9b7   :  { %v9866_v15 = vpop.eup %9865 }
 0x9b8   :  { %1418 = vrot.lane.b32.xlu1 %v9866_v15, %s10269_s15 }
 0x9ba   :  { %v1695_v19 = vpop.f32.mrb[14].mxu1 }
 0x9bb   :  { %v1696_v21 = vadd.f32 %v10432_v17, %v1695_v19  ;;  %v8336_v22 = vpop.f32.mrb[15].mxu1 }
 0x9bc   :  { %1325 = vrot.lane.b32.xlu1 %v1323_v20, %s10270_s16  ;;  %v7534_v20 = vld [vmem:[%s12008_s0 + $0x8] sm:$0x3] }
 0x9bd   :  { %9867 = vtanh.f32 %v1696_v21  ;;  %v1699_v31 = vmul.f32 0.5, %v1696_v21 }
 0x9be   :  { %9869 = vtanh.f32 %v1407_v29 }
 0x9bf   :  { %9871 = vtanh.f32 %v1699_v31 }
 0x9c7   :  { %v9868_v24 = vpop.eup %9867 }
 0x9c8   :  { %1710 = vrot.lane.b32.xlu0 %v9868_v24, %s10269_s15  ;;  %v9870_v30 = vpop.eup %9869 }
 0x9c9   :  { %v1409_v32 = vadd.f32 1.0, %v9870_v30  ;;  %v9872_v43 = vpop.eup %9871 }
 0x9ca   :  { %v1701_v45 = vadd.f32 1.0, %v9872_v43 }
 0x9cb   :  { %v1410_v33 = vmul.f32 0.5, %v1409_v32 }
 0x9cc   :  { %v1702_v47 = vmul.f32 0.5, %v1701_v45 }
 0xa10   :  { %v1034_v27 = vpop.permute.xlu0 %1033 }
 0xa11   :  { %v1036_v28 = vadd.f32 %v1034_v27, %v1027_v26 }
 0xa13   :  { %1413 = vrot.lane.b32.xlu1 %v1036_v28, %s10269_s15 }
 0xa14   :  { %v1317_v35 = vpop.permute.xlu0 %1316 }
 0xa15   :  { %v1319_v39 = vmul.f32 %v9864_v13, %v1317_v35 }
 0xa2a   :  { %v1419_v36 = vpop.permute.xlu1 %1418 }
 0xa2b   :  { %v1421_v38 = vmul.f32 %v1419_v36, %v1410_v33 }
 0xa2d   :  { %1423 = vrot.lane.b32.xlu0 %v1421_v38, %s10269_s15 }
 0xa2e   :  { %v1326_v40 = vpop.permute.xlu1 %1325 }
 0xa2f   :  { %v1328_v41 = vadd.f32 %v1326_v40, %v1319_v39 }
 0xa31   :  { %1705 = vrot.lane.b32.xlu1 %v1328_v41, %s10269_s15 }
 0xa3a   :  { %v1711_v44 = vpop.permute.xlu0 %1710 }
 0xa3b   :  { %v1713_v48 = vmul.f32 %v1711_v44, %v1702_v47 }
 0xa3d   :  { %1715 = vrot.lane.b32.xlu0 %v1713_v48, %s10269_s15 }
 0xa85   :  { %v1414_v51 = vpop.permute.xlu1 %1413 }
 0xa86   :  { %v1416_v53 = vmul.f32 %v1414_v51, %v1410_v33 }
 0xa9f   :  { %v1424_v56 = vpop.permute.xlu0 %1423 }
 0xaa0   :  { %v1426_v57 = vadd.f32 %v1424_v56, %v1416_v53 }
 0xaa2   :  { %9873 = vtanh.f32 %v1426_v57 }
 0xaa3   :  { %v1706_v58 = vpop.permute.xlu1 %1705 }
 0xaa4   :  { %v1708_v61 = vmul.f32 %v1706_v58, %v1702_v47 }
 0xaac   :  { %v9874_v60 = vpop.eup %9873 }
 0xaad   :  { %1429 = vrot.lane.b32.xlu1 %v9874_v60, %s10269_s15 }
 0xaaf   :  { %v1716_v0 = vpop.permute.xlu0 %1715 }
 0xab0   :  { %v10681_v3 = vadd.f32 %v1716_v0, %v1708_v61 }
 0xab2   :  { %9875 = vtanh.f32 %v10681_v3 }
 0xabc   :  { %v9876_v4 = vpop.eup %9875 }
 0xabd   :  { %1721 = vrot.lane.b32.xlu0 %v9876_v4, %s10269_s15 }
 0xb1f   :  { %v1430_v7 = vpop.permute.xlu1 %1429 }
 0xb20   :  { %v1432_v9 = vmul.f32 %v1430_v7, %v1410_v33 }
 0xb22   :  { %1434 = vrot.lane.b32.xlu1 %v1432_v9, %s10271_s17 }
 0xb26   :  { %1818 = vrot.lane.b32.xlu1 %v1432_v9, %s10270_s16 }
 0xb2a   :  { %1516 = vrot.lane.b32.xlu1 %v9866_v15, %s10271_s17 }
 0xb2e   :  { %1512 = vrot.lane.b32.xlu1 %v1426_v57, %s10270_s16 }
 0xb2f   :  { %v1722_v10 = vpop.permute.xlu0 %1721 }
 0xb30   :  { %v1724_v12 = vmul.f32 %v1722_v10, %v1702_v47 }
 0xb32   :  { %1726 = vrot.lane.b32.xlu0 %v1724_v12, %s10271_s17 }
 0xb36   :  { %2110 = vrot.lane.b32.xlu0 %v1724_v12, %s10270_s16 }
 0xb3a   :  { %1808 = vrot.lane.b32.xlu0 %v9868_v24, %s10271_s17 }
 0xb94   :  { %v1435_v13 = vpop.permute.xlu1 %1434 }
 0xb95   :  { %8305 = vmatmul.mubr.msk.f32.vlgmr.msra.gmra.mrb[12].mxu0 %vm138_vm1, %v1435_v13 }
 0xb96   :  { %9297 = vmatpush3.bf16.msra.mxu0 %v10531_v62  ;;  %8315 = vmatprep.mubr.msk.f32.mxu0 %vm10267_vm0, %v10268_v2 }
 0xb97   :  { %9298 = vmatprep.subr.bf16.mxu0 %v10266_v1 }
 0xb98   :  { %v1819_v18 = vpop.permute.xlu1 %1818 }
 0xb9a   :  { %9300 = vmatpush3.bf16.msra.mxu0 %v10535_v5 }
 0xb9b   :  { %9313 = vmatprep.subr.bf16.mxu0 %v10266_v1 }
 0xb9c   :  { %v1517_v33 = vpop.permute.xlu1 %1516 }
 0xb9d   :  { %8316 = vmatmul.mubr.msk.f32.vlgmr.msra.gmra.mrb[14].mxu0 %vm138_vm1, %v1435_v13 }
 0xb9e   :  { %9315 = vmatpush3.bf16.msra.mxu0 %v10437_v34  ;;  %8345 = vmatprep.mubr.msk.f32.mxu0 %vm10267_vm0, %v10268_v2 }
 0xb9f   :  { %9316 = vmatprep.subr.bf16.mxu0 %v10266_v1 }
 0xba2   :  { %9318 = vmatpush3.bf16.msra.mxu0 %v10441_v37 }
 0xba3   :  { %9319 = vmatprep.subr.bf16.mxu0 %v10266_v1 }
 0xba4   :  { %v1727_v15 = vpop.permute.xlu0 %1726 }
 0xba5   :  { %8346 = vmatmul.mubr.msk.f32.vlgmr.msra.gmra.mrb[16].mxu0 %vm138_vm1, %v1727_v15  ;;  %v1821_v19 = vsel %vm138_vm1, %v1727_v15, %v1819_v18 }
 0xba6   :  { %9321 = vmatpush3.bf16.msra.mxu0 %v10450_v42  ;;  %8364 = vmatprep.mubr.msk.f32.mxu0 %vm10267_vm0, %v10268_v2 }
 0xba7   :  { %9322 = vmatprep.subr.bf16.mxu0 %v10266_v1 }
 0xba8   :  { %v2111_v21 = vpop.permute.xlu0 %2110 }
 0xba9   :  { %v2113_v22 = vsel %vm138_vm1, %v7534_v20, %v2111_v21 }
 0xbaa   :  { %9324 = vmatpush3.bf16.msra.mxu0 %v10454_v46 }
 0xbab   :  { %9325 = vmatprep.subr.bf16.mxu0 %v10266_v1 }
 0xbac   :  { %v1809_v48 = vpop.permute.xlu0 %1808 }
 0xbae   :  { %9327 = vmatpush3.bf16.msra.mxu0 %v10460_v49 }
 0xbaf   :  { %9328 = vmatprep.subr.bf16.mxu0 %v10266_v1 }
 0xbb2   :  { %9330 = vmatpush3.bf16.msra.mxu0 %v10464_v52 }
 0xbb3   :  { %9343 = vmatprep.subr.bf16.mxu0 %v10266_v1 }
 0xbb5   :  { %8365 = vmatmul.mubr.msk.f32.vlgmr.msra.gmra.mrb[18].mxu0 %vm148_vm2, %v1821_v19 }
 0xbb6   :  { %9345 = vmatpush3.bf16.msra.mxu0 %v10406_v6  ;;  %8405 = vmatprep.mubr.msk.f32.mxu0 %vm10267_vm0, %v10268_v2 }
 0xbb7   :  { %9346 = vmatprep.subr.bf16.mxu0 %v10266_v1 }
 0xbba   :  { %9348 = vmatpush3.bf16.msra.mxu0 %v10409_v8 }
 0xbbb   :  { %9349 = vmatprep.subr.bf16.mxu0 %v10266_v1 }
 0xbbe   :  { %9351 = vmatpush3.bf16.msra.mxu0 %v10413_v11 }
 0xbbf   :  { %9352 = vmatprep.subr.bf16.mxu0 %v10266_v1 }
 0xbc2   :  { %9354 = vmatpush3.bf16.msra.mxu0 %v10417_v14 }
 0xbc3   :  { %9373 = vmatprep.subr.bf16.mxu0 %v10266_v1 }
 0xbc5   :  { %8406 = vmatmul.mubr.msk.f32.vlgmr.msra.gmra.mrb[20].mxu0 %vm148_vm2, %v2113_v22 }
 0xbc6   :  { %9375 = vmatpush3.bf16.msra.mxu0 %v10511_v50  ;;  %8446 = vmatprep.mubr.msk.f32.mxu0 %vm10267_vm0, %v10268_v2 }
 0xbc7   :  { %9376 = vmatprep.subr.bf16.mxu0 %v10266_v1 }
 0xbca   :  { %9378 = vmatpush3.bf16.msra.mxu0 %v10515_v54 }
 0xbcb   :  { %9379 = vmatprep.subr.bf16.mxu0 %v10266_v1 }
 0xc68   :  { %v1504_v24 = vpop.f32.mrb[12].mxu0 }
 0xc69   :  { %v1505_v25 = vadd.f32 %v10586_v16, %v1504_v24  ;;  %v8306_v26 = vpop.f32.mrb[13].mxu0 }
 0xc6b   :  { %v1508_v27 = vmin.f32 %v1505_v25, 20.0 }
 0xc6d   :  { %v1509_v28 = vmul.f32 1.442695, %v1508_v27 }
 0xc6f   :  { %9877 = vpow2.f32 %v1509_v28 }
 0xc70   :  { %v10741_v29 = vpop.f32.mrb[14].mxu0 }
 0xc71   :  { %v8317_v30 = vpop.f32.mrb[15].mxu0 }
 0xc78   :  { %v1796_v31 = vpop.f32.mrb[16].mxu0 }
 0xc79   :  { %v9878_v32 = vpop.eup %9877  ;;  %v8347_v35 = vpop.f32.mrb[17].mxu0  ;;  %v1797_v38 = vadd.f32 %v10491_v59, %v1796_v31 }
 0xc7a   :  { %v1519_v36 = vmul.f32 %v9878_v32, %v1517_v33 }
 0xc7b   :  { %v1800_v39 = vmin.f32 %v1797_v38, 20.0 }
 0xc7c   :  { %1521 = vrot.lane.b32.xlu0 %v1519_v36, %s10270_s16 }
 0xc7d   :  { %v1801_v40 = vmul.f32 1.442695, %v1800_v39 }
 0xc7f   :  { %9879 = vpow2.f32 %v1801_v40 }
 0xc80   :  { %1804 = vrot.lane.b32.xlu0 %v10681_v3, %s10270_s16 }
 0xc88   :  { %v1891_v41 = vpop.f32.mrb[18].mxu0 }
 0xc89   :  { %v1892_v43 = vadd.f32 %v10497_v63, %v1891_v41  ;;  %v8366_v45 = vpop.f32.mrb[19].mxu0  ;;  %v9880_v47 = vpop.eup %9879 }
 0xc8a   :  { %v1811_v53 = vmul.f32 %v9880_v47, %v1809_v48  ;;  %v1513_v63 = vpop.permute.xlu1 %1512  ;;  %v7540_v48 = vld [vmem:[%s12008_s0 + $0xa] sm:$0x3] }
 0xc8b   :  { %9881 = vtanh.f32 %v1892_v43  ;;  %v1515_v58 = vmul.f32 %v9878_v32, %v1513_v63  ;;  %v1895_v0 = vmul.f32 0.5, %v1892_v43 }
 0xc95   :  { %v9882_v44 = vpop.eup %9881 }
 0xc96   :  { %1906 = vrot.lane.b32.xlu1 %v9882_v44, %s10269_s15 }
 0xc98   :  { %v2183_v51 = vpop.f32.mrb[20].mxu0 }
 0xc99   :  { %v2184_v59 = vadd.f32 %v10432_v17, %v2183_v51  ;;  %v8407_v56 = vpop.f32.mrb[21].mxu0 }
 0xc9a   :  { %1813 = vrot.lane.b32.xlu1 %v1811_v53, %s10270_s16 }
 0xc9b   :  { %9883 = vtanh.f32 %v2184_v59  ;;  %v2187_v4 = vmul.f32 0.5, %v2184_v59 }
 0xc9c   :  { %9885 = vtanh.f32 %v1895_v0 }
 0xc9d   :  { %9887 = vtanh.f32 %v2187_v4 }
 0xca5   :  { %v9884_v57 = vpop.eup %9883 }
 0xca6   :  { %2198 = vrot.lane.b32.xlu0 %v9884_v57, %s10269_s15  ;;  %v9886_v3 = vpop.eup %9885 }
 0xca7   :  { %v1897_v7 = vadd.f32 1.0, %v9886_v3  ;;  %v9888_v19 = vpop.eup %9887 }
 0xca8   :  { %v2189_v20 = vadd.f32 1.0, %v9888_v19 }
 0xca9   :  { %v1898_v17 = vmul.f32 0.5, %v1897_v7 }
 0xcaa   :  { %v2190_v21 = vmul.f32 0.5, %v2189_v20 }
 0xcee   :  { %v1522_v60 = vpop.permute.xlu0 %1521 }
 0xcef   :  { %v1524_v61 = vadd.f32 %v1522_v60, %v1515_v58 }
 0xcf1   :  { %1901 = vrot.lane.b32.xlu1 %v1524_v61, %s10269_s15 }
 0xcf2   :  { %v1805_v9 = vpop.permute.xlu0 %1804 }
 0xcf3   :  { %v1807_v13 = vmul.f32 %v9880_v47, %v1805_v9  ;;  %v10823_v9 = vld [vmem:[%s12012_s4] ss:$0 sm:$0xff] }
 0xd08   :  { %v1907_v10 = vpop.permute.xlu1 %1906 }
 0xd09   :  { %v1909_v12 = vmul.f32 %v1907_v10, %v1898_v17 }
 0xd0b   :  { %1911 = vrot.lane.b32.xlu0 %v1909_v12, %s10269_s15 }
 0xd0c   :  { %v1814_v15 = vpop.permute.xlu1 %1813 }
 0xd0d   :  { %v1816_v18 = vadd.f32 %v1814_v15, %v1807_v13  ;;  %v10831_v15 = vld [vmem:[%s12010_s2 + $0x1] ss:$0 sm:$0xff] }
 0xd0f   :  { %2193 = vrot.lane.b32.xlu1 %v1816_v18, %s10269_s15 }
 0xd18   :  { %v2199_v22 = vpop.permute.xlu0 %2198 }
 0xd19   :  { %v2201_v24 = vmul.f32 %v2199_v22, %v2190_v21 }
 0xd1b   :  { %2203 = vrot.lane.b32.xlu0 %v2201_v24, %s10269_s15 }
 0xd63   :  { %v1902_v25 = vpop.permute.xlu1 %1901 }
 0xd64   :  { %v1904_v26 = vmul.f32 %v1902_v25, %v1898_v17 }
 0xd7d   :  { %v1912_v27 = vpop.permute.xlu0 %1911 }
 0xd7e   :  { %v1914_v28 = vadd.f32 %v1912_v27, %v1904_v26  ;;  %v10838_v26 = vld [vmem:[%s12010_s2] ss:$0 sm:$0xff] }
 0xd80   :  { %9889 = vtanh.f32 %v1914_v28 }
 0xd81   :  { %v2194_v30 = vpop.permute.xlu1 %2193 }
 0xd82   :  { %v2196_v32 = vmul.f32 %v2194_v30, %v2190_v21 }
 0xd8a   :  { %v9890_v31 = vpop.eup %9889 }
 0xd8b   :  { %1917 = vrot.lane.b32.xlu1 %v9890_v31, %s10269_s15 }
 0xd8d   :  { %v2204_v33 = vpop.permute.xlu0 %2203 }
 0xd8e   :  { %v10757_v35 = vadd.f32 %v2204_v33, %v2196_v32 }
 0xd90   :  { %9891 = vtanh.f32 %v10757_v35 }
 0xd9a   :  { %v9892_v36 = vpop.eup %9891 }
 0xd9b   :  { %2209 = vrot.lane.b32.xlu0 %v9892_v36, %s10269_s15 }
 0xdfd   :  { %v1918_v38 = vpop.permute.xlu1 %1917 }
 0xdfe   :  { %v1920_v39 = vmul.f32 %v1918_v38, %v1898_v17 }
 0xe00   :  { %1922 = vrot.lane.b32.xlu1 %v1920_v39, %s10271_s17 }
 0xe04   :  { %2306 = vrot.lane.b32.xlu1 %v1920_v39, %s10270_s16 }
 0xe08   :  { %2004 = vrot.lane.b32.xlu1 %v9882_v44, %s10271_s17 }
 0xe0c   :  { %2000 = vrot.lane.b32.xlu1 %v1914_v28, %s10270_s16 }
 0xe0d   :  { %v2210_v40 = vpop.permute.xlu0 %2209 }
 0xe0e   :  { %v2212_v41 = vmul.f32 %v2210_v40, %v2190_v21 }
 0xe10   :  { %2214 = vrot.lane.b32.xlu0 %v2212_v41, %s10271_s17 }
 0xe14   :  { %2598 = vrot.lane.b32.xlu0 %v2212_v41, %s10270_s16 }
 0xe18   :  { %2296 = vrot.lane.b32.xlu0 %v9884_v57, %s10271_s17 }
 0xe72   :  { %v1923_v43 = vpop.permute.xlu1 %1922 }
 0xe73   :  { %8376 = vmatmul.mubr.msk.f32.vlgmr.msra.gmra.mrb[16].mxu1 %vm138_vm1, %v1923_v43 }
 0xe74   :  { %9339 = vmatpush3.bf16.msra.mxu1 %v10531_v62  ;;  %8386 = vmatprep.mubr.msk.f32.mxu1 %vm10267_vm0, %v10268_v2 }
 0xe75   :  { %9340 = vmatprep.subr.bf16.mxu1 %v10266_v1 }
 0xe76   :  { %v2307_v47 = vpop.permute.xlu1 %2306 }
 0xe78   :  { %9342 = vmatpush3.bf16.msra.mxu1 %v10535_v5 }
 0xe79   :  { %9355 = vmatprep.subr.bf16.mxu1 %v10266_v1 }
 0xe7a   :  { %v2005_v4 = vpop.permute.xlu1 %2004 }
 0xe7b   :  { %8387 = vmatmul.mubr.msk.f32.vlgmr.msra.gmra.mrb[18].mxu1 %vm138_vm1, %v1923_v43 }
 0xe7c   :  { %9357 = vmatpush3.bf16.msra.mxu1 %v10437_v34  ;;  %8416 = vmatprep.mubr.msk.f32.mxu1 %vm10267_vm0, %v10268_v2 }
 0xe7d   :  { %9358 = vmatprep.subr.bf16.mxu1 %v10266_v1 }
 0xe7e   :  { %v2001_v31 = vpop.permute.xlu1 %2000 }
 0xe80   :  { %9360 = vmatpush3.bf16.msra.mxu1 %v10441_v37 }
 0xe81   :  { %9361 = vmatprep.subr.bf16.mxu1 %v10266_v1 }
 0xe82   :  { %v2215_v45 = vpop.permute.xlu0 %2214 }
 0xe83   :  { %8417 = vmatmul.mubr.msk.f32.vlgmr.msra.gmra.mrb[20].mxu1 %vm138_vm1, %v2215_v45  ;;  %v2309_v44 = vsel %vm138_vm1, %v2215_v45, %v2307_v47 }
 0xe84   :  { %9363 = vmatpush3.bf16.msra.mxu1 %v10450_v42  ;;  %8435 = vmatprep.mubr.msk.f32.mxu1 %vm10267_vm0, %v10268_v2 }
 0xe85   :  { %9364 = vmatprep.subr.bf16.mxu1 %v10266_v1 }
 0xe86   :  { %v2599_v51 = vpop.permute.xlu0 %2598 }
 0xe87   :  { %v2601_v53 = vsel %vm138_vm1, %v7540_v48, %v2599_v51 }
 0xe88   :  { %9366 = vmatpush3.bf16.msra.mxu1 %v10454_v46 }
 0xe89   :  { %9367 = vmatprep.subr.bf16.mxu1 %v10266_v1 }
 0xe8a   :  { %v2297_v22 = vpop.permute.xlu0 %2296 }
 0xe8c   :  { %9369 = vmatpush3.bf16.msra.mxu1 %v10460_v49 }
 0xe8d   :  { %9370 = vmatprep.subr.bf16.mxu1 %v10266_v1 }
 0xe90   :  { %9372 = vmatpush3.bf16.msra.mxu1 %v10464_v52 }
 0xe91   :  { %9385 = vmatprep.subr.bf16.mxu1 %v10266_v1 }
 0xe93   :  { %8436 = vmatmul.mubr.msk.f32.vlgmr.msra.gmra.mrb[22].mxu1 %vm148_vm2, %v2309_v44 }
 0xe94   :  { %9387 = vmatpush3.bf16.msra.mxu1 %v10406_v6  ;;  %8476 = vmatprep.mubr.msk.f32.mxu1 %vm10267_vm0, %v10268_v2 }
 0xe95   :  { %9388 = vmatprep.subr.bf16.mxu1 %v10266_v1 }
 0xe98   :  { %9390 = vmatpush3.bf16.msra.mxu1 %v10409_v8 }
 0xe99   :  { %9391 = vmatprep.subr.bf16.mxu1 %v10266_v1 }
 0xe9c   :  { %9393 = vmatpush3.bf16.msra.mxu1 %v10413_v11 }
 0xe9d   :  { %9394 = vmatprep.subr.bf16.mxu1 %v10266_v1 }
 0xea0   :  { %9396 = vmatpush3.bf16.msra.mxu1 %v10417_v14 }
 0xea1   :  { %9415 = vmatprep.subr.bf16.mxu1 %v10266_v1 }
 0xea3   :  { %8477 = vmatmul.mubr.msk.f32.vlgmr.msra.gmra.mrb[24].mxu1 %vm148_vm2, %v2601_v53 }
 0xea4   :  { %9417 = vmatpush3.bf16.msra.mxu1 %v10511_v50  ;;  %8517 = vmatprep.mubr.msk.f32.mxu1 %vm10267_vm0, %v10268_v2 }
 0xea5   :  { %9418 = vmatprep.subr.bf16.mxu1 %v10266_v1 }
 0xea8   :  { %9420 = vmatpush3.bf16.msra.mxu1 %v10515_v54 }
 0xea9   :  { %9421 = vmatprep.subr.bf16.mxu1 %v10266_v1 }
 0xf46   :  { %v1992_v59 = vpop.f32.mrb[16].mxu1 }
 0xf47   :  { %v1993_v56 = vadd.f32 %v10586_v16, %v1992_v59  ;;  %v8377_v57 = vpop.f32.mrb[17].mxu1 }
 0xf49   :  { %v1996_v63 = vmin.f32 %v1993_v56, 20.0 }
 0xf4b   :  { %v1997_v58 = vmul.f32 1.442695, %v1996_v63 }
 0xf4d   :  { %9893 = vpow2.f32 %v1997_v58 }
 0xf4e   :  { %v10817_v60 = vpop.f32.mrb[18].mxu1 }
 0xf4f   :  { %v8388_v61 = vpop.f32.mrb[19].mxu1 }
 0xf56   :  { %v2284_v0 = vpop.f32.mrb[20].mxu1 }
 0xf57   :  { %v9894_v3 = vpop.eup %9893  ;;  %v8418_v7 = vpop.f32.mrb[21].mxu1  ;;  %v2285_v16 = vadd.f32 %v10823_v9, %v2284_v0 }
 0xf58   :  { %v2007_v17 = vmul.f32 %v9894_v3, %v2005_v4  ;;  %v2003_v32 = vmul.f32 %v9894_v3, %v2001_v31 }
 0xf59   :  { %v2288_v10 = vmin.f32 %v2285_v16, 20.0 }
 0xf5a   :  { %2009 = vrot.lane.b32.xlu0 %v2007_v17, %s10270_s16 }
 0xf5b   :  { %v2289_v12 = vmul.f32 1.442695, %v2288_v10 }
 0xf5d   :  { %9895 = vpow2.f32 %v2289_v12 }
 0xf5e   :  { %2292 = vrot.lane.b32.xlu0 %v10757_v35, %s10270_s16 }
 0xf66   :  { %v2379_v13 = vpop.f32.mrb[22].mxu1 }
 0xf67   :  { %v2380_v18 = vadd.f32 %v10831_v15, %v2379_v13  ;;  %v8437_v19 = vpop.f32.mrb[23].mxu1  ;;  %v9896_v20 = vpop.eup %9895 }
 0xf68   :  { %v2299_v25 = vmul.f32 %v9896_v20, %v2297_v22 }
 0xf69   :  { %9897 = vtanh.f32 %v2380_v18  ;;  %v2383_v36 = vmul.f32 0.5, %v2380_v18 }
 0xf73   :  { %v9898_v21 = vpop.eup %9897 }
 0xf74   :  { %2394 = vrot.lane.b32.xlu1 %v9898_v21, %s10269_s15 }
 0xf76   :  { %v2671_v24 = vpop.f32.mrb[24].mxu1 }
 0xf77   :  { %v2672_v27 = vadd.f32 %v10838_v26, %v2671_v24  ;;  %v8478_v28 = vpop.f32.mrb[25].mxu1 }
 0xf78   :  { %2301 = vrot.lane.b32.xlu1 %v2299_v25, %s10270_s16 }
 0xf79   :  { %9899 = vtanh.f32 %v2672_v27  ;;  %v2675_v39 = vmul.f32 0.5, %v2672_v27  ;;  %v7546_v27 = vld [vmem:[%s12008_s0 + $0xc] sm:$0x3] }
 0xf7a   :  { %9901 = vtanh.f32 %v2383_v36 }
 0xf7b   :  { %9903 = vtanh.f32 %v2675_v39 }
 0xf83   :  { %v9900_v30 = vpop.eup %9899 }
 0xf84   :  { %2686 = vrot.lane.b32.xlu0 %v9900_v30, %s10269_s15  ;;  %v9902_v38 = vpop.eup %9901 }
 0xf85   :  { %v2385_v40 = vadd.f32 1.0, %v9902_v38  ;;  %v9904_v53 = vpop.eup %9903 }
 0xf86   :  { %v2677_v59 = vadd.f32 1.0, %v9904_v53 }
 0xf87   :  { %v2386_v41 = vmul.f32 0.5, %v2385_v40 }
 0xf88   :  { %v2678_v56 = vmul.f32 0.5, %v2677_v59 }
 0xfcc   :  { %v2010_v33 = vpop.permute.xlu0 %2009 }
 0xfcd   :  { %v2012_v35 = vadd.f32 %v2010_v33, %v2003_v32  ;;  %v10910_v32 = vld [vmem:[%s12012_s4 + $0x1] ss:$0 sm:$0xff] }
 0xfcf   :  { %2389 = vrot.lane.b32.xlu1 %v2012_v35, %s10269_s15 }
 0xfd0   :  { %v2293_v43 = vpop.permute.xlu0 %2292 }
 0xfd1   :  { %v2295_v44 = vmul.f32 %v9896_v20, %v2293_v43 }
 0xfe6   :  { %v2395_v45 = vpop.permute.xlu1 %2394 }
 0xfe7   :  { %v2397_v47 = vmul.f32 %v2395_v45, %v2386_v41 }
 0xfe9   :  { %2399 = vrot.lane.b32.xlu0 %v2397_v47, %s10269_s15 }
 0xfea   :  { %v2302_v48 = vpop.permute.xlu1 %2301 }
 0xfeb   :  { %v2304_v51 = vadd.f32 %v2302_v48, %v2295_v44 }
 0xfed   :  { %2681 = vrot.lane.b32.xlu1 %v2304_v51, %s10269_s15 }
 0xff6   :  { %v2687_v57 = vpop.permute.xlu0 %2686 }
 0xff7   :  { %v2689_v63 = vmul.f32 %v2687_v57, %v2678_v56 }
 0xff9   :  { %2691 = vrot.lane.b32.xlu0 %v2689_v63, %s10269_s15 }
0x1041   :  { %v2390_v58 = vpop.permute.xlu1 %2389 }
0x1042   :  { %v2392_v61 = vmul.f32 %v2390_v58, %v2386_v41 }
0x105b   :  { %v2400_v0 = vpop.permute.xlu0 %2399 }
0x105c   :  { %v2402_v3 = vadd.f32 %v2400_v0, %v2392_v61 }
0x105e   :  { %9905 = vtanh.f32 %v2402_v3 }
0x105f   :  { %v2682_v4 = vpop.permute.xlu1 %2681 }
0x1060   :  { %v2684_v17 = vmul.f32 %v2682_v4, %v2678_v56 }
0x1068   :  { %v9906_v7 = vpop.eup %9905 }
0x1069   :  { %2405 = vrot.lane.b32.xlu1 %v9906_v7, %s10269_s15 }
0x106b   :  { %v2692_v16 = vpop.permute.xlu0 %2691 }
0x106c   :  { %v10848_v10 = vadd.f32 %v2692_v16, %v2684_v17 }
0x106e   :  { %9907 = vtanh.f32 %v10848_v10 }
0x1078   :  { %v9908_v12 = vpop.eup %9907 }
0x1079   :  { %2697 = vrot.lane.b32.xlu0 %v9908_v12, %s10269_s15 }
0x10db   :  { %v2406_v13 = vpop.permute.xlu1 %2405 }
0x10dc   :  { %v2408_v18 = vmul.f32 %v2406_v13, %v2386_v41 }
0x10de   :  { %2410 = vrot.lane.b32.xlu1 %v2408_v18, %s10271_s17 }
0x10e2   :  { %2794 = vrot.lane.b32.xlu1 %v2408_v18, %s10270_s16 }
0x10e6   :  { %2492 = vrot.lane.b32.xlu1 %v9898_v21, %s10271_s17 }
0x10ea   :  { %2488 = vrot.lane.b32.xlu1 %v2402_v3, %s10270_s16 }
0x10eb   :  { %v2698_v19 = vpop.permute.xlu0 %2697 }
0x10ec   :  { %v2700_v20 = vmul.f32 %v2698_v19, %v2678_v56 }
0x10ee   :  { %2702 = vrot.lane.b32.xlu0 %v2700_v20, %s10271_s17 }
0x10f2   :  { %3086 = vrot.lane.b32.xlu0 %v2700_v20, %s10270_s16 }
0x10f6   :  { %2784 = vrot.lane.b32.xlu0 %v9900_v30, %s10271_s17 }
0x1150   :  { %v2411_v22 = vpop.permute.xlu1 %2410 }
0x1151   :  { %8447 = vmatmul.mubr.msk.f32.vlgmr.msra.gmra.mrb[22].mxu0 %vm138_vm1, %v2411_v22 }
0x1152   :  { %9381 = vmatpush3.bf16.msra.mxu0 %v10531_v62  ;;  %8457 = vmatprep.mubr.msk.f32.mxu0 %vm10267_vm0, %v10268_v2 }
0x1153   :  { %9382 = vmatprep.subr.bf16.mxu0 %v10266_v1 }
0x1154   :  { %v2795_v24 = vpop.permute.xlu1 %2794 }
0x1156   :  { %9384 = vmatpush3.bf16.msra.mxu0 %v10535_v5 }
0x1157   :  { %9397 = vmatprep.subr.bf16.mxu0 %v10266_v1 }
0x1158   :  { %v2493_v45 = vpop.permute.xlu1 %2492 }
0x1159   :  { %8458 = vmatmul.mubr.msk.f32.vlgmr.msra.gmra.mrb[24].mxu0 %vm138_vm1, %v2411_v22 }
0x115a   :  { %9399 = vmatpush3.bf16.msra.mxu0 %v10437_v34  ;;  %8487 = vmatprep.mubr.msk.f32.mxu0 %vm10267_vm0, %v10268_v2 }
0x115b   :  { %9400 = vmatprep.subr.bf16.mxu0 %v10266_v1 }
0x115c   :  { %v2489_v16 = vpop.permute.xlu1 %2488 }
0x115e   :  { %9402 = vmatpush3.bf16.msra.mxu0 %v10441_v37 }
0x115f   :  { %9403 = vmatprep.subr.bf16.mxu0 %v10266_v1 }
0x1160   :  { %v2703_v21 = vpop.permute.xlu0 %2702 }
0x1161   :  { %8488 = vmatmul.mubr.msk.f32.vlgmr.msra.gmra.mrb[26].mxu0 %vm138_vm1, %v2703_v21  ;;  %v2797_v25 = vsel %vm138_vm1, %v2703_v21, %v2795_v24 }
0x1162   :  { %9405 = vmatpush3.bf16.msra.mxu0 %v10450_v42  ;;  %8506 = vmatprep.mubr.msk.f32.mxu0 %vm10267_vm0, %v10268_v2 }
0x1163   :  { %9406 = vmatprep.subr.bf16.mxu0 %v10266_v1 }
0x1164   :  { %v3087_v28 = vpop.permute.xlu0 %3086 }
0x1165   :  { %v3089_v30 = vsel %vm138_vm1, %v7546_v27, %v3087_v28 }
0x1166   :  { %9408 = vmatpush3.bf16.msra.mxu0 %v10454_v46 }
0x1167   :  { %9409 = vmatprep.subr.bf16.mxu0 %v10266_v1 }
0x1168   :  { %v2785_v61 = vpop.permute.xlu0 %2784 }
0x116a   :  { %9411 = vmatpush3.bf16.msra.mxu0 %v10460_v49 }
0x116b   :  { %9412 = vmatprep.subr.bf16.mxu0 %v10266_v1 }
0x116e   :  { %9414 = vmatpush3.bf16.msra.mxu0 %v10464_v52 }
0x116f   :  { %9427 = vmatprep.subr.bf16.mxu0 %v10266_v1 }
0x1171   :  { %8507 = vmatmul.mubr.msk.f32.vlgmr.msra.gmra.mrb[28].mxu0 %vm148_vm2, %v2797_v25 }
0x1172   :  { %9429 = vmatpush3.bf16.msra.mxu0 %v10406_v6  ;;  %8547 = vmatprep.mubr.msk.f32.mxu0 %vm10267_vm0, %v10268_v2 }
0x1173   :  { %9430 = vmatprep.subr.bf16.mxu0 %v10266_v1 }
0x1176   :  { %9432 = vmatpush3.bf16.msra.mxu0 %v10409_v8 }
0x1177   :  { %9433 = vmatprep.subr.bf16.mxu0 %v10266_v1 }
0x117a   :  { %9435 = vmatpush3.bf16.msra.mxu0 %v10413_v11 }
0x117b   :  { %9436 = vmatprep.subr.bf16.mxu0 %v10266_v1 }
0x117e   :  { %9438 = vmatpush3.bf16.msra.mxu0 %v10417_v14 }
0x117f   :  { %9457 = vmatprep.subr.bf16.mxu0 %v10266_v1 }
0x1181   :  { %8548 = vmatmul.mubr.msk.f32.vlgmr.msra.gmra.mrb[30].mxu0 %vm148_vm2, %v3089_v30 }
0x1182   :  { %9459 = vmatpush3.bf16.msra.mxu0 %v10511_v50  ;;  %8588 = vmatprep.mubr.msk.f32.mxu0 %vm10267_vm0, %v10268_v2 }
0x1183   :  { %9460 = vmatprep.subr.bf16.mxu0 %v10266_v1 }
0x1186   :  { %9462 = vmatpush3.bf16.msra.mxu0 %v10515_v54 }
0x1187   :  { %9463 = vmatprep.subr.bf16.mxu0 %v10266_v1 }
0x1224   :  { %v2480_v31 = vpop.f32.mrb[22].mxu0 }
0x1225   :  { %v2481_v33 = vadd.f32 %v10910_v32, %v2480_v31  ;;  %v8448_v35 = vpop.f32.mrb[23].mxu0 }
0x1227   :  { %v2484_v36 = vmin.f32 %v2481_v33, 20.0 }
0x1229   :  { %v2485_v38 = vmul.f32 1.442695, %v2484_v36 }
0x122b   :  { %9909 = vpow2.f32 %v2485_v38 }
0x122c   :  { %v10913_v39 = vpop.f32.mrb[24].mxu0 }
0x122d   :  { %v8459_v40 = vpop.f32.mrb[25].mxu0 }
0x1234   :  { %v2772_v41 = vpop.f32.mrb[26].mxu0 }
0x1235   :  { %v9910_v43 = vpop.eup %9909  ;;  %v8489_v47 = vpop.f32.mrb[27].mxu0  ;;  %v2773_v48 = vadd.f32 %v10823_v9, %v2772_v41 }
0x1236   :  { %v2495_v44 = vmul.f32 %v9910_v43, %v2493_v45 }
0x1237   :  { %v2776_v51 = vmin.f32 %v2773_v48, 20.0 }
0x1238   :  { %2497 = vrot.lane.b32.xlu0 %v2495_v44, %s10270_s16 }
0x1239   :  { %v2777_v53 = vmul.f32 1.442695, %v2776_v51 }
0x123b   :  { %9911 = vpow2.f32 %v2777_v53 }
0x123c   :  { %2780 = vrot.lane.b32.xlu0 %v10848_v10, %s10270_s16  ;;  %v2491_v10 = vmul.f32 %v9910_v43, %v2489_v16 }
0x1244   :  { %v2867_v59 = vpop.f32.mrb[28].mxu0 }
0x1245   :  { %v2868_v56 = vadd.f32 %v10831_v15, %v2867_v59  ;;  %v8508_v57 = vpop.f32.mrb[29].mxu0  ;;  %v9912_v63 = vpop.eup %9911 }
0x1246   :  { %v2787_v3 = vmul.f32 %v9912_v63, %v2785_v61 }
0x1247   :  { %9913 = vtanh.f32 %v2868_v56  ;;  %v2871_v18 = vmul.f32 0.5, %v2868_v56 }
0x1251   :  { %v9914_v58 = vpop.eup %9913 }
0x1252   :  { %2882 = vrot.lane.b32.xlu1 %v9914_v58, %s10269_s15 }
0x1254   :  { %v3159_v0 = vpop.f32.mrb[30].mxu0 }
0x1255   :  { %v3160_v4 = vadd.f32 %v10838_v26, %v3159_v0  ;;  %v8549_v7 = vpop.f32.mrb[31].mxu0 }
0x1256   :  { %2789 = vrot.lane.b32.xlu1 %v2787_v3, %s10270_s16 }
0x1257   :  { %9915 = vtanh.f32 %v3160_v4  ;;  %v3163_v20 = vmul.f32 0.5, %v3160_v4 }
0x1258   :  { %9917 = vtanh.f32 %v2871_v18 }
0x1259   :  { %9919 = vtanh.f32 %v3163_v20 }
0x1261   :  { %v9916_v17 = vpop.eup %9915 }
0x1262   :  { %3174 = vrot.lane.b32.xlu0 %v9916_v17, %s10269_s15  ;;  %v9918_v19 = vpop.eup %9917 }
0x1263   :  { %v2873_v22 = vadd.f32 1.0, %v9918_v19  ;;  %v9920_v33 = vpop.eup %9919 }
0x1264   :  { %v3165_v35 = vadd.f32 1.0, %v9920_v33 }
0x1265   :  { %v2874_v21 = vmul.f32 0.5, %v2873_v22 }
0x1266   :  { %v3166_v36 = vmul.f32 0.5, %v3165_v35 }
0x12aa   :  { %v2498_v12 = vpop.permute.xlu0 %2497 }
0x12ab   :  { %v2500_v13 = vadd.f32 %v2498_v12, %v2491_v10 }
0x12ad   :  { %2877 = vrot.lane.b32.xlu1 %v2500_v13, %s10269_s15 }
0x12ae   :  { %v2781_v24 = vpop.permute.xlu0 %2780 }
0x12af   :  { %v2783_v28 = vmul.f32 %v9912_v63, %v2781_v24 }
0x12c4   :  { %v2883_v25 = vpop.permute.xlu1 %2882 }
0x12c5   :  { %v2885_v27 = vmul.f32 %v2883_v25, %v2874_v21 }
0x12c7   :  { %2887 = vrot.lane.b32.xlu0 %v2885_v27, %s10269_s15 }
0x12c8   :  { %v2790_v30 = vpop.permute.xlu1 %2789 }
0x12c9   :  { %v2792_v31 = vadd.f32 %v2790_v30, %v2783_v28 }
0x12cb   :  { %3169 = vrot.lane.b32.xlu1 %v2792_v31, %s10269_s15 }
0x12d4   :  { %v3175_v38 = vpop.permute.xlu0 %3174 }
0x12d5   :  { %v3177_v40 = vmul.f32 %v3175_v38, %v3166_v36 }
0x12d7   :  { %3179 = vrot.lane.b32.xlu0 %v3177_v40, %s10269_s15 }
0x131f   :  { %v2878_v41 = vpop.permute.xlu1 %2877 }
0x1320   :  { %v2880_v43 = vmul.f32 %v2878_v41, %v2874_v21 }
0x1339   :  { %v2888_v45 = vpop.permute.xlu0 %2887 }
0x133a   :  { %v2890_v47 = vadd.f32 %v2888_v45, %v2880_v43 }
0x133c   :  { %9921 = vtanh.f32 %v2890_v47 }
0x133d   :  { %v3170_v44 = vpop.permute.xlu1 %3169 }
0x133e   :  { %v3172_v51 = vmul.f32 %v3170_v44, %v3166_v36 }
0x1346   :  { %v9922_v48 = vpop.eup %9921 }
0x1347   :  { %2893 = vrot.lane.b32.xlu1 %v9922_v48, %s10269_s15 }
0x1349   :  { %v3180_v53 = vpop.permute.xlu0 %3179 }
0x134a   :  { %v10929_v59 = vadd.f32 %v3180_v53, %v3172_v51 }
0x134c   :  { %9923 = vtanh.f32 %v10929_v59 }
0x1356   :  { %v9924_v56 = vpop.eup %9923 }
0x1357   :  { %3185 = vrot.lane.b32.xlu0 %v9924_v56, %s10269_s15 }
0x13b9   :  { %v2894_v57 = vpop.permute.xlu1 %2893 }
0x13ba   :  { %v2896_v63 = vmul.f32 %v2894_v57, %v2874_v21 }
0x13bc   :  { %2898 = vrot.lane.b32.xlu1 %v2896_v63, %s10271_s17 }
0x13c0   :  { %3282 = vrot.lane.b32.xlu1 %v2896_v63, %s10270_s16 }
0x13c4   :  { %2980 = vrot.lane.b32.xlu1 %v9914_v58, %s10271_s17 }
0x13c8   :  { %2976 = vrot.lane.b32.xlu1 %v2890_v47, %s10270_s16 }
0x13c9   :  { %v3186_v61 = vpop.permute.xlu0 %3185 }
0x13ca   :  { %v3188_v0 = vmul.f32 %v3186_v61, %v3166_v36 }
0x13cc   :  { %3190 = vrot.lane.b32.xlu0 %v3188_v0, %s10271_s17 }
0x13d0   :  { %3574 = vrot.lane.b32.xlu0 %v3188_v0, %s10270_s16 }
0x13d4   :  { %3272 = vrot.lane.b32.xlu0 %v9916_v17, %s10271_s17  ;;  %v7552_v17 = vld [vmem:[%s12008_s0 + $0xe] sm:$0x3] }
0x142e   :  { %v2899_v3 = vpop.permute.xlu1 %2898 }
0x142f   :  { %8518 = vmatmul.mubr.msk.f32.vlgmr.msra.gmra.mrb[26].mxu1 %vm138_vm1, %v2899_v3 }
0x1430   :  { %9423 = vmatpush3.bf16.msra.mxu1 %v10531_v62  ;;  %8528 = vmatprep.mubr.msk.f32.mxu1 %vm10267_vm0, %v10268_v2 }
0x1431   :  { %9424 = vmatprep.subr.bf16.mxu1 %v10266_v1 }
0x1432   :  { %v3283_v4 = vpop.permute.xlu1 %3282 }
0x1434   :  { %9426 = vmatpush3.bf16.msra.mxu1 %v10535_v5 }
0x1435   :  { %9439 = vmatprep.subr.bf16.mxu1 %v10266_v1 }
0x1436   :  { %v2981_v20 = vpop.permute.xlu1 %2980 }
0x1437   :  { %8529 = vmatmul.mubr.msk.f32.vlgmr.msra.gmra.mrb[28].mxu1 %vm138_vm1, %v2899_v3 }
0x1438   :  { %9441 = vmatpush3.bf16.msra.mxu1 %v10437_v34  ;;  %8558 = vmatprep.mubr.msk.f32.mxu1 %vm10267_vm0, %v10268_v2 }
0x1439   :  { %9442 = vmatprep.subr.bf16.mxu1 %v10266_v1 }
0x143a   :  { %v2977_v43 = vpop.permute.xlu1 %2976 }
0x143c   :  { %9444 = vmatpush3.bf16.msra.mxu1 %v10441_v37 }
0x143d   :  { %9445 = vmatprep.subr.bf16.mxu1 %v10266_v1 }
0x143e   :  { %v3191_v58 = vpop.permute.xlu0 %3190 }
0x143f   :  { %8559 = vmatmul.mubr.msk.f32.vlgmr.msra.gmra.mrb[30].mxu1 %vm138_vm1, %v3191_v58  ;;  %v3285_v7 = vsel %vm138_vm1, %v3191_v58, %v3283_v4 }
0x1440   :  { %9447 = vmatpush3.bf16.msra.mxu1 %v10450_v42  ;;  %8577 = vmatprep.mubr.msk.f32.mxu1 %vm10267_vm0, %v10268_v2 }
0x1441   :  { %9448 = vmatprep.subr.bf16.mxu1 %v10266_v1 }
0x1442   :  { %v3575_v16 = vpop.permute.xlu0 %3574 }
0x1444   :  { %9450 = vmatpush3.bf16.msra.mxu1 %v10454_v46 }
0x1445   :  { %9451 = vmatprep.subr.bf16.mxu1 %v10266_v1 }
0x1446   :  { %v3273_v35 = vpop.permute.xlu0 %3272 }
0x1448   :  { %9453 = vmatpush3.bf16.msra.mxu1 %v10460_v49 }
0x1449   :  { %9454 = vmatprep.subr.bf16.mxu1 %v10266_v1 }
0x144c   :  { %9456 = vmatpush3.bf16.msra.mxu1 %v10464_v52 }
0x144d   :  { %9469 = vmatprep.subr.bf16.mxu1 %v10266_v1 }
0x144f   :  { %8578 = vmatmul.mubr.msk.f32.vlgmr.msra.gmra.mrb[32].mxu1 %vm148_vm2, %v3285_v7 }
0x1450   :  { %9471 = vmatpush3.bf16.msra.mxu1 %v10406_v6  ;;  %8618 = vmatprep.mubr.msk.f32.mxu1 %vm10267_vm0, %v10268_v2  ;;  %v3577_v6 = vsel %vm138_vm1, %v7552_v17, %v3575_v16 }
0x1451   :  { %9472 = vmatprep.subr.bf16.mxu1 %v10266_v1 }
0x1454   :  { %9474 = vmatpush3.bf16.msra.mxu1 %v10409_v8 }
0x1455   :  { %9475 = vmatprep.subr.bf16.mxu1 %v10266_v1 }
0x1458   :  { %9477 = vmatpush3.bf16.msra.mxu1 %v10413_v11 }
0x1459   :  { %9478 = vmatprep.subr.bf16.mxu1 %v10266_v1 }
0x145c   :  { %9480 = vmatpush3.bf16.msra.mxu1 %v10417_v14 }
0x145d   :  { %9499 = vmatprep.subr.bf16.mxu1 %v10266_v1 }
0x145f   :  { %8619 = vmatmul.mubr.msk.f32.vlgmr.msra.gmra.mrb[34].mxu1 %vm148_vm2, %v3577_v6 }
0x1460   :  { %9501 = vmatpush3.bf16.msra.mxu1 %v10511_v50  ;;  %8659 = vmatprep.mubr.msk.f32.mxu1 %vm10267_vm0, %v10268_v2 }
0x1461   :  { %9502 = vmatprep.subr.bf16.mxu1 %v10266_v1 }
0x1464   :  { %9504 = vmatpush3.bf16.msra.mxu1 %v10515_v54 }
0x1465   :  { %9505 = vmatprep.subr.bf16.mxu1 %v10266_v1 }
0x1502   :  { %v2968_v8 = vpop.f32.mrb[26].mxu1 }
0x1503   :  { %v2969_v11 = vadd.f32 %v10910_v32, %v2968_v8  ;;  %v8519_v14 = vpop.f32.mrb[27].mxu1 }
0x1505   :  { %v2972_v10 = vmin.f32 %v2969_v11, 20.0 }
0x1507   :  { %v2973_v12 = vmul.f32 1.442695, %v2972_v10 }
0x1509   :  { %9925 = vpow2.f32 %v2973_v12 }
0x150a   :  { %v10989_v13 = vpop.f32.mrb[28].mxu1 }
0x150b   :  { %v8530_v18 = vpop.f32.mrb[29].mxu1 }
0x1512   :  { %v3260_v50 = vpop.f32.mrb[30].mxu1 }
0x1513   :  { %v9926_v19 = vpop.eup %9925  ;;  %v8560_v22 = vpop.f32.mrb[31].mxu1  ;;  %v3261_v54 = vadd.f32 %v10823_v9, %v3260_v50 }
0x1514   :  { %v2983_v21 = vmul.f32 %v9926_v19, %v2981_v20  ;;  %v2979_v45 = vmul.f32 %v9926_v19, %v2977_v43  ;;  %v10123_v22 = vld [vmem:[%s12008_s0] sm:$0x3] }
0x1515   :  { %v3264_v24 = vmin.f32 %v3261_v54, 20.0 }
0x1516   :  { %2985 = vrot.lane.b32.xlu0 %v2983_v21, %s10270_s16 }
0x1517   :  { %v3265_v25 = vmul.f32 1.442695, %v3264_v24 }
0x1519   :  { %9927 = vpow2.f32 %v3265_v25 }
0x151a   :  { %3268 = vrot.lane.b32.xlu0 %v10929_v59, %s10270_s16 }
0x1522   :  { %v3355_v27 = vpop.f32.mrb[32].mxu1 }
0x1523   :  { %v3356_v28 = vadd.f32 %v10831_v15, %v3355_v27  ;;  %v8579_v30 = vpop.f32.mrb[33].mxu1  ;;  %v9928_v31 = vpop.eup %9927 }
0x1524   :  { %v3275_v9 = vmul.f32 %v9928_v31, %v3273_v35 }
0x1525   :  { %9929 = vtanh.f32 %v3356_v28  ;;  %v3359_v48 = vmul.f32 0.5, %v3356_v28 }
0x152f   :  { %v10996_v33 = vpop.eup %9929 }
0x1530   :  { %3370 = vrot.lane.b32.xlu1 %v10996_v33, %s10269_s15 }
0x1532   :  { %v3647_v36 = vpop.f32.mrb[34].mxu1 }
0x1533   :  { %v3648_v38 = vadd.f32 %v10838_v26, %v3647_v36  ;;  %v8620_v40 = vpop.f32.mrb[35].mxu1  ;;  %v11010_v26 = vld [vmem:[%s12014_s6] ss:$0 sm:$0xff] }
0x1534   :  { %3277 = vrot.lane.b32.xlu1 %v3275_v9, %s10270_s16  ;;  %v614_v53 = vadd.f32 %v11010_v26, %v10589_v23 }
0x1535   :  { %9931 = vtanh.f32 %v3648_v38  ;;  %v3651_v59 = vmul.f32 0.5, %v3648_v38 }
0x1536   :  { %9933 = vtanh.f32 %v3359_v48  ;;  %v618_v57 = vmul.f32 0.044715, %v614_v53  ;;  %v617_v19 = vmul.f32 0.5, %v614_v53 }
0x1537   :  { %9935 = vtanh.f32 %v3651_v59 }
0x1538   :  { %v619_v3 = vmul.f32 %v618_v57, %v614_v53 }
0x153a   :  { %v620_v17 = vmul.f32 %v619_v3, %v614_v53  ;;  %v4127_v3 = vld [vmem:[#allocation3 + $0x90] sm:$0xff] }
0x153c   :  { %v621_v8 = vadd.f32 %v620_v17, %v614_v53  ;;  %v4131_v17 = vld [vmem:[#allocation3 + $0xb0] sm:$0xff] }
0x153e   :  { %v622_v11 = vmul.f32 0.7978846, %v621_v8 }
0x153f   :  { %v11002_v41 = vpop.eup %9931 }
0x1540   :  { %3662 = vrot.lane.b32.xlu0 %v11002_v41, %s10269_s15  ;;  %v9934_v51 = vpop.eup %9933  ;;  %9937 = vtanh.f32 %v622_v11 }
0x1541   :  { %v3361_v56 = vadd.f32 1.0, %v9934_v51  ;;  %v9936_v6 = vpop.eup %9935 }
0x1542   :  { %v3653_v23 = vadd.f32 1.0, %v9936_v6 }
0x1543   :  { %v3362_v63 = vmul.f32 0.5, %v3361_v56 }
0x1544   :  { %v3654_v14 = vmul.f32 0.5, %v3653_v23  ;;  %v11079_v23 = vld [vmem:[%s12015_s7] ss:$0 sm:$0xff] }
0x154a   :  { %v9938_v18 = vpop.eup %9937 }
0x154b   :  { %v624_v50 = vadd.f32 1.0, %v9938_v18 }
0x154d   :  { %v625_v20 = vmul.f32 %v624_v50, %v617_v19 }
0x154f   :  { %v626_v21 = vadd.f32 %v10123_v22, %v625_v20 }
0x1551   :  { %v628_v54 = vsel %vm627_vm3, %v626_v21, 0.0 }
0x1588   :  { %v2986_v47 = vpop.permute.xlu0 %2985 }
0x1589   :  { %v2988_v44 = vadd.f32 %v2986_v47, %v2979_v45 }
0x158b   :  { %3365 = vrot.lane.b32.xlu1 %v2988_v44, %s10269_s15 }
0x158c   :  { %v3269_v61 = vpop.permute.xlu0 %3268 }
0x158d   :  { %v3271_v4 = vmul.f32 %v9928_v31, %v3269_v61 }
0x15a2   :  { %v3371_v0 = vpop.permute.xlu1 %3370 }
0x15a3   :  { %v3373_v58 = vmul.f32 %v3371_v0, %v3362_v63 }
0x15a5   :  { %3375 = vrot.lane.b32.xlu0 %v3373_v58, %s10269_s15 }
0x15a6   :  { %v3278_v7 = vpop.permute.xlu1 %3277 }
0x15a7   :  { %v3280_v16 = vadd.f32 %v3278_v7, %v3271_v4  ;;  %v4130_v4 = vld [vmem:[#allocation3 + $0xa8] sm:$0xff] }
0x15a9   :  { %3657 = vrot.lane.b32.xlu1 %v3280_v16, %s10269_s15  ;;  %v4132_v16 = vld [vmem:[#allocation3 + $0xb8] sm:$0xff] }
0x15aa   :  { %v11074_v8 = vpack.c.bf16 %v4132_v16, %v4131_v17 }
0x15b2   :  { %v3663_v10 = vpop.permute.xlu0 %3662 }
0x15b3   :  { %v3665_v12 = vmul.f32 %v3663_v10, %v3654_v14 }
0x15b5   :  { %3667 = vrot.lane.b32.xlu0 %v3665_v12, %s10269_s15 }
0x15cd   :  { %629 = vadd.xlane.f32.xlu1 %v628_v54 }
0x15fd   :  { %v3366_v24 = vpop.permute.xlu1 %3365 }
0x15fe   :  { %v3368_v25 = vmul.f32 %v3366_v24, %v3362_v63 }
0x1617   :  { %v3376_v27 = vpop.permute.xlu0 %3375 }
0x1618   :  { %v3378_v28 = vadd.f32 %v3376_v27, %v3368_v25 }
0x161a   :  { %9939 = vtanh.f32 %v3378_v28 }
0x161b   :  { %v3658_v30 = vpop.permute.xlu1 %3657 }
0x161c   :  { %v3660_v35 = vmul.f32 %v3658_v30, %v3654_v14 }
0x1624   :  { %v9940_v31 = vpop.eup %9939 }
0x1625   :  { %3381 = vrot.lane.b32.xlu0 %v9940_v31, %s10269_s15 }
0x1627   :  { %v3668_v36 = vpop.permute.xlu0 %3667 }
0x1628   :  { %v11022_v9 = vadd.f32 %v3668_v36, %v3660_v35 }
0x162a   :  { %9941 = vtanh.f32 %v11022_v9 }
0x1634   :  { %v9942_v38 = vpop.eup %9941 }
0x1635   :  { %3673 = vrot.lane.b32.xlu0 %v9942_v38, %s10269_s15 }
0x165a   :  { %v630_v44 = vpop.xlane.xlu1 %629 }
0x165b   :  { %v632_v48 = vmul.f32 0.03125, %v630_v44 }
0x165d   :  { %v633_v51 = vsub.f32 %v626_v21, %v632_v48 }
0x165f   :  { %v634_v53 = vmul.f32 %v633_v51, %v633_v51 }
0x1661   :  { %v635_v59 = vsel %vm627_vm3, %v634_v53, 0.0 }
0x1697   :  { %v3382_v40 = vpop.permute.xlu0 %3381 }
0x1698   :  { %v3384_v43 = vmul.f32 %v3382_v40, %v3362_v63  ;;  %v11109_v40 = vld [vmem:[%s12010_s2 + $0x2] ss:$0 sm:$0xff] }
0x169a   :  { %3386 = vrot.lane.b32.xlu0 %v3384_v43, %s10271_s17 }
0x16a7   :  { %v3674_v45 = vpop.permute.xlu0 %3673 }
0x16a8   :  { %v3676_v47 = vmul.f32 %v3674_v45, %v3654_v14  ;;  %v11085_v14 = vld [vmem:[%s12016_s8] ss:$0 sm:$0xff] }
0x16aa   :  { %3678 = vrot.lane.b32.xlu1 %v3676_v47, %s10271_s17 }
0x16ae   :  { %3468 = vrot.lane.b32.xlu1 %v10996_v33, %s10271_s17 }
0x16b2   :  { %3464 = vrot.lane.b32.xlu1 %v3378_v28, %s10270_s16 }
0x16b9   :  { %636 = vadd.xlane.f32.xlu0 %v635_v59 }
0x16cf   :  { %3770 = vrot.lane.b32.xlu0 %v3384_v43, %s10270_s16 }
0x170c   :  { %v3387_v56 = vpop.permute.xlu0 %3386 }
0x170d   :  { %8589 = vmatmul.mubr.msk.f32.vlgmr.msra.gmra.mrb[32].mxu0 %vm138_vm1, %v3387_v56 }
0x170e   :  { %9465 = vmatpush3.bf16.msra.mxu0 %v10531_v62  ;;  %8599 = vmatprep.mubr.msk.f32.mxu0 %vm10267_vm0, %v10268_v2 }
0x170f   :  { %9466 = vmatprep.subr.bf16.mxu0 %v10266_v1 }
0x1712   :  { %9468 = vmatpush3.bf16.msra.mxu0 %v10535_v5 }
0x1713   :  { %9481 = vmatprep.subr.bf16.mxu0 %v10266_v1 }
0x1715   :  { %8600 = vmatmul.mubr.msk.f32.vlgmr.msra.gmra.mrb[34].mxu0 %vm138_vm1, %v3387_v56 }
0x1716   :  { %9483 = vmatpush3.bf16.msra.mxu0 %v10437_v34  ;;  %8629 = vmatprep.mubr.msk.f32.mxu0 %vm10267_vm0, %v10268_v2 }
0x1717   :  { %9484 = vmatprep.subr.bf16.mxu0 %v10266_v1 }
0x171a   :  { %9486 = vmatpush3.bf16.msra.mxu0 %v10441_v37  ;;  %v4125_v37 = vld [vmem:[#allocation3 + $0x80] sm:$0xff] }
0x171b   :  { %9487 = vmatprep.subr.bf16.mxu0 %v10266_v1 }
0x171c   :  { %v3679_v33 = vpop.permute.xlu1 %3678 }
0x171d   :  { %4060 = vst.msk [vmem:[#allocation9] sm:$0x3] %vm627_vm3, %v3679_v33  ;;  %8630 = vmatmul.mubr.msk.f32.vlgmr.msra.gmra.mrb[36].mxu0 %vm138_vm1, %v3679_v33 }
0x171e   :  { %9489 = vmatpush3.bf16.msra.mxu0 %v10450_v42  ;;  %8648 = vmatprep.mubr.msk.f32.mxu0 %vm10267_vm0, %v10268_v2  ;;  %v4126_v42 = vld [vmem:[#allocation3 + $0x88] sm:$0xff] }
0x171f   :  { %9490 = vmatprep.subr.bf16.mxu0 %v10266_v1  ;;  %v11059_v61 = vpack.c.bf16 %v4126_v42, %v4125_v37 }
0x1720   :  { %v3469_v28 = vpop.permute.xlu1 %3468 }
0x1722   :  { %9492 = vmatpush3.bf16.msra.mxu0 %v10454_v46  ;;  %v4128_v46 = vld [vmem:[#allocation3 + $0x98] sm:$0xff] }
0x1723   :  { %9493 = vmatprep.subr.bf16.mxu0 %v10266_v1 }
0x1726   :  { %9495 = vmatpush3.bf16.msra.mxu0 %v10460_v49  ;;  %v11064_v49 = vpack.c.bf16 %v4128_v46, %v4127_v3 }
0x1727   :  { %9496 = vmatprep.subr.bf16.mxu0 %v10266_v1 }
0x172a   :  { %9498 = vmatpush3.bf16.msra.mxu0 %v10464_v52  ;;  %v4129_v52 = vld [vmem:[#allocation3 + $0xa0] sm:$0xff] }
0x172b   :  { %9511 = vmatprep.subr.bf16.mxu0 %v10266_v1  ;;  %v11070_v7 = vpack.c.bf16 %v4130_v4, %v4129_v52 }
0x1746   :  { %v637_v34 = vpop.xlane.xlu0 %636 }
0x1747   :  { %v638_v57 = vmul.f32 0.03125, %v637_v34 }
0x1749   :  { %v639_v63 = vadd.f32 1e-05, %v638_v57 }
0x174a   :  { %v3771_v0 = vpop.permute.xlu0 %3770 }
0x174b   :  { %9943 = vrsqrt.f32 %v639_v63  ;;  %v3773_v58 = vsel %vm138_vm1, %v3679_v33, %v3771_v0 }
0x174c   :  { %8649 = vmatmul.mubr.msk.f32.vlgmr.msra.gmra.mrb[38].mxu0 %vm148_vm2, %v3773_v58 }
0x174d   :  { %9513 = vmatpush3.bf16.msra.mxu0 %v11059_v61  ;;  %8689 = vmatprep.mubr.msk.f32.mxu0 %vm10267_vm0, %v10268_v2 }
0x174e   :  { %9514 = vmatprep.subr.bf16.mxu0 %v10266_v1 }
0x1751   :  { %9516 = vmatpush3.bf16.msra.mxu0 %v11064_v49 }
0x1752   :  { %9517 = vmatprep.subr.bf16.mxu0 %v10266_v1 }
0x1755   :  { %v9944_v6 = vpop.eup %9943  ;;  %9519 = vmatpush3.bf16.msra.mxu0 %v11070_v7 }
0x1756   :  { %9520 = vmatprep.subr.bf16.mxu0 %v10266_v1  ;;  %v641_v11 = vmul.f32 %v9944_v6, %v633_v51 }
0x1758   :  { %v642_v10 = vmul.f32 %v11079_v23, %v641_v11 }
0x1759   :  { %9522 = vmatpush3.bf16.msra.mxu0 %v11074_v8 }
0x175a   :  { %v643_v12 = vadd.f32 %v11085_v14, %v642_v10  ;;  %9541 = vmatprep.subr.bf16.mxu0 %v10266_v1 }
0x175c   :  { %v4123_v18 = vsel %vm138_vm1, %v643_v12, 0.0 }
0x175d   :  { %8690 = vmatmul.mubr.msk.f32.vlgmr.msra.gmra.mrb[40].mxu0 %vm148_vm2, %v4123_v18 }
0x175e   :  { %8730 = vmatprep.mubr.msk.f32.mxu0 %vm10267_vm0, %v10268_v2 }
0x17e0   :  { %v3456_v50 = vpop.f32.mrb[32].mxu0 }
0x17e1   :  { %v3457_v19 = vadd.f32 %v10910_v32, %v3456_v50  ;;  %v8590_v20 = vpop.f32.mrb[33].mxu0 }
0x17e3   :  { %v3460_v22 = vmin.f32 %v3457_v19, 20.0 }
0x17e5   :  { %v3461_v21 = vmul.f32 1.442695, %v3460_v22 }
0x17e7   :  { %9945 = vpow2.f32 %v3461_v21 }
0x17e8   :  { %v11096_v54 = vpop.f32.mrb[34].mxu0 }
0x17e9   :  { %v8601_v24 = vpop.f32.mrb[35].mxu0 }
0x17ea   :  { %v4229_v24 = vld [vmem:[#allocation6 + $0x40] sm:$0xff] }
0x17f0   :  { %v11098_v25 = vpop.f32.mrb[36].mxu0 }
0x17f1   :  { %v9946_v27 = vpop.eup %9945  ;;  %v8631_v30 = vpop.f32.mrb[37].mxu0 }
0x17f2   :  { %v3471_v31 = vmul.f32 %v9946_v27, %v3469_v28  ;;  %v4231_v30 = vld [vmem:[#allocation6 + $0x50] sm:$0xff] }
0x17f4   :  { %3473 = vrot.lane.b32.xlu1 %v3471_v31, %s10270_s16  ;;  %v4232_v31 = vld [vmem:[#allocation6 + $0x58] sm:$0xff] }
0x181f   :  { %v3843_v35 = vpop.f32.mrb[38].mxu0 }
0x1820   :  { %v3844_v36 = vadd.f32 %v10831_v15, %v3843_v35  ;;  %v8650_v38 = vpop.f32.mrb[39].mxu0  ;;  %v3465_v15 = vpop.permute.xlu1 %3464  ;;  %v4328_v35 = vld [vmem:[#allocation3 + $0xc0] sm:$0xff] }
0x1821   :  { %v3467_v48 = vmul.f32 %v9946_v27, %v3465_v15  ;;  %v4230_v27 = vld [vmem:[#allocation6 + $0x48] sm:$0xff]  ;;  %v4330_v38 = vld [vmem:[#allocation3 + $0xd0] sm:$0xff]  ;;  %v4332_v15 = vld [vmem:[#allocation3 + $0xe0] sm:$0xff] }
0x1822   :  { %9947 = vtanh.f32 %v3844_v36  ;;  %v3847_v59 = vmul.f32 0.5, %v3844_v36  ;;  %v11139_v28 = vpack.c.bf16 %v4230_v27, %v4229_v24  ;;  %v4329_v36 = vld [vmem:[#allocation3 + $0xc8] sm:$0xff]  ;;  %v10124_v24 = vld [vmem:[%s12008_s0 + $0x2] sm:$0x3] }
0x182c   :  { %v11102_v32 = vpop.eup %9947 }
0x182d   :  { %3858 = vrot.lane.b32.xlu1 %v11102_v32, %s10269_s15 }
0x1830   :  { %v4202_v43 = vpop.f32.mrb[40].mxu0 }
0x1831   :  { %v4203_v45 = vadd.f32 %v11109_v40, %v4202_v43  ;;  %v8691_v47 = vpop.f32.mrb[41].mxu0  ;;  %v4331_v43 = vld [vmem:[#allocation3 + $0xd8] sm:$0xff] }
0x1832   :  { %v11155_v47 = vpack.c.bf16 %v4331_v43, %v4330_v38 }
0x1833   :  { %9949 = vtanh.f32 %v4203_v45  ;;  %v4206_v34 = vmul.f32 0.5, %v4203_v45 }
0x1834   :  { %9951 = vtanh.f32 %v3847_v59  ;;  %v4335_v59 = vld [vmem:[#allocation3 + $0xf8] sm:$0xff] }
0x1835   :  { %9953 = vtanh.f32 %v4206_v34 }
0x183d   :  { %v11112_v44 = vpop.eup %9949 }
0x183e   :  { %4213 = vrot.lane.b32.xlu0 %v11112_v44, %s10269_s15  ;;  %v9952_v56 = vpop.eup %9951 }
0x183f   :  { %v3849_v33 = vadd.f32 1.0, %v9952_v56  ;;  %v9954_v63 = vpop.eup %9953 }
0x1840   :  { %v4208_v0 = vadd.f32 1.0, %v9954_v63 }
0x1841   :  { %v3850_v37 = vmul.f32 0.5, %v3849_v33 }
0x1842   :  { %v4209_v3 = vmul.f32 0.5, %v4208_v0 }
0x1844   :  { %v4211_v11 = vmul.f32 0.0, %v4209_v3 }
0x1866   :  { %v3474_v51 = vpop.permute.xlu1 %3473 }
0x1867   :  { %v3476_v53 = vadd.f32 %v3474_v51, %v3467_v48  ;;  %v4333_v48 = vld [vmem:[#allocation3 + $0xe8] sm:$0xff] }
0x1868   :  { %v11161_v51 = vpack.c.bf16 %v4333_v48, %v4332_v15 }
0x1869   :  { %3853 = vrot.lane.b32.xlu1 %v3476_v53, %s10269_s15  ;;  %v4334_v53 = vld [vmem:[#allocation3 + $0xf0] sm:$0xff] }
0x186a   :  { %v11165_v56 = vpack.c.bf16 %v4335_v59, %v4334_v53 }
0x189f   :  { %v3859_v42 = vpop.permute.xlu1 %3858 }
0x18a0   :  { %v3861_v57 = vmul.f32 %v3859_v42, %v3850_v37 }
0x18a2   :  { %3863 = vrot.lane.b32.xlu0 %v3861_v57, %s10269_s15 }
0x18b0   :  { %v4214_v46 = vpop.permute.xlu0 %4213 }
0x18b1   :  { %v4216_v58 = vmul.f32 %v4214_v46, %v4209_v3  ;;  %v11187_v46 = vld [vmem:[%s12010_s2 + $0x3] ss:$0 sm:$0xff] }
0x18b3   :  { %4218 = vrot.lane.b32.xlu1 %v4216_v58, %s10269_s15 }
0x18db   :  { %v3854_v52 = vpop.permute.xlu1 %3853 }
0x18dc   :  { %v3856_v4 = vmul.f32 %v3854_v52, %v3850_v37 }
0x1914   :  { %v3864_v17 = vpop.permute.xlu0 %3863 }
0x1915   :  { %v11119_v16 = vadd.f32 %v3864_v17, %v3856_v4 }
0x1917   :  { %9955 = vtanh.f32 %v11119_v16 }
0x1921   :  { %v9956_v6 = vpop.eup %9955 }
0x1922   :  { %3869 = vrot.lane.b32.xlu0 %v9956_v6, %s10269_s15 }
0x1925   :  { %v4219_v10 = vpop.permute.xlu1 %4218 }
0x1926   :  { %v11123_v12 = vadd.f32 %v4219_v10, %v4211_v11 }
0x1928   :  { %9957 = vtanh.f32 %v11123_v12 }
0x1932   :  { %v9958_v18 = vpop.eup %9957 }
0x1933   :  { %4224 = vrot.lane.b32.xlu1 %v9958_v18, %s10269_s15 }
0x1994   :  { %v3870_v50 = vpop.permute.xlu0 %3869 }
0x1995   :  { %v3872_v19 = vmul.f32 %v3870_v50, %v3850_v37 }
0x1997   :  { %3874 = vrot.lane.b32.xlu0 %v3872_v19, %s10271_s17 }
0x19a5   :  { %v4225_v20 = vpop.permute.xlu1 %4224 }
0x19a6   :  { %v11128_v22 = vmul.f32 %v4225_v20, %v4209_v3  ;;  %v1104_v3 = vadd.f32 %v11010_v26, %v10665_v55 }
0x19a8   :  { %4234 = vrot.lane.b32.xlu1 %v11128_v22, %s10271_s17  ;;  %v1108_v58 = vmul.f32 0.044715, %v1104_v3  ;;  %v1107_v20 = vmul.f32 0.5, %v1104_v3 }
0x19aa   :  { %v1109_v6 = vmul.f32 %v1108_v58, %v1104_v3  ;;  %v4432_v58 = vld [vmem:[#allocation6 + $0x60] sm:$0xff] }
0x19ac   :  { %v1110_v11 = vmul.f32 %v1109_v6, %v1104_v3  ;;  %v4435_v6 = vld [vmem:[#allocation6 + $0x78] sm:$0xff] }
0x19ae   :  { %v1111_v10 = vadd.f32 %v1110_v11, %v1104_v3 }
0x19b0   :  { %v1112_v55 = vmul.f32 0.7978846, %v1111_v10 }
0x1a09   :  { %v3875_v21 = vpop.permute.xlu0 %3874 }
0x1a0a   :  { %4064 = vst.msk [vmem:[#allocation9 + $0x2] sm:$0x3] %vm627_vm3, %v3875_v21  ;;  %8660 = vmatmul.mubr.msk.f32.vlgmr.msra.gmra.mrb[36].mxu1 %vm138_vm1, %v3875_v21 }
0x1a0b   :  { %9507 = vmatpush3.bf16.msra.mxu1 %v10531_v62  ;;  %8670 = vmatprep.mubr.msk.f32.mxu1 %vm10267_vm0, %v10268_v2  ;;  %v11144_v62 = vpack.c.bf16 %v4232_v31, %v4231_v30 }
0x1a0c   :  { %9508 = vmatprep.subr.bf16.mxu1 %v10266_v1 }
0x1a0f   :  { %9510 = vmatpush3.bf16.msra.mxu1 %v10535_v5  ;;  %v11151_v5 = vpack.c.bf16 %v4329_v36, %v4328_v35 }
0x1a10   :  { %9523 = vmatprep.subr.bf16.mxu1 %v10266_v1 }
0x1a12   :  { %8671 = vmatmul.mubr.msk.f32.vlgmr.msra.gmra.mrb[38].mxu1 %vm138_vm1, %v3875_v21 }
0x1a13   :  { %9525 = vmatpush3.bf16.msra.mxu1 %v11139_v28  ;;  %8700 = vmatprep.mubr.msk.f32.mxu1 %vm10267_vm0, %v10268_v2 }
0x1a14   :  { %9526 = vmatprep.subr.bf16.mxu1 %v10266_v1 }
0x1a17   :  { %9528 = vmatpush3.bf16.msra.mxu1 %v11144_v62 }
0x1a18   :  { %9529 = vmatprep.subr.bf16.mxu1 %v10266_v1 }
0x1a1a   :  { %v4235_v45 = vpop.permute.xlu1 %4234 }
0x1a1b   :  { %8701 = vmatmul.mubr.msk.f32.vlgmr.msra.gmra.mrb[40].mxu1 %vm138_vm1, %v4235_v45  ;;  %v4326_v33 = vsel %vm138_vm1, %v4235_v45, 0.0 }
0x1a1c   :  { %9531 = vmatpush3.bf16.msra.mxu1 %v11151_v5  ;;  %8719 = vmatprep.mubr.msk.f32.mxu1 %vm10267_vm0, %v10268_v2 }
0x1a1d   :  { %9532 = vmatprep.subr.bf16.mxu1 %v10266_v1 }
0x1a20   :  { %9534 = vmatpush3.bf16.msra.mxu1 %v11155_v47 }
0x1a21   :  { %9535 = vmatprep.subr.bf16.mxu1 %v10266_v1 }
0x1a24   :  { %9537 = vmatpush3.bf16.msra.mxu1 %v11161_v51 }
0x1a25   :  { %9538 = vmatprep.subr.bf16.mxu1 %v10266_v1 }
0x1a28   :  { %9540 = vmatpush3.bf16.msra.mxu1 %v11165_v56 }
0x1a29   :  { %9559 = vmatprep.subr.bf16.mxu1 %v10266_v1 }
0x1a2b   :  { %8720 = vmatmul.mubr.msk.f32.vlgmr.msra.gmra.mrb[42].mxu1 %vm148_vm2, %v4326_v33 }
0x1a2c   :  { %9561 = vmatpush3.bf16.msra.mxu1 %v11139_v28  ;;  %8760 = vmatprep.mubr.msk.f32.mxu1 %vm10267_vm0, %v10268_v2 }
0x1a2d   :  { %9562 = vmatprep.subr.bf16.mxu1 %v10266_v1 }
0x1a30   :  { %9564 = vmatpush3.bf16.msra.mxu1 %v11144_v62 }
0x1a31   :  { %9565 = vmatprep.subr.bf16.mxu1 %v10266_v1 }
0x1add   :  { %v11178_v34 = vpop.f32.mrb[36].mxu1 }
0x1ade   :  { %v8661_v37 = vpop.f32.mrb[37].mxu1 }
0x1ae5   :  { %v11180_v42 = vpop.f32.mrb[38].mxu1 }
0x1ae6   :  { %v8672_v57 = vpop.f32.mrb[39].mxu1 }
0x1aee   :  { %v4304_v63 = vpop.f32.mrb[40].mxu1 }
0x1aef   :  { %v8702_v0 = vpop.f32.mrb[41].mxu1 }
0x1afe   :  { %v4405_v52 = vpop.f32.mrb[42].mxu1 }
0x1aff   :  { %v4406_v4 = vadd.f32 %v11187_v46, %v4405_v52  ;;  %v8721_v17 = vpop.f32.mrb[43].mxu1  ;;  %v4433_v52 = vld [vmem:[#allocation6 + $0x68] sm:$0xff] }
0x1b00   :  { %v11206_v17 = vpack.c.bf16 %v4433_v52, %v4432_v58 }
0x1b01   :  { %9959 = vtanh.f32 %v4406_v4  ;;  %v4409_v31 = vmul.f32 0.5, %v4406_v4  ;;  %v4434_v4 = vld [vmem:[#allocation6 + $0x70] sm:$0xff] }
0x1b02   :  { %9961 = vtanh.f32 %v1112_v55  ;;  %9543 = vmatpush3.bf16.msra.mxu0 %v11206_v17  ;;  %v11209_v11 = vpack.c.bf16 %v4435_v6, %v4434_v4 }
0x1b03   :  { %9963 = vtanh.f32 %v4409_v31  ;;  %9544 = vmatprep.subr.bf16.mxu0 %v10266_v1 }
0x1b06   :  { %9546 = vmatpush3.bf16.msra.mxu0 %v11209_v11 }
0x1b07   :  { %9547 = vmatprep.subr.bf16.mxu0 %v10266_v1 }
0x1b0b   :  { %v11190_v18 = vpop.eup %9959 }
0x1b0c   :  { %4416 = vrot.lane.b32.xlu0 %v11190_v18, %s10269_s15  ;;  %v9962_v50 = vpop.eup %9961 }
0x1b0d   :  { %v1114_v19 = vadd.f32 1.0, %v9962_v50  ;;  %v9964_v35 = vpop.eup %9963 }
0x1b0e   :  { %v4411_v36 = vadd.f32 1.0, %v9964_v35 }
0x1b0f   :  { %v1115_v21 = vmul.f32 %v1114_v19, %v1107_v20 }
0x1b10   :  { %v4412_v38 = vmul.f32 0.5, %v4411_v36 }
0x1b11   :  { %v1116_v27 = vadd.f32 %v10124_v24, %v1115_v21 }
0x1b12   :  { %v4414_v15 = vmul.f32 0.0, %v4412_v38 }
0x1b13   :  { %v1117_v30 = vsel %vm627_vm3, %v1116_v27, 0.0 }
0x1b2b   :  { %1118 = vadd.xlane.f32.xlu0 %v1117_v30 }
0x1b7e   :  { %v4417_v43 = vpop.permute.xlu0 %4416 }
0x1b7f   :  { %v4419_v45 = vmul.f32 %v4417_v43, %v4412_v38 }
0x1b81   :  { %4421 = vrot.lane.b32.xlu1 %v4419_v45, %s10269_s15 }
0x1bb8   :  { %v1119_v33 = vpop.xlane.xlu0 %1118 }
0x1bb9   :  { %v1120_v37 = vmul.f32 0.03125, %v1119_v33 }
0x1bbb   :  { %v1121_v57 = vsub.f32 %v1116_v27, %v1120_v37 }
0x1bbd   :  { %v1122_v0 = vmul.f32 %v1121_v57, %v1121_v57 }
0x1bbf   :  { %v1123_v3 = vsel %vm627_vm3, %v1122_v0, 0.0 }
0x1bf3   :  { %v4422_v48 = vpop.permute.xlu1 %4421 }
0x1bf4   :  { %v11199_v53 = vadd.f32 %v4422_v48, %v4414_v15 }
0x1bf6   :  { %9965 = vtanh.f32 %v11199_v53 }
0x1c00   :  { %v9966_v59 = vpop.eup %9965 }
0x1c01   :  { %4427 = vrot.lane.b32.xlu1 %v9966_v59, %s10269_s15 }
0x1c25   :  { %1124 = vadd.xlane.f32.xlu1 %v1123_v3 }
0x1c36   :  { %4528 = vrot.lane.b32.xlu1 %v11128_v22, %s10270_s16  ;;  %v11225_v22 = vld [vmem:[%s12012_s4 + $0x2] ss:$0 sm:$0xff] }
0x1c37   :  { %v4305_v19 = vadd.f32 %v11225_v22, %v4304_v63 }
0x1c39   :  { %v4308_v21 = vmin.f32 %v4305_v19, 20.0 }
0x1c3b   :  { %v4309_v27 = vmul.f32 1.442695, %v4308_v21 }
0x1c73   :  { %v4428_v10 = vpop.permute.xlu1 %4427 }
0x1c74   :  { %v11214_v55 = vmul.f32 %v4428_v10, %v4412_v38 }
0x1c76   :  { %4437 = vrot.lane.b32.xlu0 %v11214_v55, %s10271_s17 }
0x1c7a   :  { %4316 = vrot.lane.b32.xlu0 %v11112_v44, %s10271_s17 }
0x1c7e   :  { %4312 = vrot.lane.b32.xlu0 %v11123_v12, %s10270_s16 }
0x1cb2   :  { %v1125_v50 = vpop.xlane.xlu1 %1124 }
0x1cb3   :  { %v1126_v20 = vmul.f32 0.03125, %v1125_v50 }
0x1cb5   :  { %v1127_v24 = vadd.f32 1e-05, %v1126_v20 }
0x1cb6   :  { %v4529_v43 = vpop.permute.xlu1 %4528 }
0x1cb7   :  { %9967 = vrsqrt.f32 %v1127_v24 }
0x1cb8   :  { %9969 = vpow2.f32 %v4309_v27 }
0x1cc1   :  { %v9968_v31 = vpop.eup %9967 }
0x1cc2   :  { %v9970_v44 = vpop.eup %9969  ;;  %v1129_v12 = vmul.f32 %v9968_v31, %v1121_v57 }
0x1cc4   :  { %v1130_v36 = vmul.f32 %v11079_v23, %v1129_v12 }
0x1cc6   :  { %v1131_v38 = vadd.f32 %v11085_v14, %v1130_v36 }
0x1cc8   :  { %v4531_v45 = vsel %vm138_vm1, %v1131_v38, %v4529_v43 }
0x1ce8   :  { %v4438_v30 = vpop.permute.xlu0 %4437 }
0x1ce9   :  { %8731 = vmatmul.mubr.msk.f32.vlgmr.msra.gmra.mrb[42].mxu0 %vm138_vm1, %v4438_v30 }
0x1cea   :  { %9549 = vmatpush3.bf16.msra.mxu0 %v11059_v61  ;;  %8749 = vmatprep.mubr.msk.f32.mxu0 %vm10267_vm0, %v10268_v2 }
0x1ceb   :  { %9550 = vmatprep.subr.bf16.mxu0 %v10266_v1 }
0x1cec   :  { %v4317_v63 = vpop.permute.xlu0 %4316 }
0x1ced   :  { %v4319_v35 = vmul.f32 %v9970_v44, %v4317_v63  ;;  %v11274_v63 = vld [vmem:[%s12012_s4 + $0x3] ss:$0 sm:$0xff] }
0x1cee   :  { %9552 = vmatpush3.bf16.msra.mxu0 %v11064_v49 }
0x1cef   :  { %4321 = vrot.lane.b32.xlu1 %v4319_v35, %s10270_s16  ;;  %9553 = vmatprep.subr.bf16.mxu0 %v10266_v1 }
0x1cf0   :  { %v4313_v15 = vpop.permute.xlu0 %4312 }
0x1cf1   :  { %v4315_v48 = vmul.f32 %v9970_v44, %v4313_v15 }
0x1cf2   :  { %9555 = vmatpush3.bf16.msra.mxu0 %v11070_v7 }
0x1cf3   :  { %9556 = vmatprep.subr.bf16.mxu0 %v10266_v1 }
0x1cf6   :  { %9558 = vmatpush3.bf16.msra.mxu0 %v11074_v8 }
0x1cf7   :  { %9577 = vmatprep.subr.bf16.mxu0 %v10266_v1 }
0x1cf9   :  { %8750 = vmatmul.mubr.msk.f32.vlgmr.msra.gmra.mrb[44].mxu0 %vm148_vm2, %v4531_v45 }
0x1cfa   :  { %9579 = vmatpush3.bf16.msra.mxu0 %v11206_v17  ;;  %8790 = vmatprep.mubr.msk.f32.mxu0 %vm10267_vm0, %v10268_v2 }
0x1cfb   :  { %9580 = vmatprep.subr.bf16.mxu0 %v10266_v1 }
0x1cfe   :  { %9582 = vmatpush3.bf16.msra.mxu0 %v11209_v11 }
0x1cff   :  { %9583 = vmatprep.subr.bf16.mxu0 %v10266_v1 }
0x1d61   :  { %v4322_v59 = vpop.permute.xlu1 %4321 }
0x1d62   :  { %v4324_v33 = vadd.f32 %v4322_v59, %v4315_v48  ;;  %v1592_v48 = vadd.f32 %v11010_v26, %v10741_v29  ;;  %v10125_v29 = vld [vmem:[%s12008_s0 + $0x4] sm:$0x3] }
0x1d64   :  { %4611 = vrot.lane.b32.xlu1 %v4324_v33, %s10269_s15  ;;  %v1596_v59 = vmul.f32 0.044715, %v1592_v48 }
0x1d66   :  { %v1597_v33 = vmul.f32 %v1596_v59, %v1592_v48 }
0x1dbc   :  { %v4507_v37 = vpop.f32.mrb[42].mxu0 }
0x1dbd   :  { %v8732_v57 = vpop.f32.mrb[43].mxu0  ;;  %v4508_v35 = vadd.f32 %v11274_v63, %v4507_v37  ;;  %v1598_v37 = vmul.f32 %v1597_v33, %v1592_v48 }
0x1dcc   :  { %v4601_v0 = vpop.f32.mrb[44].mxu0 }
0x1dcd   :  { %v4602_v3 = vadd.f32 %v11109_v40, %v4601_v0  ;;  %v8751_v58 = vpop.f32.mrb[45].mxu0 }
0x1dce   :  { %v1599_v58 = vadd.f32 %v1598_v37, %v1592_v48 }
0x1dcf   :  { %9971 = vtanh.f32 %v4602_v3  ;;  %v4605_v4 = vmul.f32 0.5, %v4602_v3 }
0x1dd1   :  { %9973 = vtanh.f32 %v4605_v4 }
0x1dd6   :  { %v4612_v21 = vpop.permute.xlu1 %4611 }
0x1dd9   :  { %v11252_v52 = vpop.eup %9971 }
0x1dda   :  { %4616 = vrot.lane.b32.xlu0 %v11252_v52, %s10269_s15 }
0x1ddb   :  { %v9974_v6 = vpop.eup %9973 }
0x1ddc   :  { %v4607_v10 = vadd.f32 1.0, %v9974_v6  ;;  %v1600_v6 = vmul.f32 0.7978846, %v1599_v58 }
0x1dde   :  { %v4608_v50 = vmul.f32 0.5, %v4607_v10 }
0x1de0   :  { %v4614_v24 = vmul.f32 %v4612_v21, %v4608_v50 }
0x1e4c   :  { %v4617_v19 = vpop.permute.xlu0 %4616 }
0x1e4d   :  { %v4619_v20 = vmul.f32 %v4617_v19, %v4608_v50  ;;  %v1595_v19 = vmul.f32 0.5, %v1592_v48 }
0x1e4f   :  { %4621 = vrot.lane.b32.xlu0 %v4619_v20, %s10269_s15 }
0x1ec1   :  { %v4622_v27 = vpop.permute.xlu0 %4621 }
0x1ec2   :  { %v11257_v30 = vadd.f32 %v4622_v27, %v4614_v24 }
0x1ec4   :  { %9975 = vtanh.f32 %v11257_v30 }
0x1ece   :  { %v9976_v31 = vpop.eup %9975 }
0x1ecf   :  { %4627 = vrot.lane.b32.xlu1 %v9976_v31, %s10269_s15 }
0x1ed3   :  { %4724 = vrot.lane.b32.xlu1 %v11214_v55, %s10270_s16  ;;  %v4511_v55 = vmin.f32 %v4508_v35, 20.0 }
0x1ed5   :  { %v4512_v36 = vmul.f32 1.442695, %v4511_v55 }
0x1ed7   :  { %4515 = vrot.lane.b32.xlu1 %v11199_v53, %s10270_s16  ;;  %9977 = vpow2.f32 %v4512_v36 }
0x1ed8   :  { %9979 = vtanh.f32 %v1600_v6 }
0x1f41   :  { %v4628_v44 = vpop.permute.xlu1 %4627 }
0x1f42   :  { %v11265_v12 = vmul.f32 %v4628_v44, %v4608_v50 }
0x1f44   :  { %4632 = vrot.lane.b32.xlu0 %v11265_v12, %s10271_s17 }
0x1f45   :  { %v4725_v45 = vpop.permute.xlu1 %4724 }
0x1f48   :  { %4519 = vrot.lane.b32.xlu0 %v11190_v18, %s10271_s17  ;;  %v9978_v18 = vpop.eup %9977 }
0x1f49   :  { %v4516_v57 = vpop.permute.xlu1 %4515  ;;  %v9980_v10 = vpop.eup %9979 }
0x1f4a   :  { %v4518_v0 = vmul.f32 %v9978_v18, %v4516_v57  ;;  %v1602_v50 = vadd.f32 1.0, %v9980_v10 }
0x1f4c   :  { %v1603_v20 = vmul.f32 %v1602_v50, %v1595_v19 }
0x1f4e   :  { %v1604_v26 = vadd.f32 %v10125_v29, %v1603_v20 }
0x1f50   :  { %v1605_v21 = vsel %vm627_vm3, %v1604_v26, 0.0 }
0x1fb6   :  { %v4633_v53 = vpop.permute.xlu0 %4632 }
0x1fb7   :  { %8761 = vmatmul.mubr.msk.f32.vlgmr.msra.gmra.mrb[44].mxu1 %vm138_vm1, %v4633_v53  ;;  %v4727_v15 = vsel %vm138_vm1, %v4633_v53, %v4725_v45 }
0x1fb8   :  { %9567 = vmatpush3.bf16.msra.mxu1 %v11151_v5  ;;  %8779 = vmatprep.mubr.msk.f32.mxu1 %vm10267_vm0, %v10268_v2 }
0x1fb9   :  { %9568 = vmatprep.subr.bf16.mxu1 %v10266_v1 }
0x1fba   :  { %v4520_v38 = vpop.permute.xlu0 %4519 }
0x1fbb   :  { %v4522_v43 = vmul.f32 %v9978_v18, %v4520_v38 }
0x1fbc   :  { %9570 = vmatpush3.bf16.msra.mxu1 %v11155_v47 }
0x1fbd   :  { %4524 = vrot.lane.b32.xlu0 %v4522_v43, %s10270_s16  ;;  %9571 = vmatprep.subr.bf16.mxu1 %v10266_v1 }
0x1fc0   :  { %9573 = vmatpush3.bf16.msra.mxu1 %v11161_v51 }
0x1fc1   :  { %9574 = vmatprep.subr.bf16.mxu1 %v10266_v1 }
0x1fc4   :  { %9576 = vmatpush3.bf16.msra.mxu1 %v11165_v56 }
0x1fc5   :  { %9595 = vmatprep.subr.bf16.mxu1 %v10266_v1 }
0x1fc7   :  { %8780 = vmatmul.mubr.msk.f32.vlgmr.msra.gmra.mrb[46].mxu1 %vm148_vm2, %v4727_v15 }
0x1fc8   :  { %9597 = vmatpush3.bf16.msra.mxu1 %v11139_v28  ;;  %8820 = vmatprep.mubr.msk.f32.mxu1 %vm10267_vm0, %v10268_v2 }
0x1fc9   :  { %9598 = vmatprep.subr.bf16.mxu1 %v10266_v1 }
0x1fcc   :  { %9600 = vmatpush3.bf16.msra.mxu1 %v11144_v62 }
0x1fcd   :  { %9601 = vmatprep.subr.bf16.mxu1 %v10266_v1 }
0x202f   :  { %v4525_v3 = vpop.permute.xlu0 %4524 }
0x2030   :  { %v4527_v4 = vadd.f32 %v4525_v3, %v4518_v0 }
0x2032   :  { %4807 = vrot.lane.b32.xlu0 %v4527_v4, %s10269_s15 }
0x2051   :  { %1606 = vadd.xlane.f32.xlu0 %v1605_v21 }
0x208a   :  { %v4702_v24 = vpop.f32.mrb[44].mxu1 }
0x208b   :  { %v8762_v27 = vpop.f32.mrb[45].mxu1  ;;  %v4703_v19 = vadd.f32 %v11225_v22, %v4702_v24 }
0x208d   :  { %v4706_v29 = vmin.f32 %v4703_v19, 20.0 }
0x208f   :  { %v4707_v21 = vmul.f32 1.442695, %v4706_v29 }
0x209a   :  { %v4797_v31 = vpop.f32.mrb[46].mxu1 }
0x209b   :  { %v4798_v44 = vadd.f32 %v11187_v46, %v4797_v31  ;;  %v8781_v35 = vpop.f32.mrb[47].mxu1 }
0x209d   :  { %9981 = vtanh.f32 %v4798_v44  ;;  %v4801_v36 = vmul.f32 0.5, %v4798_v44 }
0x209f   :  { %9983 = vtanh.f32 %v4801_v36 }
0x20a4   :  { %v4808_v15 = vpop.permute.xlu0 %4807 }
0x20a7   :  { %v11305_v55 = vpop.eup %9981 }
0x20a8   :  { %4812 = vrot.lane.b32.xlu1 %v11305_v55, %s10269_s15 }
0x20a9   :  { %v9984_v53 = vpop.eup %9983 }
0x20aa   :  { %v4803_v18 = vadd.f32 1.0, %v9984_v53 }
0x20ac   :  { %v4804_v38 = vmul.f32 0.5, %v4803_v18 }
0x20ae   :  { %v4810_v48 = vmul.f32 %v4808_v15, %v4804_v38 }
0x20de   :  { %v1607_v57 = vpop.xlane.xlu0 %1606 }
0x20df   :  { %v1608_v0 = vmul.f32 0.03125, %v1607_v57 }
0x20e1   :  { %v1609_v3 = vsub.f32 %v1604_v26, %v1608_v0 }
0x20e3   :  { %v1610_v58 = vmul.f32 %v1609_v3, %v1609_v3 }
0x20e5   :  { %v1611_v4 = vsel %vm627_vm3, %v1610_v58, 0.0 }
0x211a   :  { %v4813_v43 = vpop.permute.xlu1 %4812 }
0x211b   :  { %v4815_v45 = vmul.f32 %v4813_v43, %v4804_v38 }
0x211d   :  { %4817 = vrot.lane.b32.xlu1 %v4815_v45, %s10269_s15 }
0x218f   :  { %v4818_v59 = vpop.permute.xlu1 %4817 }
0x2190   :  { %v11310_v33 = vadd.f32 %v4818_v59, %v4810_v48 }
0x2192   :  { %9985 = vtanh.f32 %v11310_v33 }
0x219c   :  { %v9986_v37 = vpop.eup %9985 }
0x219d   :  { %4823 = vrot.lane.b32.xlu1 %v9986_v37, %s10269_s15 }
0x21c1   :  { %1612 = vadd.xlane.f32.xlu1 %v1611_v4 }
0x21d2   :  { %4919 = vrot.lane.b32.xlu1 %v11265_v12, %s10270_s16 }
0x220f   :  { %v4824_v6 = vpop.permute.xlu1 %4823 }
0x2210   :  { %v11317_v10 = vmul.f32 %v4824_v6, %v4804_v38 }
0x2212   :  { %4828 = vrot.lane.b32.xlu0 %v11317_v10, %s10271_s17 }
0x2216   :  { %4714 = vrot.lane.b32.xlu0 %v11252_v52, %s10271_s17 }
0x221a   :  { %4710 = vrot.lane.b32.xlu0 %v11257_v30, %s10270_s16 }
0x224e   :  { %v1613_v50 = vpop.xlane.xlu1 %1612 }
0x224f   :  { %v1614_v20 = vmul.f32 0.03125, %v1613_v50 }
0x2251   :  { %v1615_v26 = vadd.f32 1e-05, %v1614_v20 }
0x2252   :  { %v4920_v36 = vpop.permute.xlu1 %4919 }
0x2253   :  { %9987 = vrsqrt.f32 %v1615_v26 }
0x2254   :  { %9989 = vpow2.f32 %v4707_v21 }
0x225d   :  { %v9988_v27 = vpop.eup %9987 }
0x225e   :  { %v9990_v52 = vpop.eup %9989  ;;  %v1617_v30 = vmul.f32 %v9988_v27, %v1609_v3 }
0x2260   :  { %v1618_v44 = vmul.f32 %v11079_v23, %v1617_v30 }
0x2262   :  { %v1619_v35 = vadd.f32 %v11085_v14, %v1618_v44 }
0x2264   :  { %v4922_v53 = vsel %vm138_vm1, %v1619_v35, %v4920_v36  ;;  %v11393_v35 = vld [vmem:[%s12014_s6] ss:$0 sm:$0xff] }
0x2265   :  { %v2080_v36 = vadd.f32 %v11393_v35, %v10817_v60  ;;  %v10127_v60 = vld [vmem:[%s12008_s0 + $0x6] sm:$0x3] }
0x2284   :  { %v4829_v12 = vpop.permute.xlu0 %4828 }
0x2285   :  { %8791 = vmatmul.mubr.msk.f32.vlgmr.msra.gmra.mrb[46].mxu0 %vm138_vm1, %v4829_v12 }
0x2286   :  { %9585 = vmatpush3.bf16.msra.mxu0 %v11059_v61  ;;  %8809 = vmatprep.mubr.msk.f32.mxu0 %vm10267_vm0, %v10268_v2 }
0x2287   :  { %9586 = vmatprep.subr.bf16.mxu0 %v10266_v1 }
0x2288   :  { %v4715_v24 = vpop.permute.xlu0 %4714 }
0x2289   :  { %v4717_v31 = vmul.f32 %v9990_v52, %v4715_v24 }
0x228a   :  { %9588 = vmatpush3.bf16.msra.mxu0 %v11064_v49 }
0x228b   :  { %4719 = vrot.lane.b32.xlu1 %v4717_v31, %s10270_s16  ;;  %9589 = vmatprep.subr.bf16.mxu0 %v10266_v1 }
0x228c   :  { %v4711_v23 = vpop.permute.xlu0 %4710 }
0x228d   :  { %v4713_v14 = vmul.f32 %v9990_v52, %v4711_v23 }
0x228e   :  { %9591 = vmatpush3.bf16.msra.mxu0 %v11070_v7 }
0x228f   :  { %9592 = vmatprep.subr.bf16.mxu0 %v10266_v1 }
0x2292   :  { %9594 = vmatpush3.bf16.msra.mxu0 %v11074_v8 }
0x2293   :  { %9613 = vmatprep.subr.bf16.mxu0 %v10266_v1 }
0x2295   :  { %8810 = vmatmul.mubr.msk.f32.vlgmr.msra.gmra.mrb[48].mxu0 %vm148_vm2, %v4922_v53  ;;  %v2084_v53 = vmul.f32 0.044715, %v2080_v36 }
0x2296   :  { %9615 = vmatpush3.bf16.msra.mxu0 %v11206_v17  ;;  %8850 = vmatprep.mubr.msk.f32.mxu0 %vm10267_vm0, %v10268_v2 }
0x2297   :  { %9616 = vmatprep.subr.bf16.mxu0 %v10266_v1  ;;  %v2085_v23 = vmul.f32 %v2084_v53, %v2080_v36 }
0x229a   :  { %9618 = vmatpush3.bf16.msra.mxu0 %v11209_v11 }
0x229b   :  { %9619 = vmatprep.subr.bf16.mxu0 %v10266_v1 }
0x22fd   :  { %v4720_v18 = vpop.permute.xlu1 %4719 }
0x22fe   :  { %v4722_v38 = vadd.f32 %v4720_v18, %v4713_v14  ;;  %v2086_v14 = vmul.f32 %v2085_v23, %v2080_v36 }
0x2300   :  { %5002 = vrot.lane.b32.xlu1 %v4722_v38, %s10269_s15 }
0x2358   :  { %v4898_v43 = vpop.f32.mrb[46].mxu0 }
0x2359   :  { %v8792_v45 = vpop.f32.mrb[47].mxu0  ;;  %v4899_v27 = vadd.f32 %v11274_v63, %v4898_v43 }
0x235a   :  { %v2087_v45 = vadd.f32 %v2086_v14, %v2080_v36 }
0x235b   :  { %v4902_v52 = vmin.f32 %v4899_v27, 20.0 }
0x235d   :  { %v4903_v30 = vmul.f32 1.442695, %v4902_v52 }
0x2368   :  { %v4992_v15 = vpop.f32.mrb[48].mxu0 }
0x2369   :  { %v4993_v48 = vadd.f32 %v11109_v40, %v4992_v15  ;;  %v8811_v59 = vpop.f32.mrb[49].mxu0 }
0x236b   :  { %9991 = vtanh.f32 %v4993_v48  ;;  %v4996_v57 = vmul.f32 0.5, %v4993_v48  ;;  %v2088_v48 = vmul.f32 0.7978846, %v2087_v45 }
0x236d   :  { %9993 = vtanh.f32 %v4996_v57 }
0x2372   :  { %v5003_v50 = vpop.permute.xlu1 %5002 }
0x2375   :  { %v11350_v37 = vpop.eup %9991 }
0x2376   :  { %5007 = vrot.lane.b32.xlu0 %v11350_v37, %s10269_s15 }
0x2377   :  { %v9994_v0 = vpop.eup %9993 }
0x2378   :  { %v4998_v3 = vadd.f32 1.0, %v9994_v0  ;;  %v2083_v0 = vmul.f32 0.5, %v2080_v36 }
0x237a   :  { %v4999_v58 = vmul.f32 0.5, %v4998_v3 }
0x237c   :  { %v5005_v19 = vmul.f32 %v5003_v50, %v4999_v58 }
0x23e8   :  { %v5008_v4 = vpop.permute.xlu0 %5007 }
0x23e9   :  { %v5010_v6 = vmul.f32 %v5008_v4, %v4999_v58 }
0x23eb   :  { %5012 = vrot.lane.b32.xlu0 %v5010_v6, %s10269_s15 }
0x245d   :  { %v5013_v20 = vpop.permute.xlu0 %5012 }
0x245e   :  { %v11355_v29 = vadd.f32 %v5013_v20, %v5005_v19 }
0x2460   :  { %9995 = vtanh.f32 %v11355_v29 }
0x2461   :  { %9997 = vpow2.f32 %v4903_v30 }
0x2462   :  { %9999 = vtanh.f32 %v2088_v48 }
0x246a   :  { %v9996_v26 = vpop.eup %9995 }
0x246b   :  { %5018 = vrot.lane.b32.xlu1 %v9996_v26, %s10269_s15 }
0x246f   :  { %5115 = vrot.lane.b32.xlu1 %v11317_v10, %s10270_s16 }
0x2473   :  { %4906 = vrot.lane.b32.xlu1 %v11310_v33, %s10270_s16  ;;  %v9998_v33 = vpop.eup %9997 }
0x2474   :  { %v10000_v59 = vpop.eup %9999 }
0x2475   :  { %v2090_v57 = vadd.f32 1.0, %v10000_v59 }
0x2477   :  { %v2091_v3 = vmul.f32 %v2090_v57, %v2083_v0 }
0x24dd   :  { %v5019_v21 = vpop.permute.xlu1 %5018 }
0x24de   :  { %v11363_v12 = vmul.f32 %v5019_v21, %v4999_v58  ;;  %v2092_v58 = vadd.f32 %v10127_v60, %v2091_v3 }
0x24e0   :  { %5023 = vrot.lane.b32.xlu0 %v11363_v12, %s10271_s17  ;;  %v2093_v4 = vsel %vm627_vm3, %v2092_v58, 0.0 }
0x24e4   :  { %4910 = vrot.lane.b32.xlu0 %v11305_v55, %s10271_s17  ;;  %v5116_v55 = vpop.permute.xlu1 %5115 }
0x24e8   :  { %v4907_v18 = vpop.permute.xlu1 %4906 }
0x24e9   :  { %v4909_v38 = vmul.f32 %v9998_v33, %v4907_v18 }
0x2552   :  { %v5024_v24 = vpop.permute.xlu0 %5023 }
0x2553   :  { %8821 = vmatmul.mubr.msk.f32.vlgmr.msra.gmra.mrb[48].mxu1 %vm138_vm1, %v5024_v24  ;;  %v5118_v44 = vsel %vm138_vm1, %v5024_v24, %v5116_v55 }
0x2554   :  { %9603 = vmatpush3.bf16.msra.mxu1 %v11151_v5  ;;  %8839 = vmatprep.mubr.msk.f32.mxu1 %vm10267_vm0, %v10268_v2 }
0x2555   :  { %9604 = vmatprep.subr.bf16.mxu1 %v10266_v1 }
0x2556   :  { %v4911_v10 = vpop.permute.xlu0 %4910 }
0x2557   :  { %v4913_v31 = vmul.f32 %v9998_v33, %v4911_v10 }
0x2558   :  { %9606 = vmatpush3.bf16.msra.mxu1 %v11155_v47 }
0x2559   :  { %4915 = vrot.lane.b32.xlu0 %v4913_v31, %s10270_s16  ;;  %9607 = vmatprep.subr.bf16.mxu1 %v10266_v1 }
0x255c   :  { %9609 = vmatpush3.bf16.msra.mxu1 %v11161_v51 }
0x255d   :  { %9610 = vmatprep.subr.bf16.mxu1 %v10266_v1 }
0x2560   :  { %9612 = vmatpush3.bf16.msra.mxu1 %v11165_v56 }
0x2561   :  { %9631 = vmatprep.subr.bf16.mxu1 %v10266_v1 }
0x2563   :  { %8840 = vmatmul.mubr.msk.f32.vlgmr.msra.gmra.mrb[50].mxu1 %vm148_vm2, %v5118_v44 }
0x2564   :  { %9633 = vmatpush3.bf16.msra.mxu1 %v11139_v28  ;;  %8880 = vmatprep.mubr.msk.f32.mxu1 %vm10267_vm0, %v10268_v2 }
0x2565   :  { %9634 = vmatprep.subr.bf16.mxu1 %v10266_v1 }
0x2568   :  { %9636 = vmatpush3.bf16.msra.mxu1 %v11144_v62 }
0x2569   :  { %9637 = vmatprep.subr.bf16.mxu1 %v10266_v1 }
0x25cb   :  { %v4916_v43 = vpop.permute.xlu0 %4915 }
0x25cc   :  { %v4918_v15 = vadd.f32 %v4916_v43, %v4909_v38 }
0x25ce   :  { %5198 = vrot.lane.b32.xlu0 %v4918_v15, %s10269_s15 }
0x25ed   :  { %2094 = vadd.xlane.f32.xlu0 %v2093_v4 }
0x2626   :  { %v5093_v6 = vpop.f32.mrb[48].mxu1 }
0x2627   :  { %v8822_v50 = vpop.f32.mrb[49].mxu1  ;;  %v5094_v59 = vadd.f32 %v11225_v22, %v5093_v6 }
0x2628   :  { %v11435_v50 = vld [vmem:[%s12015_s7] ss:$0 sm:$0xff] }
0x2629   :  { %v5097_v0 = vmin.f32 %v5094_v59, 20.0 }
0x262b   :  { %v5098_v60 = vmul.f32 1.442695, %v5097_v0 }
0x2636   :  { %v5188_v19 = vpop.f32.mrb[50].mxu1 }
0x2637   :  { %v5189_v20 = vadd.f32 %v11187_v46, %v5188_v19  ;;  %v8841_v26 = vpop.f32.mrb[51].mxu1 }
0x2639   :  { %10001 = vtanh.f32 %v5189_v20  ;;  %v5192_v27 = vmul.f32 0.5, %v5189_v20  ;;  %v11443_v20 = vld [vmem:[%s12016_s8] ss:$0 sm:$0xff] }
0x263b   :  { %10003 = vtanh.f32 %v5192_v27 }
0x2640   :  { %v5199_v31 = vpop.permute.xlu0 %5198 }
0x2643   :  { %v11403_v21 = vpop.eup %10001 }
0x2644   :  { %5203 = vrot.lane.b32.xlu1 %v11403_v21, %s10269_s15 }
0x2645   :  { %v10004_v52 = vpop.eup %10003 }
0x2646   :  { %v5194_v30 = vadd.f32 1.0, %v10004_v52 }
0x2648   :  { %v5195_v24 = vmul.f32 0.5, %v5194_v30 }
0x264a   :  { %v5201_v55 = vmul.f32 %v5199_v31, %v5195_v24 }
0x267a   :  { %v2095_v23 = vpop.xlane.xlu0 %2094 }
0x267b   :  { %v2096_v14 = vmul.f32 0.03125, %v2095_v23 }
0x267d   :  { %v2097_v18 = vsub.f32 %v2092_v58, %v2096_v14 }
0x267f   :  { %v2098_v38 = vmul.f32 %v2097_v18, %v2097_v18 }
0x2681   :  { %v2099_v43 = vsel %vm627_vm3, %v2098_v38, 0.0 }
0x26b6   :  { %v5204_v33 = vpop.permute.xlu1 %5203 }
0x26b7   :  { %v5206_v10 = vmul.f32 %v5204_v33, %v5195_v24 }
0x26b9   :  { %5208 = vrot.lane.b32.xlu1 %v5206_v10, %s10269_s15 }
0x272b   :  { %v5209_v44 = vpop.permute.xlu1 %5208 }
0x272c   :  { %v11408_v36 = vadd.f32 %v5209_v44, %v5201_v55 }
0x272e   :  { %10005 = vtanh.f32 %v11408_v36 }
0x2738   :  { %v10006_v53 = vpop.eup %10005 }
0x2739   :  { %5214 = vrot.lane.b32.xlu1 %v10006_v53, %s10269_s15 }
0x275d   :  { %2100 = vadd.xlane.f32.xlu1 %v2099_v43 }
0x276e   :  { %5310 = vrot.lane.b32.xlu1 %v11363_v12, %s10270_s16 }
0x27ab   :  { %v5215_v45 = vpop.permute.xlu1 %5214 }
0x27ac   :  { %v11415_v15 = vmul.f32 %v5215_v45, %v5195_v24 }
0x27ae   :  { %5219 = vrot.lane.b32.xlu0 %v11415_v15, %s10271_s17 }
0x27b2   :  { %5105 = vrot.lane.b32.xlu0 %v11350_v37, %s10271_s17 }
0x27b6   :  { %5101 = vrot.lane.b32.xlu0 %v11355_v29, %s10270_s16 }
0x27ea   :  { %v2101_v48 = vpop.xlane.xlu1 %2100 }
0x27eb   :  { %v2102_v57 = vmul.f32 0.03125, %v2101_v48 }
0x27ed   :  { %v2103_v3 = vadd.f32 1e-05, %v2102_v57 }
0x27ee   :  { %v5311_v27 = vpop.permute.xlu1 %5310 }
0x27ef   :  { %10007 = vrsqrt.f32 %v2103_v3 }
0x27f0   :  { %10009 = vpow2.f32 %v5098_v60 }
0x27f9   :  { %v10008_v58 = vpop.eup %10007 }
0x27fa   :  { %v10010_v37 = vpop.eup %10009  ;;  %v2105_v29 = vmul.f32 %v10008_v58, %v2097_v18 }
0x27fc   :  { %v2106_v19 = vmul.f32 %v11435_v50, %v2105_v29 }
0x27fe   :  { %v2107_v26 = vadd.f32 %v11443_v20, %v2106_v19 }
0x2800   :  { %v5313_v52 = vsel %vm138_vm1, %v2107_v26, %v5311_v27  ;;  %v2568_v27 = vadd.f32 %v11393_v35, %v10913_v39  ;;  %v10130_v39 = vld [vmem:[%s12008_s0 + $0x8] sm:$0x3] }
0x2820   :  { %v5220_v12 = vpop.permute.xlu0 %5219 }
0x2821   :  { %8851 = vmatmul.mubr.msk.f32.vlgmr.msra.gmra.mrb[50].mxu0 %vm138_vm1, %v5220_v12 }
0x2822   :  { %9621 = vmatpush3.bf16.msra.mxu0 %v11059_v61  ;;  %8869 = vmatprep.mubr.msk.f32.mxu0 %vm10267_vm0, %v10268_v2 }
0x2823   :  { %9622 = vmatprep.subr.bf16.mxu0 %v10266_v1 }
0x2824   :  { %v5106_v4 = vpop.permute.xlu0 %5105 }
0x2825   :  { %v5108_v6 = vmul.f32 %v10010_v37, %v5106_v4 }
0x2826   :  { %9624 = vmatpush3.bf16.msra.mxu0 %v11064_v49 }
0x2827   :  { %5110 = vrot.lane.b32.xlu1 %v5108_v6, %s10270_s16  ;;  %9625 = vmatprep.subr.bf16.mxu0 %v10266_v1 }
0x2828   :  { %v5102_v30 = vpop.permute.xlu0 %5101 }
0x2829   :  { %v5104_v24 = vmul.f32 %v10010_v37, %v5102_v30 }
0x282a   :  { %9627 = vmatpush3.bf16.msra.mxu0 %v11070_v7 }
0x282b   :  { %9628 = vmatprep.subr.bf16.mxu0 %v10266_v1 }
0x282e   :  { %9630 = vmatpush3.bf16.msra.mxu0 %v11074_v8 }
0x282f   :  { %9649 = vmatprep.subr.bf16.mxu0 %v10266_v1 }
0x2831   :  { %8870 = vmatmul.mubr.msk.f32.vlgmr.msra.gmra.mrb[52].mxu0 %vm148_vm2, %v5313_v52  ;;  %v2572_v52 = vmul.f32 0.044715, %v2568_v27 }
0x2832   :  { %9651 = vmatpush3.bf16.msra.mxu0 %v11206_v17  ;;  %8910 = vmatprep.mubr.msk.f32.mxu0 %vm10267_vm0, %v10268_v2 }
0x2833   :  { %9652 = vmatprep.subr.bf16.mxu0 %v10266_v1  ;;  %v2573_v30 = vmul.f32 %v2572_v52, %v2568_v27 }
0x2836   :  { %9654 = vmatpush3.bf16.msra.mxu0 %v11209_v11 }
0x2837   :  { %9655 = vmatprep.subr.bf16.mxu0 %v10266_v1 }
0x2899   :  { %v5111_v33 = vpop.permute.xlu1 %5110 }
0x289a   :  { %v5113_v10 = vadd.f32 %v5111_v33, %v5104_v24  ;;  %v2574_v24 = vmul.f32 %v2573_v30, %v2568_v27 }
0x289c   :  { %5393 = vrot.lane.b32.xlu1 %v5113_v10, %s10269_s15 }
0x28f4   :  { %v5289_v31 = vpop.f32.mrb[50].mxu0 }
0x28f5   :  { %v8852_v55 = vpop.f32.mrb[51].mxu0  ;;  %v5290_v37 = vadd.f32 %v11274_v63, %v5289_v31 }
0x28f6   :  { %v2575_v55 = vadd.f32 %v2574_v24, %v2568_v27 }
0x28f7   :  { %v5293_v29 = vmin.f32 %v5290_v37, 20.0 }
0x28f9   :  { %v5294_v4 = vmul.f32 1.442695, %v5293_v29 }
0x2904   :  { %v5383_v44 = vpop.f32.mrb[52].mxu0 }
0x2905   :  { %v5384_v53 = vadd.f32 %v11109_v40, %v5383_v44  ;;  %v8871_v23 = vpop.f32.mrb[53].mxu0 }
0x2907   :  { %10011 = vtanh.f32 %v5384_v53  ;;  %v5387_v18 = vmul.f32 0.5, %v5384_v53  ;;  %v2576_v53 = vmul.f32 0.7978846, %v2575_v55 }
0x2909   :  { %10013 = vtanh.f32 %v5387_v18 }
0x290e   :  { %v5394_v57 = vpop.permute.xlu1 %5393 }
0x2911   :  { %v11458_v14 = vpop.eup %10011 }
0x2912   :  { %5398 = vrot.lane.b32.xlu0 %v11458_v14, %s10269_s15 }
0x2913   :  { %v10014_v38 = vpop.eup %10013 }
0x2914   :  { %v5389_v43 = vadd.f32 1.0, %v10014_v38  ;;  %v2571_v38 = vmul.f32 0.5, %v2568_v27 }
0x2916   :  { %v5390_v45 = vmul.f32 0.5, %v5389_v43 }
0x2918   :  { %v5396_v0 = vmul.f32 %v5394_v57, %v5390_v45 }
0x2984   :  { %v5399_v48 = vpop.permute.xlu0 %5398 }
0x2985   :  { %v5401_v59 = vmul.f32 %v5399_v48, %v5390_v45 }
0x2987   :  { %5403 = vrot.lane.b32.xlu0 %v5401_v59, %s10269_s15 }
0x29f9   :  { %v5404_v3 = vpop.permute.xlu0 %5403 }
0x29fa   :  { %v11463_v40 = vadd.f32 %v5404_v3, %v5396_v0 }
0x29fc   :  { %10015 = vtanh.f32 %v11463_v40 }
0x29fd   :  { %10017 = vpow2.f32 %v5294_v4 }
0x29fe   :  { %10019 = vtanh.f32 %v2576_v53 }
0x2a06   :  { %v10016_v60 = vpop.eup %10015 }
0x2a07   :  { %5409 = vrot.lane.b32.xlu1 %v10016_v60, %s10269_s15 }
0x2a0b   :  { %5506 = vrot.lane.b32.xlu1 %v11415_v15, %s10270_s16 }
0x2a0f   :  { %5297 = vrot.lane.b32.xlu1 %v11408_v36, %s10270_s16  ;;  %v10018_v36 = vpop.eup %10017 }
0x2a10   :  { %v10020_v23 = vpop.eup %10019 }
0x2a11   :  { %v2578_v18 = vadd.f32 1.0, %v10020_v23 }
0x2a13   :  { %v2579_v43 = vmul.f32 %v2578_v18, %v2571_v38 }
0x2a79   :  { %v5410_v12 = vpop.permute.xlu1 %5409 }
0x2a7a   :  { %v11471_v58 = vmul.f32 %v5410_v12, %v5390_v45  ;;  %v2580_v45 = vadd.f32 %v10130_v39, %v2579_v43 }
0x2a7c   :  { %5414 = vrot.lane.b32.xlu0 %v11471_v58, %s10271_s17  ;;  %v2581_v48 = vsel %vm627_vm3, %v2580_v45, 0.0 }
0x2a80   :  { %5301 = vrot.lane.b32.xlu0 %v11403_v21, %s10271_s17  ;;  %v5507_v21 = vpop.permute.xlu1 %5506 }
0x2a84   :  { %v5298_v33 = vpop.permute.xlu1 %5297 }
0x2a85   :  { %v5300_v10 = vmul.f32 %v10018_v36, %v5298_v33 }
0x2aee   :  { %v5415_v6 = vpop.permute.xlu0 %5414 }
0x2aef   :  { %8881 = vmatmul.mubr.msk.f32.vlgmr.msra.gmra.mrb[52].mxu1 %vm138_vm1, %v5415_v6  ;;  %v5509_v26 = vsel %vm138_vm1, %v5415_v6, %v5507_v21 }
0x2af0   :  { %9639 = vmatpush3.bf16.msra.mxu1 %v11151_v5  ;;  %8899 = vmatprep.mubr.msk.f32.mxu1 %vm10267_vm0, %v10268_v2 }
0x2af1   :  { %9640 = vmatprep.subr.bf16.mxu1 %v10266_v1 }
0x2af2   :  { %v5302_v15 = vpop.permute.xlu0 %5301 }
0x2af3   :  { %v5304_v19 = vmul.f32 %v10018_v36, %v5302_v15 }
0x2af4   :  { %9642 = vmatpush3.bf16.msra.mxu1 %v11155_v47 }
0x2af5   :  { %5306 = vrot.lane.b32.xlu0 %v5304_v19, %s10270_s16  ;;  %9643 = vmatprep.subr.bf16.mxu1 %v10266_v1 }
0x2af8   :  { %9645 = vmatpush3.bf16.msra.mxu1 %v11161_v51 }
0x2af9   :  { %9646 = vmatprep.subr.bf16.mxu1 %v10266_v1 }
0x2afc   :  { %9648 = vmatpush3.bf16.msra.mxu1 %v11165_v56 }
0x2afd   :  { %9667 = vmatprep.subr.bf16.mxu1 %v10266_v1 }
0x2aff   :  { %8900 = vmatmul.mubr.msk.f32.vlgmr.msra.gmra.mrb[54].mxu1 %vm148_vm2, %v5509_v26 }
0x2b00   :  { %9669 = vmatpush3.bf16.msra.mxu1 %v11139_v28  ;;  %8940 = vmatprep.mubr.msk.f32.mxu1 %vm10267_vm0, %v10268_v2 }
0x2b01   :  { %9670 = vmatprep.subr.bf16.mxu1 %v10266_v1 }
0x2b04   :  { %9672 = vmatpush3.bf16.msra.mxu1 %v11144_v62 }
0x2b05   :  { %9673 = vmatprep.subr.bf16.mxu1 %v10266_v1 }
0x2b67   :  { %v5307_v31 = vpop.permute.xlu0 %5306 }
0x2b68   :  { %v5309_v44 = vadd.f32 %v5307_v31, %v5300_v10 }
0x2b6a   :  { %5589 = vrot.lane.b32.xlu0 %v5309_v44, %s10269_s15 }
0x2b89   :  { %2582 = vadd.xlane.f32.xlu0 %v2581_v48 }
0x2bc2   :  { %v5484_v59 = vpop.f32.mrb[52].mxu1 }
0x2bc3   :  { %v8882_v57 = vpop.f32.mrb[53].mxu1  ;;  %v5485_v53 = vadd.f32 %v11225_v22, %v5484_v59 }
0x2bc5   :  { %v5488_v18 = vmin.f32 %v5485_v53, 20.0 }
0x2bc7   :  { %v5489_v43 = vmul.f32 1.442695, %v5488_v18 }
0x2bd2   :  { %v5579_v0 = vpop.f32.mrb[54].mxu1 }
0x2bd3   :  { %v5580_v3 = vadd.f32 %v11187_v46, %v5579_v0  ;;  %v8901_v60 = vpop.f32.mrb[55].mxu1 }
0x2bd5   :  { %10021 = vtanh.f32 %v5580_v3  ;;  %v5583_v37 = vmul.f32 0.5, %v5580_v3 }
0x2bd7   :  { %10023 = vtanh.f32 %v5583_v37 }
0x2bdc   :  { %v5590_v19 = vpop.permute.xlu0 %5589 }
0x2bdf   :  { %v11506_v12 = vpop.eup %10021 }
0x2be0   :  { %5594 = vrot.lane.b32.xlu1 %v11506_v12, %s10269_s15 }
0x2be1   :  { %v10024_v29 = vpop.eup %10023 }
0x2be2   :  { %v5585_v4 = vadd.f32 1.0, %v10024_v29 }
0x2be4   :  { %v5586_v6 = vmul.f32 0.5, %v5585_v4 }
0x2be6   :  { %v5592_v21 = vmul.f32 %v5590_v19, %v5586_v6 }
0x2c16   :  { %v2583_v52 = vpop.xlane.xlu0 %2582 }
0x2c17   :  { %v2584_v30 = vmul.f32 0.03125, %v2583_v52 }
0x2c19   :  { %v2585_v24 = vsub.f32 %v2580_v45, %v2584_v30 }
0x2c1b   :  { %v2586_v33 = vmul.f32 %v2585_v24, %v2585_v24 }
0x2c1d   :  { %v2587_v10 = vsel %vm627_vm3, %v2586_v33, 0.0 }
0x2c52   :  { %v5595_v36 = vpop.permute.xlu1 %5594 }
0x2c53   :  { %v5597_v15 = vmul.f32 %v5595_v36, %v5586_v6 }
0x2c55   :  { %5599 = vrot.lane.b32.xlu1 %v5597_v15, %s10269_s15  ;;  %v11553_v15 = vld [vmem:[%s12010_s2 + $0x2] ss:$0 sm:$0xff] }
0x2cc7   :  { %v5600_v26 = vpop.permute.xlu1 %5599 }
0x2cc8   :  { %v11511_v46 = vadd.f32 %v5600_v26, %v5592_v21 }
0x2cca   :  { %10025 = vtanh.f32 %v11511_v46 }
0x2cd4   :  { %v10026_v27 = vpop.eup %10025 }
0x2cd5   :  { %5605 = vrot.lane.b32.xlu1 %v10026_v27, %s10269_s15 }
0x2cf9   :  { %2588 = vadd.xlane.f32.xlu1 %v2587_v10 }
0x2d0a   :  { %5701 = vrot.lane.b32.xlu1 %v11471_v58, %s10270_s16 }
0x2d47   :  { %v5606_v31 = vpop.permute.xlu1 %5605 }
0x2d48   :  { %v11518_v55 = vmul.f32 %v5606_v31, %v5586_v6 }
0x2d4a   :  { %5610 = vrot.lane.b32.xlu0 %v11518_v55, %s10271_s17 }
0x2d4e   :  { %5496 = vrot.lane.b32.xlu0 %v11458_v14, %s10271_s17 }
0x2d52   :  { %5492 = vrot.lane.b32.xlu0 %v11463_v40, %s10270_s16 }
0x2d86   :  { %v2589_v44 = vpop.xlane.xlu1 %2588 }
0x2d87   :  { %v2590_v23 = vmul.f32 0.03125, %v2589_v44 }
0x2d89   :  { %v2591_v38 = vadd.f32 1e-05, %v2590_v23 }
0x2d8a   :  { %v5702_v57 = vpop.permute.xlu1 %5701 }
0x2d8b   :  { %10027 = vrsqrt.f32 %v2591_v38 }
0x2d8c   :  { %10029 = vpow2.f32 %v5489_v43 }
0x2d95   :  { %v10028_v39 = vpop.eup %10027 }
0x2d96   :  { %v10030_v14 = vpop.eup %10029  ;;  %v2593_v40 = vmul.f32 %v10028_v39, %v2585_v24 }
0x2d98   :  { %v2594_v48 = vmul.f32 %v11435_v50, %v2593_v40 }
0x2d9a   :  { %v2595_v59 = vadd.f32 %v11443_v20, %v2594_v48 }
0x2d9c   :  { %v5704_v0 = vsel %vm138_vm1, %v2595_v59, %v5702_v57 }
0x2dbc   :  { %v5611_v58 = vpop.permute.xlu0 %5610 }
0x2dbd   :  { %8911 = vmatmul.mubr.msk.f32.vlgmr.msra.gmra.mrb[54].mxu0 %vm138_vm1, %v5611_v58 }
0x2dbe   :  { %9657 = vmatpush3.bf16.msra.mxu0 %v11059_v61  ;;  %8929 = vmatprep.mubr.msk.f32.mxu0 %vm10267_vm0, %v10268_v2 }
0x2dbf   :  { %9658 = vmatprep.subr.bf16.mxu0 %v10266_v1 }
0x2dc0   :  { %v5497_v22 = vpop.permute.xlu0 %5496 }
0x2dc1   :  { %v5499_v45 = vmul.f32 %v10030_v14, %v5497_v22 }
0x2dc2   :  { %9660 = vmatpush3.bf16.msra.mxu0 %v11064_v49 }
0x2dc3   :  { %5501 = vrot.lane.b32.xlu1 %v5499_v45, %s10270_s16  ;;  %9661 = vmatprep.subr.bf16.mxu0 %v10266_v1  ;;  %v3056_v45 = vadd.f32 %v11393_v35, %v10989_v13  ;;  %v10132_v13 = vld [vmem:[%s12008_s0 + $0xa] sm:$0x3] }
0x2dc4   :  { %v5493_v3 = vpop.permute.xlu0 %5492 }
0x2dc5   :  { %v5495_v60 = vmul.f32 %v10030_v14, %v5493_v3  ;;  %v3060_v48 = vmul.f32 0.044715, %v3056_v45 }
0x2dc6   :  { %9663 = vmatpush3.bf16.msra.mxu0 %v11070_v7 }
0x2dc7   :  { %9664 = vmatprep.subr.bf16.mxu0 %v10266_v1  ;;  %v3061_v59 = vmul.f32 %v3060_v48, %v3056_v45 }
0x2dc9   :  { %v3062_v57 = vmul.f32 %v3061_v59, %v3056_v45 }
0x2dca   :  { %9666 = vmatpush3.bf16.msra.mxu0 %v11074_v8 }
0x2dcb   :  { %9685 = vmatprep.subr.bf16.mxu0 %v10266_v1 }
0x2dcd   :  { %8930 = vmatmul.mubr.msk.f32.vlgmr.msra.gmra.mrb[56].mxu0 %vm148_vm2, %v5704_v0 }
0x2dce   :  { %9687 = vmatpush3.bf16.msra.mxu0 %v11206_v17  ;;  %8970 = vmatprep.mubr.msk.f32.mxu0 %vm10267_vm0, %v10268_v2 }
0x2dcf   :  { %9688 = vmatprep.subr.bf16.mxu0 %v10266_v1 }
0x2dd2   :  { %9690 = vmatpush3.bf16.msra.mxu0 %v11209_v11 }
0x2dd3   :  { %9691 = vmatprep.subr.bf16.mxu0 %v10266_v1 }
0x2e35   :  { %v5502_v37 = vpop.permute.xlu1 %5501 }
0x2e36   :  { %v5504_v29 = vadd.f32 %v5502_v37, %v5495_v60  ;;  %v3063_v37 = vadd.f32 %v3062_v57, %v3056_v45 }
0x2e38   :  { %5784 = vrot.lane.b32.xlu1 %v5504_v29, %s10269_s15 }
0x2e90   :  { %v5680_v4 = vpop.f32.mrb[54].mxu0 }
0x2e91   :  { %v8912_v6 = vpop.f32.mrb[55].mxu0  ;;  %v5681_v58 = vadd.f32 %v11274_v63, %v5680_v4  ;;  %v3064_v4 = vmul.f32 0.7978846, %v3063_v37 }
0x2e93   :  { %v5684_v39 = vmin.f32 %v5681_v58, 20.0 }
0x2e95   :  { %v5685_v14 = vmul.f32 1.442695, %v5684_v39 }
0x2ea0   :  { %v5774_v36 = vpop.f32.mrb[56].mxu0 }
0x2ea1   :  { %v5775_v19 = vadd.f32 %v11553_v15, %v5774_v36  ;;  %v8931_v21 = vpop.f32.mrb[57].mxu0 }
0x2ea3   :  { %10031 = vtanh.f32 %v5775_v19  ;;  %v5778_v27 = vmul.f32 0.5, %v5775_v19  ;;  %v3059_v19 = vmul.f32 0.5, %v3056_v45 }
0x2ea5   :  { %10033 = vtanh.f32 %v5778_v27 }
0x2eaa   :  { %v5785_v31 = vpop.permute.xlu1 %5784 }
0x2ead   :  { %v11556_v26 = vpop.eup %10031 }
0x2eae   :  { %5789 = vrot.lane.b32.xlu0 %v11556_v26, %s10269_s15 }
0x2eaf   :  { %v10034_v52 = vpop.eup %10033 }
0x2eb0   :  { %v5780_v30 = vadd.f32 1.0, %v10034_v52 }
0x2eb2   :  { %v5781_v24 = vmul.f32 0.5, %v5780_v30 }
0x2eb4   :  { %v5787_v44 = vmul.f32 %v5785_v31, %v5781_v24 }
0x2f20   :  { %v5790_v33 = vpop.permute.xlu0 %5789 }
0x2f21   :  { %v5792_v10 = vmul.f32 %v5790_v33, %v5781_v24 }
0x2f23   :  { %5794 = vrot.lane.b32.xlu0 %v5792_v10, %s10269_s15  ;;  %v11606_v10 = vld [vmem:[%s12010_s2 + $0x3] ss:$0 sm:$0xff] }
0x2f95   :  { %v5795_v53 = vpop.permute.xlu0 %5794 }
0x2f96   :  { %v11561_v23 = vadd.f32 %v5795_v53, %v5787_v44 }
0x2f98   :  { %10035 = vtanh.f32 %v11561_v23 }
0x2f99   :  { %10037 = vpow2.f32 %v5685_v14 }
0x2f9a   :  { %10039 = vtanh.f32 %v3064_v4 }
0x2fa2   :  { %v10036_v18 = vpop.eup %10035 }
0x2fa3   :  { %5800 = vrot.lane.b32.xlu1 %v10036_v18, %s10269_s15 }
0x2fa7   :  { %5897 = vrot.lane.b32.xlu1 %v11518_v55, %s10270_s16 }
0x2fab   :  { %5688 = vrot.lane.b32.xlu1 %v11511_v46, %s10270_s16  ;;  %v10038_v46 = vpop.eup %10037 }
0x2fac   :  { %v10040_v6 = vpop.eup %10039 }
0x2fad   :  { %v3066_v36 = vadd.f32 1.0, %v10040_v6 }
0x2faf   :  { %v3067_v21 = vmul.f32 %v3066_v36, %v3059_v19 }
0x2fb1   :  { %v3068_v27 = vadd.f32 %v10132_v13, %v3067_v21 }
0x2fb3   :  { %v3069_v52 = vsel %vm627_vm3, %v3068_v27, 0.0 }
0x3015   :  { %v5801_v38 = vpop.permute.xlu1 %5800 }
0x3016   :  { %v11569_v43 = vmul.f32 %v5801_v38, %v5781_v24 }
0x3018   :  { %5805 = vrot.lane.b32.xlu0 %v11569_v43, %s10271_s17 }
0x3019   :  { %v5898_v63 = vpop.permute.xlu1 %5897 }
0x301c   :  { %5692 = vrot.lane.b32.xlu0 %v11506_v12, %s10271_s17 }
0x301d   :  { %v5689_v0 = vpop.permute.xlu1 %5688 }
0x301e   :  { %v5691_v3 = vmul.f32 %v10038_v46, %v5689_v0 }
0x308a   :  { %v5806_v40 = vpop.permute.xlu0 %5805 }
0x308b   :  { %8941 = vmatmul.mubr.msk.f32.vlgmr.msra.gmra.mrb[56].mxu1 %vm138_vm1, %v5806_v40  ;;  %v5900_v12 = vsel %vm138_vm1, %v5806_v40, %v5898_v63 }
0x308c   :  { %9675 = vmatpush3.bf16.msra.mxu1 %v11151_v5  ;;  %8959 = vmatprep.mubr.msk.f32.mxu1 %vm10267_vm0, %v10268_v2 }
0x308d   :  { %9676 = vmatprep.subr.bf16.mxu1 %v10266_v1 }
0x308e   :  { %v5693_v55 = vpop.permute.xlu0 %5692 }
0x308f   :  { %v5695_v22 = vmul.f32 %v10038_v46, %v5693_v55 }
0x3090   :  { %9678 = vmatpush3.bf16.msra.mxu1 %v11155_v47 }
0x3091   :  { %5697 = vrot.lane.b32.xlu0 %v5695_v22, %s10270_s16  ;;  %9679 = vmatprep.subr.bf16.mxu1 %v10266_v1 }
0x3094   :  { %9681 = vmatpush3.bf16.msra.mxu1 %v11161_v51 }
0x3095   :  { %9682 = vmatprep.subr.bf16.mxu1 %v10266_v1 }
0x3098   :  { %9684 = vmatpush3.bf16.msra.mxu1 %v11165_v56 }
0x3099   :  { %9703 = vmatprep.subr.bf16.mxu1 %v10266_v1 }
0x309b   :  { %8960 = vmatmul.mubr.msk.f32.vlgmr.msra.gmra.mrb[58].mxu1 %vm148_vm2, %v5900_v12 }
0x309c   :  { %9705 = vmatpush3.bf16.msra.mxu1 %v11139_v28  ;;  %9000 = vmatprep.mubr.msk.f32.mxu1 %vm10267_vm0, %v10268_v2 }
0x309d   :  { %9706 = vmatprep.subr.bf16.mxu1 %v10266_v1 }
0x30a0   :  { %9708 = vmatpush3.bf16.msra.mxu1 %v11144_v62 }
0x30a1   :  { %9709 = vmatprep.subr.bf16.mxu1 %v10266_v1 }
0x3103   :  { %v5698_v60 = vpop.permute.xlu0 %5697 }
0x3104   :  { %v5700_v29 = vadd.f32 %v5698_v60, %v5691_v3 }
0x3106   :  { %5980 = vrot.lane.b32.xlu0 %v5700_v29, %s10269_s15  ;;  %v11632_v29 = vld [vmem:[%s12012_s4 + $0x2] ss:$0 sm:$0xff] }
0x3125   :  { %3070 = vadd.xlane.f32.xlu0 %v3069_v52 }
0x315e   :  { %v5875_v30 = vpop.f32.mrb[56].mxu1 }
0x315f   :  { %v8942_v24 = vpop.f32.mrb[57].mxu1 }
0x316e   :  { %v5970_v33 = vpop.f32.mrb[58].mxu1 }
0x316f   :  { %v5971_v31 = vadd.f32 %v11606_v10, %v5970_v33  ;;  %v8961_v44 = vpop.f32.mrb[59].mxu1 }
0x3171   :  { %10041 = vtanh.f32 %v5971_v31  ;;  %v5974_v18 = vmul.f32 0.5, %v5971_v31 }
0x3173   :  { %10043 = vtanh.f32 %v5974_v18 }
0x3178   :  { %v5981_v46 = vpop.permute.xlu0 %5980 }
0x317b   :  { %v11609_v53 = vpop.eup %10041 }
0x317c   :  { %5985 = vrot.lane.b32.xlu1 %v11609_v53, %s10269_s15 }
0x317d   :  { %v10044_v38 = vpop.eup %10043 }
0x317e   :  { %v5976_v58 = vadd.f32 1.0, %v10044_v38 }
0x3180   :  { %v5977_v39 = vmul.f32 0.5, %v5976_v58 }
0x3182   :  { %v5983_v55 = vmul.f32 %v5981_v46, %v5977_v39 }
0x31b2   :  { %v3071_v45 = vpop.xlane.xlu0 %3070 }
0x31b3   :  { %v3072_v48 = vmul.f32 0.03125, %v3071_v45 }
0x31b5   :  { %v3073_v59 = vsub.f32 %v3068_v27, %v3072_v48 }
0x31b7   :  { %v3074_v57 = vmul.f32 %v3073_v59, %v3073_v59 }
0x31b9   :  { %v3075_v0 = vsel %vm627_vm3, %v3074_v57, 0.0 }
0x31ee   :  { %v5986_v14 = vpop.permute.xlu1 %5985 }
0x31ef   :  { %v5988_v40 = vmul.f32 %v5986_v14, %v5977_v39 }
0x31f1   :  { %5990 = vrot.lane.b32.xlu1 %v5988_v40, %s10269_s15 }
0x3263   :  { %v5991_v22 = vpop.permute.xlu1 %5990 }
0x3264   :  { %v11614_v63 = vadd.f32 %v5991_v22, %v5983_v55 }
0x3266   :  { %10045 = vtanh.f32 %v11614_v63 }
0x3270   :  { %v10046_v12 = vpop.eup %10045 }
0x3271   :  { %5996 = vrot.lane.b32.xlu1 %v10046_v12, %s10269_s15 }
0x3295   :  { %3076 = vadd.xlane.f32.xlu1 %v3075_v0 }
0x32a6   :  { %6092 = vrot.lane.b32.xlu1 %v11569_v43, %s10270_s16  ;;  %v5876_v43 = vadd.f32 %v11632_v29, %v5875_v30 }
0x32a8   :  { %v5879_v6 = vmin.f32 %v5876_v43, 20.0 }
0x32aa   :  { %v5880_v19 = vmul.f32 1.442695, %v5879_v6 }
0x32e3   :  { %v5997_v3 = vpop.permute.xlu1 %5996 }
0x32e4   :  { %v11621_v60 = vmul.f32 %v5997_v3, %v5977_v39 }
0x32e6   :  { %6001 = vrot.lane.b32.xlu0 %v11621_v60, %s10271_s17 }
0x32ea   :  { %5887 = vrot.lane.b32.xlu0 %v11556_v26, %s10271_s17 }
0x32ee   :  { %5883 = vrot.lane.b32.xlu0 %v11561_v23, %s10270_s16 }
0x3322   :  { %v3077_v37 = vpop.xlane.xlu1 %3076 }
0x3323   :  { %v3078_v4 = vmul.f32 0.03125, %v3077_v37 }
0x3325   :  { %v3079_v36 = vadd.f32 1e-05, %v3078_v4 }
0x3326   :  { %v6093_v33 = vpop.permute.xlu1 %6092 }
0x3327   :  { %10047 = vrsqrt.f32 %v3079_v36 }
0x3328   :  { %10049 = vpow2.f32 %v5880_v19 }
0x3331   :  { %v10048_v13 = vpop.eup %10047 }
0x3332   :  { %v10050_v26 = vpop.eup %10049  ;;  %v3081_v23 = vmul.f32 %v10048_v13, %v3073_v59 }
0x3334   :  { %v3082_v30 = vmul.f32 %v11435_v50, %v3081_v23 }
0x3336   :  { %v3083_v24 = vadd.f32 %v11443_v20, %v3082_v30 }
0x3338   :  { %v6095_v31 = vsel %vm138_vm1, %v3083_v24, %v6093_v33  ;;  %v3544_v24 = vadd.f32 %v11393_v35, %v11096_v54  ;;  %v10136_v54 = vld [vmem:[%s12008_s0 + $0xc] sm:$0x3] }
0x333a   :  { %v3548_v33 = vmul.f32 0.044715, %v3544_v24 }
0x3358   :  { %v6002_v21 = vpop.permute.xlu0 %6001 }
0x3359   :  { %8971 = vmatmul.mubr.msk.f32.vlgmr.msra.gmra.mrb[58].mxu0 %vm138_vm1, %v6002_v21  ;;  %v11681_v21 = vld [vmem:[%s12012_s4 + $0x3] ss:$0 sm:$0xff] }
0x335a   :  { %9693 = vmatpush3.bf16.msra.mxu0 %v11059_v61  ;;  %8989 = vmatprep.mubr.msk.f32.mxu0 %vm10267_vm0, %v10268_v2 }
0x335b   :  { %9694 = vmatprep.subr.bf16.mxu0 %v10266_v1 }
0x335c   :  { %v5888_v27 = vpop.permute.xlu0 %5887 }
0x335d   :  { %v5890_v52 = vmul.f32 %v10050_v26, %v5888_v27 }
0x335e   :  { %9696 = vmatpush3.bf16.msra.mxu0 %v11064_v49 }
0x335f   :  { %5892 = vrot.lane.b32.xlu1 %v5890_v52, %s10270_s16  ;;  %9697 = vmatprep.subr.bf16.mxu0 %v10266_v1 }
0x3360   :  { %v5884_v44 = vpop.permute.xlu0 %5883 }
0x3361   :  { %v5886_v18 = vmul.f32 %v10050_v26, %v5884_v44 }
0x3362   :  { %9699 = vmatpush3.bf16.msra.mxu0 %v11070_v7 }
0x3363   :  { %9700 = vmatprep.subr.bf16.mxu0 %v10266_v1 }
0x3366   :  { %9702 = vmatpush3.bf16.msra.mxu0 %v11074_v8 }
0x3367   :  { %9721 = vmatprep.subr.bf16.mxu0 %v10266_v1 }
0x3369   :  { %8990 = vmatmul.mubr.msk.f32.vlgmr.msra.gmra.mrb[60].mxu0 %vm148_vm2, %v6095_v31  ;;  %v3549_v31 = vmul.f32 %v3548_v33, %v3544_v24 }
0x336a   :  { %9723 = vmatpush3.bf16.msra.mxu0 %v11206_v17  ;;  %9030 = vmatprep.mubr.msk.f32.mxu0 %vm10267_vm0, %v10268_v2 }
0x336b   :  { %9724 = vmatprep.subr.bf16.mxu0 %v10266_v1  ;;  %v3550_v44 = vmul.f32 %v3549_v31, %v3544_v24 }
0x336e   :  { %9726 = vmatpush3.bf16.msra.mxu0 %v11209_v11 }
0x336f   :  { %9727 = vmatprep.subr.bf16.mxu0 %v10266_v1 }
0x33d1   :  { %v5893_v38 = vpop.permute.xlu1 %5892 }
0x33d2   :  { %v5895_v58 = vadd.f32 %v5893_v38, %v5886_v18 }
0x33d4   :  { %6175 = vrot.lane.b32.xlu1 %v5895_v58, %s10269_s15 }
0x342c   :  { %v6071_v39 = vpop.f32.mrb[58].mxu0 }
0x342d   :  { %v8972_v14 = vpop.f32.mrb[59].mxu0  ;;  %v6072_v13 = vadd.f32 %v11681_v21, %v6071_v39  ;;  %v3551_v39 = vadd.f32 %v3550_v44, %v3544_v24 }
0x343c   :  { %v6165_v40 = vpop.f32.mrb[60].mxu0 }
0x343d   :  { %v6166_v46 = vadd.f32 %v11553_v15, %v6165_v40  ;;  %v8991_v55 = vpop.f32.mrb[61].mxu0  ;;  %v3552_v40 = vmul.f32 0.7978846, %v3551_v39 }
0x343f   :  { %10051 = vtanh.f32 %v6166_v46  ;;  %v6169_v12 = vmul.f32 0.5, %v6166_v46 }
0x3441   :  { %10053 = vtanh.f32 %v6169_v12  ;;  %v3547_v12 = vmul.f32 0.5, %v3544_v24 }
0x3446   :  { %v6176_v3 = vpop.permute.xlu1 %6175 }
0x3449   :  { %v11659_v22 = vpop.eup %10051 }
0x344a   :  { %6180 = vrot.lane.b32.xlu0 %v11659_v22, %s10269_s15 }
0x344b   :  { %v10054_v45 = vpop.eup %10053 }
0x344c   :  { %v6171_v48 = vadd.f32 1.0, %v10054_v45 }
0x344e   :  { %v6172_v59 = vmul.f32 0.5, %v6171_v48 }
0x3450   :  { %v6178_v37 = vmul.f32 %v6176_v3, %v6172_v59 }
0x34bc   :  { %v6181_v57 = vpop.permute.xlu0 %6180 }
0x34bd   :  { %v6183_v0 = vmul.f32 %v6181_v57, %v6172_v59 }
0x34bf   :  { %6185 = vrot.lane.b32.xlu0 %v6183_v0, %s10269_s15 }
0x3531   :  { %v6186_v43 = vpop.permute.xlu0 %6185 }
0x3532   :  { %v11664_v4 = vadd.f32 %v6186_v43, %v6178_v37 }
0x3534   :  { %10055 = vtanh.f32 %v11664_v4 }
0x353e   :  { %v10056_v6 = vpop.eup %10055 }
0x353f   :  { %6191 = vrot.lane.b32.xlu1 %v10056_v6, %s10269_s15 }
0x3543   :  { %6288 = vrot.lane.b32.xlu1 %v11621_v60, %s10270_s16  ;;  %v6075_v60 = vmin.f32 %v6072_v13, 20.0 }
0x3545   :  { %v6076_v26 = vmul.f32 1.442695, %v6075_v60 }
0x3547   :  { %6079 = vrot.lane.b32.xlu1 %v11614_v63, %s10270_s16  ;;  %10057 = vpow2.f32 %v6076_v26 }
0x3548   :  { %10059 = vtanh.f32 %v3552_v40 }
0x35b1   :  { %v6192_v36 = vpop.permute.xlu1 %6191 }
0x35b2   :  { %v11672_v19 = vmul.f32 %v6192_v36, %v6172_v59 }
0x35b4   :  { %6196 = vrot.lane.b32.xlu0 %v11672_v19, %s10271_s17 }
0x35b5   :  { %v6289_v52 = vpop.permute.xlu1 %6288 }
0x35b8   :  { %6083 = vrot.lane.b32.xlu0 %v11609_v53, %s10271_s17  ;;  %v10058_v53 = vpop.eup %10057 }
0x35b9   :  { %v6080_v18 = vpop.permute.xlu1 %6079  ;;  %v10060_v46 = vpop.eup %10059 }
0x35ba   :  { %v6082_v38 = vmul.f32 %v10058_v53, %v6080_v18  ;;  %v3554_v55 = vadd.f32 1.0, %v10060_v46 }
0x35bc   :  { %v3555_v45 = vmul.f32 %v3554_v55, %v3547_v12 }
0x35be   :  { %v3556_v35 = vadd.f32 %v10136_v54, %v3555_v45 }
0x35c0   :  { %v3557_v48 = vsel %vm627_vm3, %v3556_v35, 0.0 }
0x3626   :  { %v6197_v63 = vpop.permute.xlu0 %6196 }
0x3627   :  { %9001 = vmatmul.mubr.msk.f32.vlgmr.msra.gmra.mrb[60].mxu1 %vm138_vm1, %v6197_v63  ;;  %v6291_v30 = vsel %vm138_vm1, %v6197_v63, %v6289_v52 }
0x3628   :  { %9711 = vmatpush3.bf16.msra.mxu1 %v11151_v5  ;;  %9019 = vmatprep.mubr.msk.f32.mxu1 %vm10267_vm0, %v10268_v2 }
0x3629   :  { %9712 = vmatprep.subr.bf16.mxu1 %v10266_v1 }
0x362a   :  { %v6084_v23 = vpop.permute.xlu0 %6083 }
0x362b   :  { %v6086_v27 = vmul.f32 %v10058_v53, %v6084_v23 }
0x362c   :  { %9714 = vmatpush3.bf16.msra.mxu1 %v11155_v47 }
0x362d   :  { %6088 = vrot.lane.b32.xlu0 %v6086_v27, %s10270_s16  ;;  %9715 = vmatprep.subr.bf16.mxu1 %v10266_v1 }
0x3630   :  { %9717 = vmatpush3.bf16.msra.mxu1 %v11161_v51 }
0x3631   :  { %9718 = vmatprep.subr.bf16.mxu1 %v10266_v1 }
0x3634   :  { %9720 = vmatpush3.bf16.msra.mxu1 %v11165_v56 }
0x3635   :  { %9739 = vmatprep.subr.bf16.mxu1 %v10266_v1 }
0x3637   :  { %9020 = vmatmul.mubr.msk.f32.vlgmr.msra.gmra.mrb[62].mxu1 %vm148_vm2, %v6291_v30 }
0x3638   :  { %9741 = vmatpush3.bf16.msra.mxu1 %v11139_v28  ;;  %9060 = vmatprep.mubr.msk.f32.mxu1 %vm10267_vm0, %v10268_v2 }
0x3639   :  { %9742 = vmatprep.subr.bf16.mxu1 %v10266_v1 }
0x363c   :  { %9744 = vmatpush3.bf16.msra.mxu1 %v11144_v62 }
0x363d   :  { %9745 = vmatprep.subr.bf16.mxu1 %v10266_v1 }
0x369f   :  { %v6089_v58 = vpop.permute.xlu0 %6088 }
0x36a0   :  { %v6091_v14 = vadd.f32 %v6089_v58, %v6082_v38 }
0x36a2   :  { %6371 = vrot.lane.b32.xlu0 %v6091_v14, %s10269_s15 }
0x36c1   :  { %3558 = vadd.xlane.f32.xlu0 %v3557_v48 }
0x36fa   :  { %v6266_v59 = vpop.f32.mrb[60].mxu1 }
0x36fb   :  { %v9002_v57 = vpop.f32.mrb[61].mxu1  ;;  %v6267_v14 = vadd.f32 %v11632_v29, %v6266_v59 }
0x36fd   :  { %v6270_v46 = vmin.f32 %v6267_v14, 20.0 }
0x36ff   :  { %v6271_v12 = vmul.f32 1.442695, %v6270_v46 }
0x370a   :  { %v6361_v0 = vpop.f32.mrb[62].mxu1 }
0x370b   :  { %v6362_v3 = vadd.f32 %v11606_v10, %v6361_v0  ;;  %v9021_v37 = vpop.f32.mrb[63].mxu1 }
0x370d   :  { %10061 = vtanh.f32 %v6362_v3  ;;  %v6365_v6 = vmul.f32 0.5, %v6362_v3 }
0x370f   :  { %10063 = vtanh.f32 %v6365_v6 }
0x3714   :  { %v6372_v53 = vpop.permute.xlu0 %6371 }
0x3717   :  { %v11712_v43 = vpop.eup %10061 }
0x3718   :  { %6376 = vrot.lane.b32.xlu1 %v11712_v43, %s10269_s15 }
0x3719   :  { %v10064_v36 = vpop.eup %10063 }
0x371a   :  { %v6367_v13 = vadd.f32 1.0, %v10064_v36 }
0x371c   :  { %v6368_v60 = vmul.f32 0.5, %v6367_v13 }
0x371e   :  { %v6374_v23 = vmul.f32 %v6372_v53, %v6368_v60 }
0x374e   :  { %v3559_v24 = vpop.xlane.xlu0 %3558 }
0x374f   :  { %v3560_v33 = vmul.f32 0.03125, %v3559_v24 }
0x3751   :  { %v3561_v31 = vsub.f32 %v3556_v35, %v3560_v33 }
0x3753   :  { %v3562_v44 = vmul.f32 %v3561_v31, %v3561_v31 }
0x3755   :  { %v3563_v18 = vsel %vm627_vm3, %v3562_v44, 0.0 }
0x378a   :  { %v6377_v26 = vpop.permute.xlu1 %6376 }
0x378b   :  { %v6379_v63 = vmul.f32 %v6377_v26, %v6368_v60 }
0x378d   :  { %6381 = vrot.lane.b32.xlu1 %v6379_v63, %s10269_s15 }
0x37ff   :  { %v6382_v27 = vpop.permute.xlu1 %6381 }
0x3800   :  { %v11717_v52 = vadd.f32 %v6382_v27, %v6374_v23 }
0x3802   :  { %10065 = vtanh.f32 %v11717_v52 }
0x380c   :  { %v10066_v30 = vpop.eup %10065 }
0x380d   :  { %6387 = vrot.lane.b32.xlu1 %v10066_v30, %s10269_s15 }
0x3831   :  { %3564 = vadd.xlane.f32.xlu1 %v3563_v18 }
0x3842   :  { %6483 = vrot.lane.b32.xlu1 %v11672_v19, %s10270_s16 }
0x387f   :  { %v6388_v38 = vpop.permute.xlu1 %6387 }
0x3880   :  { %v11724_v58 = vmul.f32 %v6388_v38, %v6368_v60 }
0x3882   :  { %6392 = vrot.lane.b32.xlu0 %v11724_v58, %s10271_s17 }
0x3886   :  { %6278 = vrot.lane.b32.xlu0 %v11659_v22, %s10271_s17 }
0x388a   :  { %6274 = vrot.lane.b32.xlu0 %v11664_v4, %s10270_s16 }
0x38be   :  { %v3565_v39 = vpop.xlane.xlu1 %3564 }
0x38bf   :  { %v3566_v40 = vmul.f32 0.03125, %v3565_v39 }
0x38c1   :  { %v3567_v55 = vadd.f32 1e-05, %v3566_v40 }
0x38c2   :  { %v6484_v57 = vpop.permute.xlu1 %6483 }
0x38c3   :  { %10067 = vrsqrt.f32 %v3567_v55 }
0x38c4   :  { %10069 = vpow2.f32 %v6271_v12 }
0x38cd   :  { %v10068_v45 = vpop.eup %10067 }
0x38ce   :  { %v10070_v22 = vpop.eup %10069  ;;  %v3569_v4 = vmul.f32 %v10068_v45, %v3561_v31 }
0x38d0   :  { %v3570_v48 = vmul.f32 %v11435_v50, %v3569_v4  ;;  %v10137_v4 = vld [vmem:[%s12014_s6] ss:$0 sm:$0xff] }
0x38d2   :  { %v3571_v59 = vadd.f32 %v11443_v20, %v3570_v48 }
0x38d4   :  { %v6486_v0 = vsel %vm138_vm1, %v3571_v59, %v6484_v57 }
0x38f4   :  { %v6393_v19 = vpop.permute.xlu0 %6392 }
0x38f5   :  { %9031 = vmatmul.mubr.msk.f32.vlgmr.msra.gmra.mrb[62].mxu0 %vm138_vm1, %v6393_v19 }
0x38f6   :  { %9729 = vmatpush3.bf16.msra.mxu0 %v11059_v61  ;;  %9049 = vmatprep.mubr.msk.f32.mxu0 %vm10267_vm0, %v10268_v2 }
0x38f7   :  { %9730 = vmatprep.subr.bf16.mxu0 %v10266_v1 }
0x38f8   :  { %v6279_v54 = vpop.permute.xlu0 %6278 }
0x38f9   :  { %v6281_v35 = vmul.f32 %v10070_v22, %v6279_v54  ;;  %v4032_v54 = vadd.f32 %v10137_v4, %v11180_v42  ;;  %v10138_v42 = vld [vmem:[%s12008_s0 + $0xe] sm:$0x3]  ;;  %s7483_s0 = sshll.u32 %s10273_s3, 4  ;;  %s7484_s0 = int_to_ptr.vmem [resolvable:$true] %s7483_s0 }
0x38fa   :  { %9732 = vmatpush3.bf16.msra.mxu0 %v11064_v49 }
0x38fb   :  { %6283 = vrot.lane.b32.xlu1 %v6281_v35, %s10270_s16  ;;  %9733 = vmatprep.subr.bf16.mxu0 %v10266_v1  ;;  %v4036_v35 = vmul.f32 0.044715, %v4032_v54 }
0x38fc   :  { %v6275_v50 = vpop.permute.xlu0 %6274 }
0x38fd   :  { %v6277_v20 = vmul.f32 %v10070_v22, %v6275_v50  ;;  %v4037_v48 = vmul.f32 %v4036_v35, %v4032_v54 }
0x38fe   :  { %9735 = vmatpush3.bf16.msra.mxu0 %v11070_v7 }
0x38ff   :  { %9736 = vmatprep.subr.bf16.mxu0 %v10266_v1  ;;  %v4038_v59 = vmul.f32 %v4037_v48, %v4032_v54 }
0x3901   :  { %v4039_v50 = vadd.f32 %v4038_v59, %v4032_v54 }
0x3902   :  { %9738 = vmatpush3.bf16.msra.mxu0 %v11074_v8 }
0x3903   :  { %9757 = vmatprep.subr.bf16.mxu0 %v10266_v1 }
0x3905   :  { %9050 = vmatmul.mubr.msk.f32.vlgmr.msra.gmra.mrb[64].mxu0 %vm148_vm2, %v6486_v0 }
0x3906   :  { %9759 = vmatpush3.bf16.msra.mxu0 %v11206_v17  ;;  %9090 = vmatprep.mubr.msk.f32.mxu0 %vm10267_vm0, %v10268_v2 }
0x3907   :  { %9760 = vmatprep.subr.bf16.mxu0 %v10266_v1 }
0x390a   :  { %9762 = vmatpush3.bf16.msra.mxu0 %v11209_v11 }
0x390b   :  { %9763 = vmatprep.subr.bf16.mxu0 %v10266_v1 }
0x396d   :  { %v6284_v3 = vpop.permute.xlu1 %6283 }
0x396e   :  { %v6286_v37 = vadd.f32 %v6284_v3, %v6277_v20  ;;  %v4040_v3 = vmul.f32 0.7978846, %v4039_v50 }
0x3970   :  { %6566 = vrot.lane.b32.xlu1 %v6286_v37, %s10269_s15 }
0x39c8   :  { %v6462_v6 = vpop.f32.mrb[62].mxu0 }
0x39c9   :  { %v9032_v36 = vpop.f32.mrb[63].mxu0  ;;  %v6463_v46 = vadd.f32 %v11681_v21, %v6462_v6  ;;  %v4035_v6 = vmul.f32 0.5, %v4032_v54 }
0x39cb   :  { %v6466_v55 = vmin.f32 %v6463_v46, 20.0 }
0x39cd   :  { %v6467_v12 = vmul.f32 1.442695, %v6466_v55 }
0x39d8   :  { %v6556_v13 = vpop.f32.mrb[64].mxu0 }
0x39d9   :  { %v6557_v60 = vadd.f32 %v11553_v15, %v6556_v13  ;;  %v9051_v26 = vpop.f32.mrb[65].mxu0 }
0x39db   :  { %10071 = vtanh.f32 %v6557_v60  ;;  %v6560_v53 = vmul.f32 0.5, %v6557_v60 }
0x39dd   :  { %10073 = vtanh.f32 %v6560_v53 }
0x39e2   :  { %v6567_v31 = vpop.permute.xlu1 %6566 }
0x39e5   :  { %v11757_v63 = vpop.eup %10071 }
0x39e6   :  { %6571 = vrot.lane.b32.xlu0 %v11757_v63, %s10269_s15 }
0x39e7   :  { %v10074_v23 = vpop.eup %10073 }
0x39e8   :  { %v6562_v27 = vadd.f32 1.0, %v10074_v23 }
0x39ea   :  { %v6563_v30 = vmul.f32 0.5, %v6562_v27 }
0x39ec   :  { %v6569_v44 = vmul.f32 %v6567_v31, %v6563_v30 }
0x3a58   :  { %v6572_v24 = vpop.permute.xlu0 %6571 }
0x3a59   :  { %v6574_v33 = vmul.f32 %v6572_v24, %v6563_v30 }
0x3a5b   :  { %6576 = vrot.lane.b32.xlu0 %v6574_v33, %s10269_s15 }
0x3acd   :  { %v6577_v18 = vpop.permute.xlu0 %6576 }
0x3ace   :  { %v11762_v38 = vadd.f32 %v6577_v18, %v6569_v44 }
0x3ad0   :  { %10075 = vtanh.f32 %v11762_v38 }
0x3ad1   :  { %10077 = vpow2.f32 %v6467_v12 }
0x3ad2   :  { %10079 = vtanh.f32 %v4040_v3 }
0x3ada   :  { %v10076_v39 = vpop.eup %10075 }
0x3adb   :  { %6582 = vrot.lane.b32.xlu1 %v10076_v39, %s10269_s15 }
0x3adf   :  { %6679 = vrot.lane.b32.xlu1 %v11724_v58, %s10270_s16 }
0x3ae3   :  { %6470 = vrot.lane.b32.xlu1 %v11717_v52, %s10270_s16  ;;  %v10078_v52 = vpop.eup %10077 }
0x3b4d   :  { %v6583_v14 = vpop.permute.xlu1 %6582 }
0x3b4e   :  { %v11770_v40 = vmul.f32 %v6583_v14, %v6563_v30 }
0x3b50   :  { %6587 = vrot.lane.b32.xlu0 %v11770_v40, %s10271_s17 }
0x3b54   :  { %6474 = vrot.lane.b32.xlu0 %v11712_v43, %s10271_s17  ;;  %v6680_v43 = vpop.permute.xlu1 %6679 }
0x3b58   :  { %v6471_v57 = vpop.permute.xlu1 %6470 }
0x3bc2   :  { %v6588_v19 = vpop.permute.xlu0 %6587 }
0x3bc3   :  { %9061 = vmatmul.mubr.msk.f32.vlgmr.msra.gmra.mrb[64].mxu1 %vm138_vm1, %v6588_v19  ;;  %v6682_v22 = vsel %vm138_vm1, %v6588_v19, %v6680_v43 }
0x3bc4   :  { %9747 = vmatpush3.bf16.msra.mxu1 %v11151_v5  ;;  %9079 = vmatprep.mubr.msk.f32.mxu1 %vm10267_vm0, %v10268_v2 }
0x3bc5   :  { %9748 = vmatprep.subr.bf16.mxu1 %v10266_v1 }
0x3bc6   :  { %v6475_v58 = vpop.permute.xlu0 %6474 }
0x3bc7   :  { %v6477_v45 = vmul.f32 %v10078_v52, %v6475_v58 }
0x3bc8   :  { %9750 = vmatpush3.bf16.msra.mxu1 %v11155_v47 }
0x3bc9   :  { %6479 = vrot.lane.b32.xlu0 %v6477_v45, %s10270_s16  ;;  %9751 = vmatprep.subr.bf16.mxu1 %v10266_v1 }
0x3bcc   :  { %9753 = vmatpush3.bf16.msra.mxu1 %v11161_v51 }
0x3bcd   :  { %9754 = vmatprep.subr.bf16.mxu1 %v10266_v1 }
0x3bd0   :  { %9756 = vmatpush3.bf16.msra.mxu1 %v11165_v56 }
0x3bd1   :  { %9775 = vmatprep.subr.bf16.mxu1 %v10266_v1 }
0x3bd3   :  { %9080 = vmatmul.mubr.msk.f32.vlgmr.msra.gmra.mrb[66].mxu1 %vm148_vm2, %v6682_v22 }
0x3bd4   :  { %9777 = vmatpush3.bf16.msra.mxu1 %v11139_v28  ;;  %9120 = vmatprep.mubr.msk.f32.mxu1 %vm10267_vm0, %v10268_v2  ;;  %v6473_v28 = vmul.f32 %v10078_v52, %v6471_v57 }
0x3bd5   :  { %9778 = vmatprep.subr.bf16.mxu1 %v10266_v1 }
0x3bd8   :  { %9780 = vmatpush3.bf16.msra.mxu1 %v11144_v62  ;;  %v10080_v62 = vpop.eup %10079 }
0x3bd9   :  { %9781 = vmatprep.subr.bf16.mxu1 %v10266_v1  ;;  %v4042_v37 = vadd.f32 1.0, %v10080_v62 }
0x3bdb   :  { %v4043_v36 = vmul.f32 %v4042_v37, %v4035_v6  ;;  %v10139_v37 = vld [vmem:[%s12015_s7] ss:$0 sm:$0xff] }
0x3bdc   :  { %v10140_v6 = vld [vmem:[%s12016_s8] ss:$0 sm:$0xff] }
0x3bdd   :  { %v4044_v13 = vadd.f32 %v10138_v42, %v4043_v36 }
0x3bdf   :  { %v4045_v60 = vsel %vm627_vm3, %v4044_v13, 0.0 }
0x3c3b   :  { %v6480_v0 = vpop.permute.xlu0 %6479 }
0x3c3c   :  { %v6482_v20 = vadd.f32 %v6480_v0, %v6473_v28 }
0x3c3e   :  { %6762 = vrot.lane.b32.xlu0 %v6482_v20, %s10269_s15 }
0x3c5d   :  { %4046 = vadd.xlane.f32.xlu0 %v4045_v60 }
0x3c96   :  { %v6657_v26 = vpop.f32.mrb[64].mxu1 }
0x3c97   :  { %v9062_v53 = vpop.f32.mrb[65].mxu1  ;;  %v6658_v59 = vadd.f32 %v11632_v29, %v6657_v26 }
0x3c99   :  { %v6661_v28 = vmin.f32 %v6658_v59, 20.0 }
0x3c9b   :  { %v6662_v50 = vmul.f32 1.442695, %v6661_v28 }
0x3ca6   :  { %v6752_v23 = vpop.f32.mrb[66].mxu1 }
0x3ca7   :  { %v6753_v27 = vadd.f32 %v11606_v10, %v6752_v23  ;;  %v9081_v30 = vpop.f32.mrb[67].mxu1 }
0x3ca9   :  { %10081 = vtanh.f32 %v6753_v27  ;;  %v6756_v33 = vmul.f32 0.5, %v6753_v27 }
0x3cab   :  { %10083 = vtanh.f32 %v6756_v33 }
0x3cb0   :  { %v6763_v46 = vpop.permute.xlu0 %6762 }
0x3cb3   :  { %v11807_v24 = vpop.eup %10081 }
0x3cb4   :  { %6767 = vrot.lane.b32.xlu1 %v11807_v24, %s10269_s15 }
0x3cb5   :  { %v10084_v31 = vpop.eup %10083 }
0x3cb6   :  { %v6758_v44 = vadd.f32 1.0, %v10084_v31 }
0x3cb8   :  { %v6759_v18 = vmul.f32 0.5, %v6758_v44 }
0x3cba   :  { %v6765_v55 = vmul.f32 %v6763_v46, %v6759_v18 }
0x3cea   :  { %v4047_v58 = vpop.xlane.xlu0 %4046 }
0x3ceb   :  { %v4048_v45 = vmul.f32 0.03125, %v4047_v58 }
0x3ced   :  { %v4049_v43 = vsub.f32 %v4044_v13, %v4048_v45 }
0x3cef   :  { %v4050_v22 = vmul.f32 %v4049_v43, %v4049_v43 }
0x3cf1   :  { %v4051_v4 = vsel %vm627_vm3, %v4050_v22, 0.0 }
0x3d26   :  { %v6768_v39 = vpop.permute.xlu1 %6767 }
0x3d27   :  { %v6770_v14 = vmul.f32 %v6768_v39, %v6759_v18 }
0x3d29   :  { %6772 = vrot.lane.b32.xlu1 %v6770_v14, %s10269_s15 }
0x3d9b   :  { %v6773_v12 = vpop.permute.xlu1 %6772 }
0x3d9c   :  { %v11812_v19 = vadd.f32 %v6773_v12, %v6765_v55 }
0x3d9e   :  { %10085 = vtanh.f32 %v11812_v19 }
0x3da8   :  { %v10086_v52 = vpop.eup %10085 }
0x3da9   :  { %6778 = vrot.lane.b32.xlu1 %v10086_v52, %s10269_s15 }
0x3dcd   :  { %4052 = vadd.xlane.f32.xlu1 %v4051_v4 }
0x3dde   :  { %6874 = vrot.lane.b32.xlu1 %v11770_v40, %s10270_s16 }
0x3e1b   :  { %v6779_v54 = vpop.permute.xlu1 %6778 }
0x3e1c   :  { %v11819_v35 = vmul.f32 %v6779_v54, %v6759_v18 }
0x3e1e   :  { %6783 = vrot.lane.b32.xlu0 %v11819_v35, %s10271_s17 }
0x3e22   :  { %6669 = vrot.lane.b32.xlu0 %v11757_v63, %s10271_s17 }
0x3e26   :  { %6665 = vrot.lane.b32.xlu0 %v11762_v38, %s10270_s16 }
0x3e5a   :  { %v4053_v48 = vpop.xlane.xlu1 %4052 }
0x3e5b   :  { %v4054_v57 = vmul.f32 0.03125, %v4053_v48 }
0x3e5d   :  { %v4055_v0 = vadd.f32 1e-05, %v4054_v57 }
0x3e5f   :  { %10087 = vrsqrt.f32 %v4055_v0 }
0x3e60   :  { %10089 = vpow2.f32 %v6662_v50 }
0x3e69   :  { %v10088_v20 = vpop.eup %10087 }
0x3e6a   :  { %v10090_v63 = vpop.eup %10089  ;;  %v4057_v38 = vmul.f32 %v10088_v20, %v4049_v43 }
0x3e90   :  { %v6784_v40 = vpop.permute.xlu0 %6783 }
0x3e91   :  { %9091 = vmatmul.mubr.msk.f32.vlgmr.msra.gmra.mrb[66].mxu0 %vm138_vm1, %v6784_v40 }
0x3e92   :  { %9765 = vmatpush3.bf16.msra.mxu0 %v11059_v61  ;;  %9109 = vmatprep.mubr.msk.f32.mxu0 %vm10267_vm0, %v10268_v2  ;;  %v4058_v61 = vmul.f32 %v10139_v37, %v4057_v38 }
0x3e93   :  { %9766 = vmatprep.subr.bf16.mxu0 %v10266_v1 }
0x3e94   :  { %v6670_v3 = vpop.permute.xlu0 %6669  ;;  %v11844_v36 = vadd.f32 %v10140_v6, %v4058_v61 }
0x3e95   :  { %v6672_v62 = vmul.f32 %v10090_v63, %v6670_v3 }
0x3e96   :  { %9768 = vmatpush3.bf16.msra.mxu0 %v11064_v49  ;;  %v6875_v49 = vpop.permute.xlu1 %6874 }
0x3e97   :  { %6674 = vrot.lane.b32.xlu1 %v6672_v62, %s10270_s16  ;;  %9769 = vmatprep.subr.bf16.mxu0 %v10266_v1  ;;  %v6877_v42 = vsel %vm138_vm1, %v11844_v36, %v6875_v49 }
0x3e9a   :  { %9771 = vmatpush3.bf16.msra.mxu0 %v11070_v7  ;;  %v6666_v7 = vpop.permute.xlu0 %6665 }
0x3e9b   :  { %9772 = vmatprep.subr.bf16.mxu0 %v10266_v1 }
0x3e9e   :  { %9774 = vmatpush3.bf16.msra.mxu0 %v11074_v8  ;;  %v6668_v8 = vmul.f32 %v10090_v63, %v6666_v7 }
0x3e9f   :  { %9793 = vmatprep.subr.bf16.mxu0 %v10266_v1 }
0x3ea1   :  { %9110 = vmatmul.mubr.msk.f32.vlgmr.msra.gmra.mrb[68].mxu0 %vm148_vm2, %v6877_v42 }
0x3ea2   :  { %9795 = vmatpush3.bf16.msra.mxu0 %v11206_v17  ;;  %9150 = vmatprep.mubr.msk.f32.mxu0 %vm10267_vm0, %v10268_v2 }
0x3ea3   :  { %9796 = vmatprep.subr.bf16.mxu0 %v10266_v1 }
0x3ea6   :  { %9798 = vmatpush3.bf16.msra.mxu0 %v11209_v11 }
0x3ea7   :  { %9799 = vmatprep.subr.bf16.mxu0 %v10266_v1 }
0x3f09   :  { %v6675_v13 = vpop.permute.xlu1 %6674 }
0x3f0a   :  { %v6677_v60 = vadd.f32 %v6675_v13, %v6668_v8  ;;  %v7266_v13 = vld [vmem:[#allocation8 + $0x20] sm:$0xff] }
0x3f0c   :  { %6957 = vrot.lane.b32.xlu1 %v6677_v60, %s10269_s15  ;;  %v7267_v60 = vld [vmem:[#allocation8 + $0x28] sm:$0xff] }
0x3f64   :  { %v6853_v26 = vpop.f32.mrb[66].mxu0 }
0x3f65   :  { %v9092_v53 = vpop.f32.mrb[67].mxu0  ;;  %v6854_v45 = vadd.f32 %v11681_v21, %v6853_v26  ;;  %v9800_v26 = vpack.c.bf16 %v7267_v60, %v7266_v13 }
0x3f66   :  { %v7268_v53 = vld [vmem:[#allocation8 + $0x30] sm:$0xff] }
0x3f67   :  { %v6857_v43 = vmin.f32 %v6854_v45, 20.0 }
0x3f69   :  { %v6858_v22 = vmul.f32 1.442695, %v6857_v43 }
0x3f74   :  { %v6947_v23 = vpop.f32.mrb[68].mxu0 }
0x3f75   :  { %v6948_v17 = vadd.f32 %v11553_v15, %v6947_v23  ;;  %v9111_v27 = vpop.f32.mrb[69].mxu0  ;;  %v7269_v23 = vld [vmem:[#allocation8 + $0x38] sm:$0xff] }
0x3f76   :  { %v9803_v27 = vpack.c.bf16 %v7269_v23, %v7268_v53 }
0x3f77   :  { %10091 = vtanh.f32 %v6948_v17  ;;  %v6951_v11 = vmul.f32 0.5, %v6948_v17 }
0x3f79   :  { %10093 = vtanh.f32 %v6951_v11 }
0x3f7e   :  { %v6958_v14 = vpop.permute.xlu1 %6957 }
0x3f81   :  { %v11859_v30 = vpop.eup %10091 }
0x3f82   :  { %6962 = vrot.lane.b32.xlu0 %v11859_v30, %s10269_s15 }
0x3f83   :  { %v10094_v33 = vpop.eup %10093 }
0x3f84   :  { %v6953_v31 = vadd.f32 1.0, %v10094_v33 }
0x3f86   :  { %v6954_v44 = vmul.f32 0.5, %v6953_v31  ;;  %v7567_v31 = vld [vmem:[%s12014_s6 + $0x1] ss:$0 sm:$0xff] }
0x3f88   :  { %v6960_v46 = vmul.f32 %v6958_v14, %v6954_v44 }
0x3ff4   :  { %v6963_v18 = vpop.permute.xlu0 %6962 }
0x3ff5   :  { %v6965_v39 = vmul.f32 %v6963_v18, %v6954_v44 }
0x3ff7   :  { %6967 = vrot.lane.b32.xlu0 %v6965_v39, %s10269_s15 }
0x4069   :  { %v6968_v55 = vpop.permute.xlu0 %6967 }
0x406a   :  { %v11864_v15 = vadd.f32 %v6968_v55, %v6960_v46 }
0x406c   :  { %10095 = vtanh.f32 %v11864_v15 }
0x406d   :  { %10097 = vpow2.f32 %v6858_v22 }
0x4076   :  { %v10096_v12 = vpop.eup %10095 }
0x4077   :  { %6973 = vrot.lane.b32.xlu1 %v10096_v12, %s10269_s15 }
0x407b   :  { %7070 = vrot.lane.b32.xlu1 %v11819_v35, %s10270_s16 }
0x407f   :  { %6861 = vrot.lane.b32.xlu1 %v11812_v19, %s10270_s16  ;;  %v10098_v19 = vpop.eup %10097 }
0x40e9   :  { %v6974_v52 = vpop.permute.xlu1 %6973 }
0x40ea   :  { %v6976_v58 = vmul.f32 %v6974_v52, %v6954_v44 }
0x40ec   :  { %6978 = vrot.lane.b32.xlu0 %v6976_v58, %s10271_s17 }
0x40f0   :  { %6865 = vrot.lane.b32.xlu0 %v11807_v24, %s10271_s17 }
0x415e   :  { %v6979_v4 = vpop.permute.xlu0 %6978 }
0x415f   :  { %7366 = vst.msk [vmem:[#allocation9 + $0x4] sm:$0x3] %vm627_vm3, %v6979_v4  ;;  %9121 = vmatmul.mubr.msk.f32.vlgmr.msra.gmra.mrb[68].mxu1 %vm138_vm1, %v6979_v4 }
0x4160   :  { %9783 = vmatpush3.bf16.msra.mxu1 %v11151_v5  ;;  %9139 = vmatprep.mubr.msk.f32.mxu1 %vm10267_vm0, %v10268_v2  ;;  %v7071_v5 = vpop.permute.xlu1 %7070 }
0x4161   :  { %9784 = vmatprep.subr.bf16.mxu1 %v10266_v1  ;;  %v7073_v35 = vsel %vm138_vm1, %v6979_v4, %v7071_v5 }
0x4162   :  { %v6866_v54 = vpop.permute.xlu0 %6865 }
0x4163   :  { %v6868_v24 = vmul.f32 %v10098_v19, %v6866_v54 }
0x4164   :  { %9786 = vmatpush3.bf16.msra.mxu1 %v11155_v47  ;;  %v6862_v47 = vpop.permute.xlu1 %6861 }
0x4165   :  { %6870 = vrot.lane.b32.xlu0 %v6868_v24, %s10270_s16  ;;  %9787 = vmatprep.subr.bf16.mxu1 %v10266_v1  ;;  %v6864_v48 = vmul.f32 %v10098_v19, %v6862_v47  ;;  %v10141_v19 = vld [vmem:[%s12012_s4] ss:$0 sm:$0xff] }
0x4168   :  { %9789 = vmatpush3.bf16.msra.mxu1 %v11161_v51 }
0x4169   :  { %9790 = vmatprep.subr.bf16.mxu1 %v10266_v1 }
0x416c   :  { %9792 = vmatpush3.bf16.msra.mxu1 %v11165_v56 }
0x416d   :  { %9805 = vmatprep.subr.bf16.mxu1 %v10266_v1 }
0x416f   :  { %9140 = vmatmul.mubr.msk.f32.vlgmr.msra.gmra.mrb[70].mxu1 %vm148_vm2, %v7073_v35 }
0x4170   :  { %9172 = vmatprep.mubr.msk.f32.mxu1 %vm10267_vm0, %v10268_v2 }
0x41d7   :  { %v6871_v59 = vpop.permute.xlu0 %6870 }
0x41d8   :  { %v6873_v57 = vadd.f32 %v6871_v59, %v6864_v48 }
0x41da   :  { %7153 = vrot.lane.b32.xlu0 %v6873_v57, %s10269_s15 }
0x4232   :  { %v11894_v51 = vpop.f32.mrb[68].mxu1 }
0x4233   :  { %v9122_v28 = vpop.f32.mrb[69].mxu1  ;;  %v7049_v24 = vadd.f32 %v11632_v29, %v11894_v51  ;;  %v7374_v51 = vld [vmem:[%s12017_s9] sm:$0xff] }
0x4235   :  { %v7052_v5 = vmin.f32 %v7049_v24, 20.0 }
0x4242   :  { %v7143_v56 = vpop.f32.mrb[70].mxu1 }
0x4243   :  { %v7144_v0 = vadd.f32 %v11606_v10, %v7143_v56  ;;  %v9141_v50 = vpop.f32.mrb[71].mxu1 }
0x4245   :  { %10099 = vtanh.f32 %v7144_v0  ;;  %v7147_v20 = vmul.f32 0.5, %v7144_v0  ;;  %v7375_v0 = vld [vmem:[%s12017_s9 + $0x8] sm:$0xff] }
0x4246   :  { %v9806_v50 = vpack.c.bf16 %v7375_v0, %v7374_v51 }
0x4247   :  { %10101 = vtanh.f32 %v7147_v20 }
0x4248   :  { %9807 = vmatpush3.bf16.msra.mxu1 %v9806_v50 }
0x4249   :  { %9808 = vmatprep.subr.bf16.mxu1 %v10266_v1 }
0x424c   :  { %v7154_v61 = vpop.permute.xlu0 %7153 }
0x424f   :  { %v11897_v40 = vpop.eup %10099 }
0x4250   :  { %7158 = vrot.lane.b32.xlu1 %v11897_v40, %s10269_s15 }
0x4251   :  { %v10102_v63 = vpop.eup %10101 }
0x4252   :  { %v7149_v38 = vadd.f32 1.0, %v10102_v63 }
0x4254   :  { %v7150_v3 = vmul.f32 0.5, %v7149_v38 }
0x4256   :  { %v7156_v6 = vmul.f32 %v7154_v61, %v7150_v3 }
0x42c2   :  { %v7159_v62 = vpop.permute.xlu1 %7158 }
0x42c3   :  { %v7161_v37 = vmul.f32 %v7159_v62, %v7150_v3 }
0x42c5   :  { %7163 = vrot.lane.b32.xlu1 %v7161_v37, %s10269_s15 }
0x4337   :  { %v7164_v49 = vpop.permute.xlu1 %7163 }
0x4338   :  { %v11902_v10 = vadd.f32 %v7164_v49, %v7156_v6  ;;  %v10142_v6 = vld [vmem:[%s12012_s4 + $0x1] ss:$0 sm:$0xff] }
0x4339   :  { %v3945_v49 = vadd.f32 %v10142_v6, %v11178_v34 }
0x433a   :  { %10103 = vtanh.f32 %v11902_v10 }
0x4344   :  { %v10104_v42 = vpop.eup %10103 }
0x4345   :  { %7169 = vrot.lane.b32.xlu0 %v10104_v42, %s10269_s15 }
0x43b7   :  { %v7170_v7 = vpop.permute.xlu0 %7169 }
0x43b8   :  { %v7172_v8 = vmul.f32 %v7170_v7, %v7150_v3 }
0x43ba   :  { %7174 = vrot.lane.b32.xlu1 %v7172_v8, %s10271_s17 }
0x442c   :  { %v7175_v17 = vpop.permute.xlu1 %7174 }
0x442d   :  { %7371 = vst.msk [vmem:[#allocation9 + $0x6] sm:$0x3] %vm627_vm3, %v7175_v17  ;;  %9151 = vmatmul.mubr.msk.f32.vlgmr.msra.gmra.mrb[70].mxu0 %vm138_vm1, %v7175_v17 }
0x442e   :  { %9801 = vmatpush3.bf16.msra.mxu0 %v9800_v26  ;;  %9161 = vmatprep.mubr.msk.f32.mxu0 %vm10267_vm0, %v10268_v2 }
0x442f   :  { %9802 = vmatprep.subr.bf16.mxu0 %v10266_v1 }
0x4432   :  { %9804 = vmatpush3.bf16.msra.mxu0 %v9803_v27 }
0x4435   :  { %9162 = vmatmul.mubr.msk.f32.vlgmr.msra.gmra.mrb[72].mxu0 %vm138_vm1, %v7175_v17 }
0x4500   :  { %v11913_v11 = vpop.f32.mrb[70].mxu0 }
0x4501   :  { %v9152_v33 = vpop.f32.mrb[71].mxu0  ;;  %v7245_v42 = vadd.f32 %v11681_v21, %v11913_v11  ;;  %v7569_v11 = vld [vmem:[%s12015_s7 + $0x1] ss:$0 sm:$0xff] }
0x4503   :  { %v7248_v8 = vmin.f32 %v7245_v42, 20.0 }
0x4505   :  { %v7249_v13 = vmul.f32 1.442695, %v7248_v8 }
0x4508   :  { %v7336_v44 = vpop.f32.mrb[72].mxu0 }
0x4509   :  { %v7337_v18 = vadd.f32 %v7567_v31, %v7336_v44  ;;  %v9163_v39 = vpop.f32.mrb[73].mxu0 }
0x450b   :  { %v7341_v14 = vmul.f32 0.044715, %v7337_v18  ;;  %v7340_v58 = vmul.f32 0.5, %v7337_v18 }
0x450d   :  { %v7342_v46 = vmul.f32 %v7341_v14, %v7337_v18 }
0x450f   :  { %v7343_v55 = vmul.f32 %v7342_v46, %v7337_v18 }
0x4511   :  { %v7344_v12 = vadd.f32 %v7343_v55, %v7337_v18  ;;  %v7571_v18 = vld [vmem:[%s12016_s8 + $0x1] ss:$0 sm:$0xff] }
0x4513   :  { %v7345_v2 = vmul.f32 0.7978846, %v7344_v12 }
0x4515   :  { %10105 = vtanh.f32 %v7345_v2 }
0x451f   :  { %v10106_v52 = vpop.eup %10105 }
0x4520   :  { %v7347_v45 = vadd.f32 1.0, %v10106_v52 }
0x4522   :  { %v7348_v43 = vmul.f32 %v7347_v45, %v7340_v58 }
0x4524   :  { %v7349_v22 = vadd.f32 %v7348_v43, %v11844_v36  ;;  %v3749_v36 = vadd.f32 %v10141_v19, %v11098_v25 }
0x4526   :  { %v7350_v4 = vsel %vm627_vm3, %v7349_v22, 0.0  ;;  %v3752_v54 = vmin.f32 %v3749_v36, 20.0 }
0x4527   :  { %7351 = vadd.xlane.f32.xlu0 %v7350_v4 }
0x453d   :  { %3760 = vrot.lane.b32.xlu0 %v11002_v41, %s10271_s17  ;;  %v3753_v41 = vmul.f32 1.442695, %v3752_v54 }
0x453f   :  { %10107 = vpow2.f32 %v3753_v41 }
0x4541   :  { %7060 = vrot.lane.b32.xlu0 %v11859_v30, %s10271_s17  ;;  %v7053_v30 = vmul.f32 1.442695, %v7052_v5 }
0x4543   :  { %10109 = vpow2.f32 %v7053_v30 }
0x4545   :  { %3756 = vrot.lane.b32.xlu0 %v11022_v9, %s10270_s16 }
0x4549   :  { %7056 = vrot.lane.b32.xlu0 %v11864_v15, %s10270_s16  ;;  %v10108_v48 = vpop.eup %10107 }
0x454d   :  { %v10110_v28 = vpop.eup %10109 }
0x45b4   :  { %v7352_v35 = vpop.xlane.xlu0 %7351 }
0x45b5   :  { %v7353_v9 = vmul.f32 0.03125, %v7352_v35 }
0x45b7   :  { %v7354_v47 = vsub.f32 %v7349_v22, %v7353_v9 }
0x45b8   :  { %v3761_v15 = vpop.permute.xlu0 %3760 }
0x45b9   :  { %v3763_v59 = vmul.f32 %v10108_v48, %v3761_v15  ;;  %v7355_v57 = vmul.f32 %v7354_v47, %v7354_v47 }
0x45bb   :  { %3765 = vrot.lane.b32.xlu0 %v3763_v59, %s10270_s16  ;;  %v7356_v25 = vsel %vm627_vm3, %v7355_v57, 0.0 }
0x45bc   :  { %7357 = vadd.xlane.f32.xlu1 %v7356_v25  ;;  %v7061_v56 = vpop.permute.xlu0 %7060 }
0x45bd   :  { %v7063_v29 = vmul.f32 %v10110_v28, %v7061_v56 }
0x45bf   :  { %7065 = vrot.lane.b32.xlu0 %v7063_v29, %s10270_s16 }
0x45c0   :  { %v3757_v20 = vpop.permute.xlu0 %3756 }
0x45c1   :  { %v3759_v38 = vmul.f32 %v10108_v48, %v3757_v20 }
0x45c4   :  { %v7057_v63 = vpop.permute.xlu0 %7056 }
0x45c5   :  { %v7059_v37 = vmul.f32 %v10110_v28, %v7057_v63 }
0x45cd   :  { %3956 = vrot.lane.b32.xlu1 %v11102_v32, %s10271_s17  ;;  %v7376_v32 = vld [vmem:[%s12017_s9 + $0x10] sm:$0xff] }
0x45d1   :  { %7256 = vrot.lane.b32.xlu1 %v11897_v40, %s10271_s17 }
0x45d5   :  { %3952 = vrot.lane.b32.xlu1 %v11119_v16, %s10270_s16  ;;  %v7377_v16 = vld [vmem:[%s12017_s9 + $0x18] sm:$0xff] }
0x45d6   :  { %v9809_v40 = vpack.c.bf16 %v7377_v16, %v7376_v32 }
0x45d8   :  { %9810 = vmatpush3.bf16.msra.mxu1 %v9809_v40 }
0x45d9   :  { %7252 = vrot.lane.b32.xlu1 %v11902_v10, %s10270_s16  ;;  %v3948_v10 = vmin.f32 %v3945_v49, 20.0 }
0x45db   :  { %v3949_v7 = vmul.f32 1.442695, %v3948_v10 }
0x45dd   :  { %10111 = vpow2.f32 %v3949_v7 }
0x45de   :  { %10113 = vpow2.f32 %v7249_v13 }
0x45e7   :  { %v10112_v23 = vpop.eup %10111 }
0x45e8   :  { %v10114_v33 = vpop.eup %10113 }
0x462d   :  { %v3766_v3 = vpop.permute.xlu0 %3765 }
0x462e   :  { %v3768_v62 = vadd.f32 %v3766_v3, %v3759_v38 }
0x4630   :  { %4061 = vst.msk [vmem:[#allocation10] sm:$0x3] %vm627_vm3, %v3768_v62 }
0x4631   :  { %v7066_v61 = vpop.permute.xlu0 %7065 }
0x4632   :  { %v7068_v1 = vadd.f32 %v7066_v61, %v7059_v37 }
0x4634   :  { %7368 = vst.msk [vmem:[#allocation10 + $0x4] sm:$0x3] %vm627_vm3, %v7068_v1 }
0x4649   :  { %v7358_v60 = vpop.xlane.xlu1 %7357 }
0x464a   :  { %v7359_v26 = vmul.f32 0.03125, %v7358_v60 }
0x464c   :  { %v7360_v53 = vadd.f32 1e-05, %v7359_v26 }
0x464d   :  { %v3957_v17 = vpop.permute.xlu1 %3956 }
0x464e   :  { %10115 = vrsqrt.f32 %v7360_v53  ;;  %v3959_v27 = vmul.f32 %v10112_v23, %v3957_v17 }
0x4650   :  { %3961 = vrot.lane.b32.xlu1 %v3959_v27, %s10270_s16 }
0x4651   :  { %v7257_v34 = vpop.permute.xlu1 %7256 }
0x4652   :  { %v7259_v31 = vmul.f32 %v10114_v33, %v7257_v34 }
0x4654   :  { %7261 = vrot.lane.b32.xlu1 %v7259_v31, %s10270_s16  ;;  %s10272_s16 = smov [#allocation9]  }
0x4655   :  { %v3953_v46 = vpop.permute.xlu1 %3952  ;;  %s7471_s14 = sshll.u32 %s10272_s16, 4  ;;  %s7472_s14 = int_to_ptr.vmem [resolvable:$true] %s7471_s14 }
0x4656   :  { %v3955_v12 = vmul.f32 %v10112_v23, %v3953_v46  ;;  %s10209_s7 = scalar_lea.vmem %s7472_s14, 128  ;;  %p10214_p11 = scmp.lt.s32.totalorder %s7472_s14, %s7472_s14 }
0x4657   :  { %p10210_p10 = scmp.ne.s32.totalorder %s7472_s14, %s10209_s7  ;;  %p10215_p12 = scmp.lt.s32.totalorder %s10209_s7, %s10209_s7 }
0x4658   :  { %v10116_v21 = vpop.eup %10115 }
0x4659   :  { %v7362_v44 = vmul.f32 %v10116_v21, %v7354_v47  ;;  %v7253_v55 = vpop.permute.xlu1 %7252  ;;  %p10216_p13 = por %p10215_p12, %p10214_p11 }
0x465a   :  { %v7255_v58 = vmul.f32 %v10114_v33, %v7253_v55 }
0x465b   :  { %v7363_v39 = vmul.f32 %v7569_v11, %v7362_v44  ;;  %p10217_p0 = pnand %p10216_p13, %p10210_p10 }
0x465d   :  { %v7364_v14 = vadd.f32 %v7571_v18, %v7363_v39 }
0x465f   :  { %9173 = vmatmul.mubr.msk.f32.vlgmr.msra.gmra.mrb[72].mxu1 %vm138_vm1, %v7364_v14 }
0x46c2   :  { %v3962_v2 = vpop.permute.xlu1 %3961 }
0x46c3   :  { %v3964_v52 = vadd.f32 %v3962_v2, %v3955_v12 }
0x46c5   :  { %4066 = vst.msk [vmem:[#allocation10 + $0x2] sm:$0x3] %vm627_vm3, %v3964_v52 }
0x46c6   :  { %v7262_v45 = vpop.permute.xlu1 %7261 }
0x46c7   :  { %10220 = shalt.err (!%p10217_p0)
}
0x46c8   :  { %s10221_s18 = scalar_lea.hbm %s12020_s12, 128 }
0x46c9   :  { %p10222_p1 = scmp.ne.s32.totalorder %s12020_s12, %s10221_s18  ;;  %p10225_p2 = scmp.lt.u32.totalorder %s10221_s18, %s12020_s12 }
0x46cb   :  { %p10227_p3 = pnand %p10225_p2, %p10222_p1 }
0x46cd   :  { %10230 = shalt.err (!%p10227_p3)
}
0x46ce   :  { %s10274_s23 = smov 2   ;;  %v7264_v43 = vadd.f32 %v7262_v45, %v7255_v58  ;;  %s10231_s26 = scalar_lea.vmem %s7484_s0, 128 }
0x46cf   :  { %7477 = dma.vmem_to_hbm [thread:$0]  %s7472_s14, 128, %s12020_s12, [#allocation5], %s10269_s15, %s10269_s15, %s10274_s23  }
0x46d0   :  { %7373 = vst.msk [vmem:[#allocation10 + $0x6] sm:$0x3] %vm627_vm3, %v7264_v43  ;;  %p10232_p4 = scmp.ne.s32.totalorder %s7484_s0, %s10231_s26  ;;  %p10236_p5 = scmp.lt.s32.totalorder %s7484_s0, %s7484_s0 }
0x46d1   :  { %p10237_p6 = scmp.lt.s32.totalorder %s10231_s26, %s10231_s26 }
0x46d3   :  { %p10238_p7 = por %p10237_p6, %p10236_p5 }
0x46d5   :  { %p10239_p8 = pnand %p10238_p7, %p10232_p4 }
0x46d7   :  { %10242 = shalt.err (!%p10239_p8)
}
0x46d8   :  { %s10243_s17 = scalar_lea.hbm %s12021_s13, 128 }
0x46d9   :  { %p10244_p9 = scmp.ne.s32.totalorder %s12021_s13, %s10243_s17  ;;  %p10247_p10 = scmp.lt.u32.totalorder %s10243_s17, %s12021_s13 }
0x46db   :  { %p10249_p11 = pnand %p10247_p10, %p10244_p9 }
0x46dd   :  { %10252 = shalt.err (!%p10249_p11)
}
0x46de   :  { %7489 = dma.vmem_to_hbm [thread:$0]  %s7484_s0, 128, %s12021_s13, [#allocation11], %s10269_s15, %s10269_s15, %s10274_s23   ;;  %v7605_v22 = vld [vmem:[#allocation2] ss:$0 sm:$0xff]  ;;  %vm7462_vm4 = vcmask 1024  }
0x4732   :  { %v7454_v4 = vpop.f32.mrb[72].mxu1 }
0x4733   :  { %v7455_v19 = vadd.f32 %v7605_v22, %v7454_v4  ;;  %v9174_v36 = vpop.f32.mrb[73].mxu1 }
0x4735   :  { %v7458_v54 = vmul.f32 0.5, %v7455_v19 }
0x4737   :  { %10117 = vtanh.f32 %v7458_v54 }
0x4741   :  { %v10118_v24 = vpop.eup %10117 }
0x4742   :  { %v7460_v41 = vadd.f32 1.0, %v10118_v24 }
0x4744   :  { %v7461_v5 = vmul.f32 0.5, %v7460_v41 }
0x4746   :  { %7463 = vst.msk [vmem:[%s12019_s11] sm:$0x3] %vm7462_vm4, %v7461_v5 }
0x4747   :  { %10257 = dma.done.wait [#allocation5], 128  }
0x4748   :  { %10258 = vsyncadd [#allocation5], 4294967168 }
0x4749   :  { %10259 = dma.done.wait [#allocation11], 128  }
0x474a   :  { %10260 = vsyncadd [#allocation11], 4294967168 }
0x474b   :  { %7498 = vsyncpa [#allocation4], 1 }
0x474c   :  { %7499 = vsyncpa [#allocation7], 1 }
0x474d   :  { %7500 = vsyncpa [#allocation5], 1 }
0x474e   :  { %7501 = vsyncpa [#allocation11], 1 }

</bundles_post_ra>
